<compile_context>
chip_gen: v7x
topology: tpu7x:2x2x1
jax: 0.10.0
libtpu: 0.0.40
codegen_flags: <defaults>
</compile_context>

<pallas_src>
import functools

import numpy as np
import jax
import jax.numpy as jnp
from jax.experimental import pallas as pl
from jax.experimental.pallas import tpu as pltpu

_EPS = 1e-5


# --------------------------------------------------------------------- constant builders
def _band_selector(W, K):
    """S[kw, wout, win] = 1 iff win == wout + kw - pad (zero pad handled by omission)."""
    p = (K - 1) // 2
    S = np.zeros((K, W, W), np.float32)
    for kw in range(K):
        for wout in range(W):
            win = wout + kw - p
            if 0 <= win < W:
                S[kw, wout, win] = 1.0
    return S


def _band(w, Wl):
    """HWIO weight (K,K,Cin,Cout) -> per-row-tap banded matrices (K, Wl*Cin, Wl*Cout).

    out_row[h] += x_row[h+dh-p] @ band[dh] reproduces the 'same' conv in the lane-dense
    (H, W*C) layout (W-direction zero padding is implicit in the band)."""
    K = w.shape[0]
    cin, cout = w.shape[2], w.shape[3]
    S = jnp.asarray(_band_selector(Wl, K))                       # (K, Wout, Win)
    M = jnp.einsum("dkco,kvu->ducvo", w.astype(jnp.float32), S)  # (K, Win, Cin, Wout, Cout)
    return M.reshape(K, Wl * cin, Wl * cout)


def _flat(M):
    """(K, A, B) -> (K*A, B): row-tap axis concatenated into the contraction."""
    K, A, B = M.shape
    return M.reshape(K * A, B)


def _up_col_mat(Wsmall, C):
    """Column part of nearest 2x upsample in (H, W*C) layout: up_cols = x @ R."""
    R = np.zeros((Wsmall * C, 2 * Wsmall * C), np.float32)
    for w in range(Wsmall):
        for b in range(2):
            for c in range(C):
                R[w * C + c, (2 * w + b) * C + c] = 1.0
    return R


def _row_dup_mat(Hsmall):
    """Row part of nearest 2x upsample: up_rows = D @ x."""
    D = np.zeros((2 * Hsmall, Hsmall), np.float32)
    for i in range(2 * Hsmall):
        D[i, i // 2] = 1.0
    return D


def _pool_mats(Hl, Wl, C):
    """avg_pool2d(2) in (H, W*C) layout: pooled = Pr @ x @ Pc (exact)."""
    Pr = np.zeros((Hl // 2, Hl), np.float32)
    for h in range(Hl // 2):
        Pr[h, 2 * h] = 0.5
        Pr[h, 2 * h + 1] = 0.5
    Pc = np.zeros((Wl * C, (Wl // 2) * C), np.float32)
    for w in range(Wl // 2):
        for b in range(2):
            for c in range(C):
                Pc[(2 * w + b) * C + c, w * C + c] = 0.5
    return Pr, Pc


def _pad_channels(c, W):
    """Smallest c' >= c such that W*c' is a multiple of 128 (or c if not expressible)."""
    lanes = W * c
    target = ((lanes + 127) // 128) * 128
    if target % W:
        return c
    return target // W


# ------------------------------------------------------------------------------- kernel
def _mpinet_kernel(*refs, treedef):
    """One sample per grid step: the entire MPINet2d forward, activations in VMEM."""
    x_ref = refs[0]
    o_ref = refs[-2]
    buf_ref = refs[-1]                                        # shared im2col scratch
    P = jax.tree_util.tree_unflatten(treedef, list(refs[1:-2]))
    wdict, aff_ref = P["W"], P["aff"]
    pr_ref, pc_ref, d_ref = P["Pr"], P["Pc"], P["D"]

    def im2col(x, K, col0):
        # Write K row-shifted copies of x (zero rows at the H boundary) into the
        # scratch buffer at lane offset col0.  All offsets are static Python ints.
        Hh, L = x.shape
        p = (K - 1) // 2
        xa = x.astype(buf_ref.dtype)
        for dh in range(K):
            off = dh - p
            c0 = col0 + dh * L
            lo, hi = max(0, -off), Hh - max(0, off)
            if lo > 0:
                buf_ref[0:lo, c0:c0 + L] = jnp.zeros((lo, L), buf_ref.dtype)
            if hi < Hh:
                buf_ref[hi:Hh, c0:c0 + L] = jnp.zeros((Hh - hi, L), buf_ref.dtype)
            buf_ref[lo:hi, c0:c0 + L] = xa[max(0, off):max(0, off) + (hi - lo)]
        return col0 + K * L

    def conv(branches, w_ref):
        # 'same' 2-D conv (and optional channel-concat of several branches) as ONE fat
        # MXU matmul: row taps are concatenated along the contraction via im2col, the
        # W-direction taps are baked into the banded weight matrix.
        Hh = branches[0][0].shape[0]
        cols = 0
        for xb, K in branches:
            cols = im2col(xb, K, cols)
        lhs = buf_ref[0:Hh, 0:cols].astype(w_ref.dtype)
        return jnp.dot(lhs, w_ref[...], preferred_element_type=jnp.float32)

    def unit(branches, name, row):
        # conv + bias + ReLU + GroupNorm(1, C) with affine, epilogue as one scale/shift.
        y = conv(branches, wdict[name])
        L = y.shape[1]
        a = aff_ref[row:row + 3, 0:L]                          # bias / gamma / beta rows
        y = jnp.maximum(y + a[0:1], 0.0)
        inv_n = 1.0 / float(y.shape[0] * y.shape[1])
        s = jnp.sum(y)
        s2 = jnp.sum(y * y)
        mean = s * inv_n
        var = jnp.maximum(s2 * inv_n - mean * mean, 0.0)
        scale = a[1:2] * jax.lax.rsqrt(var + _EPS)
        shift = a[2:3] - mean * scale
        return y * scale + shift

    def pool(x, i):                                            # F.avg_pool2d(x, 2), exact
        Hh, L = x.shape
        y = jnp.dot(x, pc_ref[i, 0:L, 0:L // 2], preferred_element_type=jnp.float32)
        return jnp.dot(pr_ref[i, 0:Hh // 2, 0:Hh], y, preferred_element_type=jnp.float32)

    def up_rows(x, j):                                         # nearest 2x: rows only
        Hh = x.shape[0]                                        # (columns are folded into
        return jnp.dot(d_ref[j, 0:2 * Hh, 0:Hh], x,            #  the decoder conv weights)
                       preferred_element_type=jnp.float32)

    x = x_ref[0]                                               # (H, W*Cin_pad) f32

    c = unit([(x, 7)], "block0u1", 0)
    c1 = unit([(c, 7)], "block0u2", 3)
    c = unit([(pool(c1, 0), 5)], "block1u1", 6)
    c2 = unit([(c, 5)], "block1u2", 9)
    c = unit([(pool(c2, 1), 3)], "block2u1", 12)
    c3 = unit([(c, 3)], "block2u2", 15)
    c = unit([(pool(c3, 2), 3)], "block3u1", 18)
    c4 = unit([(c, 3)], "block3u2", 21)
    c = unit([(up_rows(c4, 0), 3), (c3, 3)], "block4u1", 24)   # cat(up(c4), c3) folded
    c5 = unit([(c, 3)], "block4u2", 27)
    c = unit([(up_rows(c5, 1), 3), (c2, 3)], "block5u1", 30)   # cat(up(c5), c2) folded
    c6 = unit([(c, 3)], "block5u2", 33)
    c = unit([(up_rows(c6, 2), 3), (c1, 3)], "block6u1", 36)   # cat(up(c6), c1) folded
    c7 = unit([(c, 3)], "block6u2", 39)

    y = conv([(c7, 3)], wdict["out"]) + aff_ref[42:43, 0:o_ref.shape[2]]
    o_ref[0] = (jnp.tanh(y) + 1.0) * 0.5


# ------------------------------------------------------------------------------ wrapper
def mpinet2d_forward(x_nchw, kparams, *, out_c):
    """x_nchw: (N, Cin, H, W) f32 -> (N, out_c, H, W) f32."""
    N, in_c, H, W = x_nchw.shape
    wdict = kparams["W"]
    in_c_pad = wdict["block0u1"].shape[0] // (7 * W)            # 7 = block0 kernel size
    out_lanes = wdict["out"].shape[1]
    out_c_pad = out_lanes // W
    max_cols = max(w.shape[0] for w in wdict.values())          # largest im2col width

    x = jnp.transpose(x_nchw, (0, 2, 3, 1))                     # NHWC
    if in_c_pad != in_c:
        x = jnp.pad(x, ((0, 0), (0, 0), (0, 0), (0, in_c_pad - in_c)))
    x = x.reshape(N, H, W * in_c_pad).astype(jnp.float32)       # lane-dense, 128-multiple

    leaves, treedef = jax.tree_util.tree_flatten(kparams)
    kernel = functools.partial(_mpinet_kernel, treedef=treedef)

    in_specs = [pl.BlockSpec((1, H, W * in_c_pad), lambda n: (n, 0, 0))]
    # Grid-invariant parameters: whole-array VMEM residents (no per-step blocking /
    # double buffering of the banded weights).
    in_specs += [pl.BlockSpec(memory_space=pltpu.MemorySpace.VMEM) for _ in leaves]

    leaf_bytes = sum(int(np.prod(a.shape)) * a.dtype.itemsize for a in leaves)
    try:
        vmem_cap = int(pltpu.get_tpu_info().vmem_capacity_bytes)
    except Exception:                                           # noqa: BLE001
        vmem_cap = 64 * 1024 * 1024
    vmem_limit = min(int(vmem_cap * 0.85),
                     max(32 * 1024 * 1024, 2 * leaf_bytes + 16 * 1024 * 1024))

    out = pl.pallas_call(
        kernel,
        out_shape=jax.ShapeDtypeStruct((N, H, out_lanes), jnp.float32),
        grid=(N,),
        in_specs=in_specs,
        out_specs=pl.BlockSpec((1, H, out_lanes), lambda n: (n, 0, 0)),
        scratch_shapes=[pltpu.VMEM((H, max_cols), jnp.float32)],
        compiler_params=pltpu.CompilerParams(
            dimension_semantics=("parallel",),                  # one sample per TC (v7x)
            vmem_limit_bytes=vmem_limit,
        ),
    )(x, *leaves)

    out = out.reshape(N, H, W, out_c_pad)[..., :out_c]
    return jnp.transpose(out, (0, 3, 1, 2))


def prepare_params(params, nf, in_c, out_c, H, W, mm_dtype=jnp.bfloat16):
    """Expand HWIO conv params into the fused-kernel form: one banded matmul matrix per
    conv (row taps + skip concat + upsample columns folded into the contraction), one
    consolidated affine slab, and packed pool / row-upsample constants."""
    assert H % 8 == 0 and W % 8 == 0, "need 3 levels of 2x pooling"
    in_c_pad = _pad_channels(in_c, W)
    out_c_pad = _pad_channels(out_c, W)
    Hs = (H, H // 2, H // 4, H // 8)
    Ws = (W, W // 2, W // 4, W // 8)

    # (name, output pyramid level, upsample-source level, up-branch channel count)
    blocks = [
        ("block0", 0, None, None),
        ("block1", 1, None, None),
        ("block2", 2, None, None),
        ("block3", 3, None, None),
        ("block4", 2, 3, nf * 4),       # cat(up(conv4)[4nf], conv3[4nf])
        ("block5", 1, 2, nf * 4),       # cat(up(conv5)[4nf], conv2[2nf])
        ("block6", 0, 1, nf * 2),       # cat(up(conv6)[2nf], conv1[nf])
    ]

    weights = {}
    aff_blocks = []

    def add_aff(vecs, Wl):
        aff_blocks.append(jnp.stack([jnp.tile(v, Wl) for v in vecs]).astype(jnp.float32))

    for name, lvl, up_lvl, split in blocks:
        Wl = Ws[lvl]
        (w1, b1, g1, t1), (w2, b2, g2, t2) = params[name]
        if name == "block0" and in_c_pad != in_c:
            w1 = jnp.pad(w1, ((0, 0), (0, 0), (0, in_c_pad - in_c), (0, 0)))
        if split is None:
            weights[name + "u1"] = _flat(_band(w1, Wl)).astype(mm_dtype)
        else:
            # conv(cat(up(a), b)) == conv_a(up(a)) + conv_b(b); fold the nearest-upsample
            # column matrix R into conv_a's band so only row duplication stays in-kernel.
            Ma = _band(w1[:, :, :split, :], Wl)                 # (K, Wl*Ca, Wl*Cout)
            R = jnp.asarray(_up_col_mat(Ws[up_lvl], split))     # (Wsm*Ca, Wl*Ca)
            Ma = jnp.einsum("su,kuo->kso", R, Ma)               # (K, Wsm*Ca, Wl*Cout)
            Mb = _band(w1[:, :, split:, :], Wl)                 # (K, Wl*Cb, Wl*Cout)
            weights[name + "u1"] = jnp.concatenate(
                [_flat(Ma), _flat(Mb)], axis=0).astype(mm_dtype)
        add_aff((b1, g1, t1), Wl)

        weights[name + "u2"] = _flat(_band(w2, Wl)).astype(mm_dtype)
        add_aff((b2, g2, t2), Wl)

    wo, bo = params["out"]
    if out_c_pad != out_c:
        wo = jnp.pad(wo, ((0, 0), (0, 0), (0, 0), (0, out_c_pad - out_c)))
        bo = jnp.pad(bo, ((0, out_c_pad - out_c),))
    weights["out"] = _flat(_band(wo, Ws[0])).astype(mm_dtype)
    add_aff((bo,), Ws[0])

    width = max(a.shape[1] for a in aff_blocks)
    aff = jnp.concatenate(
        [jnp.pad(a, ((0, 0), (0, width - a.shape[1]))) for a in aff_blocks], axis=0)

    # Packed pool / row-upsample constants (one leaf each).
    pool_cfg = ((0, nf), (1, nf * 2), (2, nf * 4))
    prp = np.zeros((3, Hs[0] // 2, Hs[0]), np.float32)
    pcp = np.zeros((3, max(Ws[l] * c for l, c in pool_cfg),
                    max(Ws[l + 1] * c for l, c in pool_cfg)), np.float32)
    for i, (l, c) in enumerate(pool_cfg):
        pr, pc = _pool_mats(Hs[l], Ws[l], c)
        prp[i, :pr.shape[0], :pr.shape[1]] = pr
        pcp[i, :pc.shape[0], :pc.shape[1]] = pc
    dp = np.zeros((3, Hs[0], Hs[1]), np.float32)
    for j, l in enumerate((3, 2, 1)):                           # up4, up5, up6 sources
        d = _row_dup_mat(Hs[l])
        dp[j, :d.shape[0], :d.shape[1]] = d

    return {"W": weights, "aff": aff,
            "Pr": jnp.asarray(prp), "Pc": jnp.asarray(pcp), "D": jnp.asarray(dp)}


# ------------------------------------------------------------------------------- params
def _init_unit(key, cin, cout, ks):
    kw_, kb_, kg_, kt_ = jax.random.split(key, 4)
    scale = 1.0 / float(ks * ks * cin) ** 0.5
    w = jax.random.normal(kw_, (ks, ks, cin, cout), jnp.float32) * scale
    b = jax.random.normal(kb_, (cout,), jnp.float32) * 0.01
    g = 1.0 + 0.1 * jax.random.normal(kg_, (cout,), jnp.float32)
    bt = 0.1 * jax.random.normal(kt_, (cout,), jnp.float32)
    return (w, b, g, bt)


def init_params(key, in_c, out_c, nf):
    cfg = [
        ("block0", in_c, nf, 7),
        ("block1", nf, nf * 2, 5),
        ("block2", nf * 2, nf * 4, 3),
        ("block3", nf * 4, nf * 4, 3),
        ("block4", nf * 8, nf * 4, 3),
        ("block5", nf * 6, nf * 2, 3),
        ("block6", nf * 3, nf, 3),
    ]
    keys = jax.random.split(key, 2 * len(cfg) + 2)
    params, i = {}, 0
    for name, cin, cout, ks in cfg:
        u1 = _init_unit(keys[i], cin, cout, ks); i += 1
        u2 = _init_unit(keys[i], cout, cout, ks); i += 1
        params[name] = (u1, u2)
    scale = 1.0 / float(3 * 3 * nf) ** 0.5
    wo = jax.random.normal(keys[i], (3, 3, nf, out_c), jnp.float32) * scale
    bo = jax.random.normal(keys[i + 1], (out_c,), jnp.float32) * 0.01
    params["out"] = (wo, bo)
    return params


# ---------------------------------------------------------------------------- reference
def _avg_pool2_nhwc(x):
    N, H, W, C = x.shape
    return x.reshape(N, H // 2, 2, W // 2, 2, C).mean(axis=(2, 4))


def _upsample2_nhwc(x):
    x = jnp.repeat(x, 2, axis=1)
    return jnp.repeat(x, 2, axis=2)


def _ref_conv(x, w, b, pad):
    y = jax.lax.conv_general_dilated(
        x, w, (1, 1), [(pad, pad), (pad, pad)],
        dimension_numbers=("NHWC", "HWIO", "NHWC"),
        preferred_element_type=jnp.float32)
    return y + b.reshape(1, 1, 1, -1)


def _ref_unit(x, unit_p):
    w, b, g, bt = unit_p
    pad = (w.shape[0] - 1) // 2
    y = jnp.maximum(_ref_conv(x, w, b, pad), 0.0)
    mean = y.mean(axis=(1, 2, 3), keepdims=True)
    var = ((y - mean) ** 2).mean(axis=(1, 2, 3), keepdims=True)
    y = (y - mean) * jax.lax.rsqrt(var + _EPS)
    return y * g.reshape(1, 1, 1, -1) + bt.reshape(1, 1, 1, -1)


def _ref_block(x, bp):
    for u in bp:
        x = _ref_unit(x, u)
    return x


def mpinet2d_reference(x_nchw, params):
    x = jnp.transpose(x_nchw, (0, 2, 3, 1))
    c1 = _ref_block(x, params["block0"])
    c2 = _ref_block(_avg_pool2_nhwc(c1), params["block1"])
    c3 = _ref_block(_avg_pool2_nhwc(c2), params["block2"])
    c4 = _ref_block(_avg_pool2_nhwc(c3), params["block3"])
    c5 = _ref_block(jnp.concatenate([_upsample2_nhwc(c4), c3], -1), params["block4"])
    c6 = _ref_block(jnp.concatenate([_upsample2_nhwc(c5), c2], -1), params["block5"])
    c7 = _ref_block(jnp.concatenate([_upsample2_nhwc(c6), c1], -1), params["block6"])
    wo, bo = params["out"]
    out = (jnp.tanh(_ref_conv(c7, wo, bo, 1)) + 1.0) * 0.5
    return jnp.transpose(out, (0, 3, 1, 2))


# --------------------------------------------------------------------------------- main
if __name__ == "__main__":
    key = jax.random.PRNGKey(0)
    k_x, k_p = jax.random.split(key)

    N, IN_C, OUT_C, NF, H, W = 2, 4, 4, 8, 16, 16
    x = jax.random.normal(k_x, (N, IN_C, H, W), jnp.float32)
    params = init_params(k_p, IN_C, OUT_C, NF)

    fwd = jax.jit(mpinet2d_forward, static_argnames=("out_c",))
    ref = jax.block_until_ready(mpinet2d_reference(x, params))

    # f32 MXU path: parity check against the PyTorch-style f32 reference.
    kp_f32 = prepare_params(params, NF, IN_C, OUT_C, H, W, mm_dtype=jnp.float32)
    out_f32 = jax.block_until_ready(fwd(x, kp_f32, out_c=OUT_C))
    assert out_f32.shape == (N, OUT_C, H, W), out_f32.shape
    assert bool(jnp.all(jnp.isfinite(out_f32)))
    err_f32 = float(jnp.max(jnp.abs(out_f32 - ref)))
    assert jnp.allclose(out_f32, ref, atol=5e-3, rtol=5e-3), err_f32

    # bf16 MXU path (fast path): bf16 matmul operands, f32 accumulation/epilogue.
    kp_bf16 = prepare_params(params, NF, IN_C, OUT_C, H, W, mm_dtype=jnp.bfloat16)
    out_bf16 = jax.block_until_ready(fwd(x, kp_bf16, out_c=OUT_C))
    assert out_bf16.shape == (N, OUT_C, H, W), out_bf16.shape
    assert bool(jnp.all(jnp.isfinite(out_bf16)))
    err_bf16 = float(jnp.max(jnp.abs(out_bf16 - ref)))
    assert err_bf16 < 1e-1, err_bf16   # bf16-operand drift bound on a [0,1] output

    print("KERNEL_OK")
</pallas_src>

<mosaic_0001>
module attributes {stable_mosaic.version = 11 : i64} {
  func.func @_mpinet_kernel(%arg0: i32, %arg1: memref<1x16x128xf32, #tpu.memory_space<vmem>>, %arg2: memref<3x16x8xf32, #tpu.memory_space<vmem>>, %arg3: memref<3x128x64xf32, #tpu.memory_space<vmem>>, %arg4: memref<3x8x16xf32, #tpu.memory_space<vmem>>, %arg5: memref<896x128xf32, #tpu.memory_space<vmem>>, %arg6: memref<896x128xf32, #tpu.memory_space<vmem>>, %arg7: memref<320x128xf32, #tpu.memory_space<vmem>>, %arg8: memref<640x128xf32, #tpu.memory_space<vmem>>, %arg9: memref<192x128xf32, #tpu.memory_space<vmem>>, %arg10: memref<384x128xf32, #tpu.memory_space<vmem>>, %arg11: memref<192x64xf32, #tpu.memory_space<vmem>>, %arg12: memref<192x64xf32, #tpu.memory_space<vmem>>, %arg13: memref<576x128xf32, #tpu.memory_space<vmem>>, %arg14: memref<384x128xf32, #tpu.memory_space<vmem>>, %arg15: memref<768x128xf32, #tpu.memory_space<vmem>>, %arg16: memref<384x128xf32, #tpu.memory_space<vmem>>, %arg17: memref<768x128xf32, #tpu.memory_space<vmem>>, %arg18: memref<384x128xf32, #tpu.memory_space<vmem>>, %arg19: memref<384x128xf32, #tpu.memory_space<vmem>>, %arg20: memref<43x128xf32, #tpu.memory_space<vmem>>, %arg21: memref<1x16x128xf32, #tpu.memory_space<vmem>>, %arg22: memref<16x896xf32, #tpu.memory_space<vmem>>) attributes {dimension_semantics = [#tpu.dimension_semantics<parallel>], iteration_bounds = array<i64: 2>, scalar_prefetch = 0 : i64, scratch_operands = 1 : i64, tpu.core_type = #tpu.core_type<tc>, window_params = [{transform_indices = @transform_0, window_bounds = array<i64: 1, 16, 128>}, {pipeline_mode = #tpu.pipeline_mode<synchronous>, transform_indices = @transform_1, window_bounds = array<i64: 3, 16, 8>}, {pipeline_mode = #tpu.pipeline_mode<synchronous>, transform_indices = @transform_2, window_bounds = array<i64: 3, 128, 64>}, {pipeline_mode = #tpu.pipeline_mode<synchronous>, transform_indices = @transform_3, window_bounds = array<i64: 3, 8, 16>}, {pipeline_mode = #tpu.pipeline_mode<synchronous>, transform_indices = @transform_4, window_bounds = array<i64: 896, 128>}, {pipeline_mode = #tpu.pipeline_mode<synchronous>, transform_indices = @transform_5, window_bounds = array<i64: 896, 128>}, {pipeline_mode = #tpu.pipeline_mode<synchronous>, transform_indices = @transform_6, window_bounds = array<i64: 320, 128>}, {pipeline_mode = #tpu.pipeline_mode<synchronous>, transform_indices = @transform_7, window_bounds = array<i64: 640, 128>}, {pipeline_mode = #tpu.pipeline_mode<synchronous>, transform_indices = @transform_8, window_bounds = array<i64: 192, 128>}, {pipeline_mode = #tpu.pipeline_mode<synchronous>, transform_indices = @transform_9, window_bounds = array<i64: 384, 128>}, {pipeline_mode = #tpu.pipeline_mode<synchronous>, transform_indices = @transform_10, window_bounds = array<i64: 192, 64>}, {pipeline_mode = #tpu.pipeline_mode<synchronous>, transform_indices = @transform_11, window_bounds = array<i64: 192, 64>}, {pipeline_mode = #tpu.pipeline_mode<synchronous>, transform_indices = @transform_12, window_bounds = array<i64: 576, 128>}, {pipeline_mode = #tpu.pipeline_mode<synchronous>, transform_indices = @transform_13, window_bounds = array<i64: 384, 128>}, {pipeline_mode = #tpu.pipeline_mode<synchronous>, transform_indices = @transform_14, window_bounds = array<i64: 768, 128>}, {pipeline_mode = #tpu.pipeline_mode<synchronous>, transform_indices = @transform_15, window_bounds = array<i64: 384, 128>}, {pipeline_mode = #tpu.pipeline_mode<synchronous>, transform_indices = @transform_16, window_bounds = array<i64: 768, 128>}, {pipeline_mode = #tpu.pipeline_mode<synchronous>, transform_indices = @transform_17, window_bounds = array<i64: 384, 128>}, {pipeline_mode = #tpu.pipeline_mode<synchronous>, transform_indices = @transform_18, window_bounds = array<i64: 384, 128>}, {pipeline_mode = #tpu.pipeline_mode<synchronous>, transform_indices = @transform_19, window_bounds = array<i64: 43, 128>}, {transform_indices = @transform_20, window_bounds = array<i64: 1, 16, 128>}]} {
    %c0 = arith.constant 0 : index
    %c0_0 = arith.constant 0 : index
    %c0_1 = arith.constant 0 : index
    %0 = vector.load %arg1[%c0, %c0_0, %c0_1] : memref<1x16x128xf32, #tpu.memory_space<vmem>>, vector<1x16x128xf32>
    %1 = vector.shape_cast %0 : vector<1x16x128xf32> to vector<16x128xf32>
    %cst = arith.constant 0.000000e+00 : f32
    %2 = vector.broadcast %cst : f32 to vector<3x128xf32>
    %c0_2 = arith.constant 0 : index
    %c0_3 = arith.constant 0 : index
    %3 = vector.load %arg22[%c0_2, %c0_3] : memref<16x896xf32, #tpu.memory_space<vmem>>, vector<3x128xf32>
    tpu.vector_store %arg22[%c0_2, %c0_3], %2 {strides = array<i32>} : memref<16x896xf32, #tpu.memory_space<vmem>>, vector<3x128xf32>,
    %4 = vector.extract_strided_slice %1 {offsets = [0, 0], sizes = [13, 128], strides = [1, 1]} : vector<16x128xf32> to vector<13x128xf32>
    %c3 = arith.constant 3 : index
    %c0_4 = arith.constant 0 : index
    %5 = vector.load %arg22[%c3, %c0_4] : memref<16x896xf32, #tpu.memory_space<vmem>>, vector<13x128xf32>
    tpu.vector_store %arg22[%c3, %c0_4], %4 {strides = array<i32>} : memref<16x896xf32, #tpu.memory_space<vmem>>, vector<13x128xf32>,
    %cst_5 = arith.constant 0.000000e+00 : f32
    %6 = vector.broadcast %cst_5 : f32 to vector<2x128xf32>
    %c0_6 = arith.constant 0 : index
    %c128 = arith.constant 128 : index
    %7 = vector.load %arg22[%c0_6, %c128] : memref<16x896xf32, #tpu.memory_space<vmem>>, vector<2x128xf32>
    tpu.vector_store %arg22[%c0_6, %c128], %6 {strides = array<i32>} : memref<16x896xf32, #tpu.memory_space<vmem>>, vector<2x128xf32>,
    %8 = vector.extract_strided_slice %1 {offsets = [0, 0], sizes = [14, 128], strides = [1, 1]} : vector<16x128xf32> to vector<14x128xf32>
    %c2 = arith.constant 2 : index
    %c128_7 = arith.constant 128 : index
    %9 = vector.load %arg22[%c2, %c128_7] : memref<16x896xf32, #tpu.memory_space<vmem>>, vector<14x128xf32>
    tpu.vector_store %arg22[%c2, %c128_7], %8 {strides = array<i32>} : memref<16x896xf32, #tpu.memory_space<vmem>>, vector<14x128xf32>,
    %cst_8 = arith.constant 0.000000e+00 : f32
    %10 = vector.broadcast %cst_8 : f32 to vector<1x128xf32>
    %c0_9 = arith.constant 0 : index
    %c256 = arith.constant 256 : index
    %11 = vector.load %arg22[%c0_9, %c256] : memref<16x896xf32, #tpu.memory_space<vmem>>, vector<1x128xf32>
    tpu.vector_store %arg22[%c0_9, %c256], %10 {strides = array<i32>} : memref<16x896xf32, #tpu.memory_space<vmem>>, vector<1x128xf32>,
    %12 = vector.extract_strided_slice %1 {offsets = [0, 0], sizes = [15, 128], strides = [1, 1]} : vector<16x128xf32> to vector<15x128xf32>
    %c1 = arith.constant 1 : index
    %c256_10 = arith.constant 256 : index
    %13 = vector.load %arg22[%c1, %c256_10] : memref<16x896xf32, #tpu.memory_space<vmem>>, vector<15x128xf32>
    tpu.vector_store %arg22[%c1, %c256_10], %12 {strides = array<i32>} : memref<16x896xf32, #tpu.memory_space<vmem>>, vector<15x128xf32>,
    %c0_11 = arith.constant 0 : index
    %c384 = arith.constant 384 : index
    %14 = vector.load %arg22[%c0_11, %c384] : memref<16x896xf32, #tpu.memory_space<vmem>>, vector<16x128xf32>
    tpu.vector_store %arg22[%c0_11, %c384], %1 {strides = array<i32>} : memref<16x896xf32, #tpu.memory_space<vmem>>, vector<16x128xf32>,
    %cst_12 = arith.constant 0.000000e+00 : f32
    %15 = vector.broadcast %cst_12 : f32 to vector<1x128xf32>
    %c15 = arith.constant 15 : index
    %c512 = arith.constant 512 : index
    %16 = vector.load %arg22[%c15, %c512] : memref<16x896xf32, #tpu.memory_space<vmem>>, vector<1x128xf32>
    tpu.vector_store %arg22[%c15, %c512], %15 {strides = array<i32>} : memref<16x896xf32, #tpu.memory_space<vmem>>, vector<1x128xf32>,
    %17 = vector.extract_strided_slice %1 {offsets = [1, 0], sizes = [15, 128], strides = [1, 1]} : vector<16x128xf32> to vector<15x128xf32>
    %c0_13 = arith.constant 0 : index
    %c512_14 = arith.constant 512 : index
    %18 = vector.load %arg22[%c0_13, %c512_14] : memref<16x896xf32, #tpu.memory_space<vmem>>, vector<15x128xf32>
    tpu.vector_store %arg22[%c0_13, %c512_14], %17 {strides = array<i32>} : memref<16x896xf32, #tpu.memory_space<vmem>>, vector<15x128xf32>,
    %cst_15 = arith.constant 0.000000e+00 : f32
    %19 = vector.broadcast %cst_15 : f32 to vector<2x128xf32>
    %c14 = arith.constant 14 : index
    %c640 = arith.constant 640 : index
    %20 = vector.load %arg22[%c14, %c640] : memref<16x896xf32, #tpu.memory_space<vmem>>, vector<2x128xf32>
    tpu.vector_store %arg22[%c14, %c640], %19 {strides = array<i32>} : memref<16x896xf32, #tpu.memory_space<vmem>>, vector<2x128xf32>,
    %21 = vector.extract_strided_slice %1 {offsets = [2, 0], sizes = [14, 128], strides = [1, 1]} : vector<16x128xf32> to vector<14x128xf32>
    %c0_16 = arith.constant 0 : index
    %c640_17 = arith.constant 640 : index
    %22 = vector.load %arg22[%c0_16, %c640_17] : memref<16x896xf32, #tpu.memory_space<vmem>>, vector<14x128xf32>
    tpu.vector_store %arg22[%c0_16, %c640_17], %21 {strides = array<i32>} : memref<16x896xf32, #tpu.memory_space<vmem>>, vector<14x128xf32>,
    %cst_18 = arith.constant 0.000000e+00 : f32
    %23 = vector.broadcast %cst_18 : f32 to vector<3x128xf32>
    %c13 = arith.constant 13 : index
    %c768 = arith.constant 768 : index
    %24 = vector.load %arg22[%c13, %c768] : memref<16x896xf32, #tpu.memory_space<vmem>>, vector<3x128xf32>
    tpu.vector_store %arg22[%c13, %c768], %23 {strides = array<i32>} : memref<16x896xf32, #tpu.memory_space<vmem>>, vector<3x128xf32>,
    %25 = vector.extract_strided_slice %1 {offsets = [3, 0], sizes = [13, 128], strides = [1, 1]} : vector<16x128xf32> to vector<13x128xf32>
    %c0_19 = arith.constant 0 : index
    %c768_20 = arith.constant 768 : index
    %26 = vector.load %arg22[%c0_19, %c768_20] : memref<16x896xf32, #tpu.memory_space<vmem>>, vector<13x128xf32>
    tpu.vector_store %arg22[%c0_19, %c768_20], %25 {strides = array<i32>} : memref<16x896xf32, #tpu.memory_space<vmem>>, vector<13x128xf32>,
    %c0_21 = arith.constant 0 : index
    %c0_22 = arith.constant 0 : index
    %27 = vector.load %arg22[%c0_21, %c0_22] : memref<16x896xf32, #tpu.memory_space<vmem>>, vector<16x896xf32>
    %c0_23 = arith.constant 0 : index
    %c0_24 = arith.constant 0 : index
    %28 = vector.load %arg5[%c0_23, %c0_24] : memref<896x128xf32, #tpu.memory_space<vmem>>, vector<896x128xf32>
    %cst_25 = arith.constant dense<0.000000e+00> : vector<16x128xf32>
    %29 = tpu.matmul %27, %28, %cst_25 {dimension_numbers = #tpu.dot_dimension_numbers<[1], [0], [0], [1], [0, 0, 1, 1], [], []>} : vector<16x896xf32>, vector<896x128xf32>, vector<16x128xf32> -> vector<16x128xf32>
    %c0_26 = arith.constant 0 : index
    %c0_27 = arith.constant 0 : index
    %30 = vector.load %arg20[%c0_26, %c0_27] : memref<43x128xf32, #tpu.memory_space<vmem>>, vector<3x128xf32>
    %31 = vector.extract_strided_slice %30 {offsets = [0, 0], sizes = [1, 128], strides = [1, 1]} : vector<3x128xf32> to vector<1x128xf32>
    %32 = vector.broadcast %31 : vector<1x128xf32> to vector<16x128xf32>
    %33 = arith.addf %29, %32 : vector<16x128xf32>
    %cst_28 = arith.constant 0.000000e+00 : f32
    %34 = vector.broadcast %cst_28 : f32 to vector<16x128xf32>
    %35 = arith.maximumf %33, %34 : vector<16x128xf32>
    %36 = vector.shape_cast %35 : vector<16x128xf32> to vector<1x16x128xf32>
    %cst_29 = arith.constant dense<0.000000e+00> : vector<1xf32>
    %37 = vector.multi_reduction <add>, %36, %cst_29 [1, 2] : vector<1x16x128xf32> to vector<1xf32>
    %38 = vector.shape_cast %37 : vector<1xf32> to vector<1x1x1xf32>
    %39 = vector.extract %38[0, 0, 0] : f32 from vector<1x1x1xf32>
    %40 = arith.mulf %35, %35 : vector<16x128xf32>
    %41 = vector.shape_cast %40 : vector<16x128xf32> to vector<1x16x128xf32>
    %cst_30 = arith.constant dense<0.000000e+00> : vector<1xf32>
    %42 = vector.multi_reduction <add>, %41, %cst_30 [1, 2] : vector<1x16x128xf32> to vector<1xf32>
    %43 = vector.shape_cast %42 : vector<1xf32> to vector<1x1x1xf32>
    %44 = vector.extract %43[0, 0, 0] : f32 from vector<1x1x1xf32>
    %cst_31 = arith.constant 4.8828125E-4 : f32
    %45 = arith.mulf %39, %cst_31 : f32
    %cst_32 = arith.constant 4.8828125E-4 : f32
    %46 = arith.mulf %44, %cst_32 : f32
    %47 = arith.mulf %45, %45 : f32
    %48 = arith.subf %46, %47 : f32
    %cst_33 = arith.constant 0.000000e+00 : f32
    %49 = arith.maximumf %48, %cst_33 : f32
    %50 = vector.extract_strided_slice %30 {offsets = [1, 0], sizes = [1, 128], strides = [1, 1]} : vector<3x128xf32> to vector<1x128xf32>
    %cst_34 = arith.constant 9.99999974E-6 : f32
    %51 = arith.addf %49, %cst_34 : f32
    %52 = math.rsqrt %51 : f32
    %53 = vector.broadcast %52 : f32 to vector<1x128xf32>
    %54 = arith.mulf %50, %53 : vector<1x128xf32>
    %55 = vector.extract_strided_slice %30 {offsets = [2, 0], sizes = [1, 128], strides = [1, 1]} : vector<3x128xf32> to vector<1x128xf32>
    %56 = vector.broadcast %45 : f32 to vector<1x128xf32>
    %57 = arith.mulf %56, %54 : vector<1x128xf32>
    %58 = arith.subf %55, %57 : vector<1x128xf32>
    %59 = vector.broadcast %54 : vector<1x128xf32> to vector<16x128xf32>
    %60 = arith.mulf %35, %59 : vector<16x128xf32>
    %61 = vector.broadcast %58 : vector<1x128xf32> to vector<16x128xf32>
    %62 = arith.addf %60, %61 : vector<16x128xf32>
    %cst_35 = arith.constant 0.000000e+00 : f32
    %63 = vector.broadcast %cst_35 : f32 to vector<3x128xf32>
    %c0_36 = arith.constant 0 : index
    %c0_37 = arith.constant 0 : index
    %64 = vector.load %arg22[%c0_36, %c0_37] : memref<16x896xf32, #tpu.memory_space<vmem>>, vector<3x128xf32>
    tpu.vector_store %arg22[%c0_36, %c0_37], %63 {strides = array<i32>} : memref<16x896xf32, #tpu.memory_space<vmem>>, vector<3x128xf32>,
    %65 = vector.extract_strided_slice %62 {offsets = [0, 0], sizes = [13, 128], strides = [1, 1]} : vector<16x128xf32> to vector<13x128xf32>
    %c3_38 = arith.constant 3 : index
    %c0_39 = arith.constant 0 : index
    %66 = vector.load %arg22[%c3_38, %c0_39] : memref<16x896xf32, #tpu.memory_space<vmem>>, vector<13x128xf32>
    tpu.vector_store %arg22[%c3_38, %c0_39], %65 {strides = array<i32>} : memref<16x896xf32, #tpu.memory_space<vmem>>, vector<13x128xf32>,
    %cst_40 = arith.constant 0.000000e+00 : f32
    %67 = vector.broadcast %cst_40 : f32 to vector<2x128xf32>
    %c0_41 = arith.constant 0 : index
    %c128_42 = arith.constant 128 : index
    %68 = vector.load %arg22[%c0_41, %c128_42] : memref<16x896xf32, #tpu.memory_space<vmem>>, vector<2x128xf32>
    tpu.vector_store %arg22[%c0_41, %c128_42], %67 {strides = array<i32>} : memref<16x896xf32, #tpu.memory_space<vmem>>, vector<2x128xf32>,
    %69 = vector.extract_strided_slice %62 {offsets = [0, 0], sizes = [14, 128], strides = [1, 1]} : vector<16x128xf32> to vector<14x128xf32>
    %c2_43 = arith.constant 2 : index
    %c128_44 = arith.constant 128 : index
    %70 = vector.load %arg22[%c2_43, %c128_44] : memref<16x896xf32, #tpu.memory_space<vmem>>, vector<14x128xf32>
    tpu.vector_store %arg22[%c2_43, %c128_44], %69 {strides = array<i32>} : memref<16x896xf32, #tpu.memory_space<vmem>>, vector<14x128xf32>,
    %cst_45 = arith.constant 0.000000e+00 : f32
    %71 = vector.broadcast %cst_45 : f32 to vector<1x128xf32>
    %c0_46 = arith.constant 0 : index
    %c256_47 = arith.constant 256 : index
    %72 = vector.load %arg22[%c0_46, %c256_47] : memref<16x896xf32, #tpu.memory_space<vmem>>, vector<1x128xf32>
    tpu.vector_store %arg22[%c0_46, %c256_47], %71 {strides = array<i32>} : memref<16x896xf32, #tpu.memory_space<vmem>>, vector<1x128xf32>,
    %73 = vector.extract_strided_slice %62 {offsets = [0, 0], sizes = [15, 128], strides = [1, 1]} : vector<16x128xf32> to vector<15x128xf32>
    %c1_48 = arith.constant 1 : index
    %c256_49 = arith.constant 256 : index
    %74 = vector.load %arg22[%c1_48, %c256_49] : memref<16x896xf32, #tpu.memory_space<vmem>>, vector<15x128xf32>
    tpu.vector_store %arg22[%c1_48, %c256_49], %73 {strides = array<i32>} : memref<16x896xf32, #tpu.memory_space<vmem>>, vector<15x128xf32>,
    %c0_50 = arith.constant 0 : index
    %c384_51 = arith.constant 384 : index
    %75 = vector.load %arg22[%c0_50, %c384_51] : memref<16x896xf32, #tpu.memory_space<vmem>>, vector<16x128xf32>
    tpu.vector_store %arg22[%c0_50, %c384_51], %62 {strides = array<i32>} : memref<16x896xf32, #tpu.memory_space<vmem>>, vector<16x128xf32>,
    %cst_52 = arith.constant 0.000000e+00 : f32
    %76 = vector.broadcast %cst_52 : f32 to vector<1x128xf32>
    %c15_53 = arith.constant 15 : index
    %c512_54 = arith.constant 512 : index
    %77 = vector.load %arg22[%c15_53, %c512_54] : memref<16x896xf32, #tpu.memory_space<vmem>>, vector<1x128xf32>
    tpu.vector_store %arg22[%c15_53, %c512_54], %76 {strides = array<i32>} : memref<16x896xf32, #tpu.memory_space<vmem>>, vector<1x128xf32>,
    %78 = vector.extract_strided_slice %62 {offsets = [1, 0], sizes = [15, 128], strides = [1, 1]} : vector<16x128xf32> to vector<15x128xf32>
    %c0_55 = arith.constant 0 : index
    %c512_56 = arith.constant 512 : index
    %79 = vector.load %arg22[%c0_55, %c512_56] : memref<16x896xf32, #tpu.memory_space<vmem>>, vector<15x128xf32>
    tpu.vector_store %arg22[%c0_55, %c512_56], %78 {strides = array<i32>} : memref<16x896xf32, #tpu.memory_space<vmem>>, vector<15x128xf32>,
    %cst_57 = arith.constant 0.000000e+00 : f32
    %80 = vector.broadcast %cst_57 : f32 to vector<2x128xf32>
    %c14_58 = arith.constant 14 : index
    %c640_59 = arith.constant 640 : index
    %81 = vector.load %arg22[%c14_58, %c640_59] : memref<16x896xf32, #tpu.memory_space<vmem>>, vector<2x128xf32>
    tpu.vector_store %arg22[%c14_58, %c640_59], %80 {strides = array<i32>} : memref<16x896xf32, #tpu.memory_space<vmem>>, vector<2x128xf32>,
    %82 = vector.extract_strided_slice %62 {offsets = [2, 0], sizes = [14, 128], strides = [1, 1]} : vector<16x128xf32> to vector<14x128xf32>
    %c0_60 = arith.constant 0 : index
    %c640_61 = arith.constant 640 : index
    %83 = vector.load %arg22[%c0_60, %c640_61] : memref<16x896xf32, #tpu.memory_space<vmem>>, vector<14x128xf32>
    tpu.vector_store %arg22[%c0_60, %c640_61], %82 {strides = array<i32>} : memref<16x896xf32, #tpu.memory_space<vmem>>, vector<14x128xf32>,
    %cst_62 = arith.constant 0.000000e+00 : f32
    %84 = vector.broadcast %cst_62 : f32 to vector<3x128xf32>
    %c13_63 = arith.constant 13 : index
    %c768_64 = arith.constant 768 : index
    %85 = vector.load %arg22[%c13_63, %c768_64] : memref<16x896xf32, #tpu.memory_space<vmem>>, vector<3x128xf32>
    tpu.vector_store %arg22[%c13_63, %c768_64], %84 {strides = array<i32>} : memref<16x896xf32, #tpu.memory_space<vmem>>, vector<3x128xf32>,
    %86 = vector.extract_strided_slice %62 {offsets = [3, 0], sizes = [13, 128], strides = [1, 1]} : vector<16x128xf32> to vector<13x128xf32>
    %c0_65 = arith.constant 0 : index
    %c768_66 = arith.constant 768 : index
    %87 = vector.load %arg22[%c0_65, %c768_66] : memref<16x896xf32, #tpu.memory_space<vmem>>, vector<13x128xf32>
    tpu.vector_store %arg22[%c0_65, %c768_66], %86 {strides = array<i32>} : memref<16x896xf32, #tpu.memory_space<vmem>>, vector<13x128xf32>,
    %c0_67 = arith.constant 0 : index
    %c0_68 = arith.constant 0 : index
    %88 = vector.load %arg22[%c0_67, %c0_68] : memref<16x896xf32, #tpu.memory_space<vmem>>, vector<16x896xf32>
    %c0_69 = arith.constant 0 : index
    %c0_70 = arith.constant 0 : index
    %89 = vector.load %arg6[%c0_69, %c0_70] : memref<896x128xf32, #tpu.memory_space<vmem>>, vector<896x128xf32>
    %cst_71 = arith.constant dense<0.000000e+00> : vector<16x128xf32>
    %90 = tpu.matmul %88, %89, %cst_71 {dimension_numbers = #tpu.dot_dimension_numbers<[1], [0], [0], [1], [0, 0, 1, 1], [], []>} : vector<16x896xf32>, vector<896x128xf32>, vector<16x128xf32> -> vector<16x128xf32>
    %c3_72 = arith.constant 3 : index
    %c0_73 = arith.constant 0 : index
    %91 = vector.load %arg20[%c3_72, %c0_73] : memref<43x128xf32, #tpu.memory_space<vmem>>, vector<3x128xf32>
    %92 = vector.extract_strided_slice %91 {offsets = [0, 0], sizes = [1, 128], strides = [1, 1]} : vector<3x128xf32> to vector<1x128xf32>
    %93 = vector.broadcast %92 : vector<1x128xf32> to vector<16x128xf32>
    %94 = arith.addf %90, %93 : vector<16x128xf32>
    %cst_74 = arith.constant 0.000000e+00 : f32
    %95 = vector.broadcast %cst_74 : f32 to vector<16x128xf32>
    %96 = arith.maximumf %94, %95 : vector<16x128xf32>
    %97 = vector.shape_cast %96 : vector<16x128xf32> to vector<1x16x128xf32>
    %cst_75 = arith.constant dense<0.000000e+00> : vector<1xf32>
    %98 = vector.multi_reduction <add>, %97, %cst_75 [1, 2] : vector<1x16x128xf32> to vector<1xf32>
    %99 = vector.shape_cast %98 : vector<1xf32> to vector<1x1x1xf32>
    %100 = vector.extract %99[0, 0, 0] : f32 from vector<1x1x1xf32>
    %101 = arith.mulf %96, %96 : vector<16x128xf32>
    %102 = vector.shape_cast %101 : vector<16x128xf32> to vector<1x16x128xf32>
    %cst_76 = arith.constant dense<0.000000e+00> : vector<1xf32>
    %103 = vector.multi_reduction <add>, %102, %cst_76 [1, 2] : vector<1x16x128xf32> to vector<1xf32>
    %104 = vector.shape_cast %103 : vector<1xf32> to vector<1x1x1xf32>
    %105 = vector.extract %104[0, 0, 0] : f32 from vector<1x1x1xf32>
    %cst_77 = arith.constant 4.8828125E-4 : f32
    %106 = arith.mulf %100, %cst_77 : f32
    %cst_78 = arith.constant 4.8828125E-4 : f32
    %107 = arith.mulf %105, %cst_78 : f32
    %108 = arith.mulf %106, %106 : f32
    %109 = arith.subf %107, %108 : f32
    %cst_79 = arith.constant 0.000000e+00 : f32
    %110 = arith.maximumf %109, %cst_79 : f32
    %111 = vector.extract_strided_slice %91 {offsets = [1, 0], sizes = [1, 128], strides = [1, 1]} : vector<3x128xf32> to vector<1x128xf32>
    %cst_80 = arith.constant 9.99999974E-6 : f32
    %112 = arith.addf %110, %cst_80 : f32
    %113 = math.rsqrt %112 : f32
    %114 = vector.broadcast %113 : f32 to vector<1x128xf32>
    %115 = arith.mulf %111, %114 : vector<1x128xf32>
    %116 = vector.extract_strided_slice %91 {offsets = [2, 0], sizes = [1, 128], strides = [1, 1]} : vector<3x128xf32> to vector<1x128xf32>
    %117 = vector.broadcast %106 : f32 to vector<1x128xf32>
    %118 = arith.mulf %117, %115 : vector<1x128xf32>
    %119 = arith.subf %116, %118 : vector<1x128xf32>
    %120 = vector.broadcast %115 : vector<1x128xf32> to vector<16x128xf32>
    %121 = arith.mulf %96, %120 : vector<16x128xf32>
    %122 = vector.broadcast %119 : vector<1x128xf32> to vector<16x128xf32>
    %123 = arith.addf %121, %122 : vector<16x128xf32>
    %c0_81 = arith.constant 0 : index
    %c0_82 = arith.constant 0 : index
    %c0_83 = arith.constant 0 : index
    %124 = vector.load %arg3[%c0_81, %c0_82, %c0_83] : memref<3x128x64xf32, #tpu.memory_space<vmem>>, vector<1x128x64xf32>
    %125 = vector.shape_cast %124 : vector<1x128x64xf32> to vector<128x64xf32>
    %cst_84 = arith.constant dense<0.000000e+00> : vector<16x64xf32>
    %126 = tpu.matmul %123, %125, %cst_84 {dimension_numbers = #tpu.dot_dimension_numbers<[1], [0], [0], [1], [0, 0, 1, 1], [], []>} : vector<16x128xf32>, vector<128x64xf32>, vector<16x64xf32> -> vector<16x64xf32>
    %c0_85 = arith.constant 0 : index
    %c0_86 = arith.constant 0 : index
    %c0_87 = arith.constant 0 : index
    %127 = vector.load %arg4[%c0_85, %c0_86, %c0_87] : memref<3x8x16xf32, #tpu.memory_space<vmem>>, vector<1x8x16xf32>
    %128 = vector.shape_cast %127 : vector<1x8x16xf32> to vector<8x16xf32>
    %cst_88 = arith.constant dense<0.000000e+00> : vector<8x64xf32>
    %129 = tpu.matmul %128, %126, %cst_88 {dimension_numbers = #tpu.dot_dimension_numbers<[1], [0], [0], [1], [0, 0, 1, 1], [], []>} : vector<8x16xf32>, vector<16x64xf32>, vector<8x64xf32> -> vector<8x64xf32>
    %cst_89 = arith.constant 0.000000e+00 : f32
    %130 = vector.broadcast %cst_89 : f32 to vector<2x64xf32>
    %c0_90 = arith.constant 0 : index
    %c0_91 = arith.constant 0 : index
    %131 = vector.load %arg22[%c0_90, %c0_91] : memref<16x896xf32, #tpu.memory_space<vmem>>, vector<2x64xf32>
    tpu.vector_store %arg22[%c0_90, %c0_91], %130 {strides = array<i32>} : memref<16x896xf32, #tpu.memory_space<vmem>>, vector<2x64xf32>,
    %132 = vector.extract_strided_slice %129 {offsets = [0, 0], sizes = [6, 64], strides = [1, 1]} : vector<8x64xf32> to vector<6x64xf32>
    %c2_92 = arith.constant 2 : index
    %c0_93 = arith.constant 0 : index
    %133 = vector.load %arg22[%c2_92, %c0_93] : memref<16x896xf32, #tpu.memory_space<vmem>>, vector<6x64xf32>
    tpu.vector_store %arg22[%c2_92, %c0_93], %132 {strides = array<i32>} : memref<16x896xf32, #tpu.memory_space<vmem>>, vector<6x64xf32>,
    %cst_94 = arith.constant 0.000000e+00 : f32
    %134 = vector.broadcast %cst_94 : f32 to vector<1x64xf32>
    %c0_95 = arith.constant 0 : index
    %c64 = arith.constant 64 : index
    %135 = vector.load %arg22[%c0_95, %c64] : memref<16x896xf32, #tpu.memory_space<vmem>>, vector<1x64xf32>
    tpu.vector_store %arg22[%c0_95, %c64], %134 {strides = array<i32>} : memref<16x896xf32, #tpu.memory_space<vmem>>, vector<1x64xf32>,
    %136 = vector.extract_strided_slice %129 {offsets = [0, 0], sizes = [7, 64], strides = [1, 1]} : vector<8x64xf32> to vector<7x64xf32>
    %c1_96 = arith.constant 1 : index
    %c64_97 = arith.constant 64 : index
    %137 = vector.load %arg22[%c1_96, %c64_97] : memref<16x896xf32, #tpu.memory_space<vmem>>, vector<7x64xf32>
    tpu.vector_store %arg22[%c1_96, %c64_97], %136 {strides = array<i32>} : memref<16x896xf32, #tpu.memory_space<vmem>>, vector<7x64xf32>,
    %c0_98 = arith.constant 0 : index
    %c128_99 = arith.constant 128 : index
    %138 = vector.load %arg22[%c0_98, %c128_99] : memref<16x896xf32, #tpu.memory_space<vmem>>, vector<8x64xf32>
    tpu.vector_store %arg22[%c0_98, %c128_99], %129 {strides = array<i32>} : memref<16x896xf32, #tpu.memory_space<vmem>>, vector<8x64xf32>,
    %cst_100 = arith.constant 0.000000e+00 : f32
    %139 = vector.broadcast %cst_100 : f32 to vector<1x64xf32>
    %c7 = arith.constant 7 : index
    %c192 = arith.constant 192 : index
    %140 = vector.load %arg22[%c7, %c192] : memref<16x896xf32, #tpu.memory_space<vmem>>, vector<1x64xf32>
    tpu.vector_store %arg22[%c7, %c192], %139 {strides = array<i32>} : memref<16x896xf32, #tpu.memory_space<vmem>>, vector<1x64xf32>,
    %141 = vector.extract_strided_slice %129 {offsets = [1, 0], sizes = [7, 64], strides = [1, 1]} : vector<8x64xf32> to vector<7x64xf32>
    %c0_101 = arith.constant 0 : index
    %c192_102 = arith.constant 192 : index
    %142 = vector.load %arg22[%c0_101, %c192_102] : memref<16x896xf32, #tpu.memory_space<vmem>>, vector<7x64xf32>
    tpu.vector_store %arg22[%c0_101, %c192_102], %141 {strides = array<i32>} : memref<16x896xf32, #tpu.memory_space<vmem>>, vector<7x64xf32>,
    %cst_103 = arith.constant 0.000000e+00 : f32
    %143 = vector.broadcast %cst_103 : f32 to vector<2x64xf32>
    %c6 = arith.constant 6 : index
    %c256_104 = arith.constant 256 : index
    %144 = vector.load %arg22[%c6, %c256_104] : memref<16x896xf32, #tpu.memory_space<vmem>>, vector<2x64xf32>
    tpu.vector_store %arg22[%c6, %c256_104], %143 {strides = array<i32>} : memref<16x896xf32, #tpu.memory_space<vmem>>, vector<2x64xf32>,
    %145 = vector.extract_strided_slice %129 {offsets = [2, 0], sizes = [6, 64], strides = [1, 1]} : vector<8x64xf32> to vector<6x64xf32>
    %c0_105 = arith.constant 0 : index
    %c256_106 = arith.constant 256 : index
    %146 = vector.load %arg22[%c0_105, %c256_106] : memref<16x896xf32, #tpu.memory_space<vmem>>, vector<6x64xf32>
    tpu.vector_store %arg22[%c0_105, %c256_106], %145 {strides = array<i32>} : memref<16x896xf32, #tpu.memory_space<vmem>>, vector<6x64xf32>,
    %c0_107 = arith.constant 0 : index
    %c0_108 = arith.constant 0 : index
    %147 = vector.load %arg22[%c0_107, %c0_108] : memref<16x896xf32, #tpu.memory_space<vmem>>, vector<8x320xf32>
    %c0_109 = arith.constant 0 : index
    %c0_110 = arith.constant 0 : index
    %148 = vector.load %arg7[%c0_109, %c0_110] : memref<320x128xf32, #tpu.memory_space<vmem>>, vector<320x128xf32>
    %cst_111 = arith.constant dense<0.000000e+00> : vector<8x128xf32>
    %149 = tpu.matmul %147, %148, %cst_111 {dimension_numbers = #tpu.dot_dimension_numbers<[1], [0], [0], [1], [0, 0, 1, 1], [], []>} : vector<8x320xf32>, vector<320x128xf32>, vector<8x128xf32> -> vector<8x128xf32>
    %c6_112 = arith.constant 6 : index
    %c0_113 = arith.constant 0 : index
    %150 = vector.load %arg20[%c6_112, %c0_113] : memref<43x128xf32, #tpu.memory_space<vmem>>, vector<3x128xf32>
    %151 = vector.extract_strided_slice %150 {offsets = [0, 0], sizes = [1, 128], strides = [1, 1]} : vector<3x128xf32> to vector<1x128xf32>
    %152 = vector.broadcast %151 : vector<1x128xf32> to vector<8x128xf32>
    %153 = arith.addf %149, %152 : vector<8x128xf32>
    %cst_114 = arith.constant 0.000000e+00 : f32
    %154 = vector.broadcast %cst_114 : f32 to vector<8x128xf32>
    %155 = arith.maximumf %153, %154 : vector<8x128xf32>
    %156 = vector.shape_cast %155 : vector<8x128xf32> to vector<1x8x128xf32>
    %cst_115 = arith.constant dense<0.000000e+00> : vector<1xf32>
    %157 = vector.multi_reduction <add>, %156, %cst_115 [1, 2] : vector<1x8x128xf32> to vector<1xf32>
    %158 = vector.shape_cast %157 : vector<1xf32> to vector<1x1x1xf32>
    %159 = vector.extract %158[0, 0, 0] : f32 from vector<1x1x1xf32>
    %160 = arith.mulf %155, %155 : vector<8x128xf32>
    %161 = vector.shape_cast %160 : vector<8x128xf32> to vector<1x8x128xf32>
    %cst_116 = arith.constant dense<0.000000e+00> : vector<1xf32>
    %162 = vector.multi_reduction <add>, %161, %cst_116 [1, 2] : vector<1x8x128xf32> to vector<1xf32>
    %163 = vector.shape_cast %162 : vector<1xf32> to vector<1x1x1xf32>
    %164 = vector.extract %163[0, 0, 0] : f32 from vector<1x1x1xf32>
    %cst_117 = arith.constant 9.765625E-4 : f32
    %165 = arith.mulf %159, %cst_117 : f32
    %cst_118 = arith.constant 9.765625E-4 : f32
    %166 = arith.mulf %164, %cst_118 : f32
    %167 = arith.mulf %165, %165 : f32
    %168 = arith.subf %166, %167 : f32
    %cst_119 = arith.constant 0.000000e+00 : f32
    %169 = arith.maximumf %168, %cst_119 : f32
    %170 = vector.extract_strided_slice %150 {offsets = [1, 0], sizes = [1, 128], strides = [1, 1]} : vector<3x128xf32> to vector<1x128xf32>
    %cst_120 = arith.constant 9.99999974E-6 : f32
    %171 = arith.addf %169, %cst_120 : f32
    %172 = math.rsqrt %171 : f32
    %173 = vector.broadcast %172 : f32 to vector<1x128xf32>
    %174 = arith.mulf %170, %173 : vector<1x128xf32>
    %175 = vector.extract_strided_slice %150 {offsets = [2, 0], sizes = [1, 128], strides = [1, 1]} : vector<3x128xf32> to vector<1x128xf32>
    %176 = vector.broadcast %165 : f32 to vector<1x128xf32>
    %177 = arith.mulf %176, %174 : vector<1x128xf32>
    %178 = arith.subf %175, %177 : vector<1x128xf32>
    %179 = vector.broadcast %174 : vector<1x128xf32> to vector<8x128xf32>
    %180 = arith.mulf %155, %179 : vector<8x128xf32>
    %181 = vector.broadcast %178 : vector<1x128xf32> to vector<8x128xf32>
    %182 = arith.addf %180, %181 : vector<8x128xf32>
    %cst_121 = arith.constant 0.000000e+00 : f32
    %183 = vector.broadcast %cst_121 : f32 to vector<2x128xf32>
    %c0_122 = arith.constant 0 : index
    %c0_123 = arith.constant 0 : index
    %184 = vector.load %arg22[%c0_122, %c0_123] : memref<16x896xf32, #tpu.memory_space<vmem>>, vector<2x128xf32>
    tpu.vector_store %arg22[%c0_122, %c0_123], %183 {strides = array<i32>} : memref<16x896xf32, #tpu.memory_space<vmem>>, vector<2x128xf32>,
    %185 = vector.extract_strided_slice %182 {offsets = [0, 0], sizes = [6, 128], strides = [1, 1]} : vector<8x128xf32> to vector<6x128xf32>
    %c2_124 = arith.constant 2 : index
    %c0_125 = arith.constant 0 : index
    %186 = vector.load %arg22[%c2_124, %c0_125] : memref<16x896xf32, #tpu.memory_space<vmem>>, vector<6x128xf32>
    tpu.vector_store %arg22[%c2_124, %c0_125], %185 {strides = array<i32>} : memref<16x896xf32, #tpu.memory_space<vmem>>, vector<6x128xf32>,
    %cst_126 = arith.constant 0.000000e+00 : f32
    %187 = vector.broadcast %cst_126 : f32 to vector<1x128xf32>
    %c0_127 = arith.constant 0 : index
    %c128_128 = arith.constant 128 : index
    %188 = vector.load %arg22[%c0_127, %c128_128] : memref<16x896xf32, #tpu.memory_space<vmem>>, vector<1x128xf32>
    tpu.vector_store %arg22[%c0_127, %c128_128], %187 {strides = array<i32>} : memref<16x896xf32, #tpu.memory_space<vmem>>, vector<1x128xf32>,
    %189 = vector.extract_strided_slice %182 {offsets = [0, 0], sizes = [7, 128], strides = [1, 1]} : vector<8x128xf32> to vector<7x128xf32>
    %c1_129 = arith.constant 1 : index
    %c128_130 = arith.constant 128 : index
    %190 = vector.load %arg22[%c1_129, %c128_130] : memref<16x896xf32, #tpu.memory_space<vmem>>, vector<7x128xf32>
    tpu.vector_store %arg22[%c1_129, %c128_130], %189 {strides = array<i32>} : memref<16x896xf32, #tpu.memory_space<vmem>>, vector<7x128xf32>,
    %c0_131 = arith.constant 0 : index
    %c256_132 = arith.constant 256 : index
    %191 = vector.load %arg22[%c0_131, %c256_132] : memref<16x896xf32, #tpu.memory_space<vmem>>, vector<8x128xf32>
    tpu.vector_store %arg22[%c0_131, %c256_132], %182 {strides = array<i32>} : memref<16x896xf32, #tpu.memory_space<vmem>>, vector<8x128xf32>,
    %cst_133 = arith.constant 0.000000e+00 : f32
    %192 = vector.broadcast %cst_133 : f32 to vector<1x128xf32>
    %c7_134 = arith.constant 7 : index
    %c384_135 = arith.constant 384 : index
    %193 = vector.load %arg22[%c7_134, %c384_135] : memref<16x896xf32, #tpu.memory_space<vmem>>, vector<1x128xf32>
    tpu.vector_store %arg22[%c7_134, %c384_135], %192 {strides = array<i32>} : memref<16x896xf32, #tpu.memory_space<vmem>>, vector<1x128xf32>,
    %194 = vector.extract_strided_slice %182 {offsets = [1, 0], sizes = [7, 128], strides = [1, 1]} : vector<8x128xf32> to vector<7x128xf32>
    %c0_136 = arith.constant 0 : index
    %c384_137 = arith.constant 384 : index
    %195 = vector.load %arg22[%c0_136, %c384_137] : memref<16x896xf32, #tpu.memory_space<vmem>>, vector<7x128xf32>
    tpu.vector_store %arg22[%c0_136, %c384_137], %194 {strides = array<i32>} : memref<16x896xf32, #tpu.memory_space<vmem>>, vector<7x128xf32>,
    %cst_138 = arith.constant 0.000000e+00 : f32
    %196 = vector.broadcast %cst_138 : f32 to vector<2x128xf32>
    %c6_139 = arith.constant 6 : index
    %c512_140 = arith.constant 512 : index
    %197 = vector.load %arg22[%c6_139, %c512_140] : memref<16x896xf32, #tpu.memory_space<vmem>>, vector<2x128xf32>
    tpu.vector_store %arg22[%c6_139, %c512_140], %196 {strides = array<i32>} : memref<16x896xf32, #tpu.memory_space<vmem>>, vector<2x128xf32>,
    %198 = vector.extract_strided_slice %182 {offsets = [2, 0], sizes = [6, 128], strides = [1, 1]} : vector<8x128xf32> to vector<6x128xf32>
    %c0_141 = arith.constant 0 : index
    %c512_142 = arith.constant 512 : index
    %199 = vector.load %arg22[%c0_141, %c512_142] : memref<16x896xf32, #tpu.memory_space<vmem>>, vector<6x128xf32>
    tpu.vector_store %arg22[%c0_141, %c512_142], %198 {strides = array<i32>} : memref<16x896xf32, #tpu.memory_space<vmem>>, vector<6x128xf32>,
    %c0_143 = arith.constant 0 : index
    %c0_144 = arith.constant 0 : index
    %200 = vector.load %arg22[%c0_143, %c0_144] : memref<16x896xf32, #tpu.memory_space<vmem>>, vector<8x640xf32>
    %c0_145 = arith.constant 0 : index
    %c0_146 = arith.constant 0 : index
    %201 = vector.load %arg8[%c0_145, %c0_146] : memref<640x128xf32, #tpu.memory_space<vmem>>, vector<640x128xf32>
    %cst_147 = arith.constant dense<0.000000e+00> : vector<8x128xf32>
    %202 = tpu.matmul %200, %201, %cst_147 {dimension_numbers = #tpu.dot_dimension_numbers<[1], [0], [0], [1], [0, 0, 1, 1], [], []>} : vector<8x640xf32>, vector<640x128xf32>, vector<8x128xf32> -> vector<8x128xf32>
    %c9 = arith.constant 9 : index
    %c0_148 = arith.constant 0 : index
    %203 = vector.load %arg20[%c9, %c0_148] : memref<43x128xf32, #tpu.memory_space<vmem>>, vector<3x128xf32>
    %204 = vector.extract_strided_slice %203 {offsets = [0, 0], sizes = [1, 128], strides = [1, 1]} : vector<3x128xf32> to vector<1x128xf32>
    %205 = vector.broadcast %204 : vector<1x128xf32> to vector<8x128xf32>
    %206 = arith.addf %202, %205 : vector<8x128xf32>
    %cst_149 = arith.constant 0.000000e+00 : f32
    %207 = vector.broadcast %cst_149 : f32 to vector<8x128xf32>
    %208 = arith.maximumf %206, %207 : vector<8x128xf32>
    %209 = vector.shape_cast %208 : vector<8x128xf32> to vector<1x8x128xf32>
    %cst_150 = arith.constant dense<0.000000e+00> : vector<1xf32>
    %210 = vector.multi_reduction <add>, %209, %cst_150 [1, 2] : vector<1x8x128xf32> to vector<1xf32>
    %211 = vector.shape_cast %210 : vector<1xf32> to vector<1x1x1xf32>
    %212 = vector.extract %211[0, 0, 0] : f32 from vector<1x1x1xf32>
    %213 = arith.mulf %208, %208 : vector<8x128xf32>
    %214 = vector.shape_cast %213 : vector<8x128xf32> to vector<1x8x128xf32>
    %cst_151 = arith.constant dense<0.000000e+00> : vector<1xf32>
    %215 = vector.multi_reduction <add>, %214, %cst_151 [1, 2] : vector<1x8x128xf32> to vector<1xf32>
    %216 = vector.shape_cast %215 : vector<1xf32> to vector<1x1x1xf32>
    %217 = vector.extract %216[0, 0, 0] : f32 from vector<1x1x1xf32>
    %cst_152 = arith.constant 9.765625E-4 : f32
    %218 = arith.mulf %212, %cst_152 : f32
    %cst_153 = arith.constant 9.765625E-4 : f32
    %219 = arith.mulf %217, %cst_153 : f32
    %220 = arith.mulf %218, %218 : f32
    %221 = arith.subf %219, %220 : f32
    %cst_154 = arith.constant 0.000000e+00 : f32
    %222 = arith.maximumf %221, %cst_154 : f32
    %223 = vector.extract_strided_slice %203 {offsets = [1, 0], sizes = [1, 128], strides = [1, 1]} : vector<3x128xf32> to vector<1x128xf32>
    %cst_155 = arith.constant 9.99999974E-6 : f32
    %224 = arith.addf %222, %cst_155 : f32
    %225 = math.rsqrt %224 : f32
    %226 = vector.broadcast %225 : f32 to vector<1x128xf32>
    %227 = arith.mulf %223, %226 : vector<1x128xf32>
    %228 = vector.extract_strided_slice %203 {offsets = [2, 0], sizes = [1, 128], strides = [1, 1]} : vector<3x128xf32> to vector<1x128xf32>
    %229 = vector.broadcast %218 : f32 to vector<1x128xf32>
    %230 = arith.mulf %229, %227 : vector<1x128xf32>
    %231 = arith.subf %228, %230 : vector<1x128xf32>
    %232 = vector.broadcast %227 : vector<1x128xf32> to vector<8x128xf32>
    %233 = arith.mulf %208, %232 : vector<8x128xf32>
    %234 = vector.broadcast %231 : vector<1x128xf32> to vector<8x128xf32>
    %235 = arith.addf %233, %234 : vector<8x128xf32>
    %c1_156 = arith.constant 1 : index
    %c0_157 = arith.constant 0 : index
    %c0_158 = arith.constant 0 : index
    %236 = vector.load %arg3[%c1_156, %c0_157, %c0_158] : memref<3x128x64xf32, #tpu.memory_space<vmem>>, vector<1x128x64xf32>
    %237 = vector.shape_cast %236 : vector<1x128x64xf32> to vector<128x64xf32>
    %cst_159 = arith.constant dense<0.000000e+00> : vector<8x64xf32>
    %238 = tpu.matmul %235, %237, %cst_159 {dimension_numbers = #tpu.dot_dimension_numbers<[1], [0], [0], [1], [0, 0, 1, 1], [], []>} : vector<8x128xf32>, vector<128x64xf32>, vector<8x64xf32> -> vector<8x64xf32>
    %c1_160 = arith.constant 1 : index
    %c0_161 = arith.constant 0 : index
    %c0_162 = arith.constant 0 : index
    %239 = vector.load %arg4[%c1_160, %c0_161, %c0_162] : memref<3x8x16xf32, #tpu.memory_space<vmem>>, vector<1x4x8xf32>
    %240 = vector.shape_cast %239 : vector<1x4x8xf32> to vector<4x8xf32>
    %cst_163 = arith.constant dense<0.000000e+00> : vector<4x64xf32>
    %241 = tpu.matmul %240, %238, %cst_163 {dimension_numbers = #tpu.dot_dimension_numbers<[1], [0], [0], [1], [0, 0, 1, 1], [], []>} : vector<4x8xf32>, vector<8x64xf32>, vector<4x64xf32> -> vector<4x64xf32>
    %cst_164 = arith.constant 0.000000e+00 : f32
    %242 = vector.broadcast %cst_164 : f32 to vector<1x64xf32>
    %c0_165 = arith.constant 0 : index
    %c0_166 = arith.constant 0 : index
    %243 = vector.load %arg22[%c0_165, %c0_166] : memref<16x896xf32, #tpu.memory_space<vmem>>, vector<1x64xf32>
    tpu.vector_store %arg22[%c0_165, %c0_166], %242 {strides = array<i32>} : memref<16x896xf32, #tpu.memory_space<vmem>>, vector<1x64xf32>,
    %244 = vector.extract_strided_slice %241 {offsets = [0, 0], sizes = [3, 64], strides = [1, 1]} : vector<4x64xf32> to vector<3x64xf32>
    %c1_167 = arith.constant 1 : index
    %c0_168 = arith.constant 0 : index
    %245 = vector.load %arg22[%c1_167, %c0_168] : memref<16x896xf32, #tpu.memory_space<vmem>>, vector<3x64xf32>
    tpu.vector_store %arg22[%c1_167, %c0_168], %244 {strides = array<i32>} : memref<16x896xf32, #tpu.memory_space<vmem>>, vector<3x64xf32>,
    %c0_169 = arith.constant 0 : index
    %c64_170 = arith.constant 64 : index
    %246 = vector.load %arg22[%c0_169, %c64_170] : memref<16x896xf32, #tpu.memory_space<vmem>>, vector<4x64xf32>
    tpu.vector_store %arg22[%c0_169, %c64_170], %241 {strides = array<i32>} : memref<16x896xf32, #tpu.memory_space<vmem>>, vector<4x64xf32>,
    %cst_171 = arith.constant 0.000000e+00 : f32
    %247 = vector.broadcast %cst_171 : f32 to vector<1x64xf32>
    %c3_172 = arith.constant 3 : index
    %c128_173 = arith.constant 128 : index
    %248 = vector.load %arg22[%c3_172, %c128_173] : memref<16x896xf32, #tpu.memory_space<vmem>>, vector<1x64xf32>
    tpu.vector_store %arg22[%c3_172, %c128_173], %247 {strides = array<i32>} : memref<16x896xf32, #tpu.memory_space<vmem>>, vector<1x64xf32>,
    %249 = vector.extract_strided_slice %241 {offsets = [1, 0], sizes = [3, 64], strides = [1, 1]} : vector<4x64xf32> to vector<3x64xf32>
    %c0_174 = arith.constant 0 : index
    %c128_175 = arith.constant 128 : index
    %250 = vector.load %arg22[%c0_174, %c128_175] : memref<16x896xf32, #tpu.memory_space<vmem>>, vector<3x64xf32>
    tpu.vector_store %arg22[%c0_174, %c128_175], %249 {strides = array<i32>} : memref<16x896xf32, #tpu.memory_space<vmem>>, vector<3x64xf32>,
    %c0_176 = arith.constant 0 : index
    %c0_177 = arith.constant 0 : index
    %251 = vector.load %arg22[%c0_176, %c0_177] : memref<16x896xf32, #tpu.memory_space<vmem>>, vector<4x192xf32>
    %c0_178 = arith.constant 0 : index
    %c0_179 = arith.constant 0 : index
    %252 = vector.load %arg9[%c0_178, %c0_179] : memref<192x128xf32, #tpu.memory_space<vmem>>, vector<192x128xf32>
    %cst_180 = arith.constant dense<0.000000e+00> : vector<4x128xf32>
    %253 = tpu.matmul %251, %252, %cst_180 {dimension_numbers = #tpu.dot_dimension_numbers<[1], [0], [0], [1], [0, 0, 1, 1], [], []>} : vector<4x192xf32>, vector<192x128xf32>, vector<4x128xf32> -> vector<4x128xf32>
    %c12 = arith.constant 12 : index
    %c0_181 = arith.constant 0 : index
    %254 = vector.load %arg20[%c12, %c0_181] : memref<43x128xf32, #tpu.memory_space<vmem>>, vector<3x128xf32>
    %255 = vector.extract_strided_slice %254 {offsets = [0, 0], sizes = [1, 128], strides = [1, 1]} : vector<3x128xf32> to vector<1x128xf32>
    %256 = vector.broadcast %255 : vector<1x128xf32> to vector<4x128xf32>
    %257 = arith.addf %253, %256 : vector<4x128xf32>
    %cst_182 = arith.constant 0.000000e+00 : f32
    %258 = vector.broadcast %cst_182 : f32 to vector<4x128xf32>
    %259 = arith.maximumf %257, %258 : vector<4x128xf32>
    %260 = vector.shape_cast %259 : vector<4x128xf32> to vector<1x4x128xf32>
    %cst_183 = arith.constant dense<0.000000e+00> : vector<1xf32>
    %261 = vector.multi_reduction <add>, %260, %cst_183 [1, 2] : vector<1x4x128xf32> to vector<1xf32>
    %262 = vector.shape_cast %261 : vector<1xf32> to vector<1x1x1xf32>
    %263 = vector.extract %262[0, 0, 0] : f32 from vector<1x1x1xf32>
    %264 = arith.mulf %259, %259 : vector<4x128xf32>
    %265 = vector.shape_cast %264 : vector<4x128xf32> to vector<1x4x128xf32>
    %cst_184 = arith.constant dense<0.000000e+00> : vector<1xf32>
    %266 = vector.multi_reduction <add>, %265, %cst_184 [1, 2] : vector<1x4x128xf32> to vector<1xf32>
    %267 = vector.shape_cast %266 : vector<1xf32> to vector<1x1x1xf32>
    %268 = vector.extract %267[0, 0, 0] : f32 from vector<1x1x1xf32>
    %cst_185 = arith.constant 0.001953125 : f32
    %269 = arith.mulf %263, %cst_185 : f32
    %cst_186 = arith.constant 0.001953125 : f32
    %270 = arith.mulf %268, %cst_186 : f32
    %271 = arith.mulf %269, %269 : f32
    %272 = arith.subf %270, %271 : f32
    %cst_187 = arith.constant 0.000000e+00 : f32
    %273 = arith.maximumf %272, %cst_187 : f32
    %274 = vector.extract_strided_slice %254 {offsets = [1, 0], sizes = [1, 128], strides = [1, 1]} : vector<3x128xf32> to vector<1x128xf32>
    %cst_188 = arith.constant 9.99999974E-6 : f32
    %275 = arith.addf %273, %cst_188 : f32
    %276 = math.rsqrt %275 : f32
    %277 = vector.broadcast %276 : f32 to vector<1x128xf32>
    %278 = arith.mulf %274, %277 : vector<1x128xf32>
    %279 = vector.extract_strided_slice %254 {offsets = [2, 0], sizes = [1, 128], strides = [1, 1]} : vector<3x128xf32> to vector<1x128xf32>
    %280 = vector.broadcast %269 : f32 to vector<1x128xf32>
    %281 = arith.mulf %280, %278 : vector<1x128xf32>
    %282 = arith.subf %279, %281 : vector<1x128xf32>
    %283 = vector.broadcast %278 : vector<1x128xf32> to vector<4x128xf32>
    %284 = arith.mulf %259, %283 : vector<4x128xf32>
    %285 = vector.broadcast %282 : vector<1x128xf32> to vector<4x128xf32>
    %286 = arith.addf %284, %285 : vector<4x128xf32>
    %cst_189 = arith.constant 0.000000e+00 : f32
    %287 = vector.broadcast %cst_189 : f32 to vector<1x128xf32>
    %c0_190 = arith.constant 0 : index
    %c0_191 = arith.constant 0 : index
    %288 = vector.load %arg22[%c0_190, %c0_191] : memref<16x896xf32, #tpu.memory_space<vmem>>, vector<1x128xf32>
    tpu.vector_store %arg22[%c0_190, %c0_191], %287 {strides = array<i32>} : memref<16x896xf32, #tpu.memory_space<vmem>>, vector<1x128xf32>,
    %289 = vector.extract_strided_slice %286 {offsets = [0, 0], sizes = [3, 128], strides = [1, 1]} : vector<4x128xf32> to vector<3x128xf32>
    %c1_192 = arith.constant 1 : index
    %c0_193 = arith.constant 0 : index
    %290 = vector.load %arg22[%c1_192, %c0_193] : memref<16x896xf32, #tpu.memory_space<vmem>>, vector<3x128xf32>
    tpu.vector_store %arg22[%c1_192, %c0_193], %289 {strides = array<i32>} : memref<16x896xf32, #tpu.memory_space<vmem>>, vector<3x128xf32>,
    %c0_194 = arith.constant 0 : index
    %c128_195 = arith.constant 128 : index
    %291 = vector.load %arg22[%c0_194, %c128_195] : memref<16x896xf32, #tpu.memory_space<vmem>>, vector<4x128xf32>
    tpu.vector_store %arg22[%c0_194, %c128_195], %286 {strides = array<i32>} : memref<16x896xf32, #tpu.memory_space<vmem>>, vector<4x128xf32>,
    %cst_196 = arith.constant 0.000000e+00 : f32
    %292 = vector.broadcast %cst_196 : f32 to vector<1x128xf32>
    %c3_197 = arith.constant 3 : index
    %c256_198 = arith.constant 256 : index
    %293 = vector.load %arg22[%c3_197, %c256_198] : memref<16x896xf32, #tpu.memory_space<vmem>>, vector<1x128xf32>
    tpu.vector_store %arg22[%c3_197, %c256_198], %292 {strides = array<i32>} : memref<16x896xf32, #tpu.memory_space<vmem>>, vector<1x128xf32>,
    %294 = vector.extract_strided_slice %286 {offsets = [1, 0], sizes = [3, 128], strides = [1, 1]} : vector<4x128xf32> to vector<3x128xf32>
    %c0_199 = arith.constant 0 : index
    %c256_200 = arith.constant 256 : index
    %295 = vector.load %arg22[%c0_199, %c256_200] : memref<16x896xf32, #tpu.memory_space<vmem>>, vector<3x128xf32>
    tpu.vector_store %arg22[%c0_199, %c256_200], %294 {strides = array<i32>} : memref<16x896xf32, #tpu.memory_space<vmem>>, vector<3x128xf32>,
    %c0_201 = arith.constant 0 : index
    %c0_202 = arith.constant 0 : index
    %296 = vector.load %arg22[%c0_201, %c0_202] : memref<16x896xf32, #tpu.memory_space<vmem>>, vector<4x384xf32>
    %c0_203 = arith.constant 0 : index
    %c0_204 = arith.constant 0 : index
    %297 = vector.load %arg10[%c0_203, %c0_204] : memref<384x128xf32, #tpu.memory_space<vmem>>, vector<384x128xf32>
    %cst_205 = arith.constant dense<0.000000e+00> : vector<4x128xf32>
    %298 = tpu.matmul %296, %297, %cst_205 {dimension_numbers = #tpu.dot_dimension_numbers<[1], [0], [0], [1], [0, 0, 1, 1], [], []>} : vector<4x384xf32>, vector<384x128xf32>, vector<4x128xf32> -> vector<4x128xf32>
    %c15_206 = arith.constant 15 : index
    %c0_207 = arith.constant 0 : index
    %299 = vector.load %arg20[%c15_206, %c0_207] : memref<43x128xf32, #tpu.memory_space<vmem>>, vector<3x128xf32>
    %300 = vector.extract_strided_slice %299 {offsets = [0, 0], sizes = [1, 128], strides = [1, 1]} : vector<3x128xf32> to vector<1x128xf32>
    %301 = vector.broadcast %300 : vector<1x128xf32> to vector<4x128xf32>
    %302 = arith.addf %298, %301 : vector<4x128xf32>
    %cst_208 = arith.constant 0.000000e+00 : f32
    %303 = vector.broadcast %cst_208 : f32 to vector<4x128xf32>
    %304 = arith.maximumf %302, %303 : vector<4x128xf32>
    %305 = vector.shape_cast %304 : vector<4x128xf32> to vector<1x4x128xf32>
    %cst_209 = arith.constant dense<0.000000e+00> : vector<1xf32>
    %306 = vector.multi_reduction <add>, %305, %cst_209 [1, 2] : vector<1x4x128xf32> to vector<1xf32>
    %307 = vector.shape_cast %306 : vector<1xf32> to vector<1x1x1xf32>
    %308 = vector.extract %307[0, 0, 0] : f32 from vector<1x1x1xf32>
    %309 = arith.mulf %304, %304 : vector<4x128xf32>
    %310 = vector.shape_cast %309 : vector<4x128xf32> to vector<1x4x128xf32>
    %cst_210 = arith.constant dense<0.000000e+00> : vector<1xf32>
    %311 = vector.multi_reduction <add>, %310, %cst_210 [1, 2] : vector<1x4x128xf32> to vector<1xf32>
    %312 = vector.shape_cast %311 : vector<1xf32> to vector<1x1x1xf32>
    %313 = vector.extract %312[0, 0, 0] : f32 from vector<1x1x1xf32>
    %cst_211 = arith.constant 0.001953125 : f32
    %314 = arith.mulf %308, %cst_211 : f32
    %cst_212 = arith.constant 0.001953125 : f32
    %315 = arith.mulf %313, %cst_212 : f32
    %316 = arith.mulf %314, %314 : f32
    %317 = arith.subf %315, %316 : f32
    %cst_213 = arith.constant 0.000000e+00 : f32
    %318 = arith.maximumf %317, %cst_213 : f32
    %319 = vector.extract_strided_slice %299 {offsets = [1, 0], sizes = [1, 128], strides = [1, 1]} : vector<3x128xf32> to vector<1x128xf32>
    %cst_214 = arith.constant 9.99999974E-6 : f32
    %320 = arith.addf %318, %cst_214 : f32
    %321 = math.rsqrt %320 : f32
    %322 = vector.broadcast %321 : f32 to vector<1x128xf32>
    %323 = arith.mulf %319, %322 : vector<1x128xf32>
    %324 = vector.extract_strided_slice %299 {offsets = [2, 0], sizes = [1, 128], strides = [1, 1]} : vector<3x128xf32> to vector<1x128xf32>
    %325 = vector.broadcast %314 : f32 to vector<1x128xf32>
    %326 = arith.mulf %325, %323 : vector<1x128xf32>
    %327 = arith.subf %324, %326 : vector<1x128xf32>
    %328 = vector.broadcast %323 : vector<1x128xf32> to vector<4x128xf32>
    %329 = arith.mulf %304, %328 : vector<4x128xf32>
    %330 = vector.broadcast %327 : vector<1x128xf32> to vector<4x128xf32>
    %331 = arith.addf %329, %330 : vector<4x128xf32>
    %c2_215 = arith.constant 2 : index
    %c0_216 = arith.constant 0 : index
    %c0_217 = arith.constant 0 : index
    %332 = vector.load %arg3[%c2_215, %c0_216, %c0_217] : memref<3x128x64xf32, #tpu.memory_space<vmem>>, vector<1x128x64xf32>
    %333 = vector.shape_cast %332 : vector<1x128x64xf32> to vector<128x64xf32>
    %cst_218 = arith.constant dense<0.000000e+00> : vector<4x64xf32>
    %334 = tpu.matmul %331, %333, %cst_218 {dimension_numbers = #tpu.dot_dimension_numbers<[1], [0], [0], [1], [0, 0, 1, 1], [], []>} : vector<4x128xf32>, vector<128x64xf32>, vector<4x64xf32> -> vector<4x64xf32>
    %c2_219 = arith.constant 2 : index
    %c0_220 = arith.constant 0 : index
    %c0_221 = arith.constant 0 : index
    %335 = vector.load %arg4[%c2_219, %c0_220, %c0_221] : memref<3x8x16xf32, #tpu.memory_space<vmem>>, vector<1x2x4xf32>
    %336 = vector.shape_cast %335 : vector<1x2x4xf32> to vector<2x4xf32>
    %cst_222 = arith.constant dense<0.000000e+00> : vector<2x64xf32>
    %337 = tpu.matmul %336, %334, %cst_222 {dimension_numbers = #tpu.dot_dimension_numbers<[1], [0], [0], [1], [0, 0, 1, 1], [], []>} : vector<2x4xf32>, vector<4x64xf32>, vector<2x64xf32> -> vector<2x64xf32>
    %cst_223 = arith.constant 0.000000e+00 : f32
    %338 = vector.broadcast %cst_223 : f32 to vector<1x64xf32>
    %c0_224 = arith.constant 0 : index
    %c0_225 = arith.constant 0 : index
    %339 = vector.load %arg22[%c0_224, %c0_225] : memref<16x896xf32, #tpu.memory_space<vmem>>, vector<1x64xf32>
    tpu.vector_store %arg22[%c0_224, %c0_225], %338 {strides = array<i32>} : memref<16x896xf32, #tpu.memory_space<vmem>>, vector<1x64xf32>,
    %340 = vector.extract_strided_slice %337 {offsets = [0, 0], sizes = [1, 64], strides = [1, 1]} : vector<2x64xf32> to vector<1x64xf32>
    %c1_226 = arith.constant 1 : index
    %c0_227 = arith.constant 0 : index
    %341 = vector.load %arg22[%c1_226, %c0_227] : memref<16x896xf32, #tpu.memory_space<vmem>>, vector<1x64xf32>
    tpu.vector_store %arg22[%c1_226, %c0_227], %340 {strides = array<i32>} : memref<16x896xf32, #tpu.memory_space<vmem>>, vector<1x64xf32>,
    %c0_228 = arith.constant 0 : index
    %c64_229 = arith.constant 64 : index
    %342 = vector.load %arg22[%c0_228, %c64_229] : memref<16x896xf32, #tpu.memory_space<vmem>>, vector<2x64xf32>
    tpu.vector_store %arg22[%c0_228, %c64_229], %337 {strides = array<i32>} : memref<16x896xf32, #tpu.memory_space<vmem>>, vector<2x64xf32>,
    %cst_230 = arith.constant 0.000000e+00 : f32
    %343 = vector.broadcast %cst_230 : f32 to vector<1x64xf32>
    %c1_231 = arith.constant 1 : index
    %c128_232 = arith.constant 128 : index
    %344 = vector.load %arg22[%c1_231, %c128_232] : memref<16x896xf32, #tpu.memory_space<vmem>>, vector<1x64xf32>
    tpu.vector_store %arg22[%c1_231, %c128_232], %343 {strides = array<i32>} : memref<16x896xf32, #tpu.memory_space<vmem>>, vector<1x64xf32>,
    %345 = vector.extract_strided_slice %337 {offsets = [1, 0], sizes = [1, 64], strides = [1, 1]} : vector<2x64xf32> to vector<1x64xf32>
    %c0_233 = arith.constant 0 : index
    %c128_234 = arith.constant 128 : index
    %346 = vector.load %arg22[%c0_233, %c128_234] : memref<16x896xf32, #tpu.memory_space<vmem>>, vector<1x64xf32>
    tpu.vector_store %arg22[%c0_233, %c128_234], %345 {strides = array<i32>} : memref<16x896xf32, #tpu.memory_space<vmem>>, vector<1x64xf32>,
    %c0_235 = arith.constant 0 : index
    %c0_236 = arith.constant 0 : index
    %347 = vector.load %arg22[%c0_235, %c0_236] : memref<16x896xf32, #tpu.memory_space<vmem>>, vector<2x192xf32>
    %c0_237 = arith.constant 0 : index
    %c0_238 = arith.constant 0 : index
    %348 = vector.load %arg11[%c0_237, %c0_238] : memref<192x64xf32, #tpu.memory_space<vmem>>, vector<192x64xf32>
    %cst_239 = arith.constant dense<0.000000e+00> : vector<2x64xf32>
    %349 = tpu.matmul %347, %348, %cst_239 {dimension_numbers = #tpu.dot_dimension_numbers<[1], [0], [0], [1], [0, 0, 1, 1], [], []>} : vector<2x192xf32>, vector<192x64xf32>, vector<2x64xf32> -> vector<2x64xf32>
    %c18 = arith.constant 18 : index
    %c0_240 = arith.constant 0 : index
    %350 = vector.load %arg20[%c18, %c0_240] : memref<43x128xf32, #tpu.memory_space<vmem>>, vector<3x64xf32>
    %351 = vector.extract_strided_slice %350 {offsets = [0, 0], sizes = [1, 64], strides = [1, 1]} : vector<3x64xf32> to vector<1x64xf32>
    %352 = vector.broadcast %351 : vector<1x64xf32> to vector<2x64xf32>
    %353 = arith.addf %349, %352 : vector<2x64xf32>
    %cst_241 = arith.constant 0.000000e+00 : f32
    %354 = vector.broadcast %cst_241 : f32 to vector<2x64xf32>
    %355 = arith.maximumf %353, %354 : vector<2x64xf32>
    %356 = vector.shape_cast %355 : vector<2x64xf32> to vector<1x2x64xf32>
    %cst_242 = arith.constant dense<0.000000e+00> : vector<1xf32>
    %357 = vector.multi_reduction <add>, %356, %cst_242 [1, 2] : vector<1x2x64xf32> to vector<1xf32>
    %358 = vector.shape_cast %357 : vector<1xf32> to vector<1x1x1xf32>
    %359 = vector.extract %358[0, 0, 0] : f32 from vector<1x1x1xf32>
    %360 = arith.mulf %355, %355 : vector<2x64xf32>
    %361 = vector.shape_cast %360 : vector<2x64xf32> to vector<1x2x64xf32>
    %cst_243 = arith.constant dense<0.000000e+00> : vector<1xf32>
    %362 = vector.multi_reduction <add>, %361, %cst_243 [1, 2] : vector<1x2x64xf32> to vector<1xf32>
    %363 = vector.shape_cast %362 : vector<1xf32> to vector<1x1x1xf32>
    %364 = vector.extract %363[0, 0, 0] : f32 from vector<1x1x1xf32>
    %cst_244 = arith.constant 7.812500e-03 : f32
    %365 = arith.mulf %359, %cst_244 : f32
    %cst_245 = arith.constant 7.812500e-03 : f32
    %366 = arith.mulf %364, %cst_245 : f32
    %367 = arith.mulf %365, %365 : f32
    %368 = arith.subf %366, %367 : f32
    %cst_246 = arith.constant 0.000000e+00 : f32
    %369 = arith.maximumf %368, %cst_246 : f32
    %370 = vector.extract_strided_slice %350 {offsets = [1, 0], sizes = [1, 64], strides = [1, 1]} : vector<3x64xf32> to vector<1x64xf32>
    %cst_247 = arith.constant 9.99999974E-6 : f32
    %371 = arith.addf %369, %cst_247 : f32
    %372 = math.rsqrt %371 : f32
    %373 = vector.broadcast %372 : f32 to vector<1x64xf32>
    %374 = arith.mulf %370, %373 : vector<1x64xf32>
    %375 = vector.extract_strided_slice %350 {offsets = [2, 0], sizes = [1, 64], strides = [1, 1]} : vector<3x64xf32> to vector<1x64xf32>
    %376 = vector.broadcast %365 : f32 to vector<1x64xf32>
    %377 = arith.mulf %376, %374 : vector<1x64xf32>
    %378 = arith.subf %375, %377 : vector<1x64xf32>
    %379 = vector.broadcast %374 : vector<1x64xf32> to vector<2x64xf32>
    %380 = arith.mulf %355, %379 : vector<2x64xf32>
    %381 = vector.broadcast %378 : vector<1x64xf32> to vector<2x64xf32>
    %382 = arith.addf %380, %381 : vector<2x64xf32>
    %cst_248 = arith.constant 0.000000e+00 : f32
    %383 = vector.broadcast %cst_248 : f32 to vector<1x64xf32>
    %c0_249 = arith.constant 0 : index
    %c0_250 = arith.constant 0 : index
    %384 = vector.load %arg22[%c0_249, %c0_250] : memref<16x896xf32, #tpu.memory_space<vmem>>, vector<1x64xf32>
    tpu.vector_store %arg22[%c0_249, %c0_250], %383 {strides = array<i32>} : memref<16x896xf32, #tpu.memory_space<vmem>>, vector<1x64xf32>,
    %385 = vector.extract_strided_slice %382 {offsets = [0, 0], sizes = [1, 64], strides = [1, 1]} : vector<2x64xf32> to vector<1x64xf32>
    %c1_251 = arith.constant 1 : index
    %c0_252 = arith.constant 0 : index
    %386 = vector.load %arg22[%c1_251, %c0_252] : memref<16x896xf32, #tpu.memory_space<vmem>>, vector<1x64xf32>
    tpu.vector_store %arg22[%c1_251, %c0_252], %385 {strides = array<i32>} : memref<16x896xf32, #tpu.memory_space<vmem>>, vector<1x64xf32>,
    %c0_253 = arith.constant 0 : index
    %c64_254 = arith.constant 64 : index
    %387 = vector.load %arg22[%c0_253, %c64_254] : memref<16x896xf32, #tpu.memory_space<vmem>>, vector<2x64xf32>
    tpu.vector_store %arg22[%c0_253, %c64_254], %382 {strides = array<i32>} : memref<16x896xf32, #tpu.memory_space<vmem>>, vector<2x64xf32>,
    %cst_255 = arith.constant 0.000000e+00 : f32
    %388 = vector.broadcast %cst_255 : f32 to vector<1x64xf32>
    %c1_256 = arith.constant 1 : index
    %c128_257 = arith.constant 128 : index
    %389 = vector.load %arg22[%c1_256, %c128_257] : memref<16x896xf32, #tpu.memory_space<vmem>>, vector<1x64xf32>
    tpu.vector_store %arg22[%c1_256, %c128_257], %388 {strides = array<i32>} : memref<16x896xf32, #tpu.memory_space<vmem>>, vector<1x64xf32>,
    %390 = vector.extract_strided_slice %382 {offsets = [1, 0], sizes = [1, 64], strides = [1, 1]} : vector<2x64xf32> to vector<1x64xf32>
    %c0_258 = arith.constant 0 : index
    %c128_259 = arith.constant 128 : index
    %391 = vector.load %arg22[%c0_258, %c128_259] : memref<16x896xf32, #tpu.memory_space<vmem>>, vector<1x64xf32>
    tpu.vector_store %arg22[%c0_258, %c128_259], %390 {strides = array<i32>} : memref<16x896xf32, #tpu.memory_space<vmem>>, vector<1x64xf32>,
    %c0_260 = arith.constant 0 : index
    %c0_261 = arith.constant 0 : index
    %392 = vector.load %arg22[%c0_260, %c0_261] : memref<16x896xf32, #tpu.memory_space<vmem>>, vector<2x192xf32>
    %c0_262 = arith.constant 0 : index
    %c0_263 = arith.constant 0 : index
    %393 = vector.load %arg12[%c0_262, %c0_263] : memref<192x64xf32, #tpu.memory_space<vmem>>, vector<192x64xf32>
    %cst_264 = arith.constant dense<0.000000e+00> : vector<2x64xf32>
    %394 = tpu.matmul %392, %393, %cst_264 {dimension_numbers = #tpu.dot_dimension_numbers<[1], [0], [0], [1], [0, 0, 1, 1], [], []>} : vector<2x192xf32>, vector<192x64xf32>, vector<2x64xf32> -> vector<2x64xf32>
    %c21 = arith.constant 21 : index
    %c0_265 = arith.constant 0 : index
    %395 = vector.load %arg20[%c21, %c0_265] : memref<43x128xf32, #tpu.memory_space<vmem>>, vector<3x64xf32>
    %396 = vector.extract_strided_slice %395 {offsets = [0, 0], sizes = [1, 64], strides = [1, 1]} : vector<3x64xf32> to vector<1x64xf32>
    %397 = vector.broadcast %396 : vector<1x64xf32> to vector<2x64xf32>
    %398 = arith.addf %394, %397 : vector<2x64xf32>
    %cst_266 = arith.constant 0.000000e+00 : f32
    %399 = vector.broadcast %cst_266 : f32 to vector<2x64xf32>
    %400 = arith.maximumf %398, %399 : vector<2x64xf32>
    %401 = vector.shape_cast %400 : vector<2x64xf32> to vector<1x2x64xf32>
    %cst_267 = arith.constant dense<0.000000e+00> : vector<1xf32>
    %402 = vector.multi_reduction <add>, %401, %cst_267 [1, 2] : vector<1x2x64xf32> to vector<1xf32>
    %403 = vector.shape_cast %402 : vector<1xf32> to vector<1x1x1xf32>
    %404 = vector.extract %403[0, 0, 0] : f32 from vector<1x1x1xf32>
    %405 = arith.mulf %400, %400 : vector<2x64xf32>
    %406 = vector.shape_cast %405 : vector<2x64xf32> to vector<1x2x64xf32>
    %cst_268 = arith.constant dense<0.000000e+00> : vector<1xf32>
    %407 = vector.multi_reduction <add>, %406, %cst_268 [1, 2] : vector<1x2x64xf32> to vector<1xf32>
    %408 = vector.shape_cast %407 : vector<1xf32> to vector<1x1x1xf32>
    %409 = vector.extract %408[0, 0, 0] : f32 from vector<1x1x1xf32>
    %cst_269 = arith.constant 7.812500e-03 : f32
    %410 = arith.mulf %404, %cst_269 : f32
    %cst_270 = arith.constant 7.812500e-03 : f32
    %411 = arith.mulf %409, %cst_270 : f32
    %412 = arith.mulf %410, %410 : f32
    %413 = arith.subf %411, %412 : f32
    %cst_271 = arith.constant 0.000000e+00 : f32
    %414 = arith.maximumf %413, %cst_271 : f32
    %415 = vector.extract_strided_slice %395 {offsets = [1, 0], sizes = [1, 64], strides = [1, 1]} : vector<3x64xf32> to vector<1x64xf32>
    %cst_272 = arith.constant 9.99999974E-6 : f32
    %416 = arith.addf %414, %cst_272 : f32
    %417 = math.rsqrt %416 : f32
    %418 = vector.broadcast %417 : f32 to vector<1x64xf32>
    %419 = arith.mulf %415, %418 : vector<1x64xf32>
    %420 = vector.extract_strided_slice %395 {offsets = [2, 0], sizes = [1, 64], strides = [1, 1]} : vector<3x64xf32> to vector<1x64xf32>
    %421 = vector.broadcast %410 : f32 to vector<1x64xf32>
    %422 = arith.mulf %421, %419 : vector<1x64xf32>
    %423 = arith.subf %420, %422 : vector<1x64xf32>
    %424 = vector.broadcast %419 : vector<1x64xf32> to vector<2x64xf32>
    %425 = arith.mulf %400, %424 : vector<2x64xf32>
    %426 = vector.broadcast %423 : vector<1x64xf32> to vector<2x64xf32>
    %427 = arith.addf %425, %426 : vector<2x64xf32>
    %c0_273 = arith.constant 0 : index
    %c0_274 = arith.constant 0 : index
    %c0_275 = arith.constant 0 : index
    %428 = vector.load %arg2[%c0_273, %c0_274, %c0_275] : memref<3x16x8xf32, #tpu.memory_space<vmem>>, vector<1x4x2xf32>
    %429 = vector.shape_cast %428 : vector<1x4x2xf32> to vector<4x2xf32>
    %cst_276 = arith.constant dense<0.000000e+00> : vector<4x64xf32>
    %430 = tpu.matmul %429, %427, %cst_276 {dimension_numbers = #tpu.dot_dimension_numbers<[1], [0], [0], [1], [0, 0, 1, 1], [], []>} : vector<4x2xf32>, vector<2x64xf32>, vector<4x64xf32> -> vector<4x64xf32>
    %cst_277 = arith.constant 0.000000e+00 : f32
    %431 = vector.broadcast %cst_277 : f32 to vector<1x64xf32>
    %c0_278 = arith.constant 0 : index
    %c0_279 = arith.constant 0 : index
    %432 = vector.load %arg22[%c0_278, %c0_279] : memref<16x896xf32, #tpu.memory_space<vmem>>, vector<1x64xf32>
    tpu.vector_store %arg22[%c0_278, %c0_279], %431 {strides = array<i32>} : memref<16x896xf32, #tpu.memory_space<vmem>>, vector<1x64xf32>,
    %433 = vector.extract_strided_slice %430 {offsets = [0, 0], sizes = [3, 64], strides = [1, 1]} : vector<4x64xf32> to vector<3x64xf32>
    %c1_280 = arith.constant 1 : index
    %c0_281 = arith.constant 0 : index
    %434 = vector.load %arg22[%c1_280, %c0_281] : memref<16x896xf32, #tpu.memory_space<vmem>>, vector<3x64xf32>
    tpu.vector_store %arg22[%c1_280, %c0_281], %433 {strides = array<i32>} : memref<16x896xf32, #tpu.memory_space<vmem>>, vector<3x64xf32>,
    %c0_282 = arith.constant 0 : index
    %c64_283 = arith.constant 64 : index
    %435 = vector.load %arg22[%c0_282, %c64_283] : memref<16x896xf32, #tpu.memory_space<vmem>>, vector<4x64xf32>
    tpu.vector_store %arg22[%c0_282, %c64_283], %430 {strides = array<i32>} : memref<16x896xf32, #tpu.memory_space<vmem>>, vector<4x64xf32>,
    %cst_284 = arith.constant 0.000000e+00 : f32
    %436 = vector.broadcast %cst_284 : f32 to vector<1x64xf32>
    %c3_285 = arith.constant 3 : index
    %c128_286 = arith.constant 128 : index
    %437 = vector.load %arg22[%c3_285, %c128_286] : memref<16x896xf32, #tpu.memory_space<vmem>>, vector<1x64xf32>
    tpu.vector_store %arg22[%c3_285, %c128_286], %436 {strides = array<i32>} : memref<16x896xf32, #tpu.memory_space<vmem>>, vector<1x64xf32>,
    %438 = vector.extract_strided_slice %430 {offsets = [1, 0], sizes = [3, 64], strides = [1, 1]} : vector<4x64xf32> to vector<3x64xf32>
    %c0_287 = arith.constant 0 : index
    %c128_288 = arith.constant 128 : index
    %439 = vector.load %arg22[%c0_287, %c128_288] : memref<16x896xf32, #tpu.memory_space<vmem>>, vector<3x64xf32>
    tpu.vector_store %arg22[%c0_287, %c128_288], %438 {strides = array<i32>} : memref<16x896xf32, #tpu.memory_space<vmem>>, vector<3x64xf32>,
    %cst_289 = arith.constant 0.000000e+00 : f32
    %440 = vector.broadcast %cst_289 : f32 to vector<1x128xf32>
    %c0_290 = arith.constant 0 : index
    %c192_291 = arith.constant 192 : index
    %441 = vector.load %arg22[%c0_290, %c192_291] : memref<16x896xf32, #tpu.memory_space<vmem>>, vector<1x128xf32>
    tpu.vector_store %arg22[%c0_290, %c192_291], %440 {strides = array<i32>} : memref<16x896xf32, #tpu.memory_space<vmem>>, vector<1x128xf32>,
    %442 = vector.extract_strided_slice %331 {offsets = [0, 0], sizes = [3, 128], strides = [1, 1]} : vector<4x128xf32> to vector<3x128xf32>
    %c1_292 = arith.constant 1 : index
    %c192_293 = arith.constant 192 : index
    %443 = vector.load %arg22[%c1_292, %c192_293] : memref<16x896xf32, #tpu.memory_space<vmem>>, vector<3x128xf32>
    tpu.vector_store %arg22[%c1_292, %c192_293], %442 {strides = array<i32>} : memref<16x896xf32, #tpu.memory_space<vmem>>, vector<3x128xf32>,
    %c0_294 = arith.constant 0 : index
    %c320 = arith.constant 320 : index
    %444 = vector.load %arg22[%c0_294, %c320] : memref<16x896xf32, #tpu.memory_space<vmem>>, vector<4x128xf32>
    tpu.vector_store %arg22[%c0_294, %c320], %331 {strides = array<i32>} : memref<16x896xf32, #tpu.memory_space<vmem>>, vector<4x128xf32>,
    %cst_295 = arith.constant 0.000000e+00 : f32
    %445 = vector.broadcast %cst_295 : f32 to vector<1x128xf32>
    %c3_296 = arith.constant 3 : index
    %c448 = arith.constant 448 : index
    %446 = vector.load %arg22[%c3_296, %c448] : memref<16x896xf32, #tpu.memory_space<vmem>>, vector<1x128xf32>
    tpu.vector_store %arg22[%c3_296, %c448], %445 {strides = array<i32>} : memref<16x896xf32, #tpu.memory_space<vmem>>, vector<1x128xf32>,
    %447 = vector.extract_strided_slice %331 {offsets = [1, 0], sizes = [3, 128], strides = [1, 1]} : vector<4x128xf32> to vector<3x128xf32>
    %c0_297 = arith.constant 0 : index
    %c448_298 = arith.constant 448 : index
    %448 = vector.load %arg22[%c0_297, %c448_298] : memref<16x896xf32, #tpu.memory_space<vmem>>, vector<3x128xf32>
    tpu.vector_store %arg22[%c0_297, %c448_298], %447 {strides = array<i32>} : memref<16x896xf32, #tpu.memory_space<vmem>>, vector<3x128xf32>,
    %c0_299 = arith.constant 0 : index
    %c0_300 = arith.constant 0 : index
    %449 = vector.load %arg22[%c0_299, %c0_300] : memref<16x896xf32, #tpu.memory_space<vmem>>, vector<4x576xf32>
    %c0_301 = arith.constant 0 : index
    %c0_302 = arith.constant 0 : index
    %450 = vector.load %arg13[%c0_301, %c0_302] : memref<576x128xf32, #tpu.memory_space<vmem>>, vector<576x128xf32>
    %cst_303 = arith.constant dense<0.000000e+00> : vector<4x128xf32>
    %451 = tpu.matmul %449, %450, %cst_303 {dimension_numbers = #tpu.dot_dimension_numbers<[1], [0], [0], [1], [0, 0, 1, 1], [], []>} : vector<4x576xf32>, vector<576x128xf32>, vector<4x128xf32> -> vector<4x128xf32>
    %c24 = arith.constant 24 : index
    %c0_304 = arith.constant 0 : index
    %452 = vector.load %arg20[%c24, %c0_304] : memref<43x128xf32, #tpu.memory_space<vmem>>, vector<3x128xf32>
    %453 = vector.extract_strided_slice %452 {offsets = [0, 0], sizes = [1, 128], strides = [1, 1]} : vector<3x128xf32> to vector<1x128xf32>
    %454 = vector.broadcast %453 : vector<1x128xf32> to vector<4x128xf32>
    %455 = arith.addf %451, %454 : vector<4x128xf32>
    %cst_305 = arith.constant 0.000000e+00 : f32
    %456 = vector.broadcast %cst_305 : f32 to vector<4x128xf32>
    %457 = arith.maximumf %455, %456 : vector<4x128xf32>
    %458 = vector.shape_cast %457 : vector<4x128xf32> to vector<1x4x128xf32>
    %cst_306 = arith.constant dense<0.000000e+00> : vector<1xf32>
    %459 = vector.multi_reduction <add>, %458, %cst_306 [1, 2] : vector<1x4x128xf32> to vector<1xf32>
    %460 = vector.shape_cast %459 : vector<1xf32> to vector<1x1x1xf32>
    %461 = vector.extract %460[0, 0, 0] : f32 from vector<1x1x1xf32>
    %462 = arith.mulf %457, %457 : vector<4x128xf32>
    %463 = vector.shape_cast %462 : vector<4x128xf32> to vector<1x4x128xf32>
    %cst_307 = arith.constant dense<0.000000e+00> : vector<1xf32>
    %464 = vector.multi_reduction <add>, %463, %cst_307 [1, 2] : vector<1x4x128xf32> to vector<1xf32>
    %465 = vector.shape_cast %464 : vector<1xf32> to vector<1x1x1xf32>
    %466 = vector.extract %465[0, 0, 0] : f32 from vector<1x1x1xf32>
    %cst_308 = arith.constant 0.001953125 : f32
    %467 = arith.mulf %461, %cst_308 : f32
    %cst_309 = arith.constant 0.001953125 : f32
    %468 = arith.mulf %466, %cst_309 : f32
    %469 = arith.mulf %467, %467 : f32
    %470 = arith.subf %468, %469 : f32
    %cst_310 = arith.constant 0.000000e+00 : f32
    %471 = arith.maximumf %470, %cst_310 : f32
    %472 = vector.extract_strided_slice %452 {offsets = [1, 0], sizes = [1, 128], strides = [1, 1]} : vector<3x128xf32> to vector<1x128xf32>
    %cst_311 = arith.constant 9.99999974E-6 : f32
    %473 = arith.addf %471, %cst_311 : f32
    %474 = math.rsqrt %473 : f32
    %475 = vector.broadcast %474 : f32 to vector<1x128xf32>
    %476 = arith.mulf %472, %475 : vector<1x128xf32>
    %477 = vector.extract_strided_slice %452 {offsets = [2, 0], sizes = [1, 128], strides = [1, 1]} : vector<3x128xf32> to vector<1x128xf32>
    %478 = vector.broadcast %467 : f32 to vector<1x128xf32>
    %479 = arith.mulf %478, %476 : vector<1x128xf32>
    %480 = arith.subf %477, %479 : vector<1x128xf32>
    %481 = vector.broadcast %476 : vector<1x128xf32> to vector<4x128xf32>
    %482 = arith.mulf %457, %481 : vector<4x128xf32>
    %483 = vector.broadcast %480 : vector<1x128xf32> to vector<4x128xf32>
    %484 = arith.addf %482, %483 : vector<4x128xf32>
    %cst_312 = arith.constant 0.000000e+00 : f32
    %485 = vector.broadcast %cst_312 : f32 to vector<1x128xf32>
    %c0_313 = arith.constant 0 : index
    %c0_314 = arith.constant 0 : index
    %486 = vector.load %arg22[%c0_313, %c0_314] : memref<16x896xf32, #tpu.memory_space<vmem>>, vector<1x128xf32>
    tpu.vector_store %arg22[%c0_313, %c0_314], %485 {strides = array<i32>} : memref<16x896xf32, #tpu.memory_space<vmem>>, vector<1x128xf32>,
    %487 = vector.extract_strided_slice %484 {offsets = [0, 0], sizes = [3, 128], strides = [1, 1]} : vector<4x128xf32> to vector<3x128xf32>
    %c1_315 = arith.constant 1 : index
    %c0_316 = arith.constant 0 : index
    %488 = vector.load %arg22[%c1_315, %c0_316] : memref<16x896xf32, #tpu.memory_space<vmem>>, vector<3x128xf32>
    tpu.vector_store %arg22[%c1_315, %c0_316], %487 {strides = array<i32>} : memref<16x896xf32, #tpu.memory_space<vmem>>, vector<3x128xf32>,
    %c0_317 = arith.constant 0 : index
    %c128_318 = arith.constant 128 : index
    %489 = vector.load %arg22[%c0_317, %c128_318] : memref<16x896xf32, #tpu.memory_space<vmem>>, vector<4x128xf32>
    tpu.vector_store %arg22[%c0_317, %c128_318], %484 {strides = array<i32>} : memref<16x896xf32, #tpu.memory_space<vmem>>, vector<4x128xf32>,
    %cst_319 = arith.constant 0.000000e+00 : f32
    %490 = vector.broadcast %cst_319 : f32 to vector<1x128xf32>
    %c3_320 = arith.constant 3 : index
    %c256_321 = arith.constant 256 : index
    %491 = vector.load %arg22[%c3_320, %c256_321] : memref<16x896xf32, #tpu.memory_space<vmem>>, vector<1x128xf32>
    tpu.vector_store %arg22[%c3_320, %c256_321], %490 {strides = array<i32>} : memref<16x896xf32, #tpu.memory_space<vmem>>, vector<1x128xf32>,
    %492 = vector.extract_strided_slice %484 {offsets = [1, 0], sizes = [3, 128], strides = [1, 1]} : vector<4x128xf32> to vector<3x128xf32>
    %c0_322 = arith.constant 0 : index
    %c256_323 = arith.constant 256 : index
    %493 = vector.load %arg22[%c0_322, %c256_323] : memref<16x896xf32, #tpu.memory_space<vmem>>, vector<3x128xf32>
    tpu.vector_store %arg22[%c0_322, %c256_323], %492 {strides = array<i32>} : memref<16x896xf32, #tpu.memory_space<vmem>>, vector<3x128xf32>,
    %c0_324 = arith.constant 0 : index
    %c0_325 = arith.constant 0 : index
    %494 = vector.load %arg22[%c0_324, %c0_325] : memref<16x896xf32, #tpu.memory_space<vmem>>, vector<4x384xf32>
    %c0_326 = arith.constant 0 : index
    %c0_327 = arith.constant 0 : index
    %495 = vector.load %arg14[%c0_326, %c0_327] : memref<384x128xf32, #tpu.memory_space<vmem>>, vector<384x128xf32>
    %cst_328 = arith.constant dense<0.000000e+00> : vector<4x128xf32>
    %496 = tpu.matmul %494, %495, %cst_328 {dimension_numbers = #tpu.dot_dimension_numbers<[1], [0], [0], [1], [0, 0, 1, 1], [], []>} : vector<4x384xf32>, vector<384x128xf32>, vector<4x128xf32> -> vector<4x128xf32>
    %c27 = arith.constant 27 : index
    %c0_329 = arith.constant 0 : index
    %497 = vector.load %arg20[%c27, %c0_329] : memref<43x128xf32, #tpu.memory_space<vmem>>, vector<3x128xf32>
    %498 = vector.extract_strided_slice %497 {offsets = [0, 0], sizes = [1, 128], strides = [1, 1]} : vector<3x128xf32> to vector<1x128xf32>
    %499 = vector.broadcast %498 : vector<1x128xf32> to vector<4x128xf32>
    %500 = arith.addf %496, %499 : vector<4x128xf32>
    %cst_330 = arith.constant 0.000000e+00 : f32
    %501 = vector.broadcast %cst_330 : f32 to vector<4x128xf32>
    %502 = arith.maximumf %500, %501 : vector<4x128xf32>
    %503 = vector.shape_cast %502 : vector<4x128xf32> to vector<1x4x128xf32>
    %cst_331 = arith.constant dense<0.000000e+00> : vector<1xf32>
    %504 = vector.multi_reduction <add>, %503, %cst_331 [1, 2] : vector<1x4x128xf32> to vector<1xf32>
    %505 = vector.shape_cast %504 : vector<1xf32> to vector<1x1x1xf32>
    %506 = vector.extract %505[0, 0, 0] : f32 from vector<1x1x1xf32>
    %507 = arith.mulf %502, %502 : vector<4x128xf32>
    %508 = vector.shape_cast %507 : vector<4x128xf32> to vector<1x4x128xf32>
    %cst_332 = arith.constant dense<0.000000e+00> : vector<1xf32>
    %509 = vector.multi_reduction <add>, %508, %cst_332 [1, 2] : vector<1x4x128xf32> to vector<1xf32>
    %510 = vector.shape_cast %509 : vector<1xf32> to vector<1x1x1xf32>
    %511 = vector.extract %510[0, 0, 0] : f32 from vector<1x1x1xf32>
    %cst_333 = arith.constant 0.001953125 : f32
    %512 = arith.mulf %506, %cst_333 : f32
    %cst_334 = arith.constant 0.001953125 : f32
    %513 = arith.mulf %511, %cst_334 : f32
    %514 = arith.mulf %512, %512 : f32
    %515 = arith.subf %513, %514 : f32
    %cst_335 = arith.constant 0.000000e+00 : f32
    %516 = arith.maximumf %515, %cst_335 : f32
    %517 = vector.extract_strided_slice %497 {offsets = [1, 0], sizes = [1, 128], strides = [1, 1]} : vector<3x128xf32> to vector<1x128xf32>
    %cst_336 = arith.constant 9.99999974E-6 : f32
    %518 = arith.addf %516, %cst_336 : f32
    %519 = math.rsqrt %518 : f32
    %520 = vector.broadcast %519 : f32 to vector<1x128xf32>
    %521 = arith.mulf %517, %520 : vector<1x128xf32>
    %522 = vector.extract_strided_slice %497 {offsets = [2, 0], sizes = [1, 128], strides = [1, 1]} : vector<3x128xf32> to vector<1x128xf32>
    %523 = vector.broadcast %512 : f32 to vector<1x128xf32>
    %524 = arith.mulf %523, %521 : vector<1x128xf32>
    %525 = arith.subf %522, %524 : vector<1x128xf32>
    %526 = vector.broadcast %521 : vector<1x128xf32> to vector<4x128xf32>
    %527 = arith.mulf %502, %526 : vector<4x128xf32>
    %528 = vector.broadcast %525 : vector<1x128xf32> to vector<4x128xf32>
    %529 = arith.addf %527, %528 : vector<4x128xf32>
    %c1_337 = arith.constant 1 : index
    %c0_338 = arith.constant 0 : index
    %c0_339 = arith.constant 0 : index
    %530 = vector.load %arg2[%c1_337, %c0_338, %c0_339] : memref<3x16x8xf32, #tpu.memory_space<vmem>>, vector<1x8x4xf32>
    %531 = vector.shape_cast %530 : vector<1x8x4xf32> to vector<8x4xf32>
    %cst_340 = arith.constant dense<0.000000e+00> : vector<8x128xf32>
    %532 = tpu.matmul %531, %529, %cst_340 {dimension_numbers = #tpu.dot_dimension_numbers<[1], [0], [0], [1], [0, 0, 1, 1], [], []>} : vector<8x4xf32>, vector<4x128xf32>, vector<8x128xf32> -> vector<8x128xf32>
    %cst_341 = arith.constant 0.000000e+00 : f32
    %533 = vector.broadcast %cst_341 : f32 to vector<1x128xf32>
    %c0_342 = arith.constant 0 : index
    %c0_343 = arith.constant 0 : index
    %534 = vector.load %arg22[%c0_342, %c0_343] : memref<16x896xf32, #tpu.memory_space<vmem>>, vector<1x128xf32>
    tpu.vector_store %arg22[%c0_342, %c0_343], %533 {strides = array<i32>} : memref<16x896xf32, #tpu.memory_space<vmem>>, vector<1x128xf32>,
    %535 = vector.extract_strided_slice %532 {offsets = [0, 0], sizes = [7, 128], strides = [1, 1]} : vector<8x128xf32> to vector<7x128xf32>
    %c1_344 = arith.constant 1 : index
    %c0_345 = arith.constant 0 : index
    %536 = vector.load %arg22[%c1_344, %c0_345] : memref<16x896xf32, #tpu.memory_space<vmem>>, vector<7x128xf32>
    tpu.vector_store %arg22[%c1_344, %c0_345], %535 {strides = array<i32>} : memref<16x896xf32, #tpu.memory_space<vmem>>, vector<7x128xf32>,
    %c0_346 = arith.constant 0 : index
    %c128_347 = arith.constant 128 : index
    %537 = vector.load %arg22[%c0_346, %c128_347] : memref<16x896xf32, #tpu.memory_space<vmem>>, vector<8x128xf32>
    tpu.vector_store %arg22[%c0_346, %c128_347], %532 {strides = array<i32>} : memref<16x896xf32, #tpu.memory_space<vmem>>, vector<8x128xf32>,
    %cst_348 = arith.constant 0.000000e+00 : f32
    %538 = vector.broadcast %cst_348 : f32 to vector<1x128xf32>
    %c7_349 = arith.constant 7 : index
    %c256_350 = arith.constant 256 : index
    %539 = vector.load %arg22[%c7_349, %c256_350] : memref<16x896xf32, #tpu.memory_space<vmem>>, vector<1x128xf32>
    tpu.vector_store %arg22[%c7_349, %c256_350], %538 {strides = array<i32>} : memref<16x896xf32, #tpu.memory_space<vmem>>, vector<1x128xf32>,
    %540 = vector.extract_strided_slice %532 {offsets = [1, 0], sizes = [7, 128], strides = [1, 1]} : vector<8x128xf32> to vector<7x128xf32>
    %c0_351 = arith.constant 0 : index
    %c256_352 = arith.constant 256 : index
    %541 = vector.load %arg22[%c0_351, %c256_352] : memref<16x896xf32, #tpu.memory_space<vmem>>, vector<7x128xf32>
    tpu.vector_store %arg22[%c0_351, %c256_352], %540 {strides = array<i32>} : memref<16x896xf32, #tpu.memory_space<vmem>>, vector<7x128xf32>,
    %cst_353 = arith.constant 0.000000e+00 : f32
    %542 = vector.broadcast %cst_353 : f32 to vector<1x128xf32>
    %c0_354 = arith.constant 0 : index
    %c384_355 = arith.constant 384 : index
    %543 = vector.load %arg22[%c0_354, %c384_355] : memref<16x896xf32, #tpu.memory_space<vmem>>, vector<1x128xf32>
    tpu.vector_store %arg22[%c0_354, %c384_355], %542 {strides = array<i32>} : memref<16x896xf32, #tpu.memory_space<vmem>>, vector<1x128xf32>,
    %544 = vector.extract_strided_slice %235 {offsets = [0, 0], sizes = [7, 128], strides = [1, 1]} : vector<8x128xf32> to vector<7x128xf32>
    %c1_356 = arith.constant 1 : index
    %c384_357 = arith.constant 384 : index
    %545 = vector.load %arg22[%c1_356, %c384_357] : memref<16x896xf32, #tpu.memory_space<vmem>>, vector<7x128xf32>
    tpu.vector_store %arg22[%c1_356, %c384_357], %544 {strides = array<i32>} : memref<16x896xf32, #tpu.memory_space<vmem>>, vector<7x128xf32>,
    %c0_358 = arith.constant 0 : index
    %c512_359 = arith.constant 512 : index
    %546 = vector.load %arg22[%c0_358, %c512_359] : memref<16x896xf32, #tpu.memory_space<vmem>>, vector<8x128xf32>
    tpu.vector_store %arg22[%c0_358, %c512_359], %235 {strides = array<i32>} : memref<16x896xf32, #tpu.memory_space<vmem>>, vector<8x128xf32>,
    %cst_360 = arith.constant 0.000000e+00 : f32
    %547 = vector.broadcast %cst_360 : f32 to vector<1x128xf32>
    %c7_361 = arith.constant 7 : index
    %c640_362 = arith.constant 640 : index
    %548 = vector.load %arg22[%c7_361, %c640_362] : memref<16x896xf32, #tpu.memory_space<vmem>>, vector<1x128xf32>
    tpu.vector_store %arg22[%c7_361, %c640_362], %547 {strides = array<i32>} : memref<16x896xf32, #tpu.memory_space<vmem>>, vector<1x128xf32>,
    %549 = vector.extract_strided_slice %235 {offsets = [1, 0], sizes = [7, 128], strides = [1, 1]} : vector<8x128xf32> to vector<7x128xf32>
    %c0_363 = arith.constant 0 : index
    %c640_364 = arith.constant 640 : index
    %550 = vector.load %arg22[%c0_363, %c640_364] : memref<16x896xf32, #tpu.memory_space<vmem>>, vector<7x128xf32>
    tpu.vector_store %arg22[%c0_363, %c640_364], %549 {strides = array<i32>} : memref<16x896xf32, #tpu.memory_space<vmem>>, vector<7x128xf32>,
    %c0_365 = arith.constant 0 : index
    %c0_366 = arith.constant 0 : index
    %551 = vector.load %arg22[%c0_365, %c0_366] : memref<16x896xf32, #tpu.memory_space<vmem>>, vector<8x768xf32>
    %c0_367 = arith.constant 0 : index
    %c0_368 = arith.constant 0 : index
    %552 = vector.load %arg15[%c0_367, %c0_368] : memref<768x128xf32, #tpu.memory_space<vmem>>, vector<768x128xf32>
    %cst_369 = arith.constant dense<0.000000e+00> : vector<8x128xf32>
    %553 = tpu.matmul %551, %552, %cst_369 {dimension_numbers = #tpu.dot_dimension_numbers<[1], [0], [0], [1], [0, 0, 1, 1], [], []>} : vector<8x768xf32>, vector<768x128xf32>, vector<8x128xf32> -> vector<8x128xf32>
    %c30 = arith.constant 30 : index
    %c0_370 = arith.constant 0 : index
    %554 = vector.load %arg20[%c30, %c0_370] : memref<43x128xf32, #tpu.memory_space<vmem>>, vector<3x128xf32>
    %555 = vector.extract_strided_slice %554 {offsets = [0, 0], sizes = [1, 128], strides = [1, 1]} : vector<3x128xf32> to vector<1x128xf32>
    %556 = vector.broadcast %555 : vector<1x128xf32> to vector<8x128xf32>
    %557 = arith.addf %553, %556 : vector<8x128xf32>
    %cst_371 = arith.constant 0.000000e+00 : f32
    %558 = vector.broadcast %cst_371 : f32 to vector<8x128xf32>
    %559 = arith.maximumf %557, %558 : vector<8x128xf32>
    %560 = vector.shape_cast %559 : vector<8x128xf32> to vector<1x8x128xf32>
    %cst_372 = arith.constant dense<0.000000e+00> : vector<1xf32>
    %561 = vector.multi_reduction <add>, %560, %cst_372 [1, 2] : vector<1x8x128xf32> to vector<1xf32>
    %562 = vector.shape_cast %561 : vector<1xf32> to vector<1x1x1xf32>
    %563 = vector.extract %562[0, 0, 0] : f32 from vector<1x1x1xf32>
    %564 = arith.mulf %559, %559 : vector<8x128xf32>
    %565 = vector.shape_cast %564 : vector<8x128xf32> to vector<1x8x128xf32>
    %cst_373 = arith.constant dense<0.000000e+00> : vector<1xf32>
    %566 = vector.multi_reduction <add>, %565, %cst_373 [1, 2] : vector<1x8x128xf32> to vector<1xf32>
    %567 = vector.shape_cast %566 : vector<1xf32> to vector<1x1x1xf32>
    %568 = vector.extract %567[0, 0, 0] : f32 from vector<1x1x1xf32>
    %cst_374 = arith.constant 9.765625E-4 : f32
    %569 = arith.mulf %563, %cst_374 : f32
    %cst_375 = arith.constant 9.765625E-4 : f32
    %570 = arith.mulf %568, %cst_375 : f32
    %571 = arith.mulf %569, %569 : f32
    %572 = arith.subf %570, %571 : f32
    %cst_376 = arith.constant 0.000000e+00 : f32
    %573 = arith.maximumf %572, %cst_376 : f32
    %574 = vector.extract_strided_slice %554 {offsets = [1, 0], sizes = [1, 128], strides = [1, 1]} : vector<3x128xf32> to vector<1x128xf32>
    %cst_377 = arith.constant 9.99999974E-6 : f32
    %575 = arith.addf %573, %cst_377 : f32
    %576 = math.rsqrt %575 : f32
    %577 = vector.broadcast %576 : f32 to vector<1x128xf32>
    %578 = arith.mulf %574, %577 : vector<1x128xf32>
    %579 = vector.extract_strided_slice %554 {offsets = [2, 0], sizes = [1, 128], strides = [1, 1]} : vector<3x128xf32> to vector<1x128xf32>
    %580 = vector.broadcast %569 : f32 to vector<1x128xf32>
    %581 = arith.mulf %580, %578 : vector<1x128xf32>
    %582 = arith.subf %579, %581 : vector<1x128xf32>
    %583 = vector.broadcast %578 : vector<1x128xf32> to vector<8x128xf32>
    %584 = arith.mulf %559, %583 : vector<8x128xf32>
    %585 = vector.broadcast %582 : vector<1x128xf32> to vector<8x128xf32>
    %586 = arith.addf %584, %585 : vector<8x128xf32>
    %cst_378 = arith.constant 0.000000e+00 : f32
    %587 = vector.broadcast %cst_378 : f32 to vector<1x128xf32>
    %c0_379 = arith.constant 0 : index
    %c0_380 = arith.constant 0 : index
    %588 = vector.load %arg22[%c0_379, %c0_380] : memref<16x896xf32, #tpu.memory_space<vmem>>, vector<1x128xf32>
    tpu.vector_store %arg22[%c0_379, %c0_380], %587 {strides = array<i32>} : memref<16x896xf32, #tpu.memory_space<vmem>>, vector<1x128xf32>,
    %589 = vector.extract_strided_slice %586 {offsets = [0, 0], sizes = [7, 128], strides = [1, 1]} : vector<8x128xf32> to vector<7x128xf32>
    %c1_381 = arith.constant 1 : index
    %c0_382 = arith.constant 0 : index
    %590 = vector.load %arg22[%c1_381, %c0_382] : memref<16x896xf32, #tpu.memory_space<vmem>>, vector<7x128xf32>
    tpu.vector_store %arg22[%c1_381, %c0_382], %589 {strides = array<i32>} : memref<16x896xf32, #tpu.memory_space<vmem>>, vector<7x128xf32>,
    %c0_383 = arith.constant 0 : index
    %c128_384 = arith.constant 128 : index
    %591 = vector.load %arg22[%c0_383, %c128_384] : memref<16x896xf32, #tpu.memory_space<vmem>>, vector<8x128xf32>
    tpu.vector_store %arg22[%c0_383, %c128_384], %586 {strides = array<i32>} : memref<16x896xf32, #tpu.memory_space<vmem>>, vector<8x128xf32>,
    %cst_385 = arith.constant 0.000000e+00 : f32
    %592 = vector.broadcast %cst_385 : f32 to vector<1x128xf32>
    %c7_386 = arith.constant 7 : index
    %c256_387 = arith.constant 256 : index
    %593 = vector.load %arg22[%c7_386, %c256_387] : memref<16x896xf32, #tpu.memory_space<vmem>>, vector<1x128xf32>
    tpu.vector_store %arg22[%c7_386, %c256_387], %592 {strides = array<i32>} : memref<16x896xf32, #tpu.memory_space<vmem>>, vector<1x128xf32>,
    %594 = vector.extract_strided_slice %586 {offsets = [1, 0], sizes = [7, 128], strides = [1, 1]} : vector<8x128xf32> to vector<7x128xf32>
    %c0_388 = arith.constant 0 : index
    %c256_389 = arith.constant 256 : index
    %595 = vector.load %arg22[%c0_388, %c256_389] : memref<16x896xf32, #tpu.memory_space<vmem>>, vector<7x128xf32>
    tpu.vector_store %arg22[%c0_388, %c256_389], %594 {strides = array<i32>} : memref<16x896xf32, #tpu.memory_space<vmem>>, vector<7x128xf32>,
    %c0_390 = arith.constant 0 : index
    %c0_391 = arith.constant 0 : index
    %596 = vector.load %arg22[%c0_390, %c0_391] : memref<16x896xf32, #tpu.memory_space<vmem>>, vector<8x384xf32>
    %c0_392 = arith.constant 0 : index
    %c0_393 = arith.constant 0 : index
    %597 = vector.load %arg16[%c0_392, %c0_393] : memref<384x128xf32, #tpu.memory_space<vmem>>, vector<384x128xf32>
    %cst_394 = arith.constant dense<0.000000e+00> : vector<8x128xf32>
    %598 = tpu.matmul %596, %597, %cst_394 {dimension_numbers = #tpu.dot_dimension_numbers<[1], [0], [0], [1], [0, 0, 1, 1], [], []>} : vector<8x384xf32>, vector<384x128xf32>, vector<8x128xf32> -> vector<8x128xf32>
    %c33 = arith.constant 33 : index
    %c0_395 = arith.constant 0 : index
    %599 = vector.load %arg20[%c33, %c0_395] : memref<43x128xf32, #tpu.memory_space<vmem>>, vector<3x128xf32>
    %600 = vector.extract_strided_slice %599 {offsets = [0, 0], sizes = [1, 128], strides = [1, 1]} : vector<3x128xf32> to vector<1x128xf32>
    %601 = vector.broadcast %600 : vector<1x128xf32> to vector<8x128xf32>
    %602 = arith.addf %598, %601 : vector<8x128xf32>
    %cst_396 = arith.constant 0.000000e+00 : f32
    %603 = vector.broadcast %cst_396 : f32 to vector<8x128xf32>
    %604 = arith.maximumf %602, %603 : vector<8x128xf32>
    %605 = vector.shape_cast %604 : vector<8x128xf32> to vector<1x8x128xf32>
    %cst_397 = arith.constant dense<0.000000e+00> : vector<1xf32>
    %606 = vector.multi_reduction <add>, %605, %cst_397 [1, 2] : vector<1x8x128xf32> to vector<1xf32>
    %607 = vector.shape_cast %606 : vector<1xf32> to vector<1x1x1xf32>
    %608 = vector.extract %607[0, 0, 0] : f32 from vector<1x1x1xf32>
    %609 = arith.mulf %604, %604 : vector<8x128xf32>
    %610 = vector.shape_cast %609 : vector<8x128xf32> to vector<1x8x128xf32>
    %cst_398 = arith.constant dense<0.000000e+00> : vector<1xf32>
    %611 = vector.multi_reduction <add>, %610, %cst_398 [1, 2] : vector<1x8x128xf32> to vector<1xf32>
    %612 = vector.shape_cast %611 : vector<1xf32> to vector<1x1x1xf32>
    %613 = vector.extract %612[0, 0, 0] : f32 from vector<1x1x1xf32>
    %cst_399 = arith.constant 9.765625E-4 : f32
    %614 = arith.mulf %608, %cst_399 : f32
    %cst_400 = arith.constant 9.765625E-4 : f32
    %615 = arith.mulf %613, %cst_400 : f32
    %616 = arith.mulf %614, %614 : f32
    %617 = arith.subf %615, %616 : f32
    %cst_401 = arith.constant 0.000000e+00 : f32
    %618 = arith.maximumf %617, %cst_401 : f32
    %619 = vector.extract_strided_slice %599 {offsets = [1, 0], sizes = [1, 128], strides = [1, 1]} : vector<3x128xf32> to vector<1x128xf32>
    %cst_402 = arith.constant 9.99999974E-6 : f32
    %620 = arith.addf %618, %cst_402 : f32
    %621 = math.rsqrt %620 : f32
    %622 = vector.broadcast %621 : f32 to vector<1x128xf32>
    %623 = arith.mulf %619, %622 : vector<1x128xf32>
    %624 = vector.extract_strided_slice %599 {offsets = [2, 0], sizes = [1, 128], strides = [1, 1]} : vector<3x128xf32> to vector<1x128xf32>
    %625 = vector.broadcast %614 : f32 to vector<1x128xf32>
    %626 = arith.mulf %625, %623 : vector<1x128xf32>
    %627 = arith.subf %624, %626 : vector<1x128xf32>
    %628 = vector.broadcast %623 : vector<1x128xf32> to vector<8x128xf32>
    %629 = arith.mulf %604, %628 : vector<8x128xf32>
    %630 = vector.broadcast %627 : vector<1x128xf32> to vector<8x128xf32>
    %631 = arith.addf %629, %630 : vector<8x128xf32>
    %c2_403 = arith.constant 2 : index
    %c0_404 = arith.constant 0 : index
    %c0_405 = arith.constant 0 : index
    %632 = vector.load %arg2[%c2_403, %c0_404, %c0_405] : memref<3x16x8xf32, #tpu.memory_space<vmem>>, vector<1x16x8xf32>
    %633 = vector.shape_cast %632 : vector<1x16x8xf32> to vector<16x8xf32>
    %cst_406 = arith.constant dense<0.000000e+00> : vector<16x128xf32>
    %634 = tpu.matmul %633, %631, %cst_406 {dimension_numbers = #tpu.dot_dimension_numbers<[1], [0], [0], [1], [0, 0, 1, 1], [], []>} : vector<16x8xf32>, vector<8x128xf32>, vector<16x128xf32> -> vector<16x128xf32>
    %cst_407 = arith.constant 0.000000e+00 : f32
    %635 = vector.broadcast %cst_407 : f32 to vector<1x128xf32>
    %c0_408 = arith.constant 0 : index
    %c0_409 = arith.constant 0 : index
    %636 = vector.load %arg22[%c0_408, %c0_409] : memref<16x896xf32, #tpu.memory_space<vmem>>, vector<1x128xf32>
    tpu.vector_store %arg22[%c0_408, %c0_409], %635 {strides = array<i32>} : memref<16x896xf32, #tpu.memory_space<vmem>>, vector<1x128xf32>,
    %637 = vector.extract_strided_slice %634 {offsets = [0, 0], sizes = [15, 128], strides = [1, 1]} : vector<16x128xf32> to vector<15x128xf32>
    %c1_410 = arith.constant 1 : index
    %c0_411 = arith.constant 0 : index
    %638 = vector.load %arg22[%c1_410, %c0_411] : memref<16x896xf32, #tpu.memory_space<vmem>>, vector<15x128xf32>
    tpu.vector_store %arg22[%c1_410, %c0_411], %637 {strides = array<i32>} : memref<16x896xf32, #tpu.memory_space<vmem>>, vector<15x128xf32>,
    %c0_412 = arith.constant 0 : index
    %c128_413 = arith.constant 128 : index
    %639 = vector.load %arg22[%c0_412, %c128_413] : memref<16x896xf32, #tpu.memory_space<vmem>>, vector<16x128xf32>
    tpu.vector_store %arg22[%c0_412, %c128_413], %634 {strides = array<i32>} : memref<16x896xf32, #tpu.memory_space<vmem>>, vector<16x128xf32>,
    %cst_414 = arith.constant 0.000000e+00 : f32
    %640 = vector.broadcast %cst_414 : f32 to vector<1x128xf32>
    %c15_415 = arith.constant 15 : index
    %c256_416 = arith.constant 256 : index
    %641 = vector.load %arg22[%c15_415, %c256_416] : memref<16x896xf32, #tpu.memory_space<vmem>>, vector<1x128xf32>
    tpu.vector_store %arg22[%c15_415, %c256_416], %640 {strides = array<i32>} : memref<16x896xf32, #tpu.memory_space<vmem>>, vector<1x128xf32>,
    %642 = vector.extract_strided_slice %634 {offsets = [1, 0], sizes = [15, 128], strides = [1, 1]} : vector<16x128xf32> to vector<15x128xf32>
    %c0_417 = arith.constant 0 : index
    %c256_418 = arith.constant 256 : index
    %643 = vector.load %arg22[%c0_417, %c256_418] : memref<16x896xf32, #tpu.memory_space<vmem>>, vector<15x128xf32>
    tpu.vector_store %arg22[%c0_417, %c256_418], %642 {strides = array<i32>} : memref<16x896xf32, #tpu.memory_space<vmem>>, vector<15x128xf32>,
    %cst_419 = arith.constant 0.000000e+00 : f32
    %644 = vector.broadcast %cst_419 : f32 to vector<1x128xf32>
    %c0_420 = arith.constant 0 : index
    %c384_421 = arith.constant 384 : index
    %645 = vector.load %arg22[%c0_420, %c384_421] : memref<16x896xf32, #tpu.memory_space<vmem>>, vector<1x128xf32>
    tpu.vector_store %arg22[%c0_420, %c384_421], %644 {strides = array<i32>} : memref<16x896xf32, #tpu.memory_space<vmem>>, vector<1x128xf32>,
    %646 = vector.extract_strided_slice %123 {offsets = [0, 0], sizes = [15, 128], strides = [1, 1]} : vector<16x128xf32> to vector<15x128xf32>
    %c1_422 = arith.constant 1 : index
    %c384_423 = arith.constant 384 : index
    %647 = vector.load %arg22[%c1_422, %c384_423] : memref<16x896xf32, #tpu.memory_space<vmem>>, vector<15x128xf32>
    tpu.vector_store %arg22[%c1_422, %c384_423], %646 {strides = array<i32>} : memref<16x896xf32, #tpu.memory_space<vmem>>, vector<15x128xf32>,
    %c0_424 = arith.constant 0 : index
    %c512_425 = arith.constant 512 : index
    %648 = vector.load %arg22[%c0_424, %c512_425] : memref<16x896xf32, #tpu.memory_space<vmem>>, vector<16x128xf32>
    tpu.vector_store %arg22[%c0_424, %c512_425], %123 {strides = array<i32>} : memref<16x896xf32, #tpu.memory_space<vmem>>, vector<16x128xf32>,
    %cst_426 = arith.constant 0.000000e+00 : f32
    %649 = vector.broadcast %cst_426 : f32 to vector<1x128xf32>
    %c15_427 = arith.constant 15 : index
    %c640_428 = arith.constant 640 : index
    %650 = vector.load %arg22[%c15_427, %c640_428] : memref<16x896xf32, #tpu.memory_space<vmem>>, vector<1x128xf32>
    tpu.vector_store %arg22[%c15_427, %c640_428], %649 {strides = array<i32>} : memref<16x896xf32, #tpu.memory_space<vmem>>, vector<1x128xf32>,
    %651 = vector.extract_strided_slice %123 {offsets = [1, 0], sizes = [15, 128], strides = [1, 1]} : vector<16x128xf32> to vector<15x128xf32>
    %c0_429 = arith.constant 0 : index
    %c640_430 = arith.constant 640 : index
    %652 = vector.load %arg22[%c0_429, %c640_430] : memref<16x896xf32, #tpu.memory_space<vmem>>, vector<15x128xf32>
    tpu.vector_store %arg22[%c0_429, %c640_430], %651 {strides = array<i32>} : memref<16x896xf32, #tpu.memory_space<vmem>>, vector<15x128xf32>,
    %c0_431 = arith.constant 0 : index
    %c0_432 = arith.constant 0 : index
    %653 = vector.load %arg22[%c0_431, %c0_432] : memref<16x896xf32, #tpu.memory_space<vmem>>, vector<16x768xf32>
    %c0_433 = arith.constant 0 : index
    %c0_434 = arith.constant 0 : index
    %654 = vector.load %arg17[%c0_433, %c0_434] : memref<768x128xf32, #tpu.memory_space<vmem>>, vector<768x128xf32>
    %cst_435 = arith.constant dense<0.000000e+00> : vector<16x128xf32>
    %655 = tpu.matmul %653, %654, %cst_435 {dimension_numbers = #tpu.dot_dimension_numbers<[1], [0], [0], [1], [0, 0, 1, 1], [], []>} : vector<16x768xf32>, vector<768x128xf32>, vector<16x128xf32> -> vector<16x128xf32>
    %c36 = arith.constant 36 : index
    %c0_436 = arith.constant 0 : index
    %656 = vector.load %arg20[%c36, %c0_436] : memref<43x128xf32, #tpu.memory_space<vmem>>, vector<3x128xf32>
    %657 = vector.extract_strided_slice %656 {offsets = [0, 0], sizes = [1, 128], strides = [1, 1]} : vector<3x128xf32> to vector<1x128xf32>
    %658 = vector.broadcast %657 : vector<1x128xf32> to vector<16x128xf32>
    %659 = arith.addf %655, %658 : vector<16x128xf32>
    %cst_437 = arith.constant 0.000000e+00 : f32
    %660 = vector.broadcast %cst_437 : f32 to vector<16x128xf32>
    %661 = arith.maximumf %659, %660 : vector<16x128xf32>
    %662 = vector.shape_cast %661 : vector<16x128xf32> to vector<1x16x128xf32>
    %cst_438 = arith.constant dense<0.000000e+00> : vector<1xf32>
    %663 = vector.multi_reduction <add>, %662, %cst_438 [1, 2] : vector<1x16x128xf32> to vector<1xf32>
    %664 = vector.shape_cast %663 : vector<1xf32> to vector<1x1x1xf32>
    %665 = vector.extract %664[0, 0, 0] : f32 from vector<1x1x1xf32>
    %666 = arith.mulf %661, %661 : vector<16x128xf32>
    %667 = vector.shape_cast %666 : vector<16x128xf32> to vector<1x16x128xf32>
    %cst_439 = arith.constant dense<0.000000e+00> : vector<1xf32>
    %668 = vector.multi_reduction <add>, %667, %cst_439 [1, 2] : vector<1x16x128xf32> to vector<1xf32>
    %669 = vector.shape_cast %668 : vector<1xf32> to vector<1x1x1xf32>
    %670 = vector.extract %669[0, 0, 0] : f32 from vector<1x1x1xf32>
    %cst_440 = arith.constant 4.8828125E-4 : f32
    %671 = arith.mulf %665, %cst_440 : f32
    %cst_441 = arith.constant 4.8828125E-4 : f32
    %672 = arith.mulf %670, %cst_441 : f32
    %673 = arith.mulf %671, %671 : f32
    %674 = arith.subf %672, %673 : f32
    %cst_442 = arith.constant 0.000000e+00 : f32
    %675 = arith.maximumf %674, %cst_442 : f32
    %676 = vector.extract_strided_slice %656 {offsets = [1, 0], sizes = [1, 128], strides = [1, 1]} : vector<3x128xf32> to vector<1x128xf32>
    %cst_443 = arith.constant 9.99999974E-6 : f32
    %677 = arith.addf %675, %cst_443 : f32
    %678 = math.rsqrt %677 : f32
    %679 = vector.broadcast %678 : f32 to vector<1x128xf32>
    %680 = arith.mulf %676, %679 : vector<1x128xf32>
    %681 = vector.extract_strided_slice %656 {offsets = [2, 0], sizes = [1, 128], strides = [1, 1]} : vector<3x128xf32> to vector<1x128xf32>
    %682 = vector.broadcast %671 : f32 to vector<1x128xf32>
    %683 = arith.mulf %682, %680 : vector<1x128xf32>
    %684 = arith.subf %681, %683 : vector<1x128xf32>
    %685 = vector.broadcast %680 : vector<1x128xf32> to vector<16x128xf32>
    %686 = arith.mulf %661, %685 : vector<16x128xf32>
    %687 = vector.broadcast %684 : vector<1x128xf32> to vector<16x128xf32>
    %688 = arith.addf %686, %687 : vector<16x128xf32>
    %cst_444 = arith.constant 0.000000e+00 : f32
    %689 = vector.broadcast %cst_444 : f32 to vector<1x128xf32>
    %c0_445 = arith.constant 0 : index
    %c0_446 = arith.constant 0 : index
    %690 = vector.load %arg22[%c0_445, %c0_446] : memref<16x896xf32, #tpu.memory_space<vmem>>, vector<1x128xf32>
    tpu.vector_store %arg22[%c0_445, %c0_446], %689 {strides = array<i32>} : memref<16x896xf32, #tpu.memory_space<vmem>>, vector<1x128xf32>,
    %691 = vector.extract_strided_slice %688 {offsets = [0, 0], sizes = [15, 128], strides = [1, 1]} : vector<16x128xf32> to vector<15x128xf32>
    %c1_447 = arith.constant 1 : index
    %c0_448 = arith.constant 0 : index
    %692 = vector.load %arg22[%c1_447, %c0_448] : memref<16x896xf32, #tpu.memory_space<vmem>>, vector<15x128xf32>
    tpu.vector_store %arg22[%c1_447, %c0_448], %691 {strides = array<i32>} : memref<16x896xf32, #tpu.memory_space<vmem>>, vector<15x128xf32>,
    %c0_449 = arith.constant 0 : index
    %c128_450 = arith.constant 128 : index
    %693 = vector.load %arg22[%c0_449, %c128_450] : memref<16x896xf32, #tpu.memory_space<vmem>>, vector<16x128xf32>
    tpu.vector_store %arg22[%c0_449, %c128_450], %688 {strides = array<i32>} : memref<16x896xf32, #tpu.memory_space<vmem>>, vector<16x128xf32>,
    %cst_451 = arith.constant 0.000000e+00 : f32
    %694 = vector.broadcast %cst_451 : f32 to vector<1x128xf32>
    %c15_452 = arith.constant 15 : index
    %c256_453 = arith.constant 256 : index
    %695 = vector.load %arg22[%c15_452, %c256_453] : memref<16x896xf32, #tpu.memory_space<vmem>>, vector<1x128xf32>
    tpu.vector_store %arg22[%c15_452, %c256_453], %694 {strides = array<i32>} : memref<16x896xf32, #tpu.memory_space<vmem>>, vector<1x128xf32>,
    %696 = vector.extract_strided_slice %688 {offsets = [1, 0], sizes = [15, 128], strides = [1, 1]} : vector<16x128xf32> to vector<15x128xf32>
    %c0_454 = arith.constant 0 : index
    %c256_455 = arith.constant 256 : index
    %697 = vector.load %arg22[%c0_454, %c256_455] : memref<16x896xf32, #tpu.memory_space<vmem>>, vector<15x128xf32>
    tpu.vector_store %arg22[%c0_454, %c256_455], %696 {strides = array<i32>} : memref<16x896xf32, #tpu.memory_space<vmem>>, vector<15x128xf32>,
    %c0_456 = arith.constant 0 : index
    %c0_457 = arith.constant 0 : index
    %698 = vector.load %arg22[%c0_456, %c0_457] : memref<16x896xf32, #tpu.memory_space<vmem>>, vector<16x384xf32>
    %c0_458 = arith.constant 0 : index
    %c0_459 = arith.constant 0 : index
    %699 = vector.load %arg18[%c0_458, %c0_459] : memref<384x128xf32, #tpu.memory_space<vmem>>, vector<384x128xf32>
    %cst_460 = arith.constant dense<0.000000e+00> : vector<16x128xf32>
    %700 = tpu.matmul %698, %699, %cst_460 {dimension_numbers = #tpu.dot_dimension_numbers<[1], [0], [0], [1], [0, 0, 1, 1], [], []>} : vector<16x384xf32>, vector<384x128xf32>, vector<16x128xf32> -> vector<16x128xf32>
    %c39 = arith.constant 39 : index
    %c0_461 = arith.constant 0 : index
    %701 = vector.load %arg20[%c39, %c0_461] : memref<43x128xf32, #tpu.memory_space<vmem>>, vector<3x128xf32>
    %702 = vector.extract_strided_slice %701 {offsets = [0, 0], sizes = [1, 128], strides = [1, 1]} : vector<3x128xf32> to vector<1x128xf32>
    %703 = vector.broadcast %702 : vector<1x128xf32> to vector<16x128xf32>
    %704 = arith.addf %700, %703 : vector<16x128xf32>
    %cst_462 = arith.constant 0.000000e+00 : f32
    %705 = vector.broadcast %cst_462 : f32 to vector<16x128xf32>
    %706 = arith.maximumf %704, %705 : vector<16x128xf32>
    %707 = vector.shape_cast %706 : vector<16x128xf32> to vector<1x16x128xf32>
    %cst_463 = arith.constant dense<0.000000e+00> : vector<1xf32>
    %708 = vector.multi_reduction <add>, %707, %cst_463 [1, 2] : vector<1x16x128xf32> to vector<1xf32>
    %709 = vector.shape_cast %708 : vector<1xf32> to vector<1x1x1xf32>
    %710 = vector.extract %709[0, 0, 0] : f32 from vector<1x1x1xf32>
    %711 = arith.mulf %706, %706 : vector<16x128xf32>
    %712 = vector.shape_cast %711 : vector<16x128xf32> to vector<1x16x128xf32>
    %cst_464 = arith.constant dense<0.000000e+00> : vector<1xf32>
    %713 = vector.multi_reduction <add>, %712, %cst_464 [1, 2] : vector<1x16x128xf32> to vector<1xf32>
    %714 = vector.shape_cast %713 : vector<1xf32> to vector<1x1x1xf32>
    %715 = vector.extract %714[0, 0, 0] : f32 from vector<1x1x1xf32>
    %cst_465 = arith.constant 4.8828125E-4 : f32
    %716 = arith.mulf %710, %cst_465 : f32
    %cst_466 = arith.constant 4.8828125E-4 : f32
    %717 = arith.mulf %715, %cst_466 : f32
    %718 = arith.mulf %716, %716 : f32
    %719 = arith.subf %717, %718 : f32
    %cst_467 = arith.constant 0.000000e+00 : f32
    %720 = arith.maximumf %719, %cst_467 : f32
    %721 = vector.extract_strided_slice %701 {offsets = [1, 0], sizes = [1, 128], strides = [1, 1]} : vector<3x128xf32> to vector<1x128xf32>
    %cst_468 = arith.constant 9.99999974E-6 : f32
    %722 = arith.addf %720, %cst_468 : f32
    %723 = math.rsqrt %722 : f32
    %724 = vector.broadcast %723 : f32 to vector<1x128xf32>
    %725 = arith.mulf %721, %724 : vector<1x128xf32>
    %726 = vector.extract_strided_slice %701 {offsets = [2, 0], sizes = [1, 128], strides = [1, 1]} : vector<3x128xf32> to vector<1x128xf32>
    %727 = vector.broadcast %716 : f32 to vector<1x128xf32>
    %728 = arith.mulf %727, %725 : vector<1x128xf32>
    %729 = arith.subf %726, %728 : vector<1x128xf32>
    %730 = vector.broadcast %725 : vector<1x128xf32> to vector<16x128xf32>
    %731 = arith.mulf %706, %730 : vector<16x128xf32>
    %732 = vector.broadcast %729 : vector<1x128xf32> to vector<16x128xf32>
    %733 = arith.addf %731, %732 : vector<16x128xf32>
    %cst_469 = arith.constant 0.000000e+00 : f32
    %734 = vector.broadcast %cst_469 : f32 to vector<1x128xf32>
    %c0_470 = arith.constant 0 : index
    %c0_471 = arith.constant 0 : index
    %735 = vector.load %arg22[%c0_470, %c0_471] : memref<16x896xf32, #tpu.memory_space<vmem>>, vector<1x128xf32>
    tpu.vector_store %arg22[%c0_470, %c0_471], %734 {strides = array<i32>} : memref<16x896xf32, #tpu.memory_space<vmem>>, vector<1x128xf32>,
    %736 = vector.extract_strided_slice %733 {offsets = [0, 0], sizes = [15, 128], strides = [1, 1]} : vector<16x128xf32> to vector<15x128xf32>
    %c1_472 = arith.constant 1 : index
    %c0_473 = arith.constant 0 : index
    %737 = vector.load %arg22[%c1_472, %c0_473] : memref<16x896xf32, #tpu.memory_space<vmem>>, vector<15x128xf32>
    tpu.vector_store %arg22[%c1_472, %c0_473], %736 {strides = array<i32>} : memref<16x896xf32, #tpu.memory_space<vmem>>, vector<15x128xf32>,
    %c0_474 = arith.constant 0 : index
    %c128_475 = arith.constant 128 : index
    %738 = vector.load %arg22[%c0_474, %c128_475] : memref<16x896xf32, #tpu.memory_space<vmem>>, vector<16x128xf32>
    tpu.vector_store %arg22[%c0_474, %c128_475], %733 {strides = array<i32>} : memref<16x896xf32, #tpu.memory_space<vmem>>, vector<16x128xf32>,
    %cst_476 = arith.constant 0.000000e+00 : f32
    %739 = vector.broadcast %cst_476 : f32 to vector<1x128xf32>
    %c15_477 = arith.constant 15 : index
    %c256_478 = arith.constant 256 : index
    %740 = vector.load %arg22[%c15_477, %c256_478] : memref<16x896xf32, #tpu.memory_space<vmem>>, vector<1x128xf32>
    tpu.vector_store %arg22[%c15_477, %c256_478], %739 {strides = array<i32>} : memref<16x896xf32, #tpu.memory_space<vmem>>, vector<1x128xf32>,
    %741 = vector.extract_strided_slice %733 {offsets = [1, 0], sizes = [15, 128], strides = [1, 1]} : vector<16x128xf32> to vector<15x128xf32>
    %c0_479 = arith.constant 0 : index
    %c256_480 = arith.constant 256 : index
    %742 = vector.load %arg22[%c0_479, %c256_480] : memref<16x896xf32, #tpu.memory_space<vmem>>, vector<15x128xf32>
    tpu.vector_store %arg22[%c0_479, %c256_480], %741 {strides = array<i32>} : memref<16x896xf32, #tpu.memory_space<vmem>>, vector<15x128xf32>,
    %c0_481 = arith.constant 0 : index
    %c0_482 = arith.constant 0 : index
    %743 = vector.load %arg22[%c0_481, %c0_482] : memref<16x896xf32, #tpu.memory_space<vmem>>, vector<16x384xf32>
    %c0_483 = arith.constant 0 : index
    %c0_484 = arith.constant 0 : index
    %744 = vector.load %arg19[%c0_483, %c0_484] : memref<384x128xf32, #tpu.memory_space<vmem>>, vector<384x128xf32>
    %cst_485 = arith.constant dense<0.000000e+00> : vector<16x128xf32>
    %745 = tpu.matmul %743, %744, %cst_485 {dimension_numbers = #tpu.dot_dimension_numbers<[1], [0], [0], [1], [0, 0, 1, 1], [], []>} : vector<16x384xf32>, vector<384x128xf32>, vector<16x128xf32> -> vector<16x128xf32>
    %c42 = arith.constant 42 : index
    %c0_486 = arith.constant 0 : index
    %746 = vector.load %arg20[%c42, %c0_486] : memref<43x128xf32, #tpu.memory_space<vmem>>, vector<1x128xf32>
    %747 = vector.broadcast %746 : vector<1x128xf32> to vector<16x128xf32>
    %748 = arith.addf %745, %747 : vector<16x128xf32>
    %749 = math.tanh %748 : vector<16x128xf32>
    %cst_487 = arith.constant 1.000000e+00 : f32
    %750 = vector.broadcast %cst_487 : f32 to vector<16x128xf32>
    %751 = arith.addf %749, %750 : vector<16x128xf32>
    %cst_488 = arith.constant 5.000000e-01 : f32
    %752 = vector.broadcast %cst_488 : f32 to vector<16x128xf32>
    %753 = arith.mulf %751, %752 : vector<16x128xf32>
    %c0_489 = arith.constant 0 : index
    %c0_490 = arith.constant 0 : index
    %c0_491 = arith.constant 0 : index
    %754 = vector.load %arg21[%c0_489, %c0_490, %c0_491] : memref<1x16x128xf32, #tpu.memory_space<vmem>>, vector<1x16x128xf32>
    %755 = vector.shape_cast %754 : vector<1x16x128xf32> to vector<16x128xf32>
    %756 = vector.shape_cast %753 : vector<16x128xf32> to vector<1x16x128xf32>
    tpu.vector_store %arg21[%c0_489, %c0_490, %c0_491], %756 {strides = array<i32>} : memref<1x16x128xf32, #tpu.memory_space<vmem>>, vector<1x16x128xf32>,
    return
  }
  func.func @transform_0(%arg0: i32) -> (i32, i32, i32) {
    %c0_i32 = arith.constant 0 : i32
    %c0_i32_0 = arith.constant 0 : i32
    %c0_i32_1 = arith.constant 0 : i32
    return %arg0, %c0_i32, %c0_i32_0 : i32, i32, i32
  }
  func.func @transform_1(%arg0: i32) -> (i32, i32, i32) {
    %c0_i32 = arith.constant 0 : i32
    %c0_i32_0 = arith.constant 0 : i32
    %c0_i32_1 = arith.constant 0 : i32
    %c0_i32_2 = arith.constant 0 : i32
    return %c0_i32, %c0_i32_0, %c0_i32_1 : i32, i32, i32
  }
  func.func @transform_2(%arg0: i32) -> (i32, i32, i32) {
    %c0_i32 = arith.constant 0 : i32
    %c0_i32_0 = arith.constant 0 : i32
    %c0_i32_1 = arith.constant 0 : i32
    %c0_i32_2 = arith.constant 0 : i32
    return %c0_i32, %c0_i32_0, %c0_i32_1 : i32, i32, i32
  }
  func.func @transform_3(%arg0: i32) -> (i32, i32, i32) {
    %c0_i32 = arith.constant 0 : i32
    %c0_i32_0 = arith.constant 0 : i32
    %c0_i32_1 = arith.constant 0 : i32
    %c0_i32_2 = arith.constant 0 : i32
    return %c0_i32, %c0_i32_0, %c0_i32_1 : i32, i32, i32
  }
  func.func @transform_4(%arg0: i32) -> (i32, i32) {
    %c0_i32 = arith.constant 0 : i32
    %c0_i32_0 = arith.constant 0 : i32
    %c0_i32_1 = arith.constant 0 : i32
    return %c0_i32, %c0_i32_0 : i32, i32
  }
  func.func @transform_5(%arg0: i32) -> (i32, i32) {
    %c0_i32 = arith.constant 0 : i32
    %c0_i32_0 = arith.constant 0 : i32
    %c0_i32_1 = arith.constant 0 : i32
    return %c0_i32, %c0_i32_0 : i32, i32
  }
  func.func @transform_6(%arg0: i32) -> (i32, i32) {
    %c0_i32 = arith.constant 0 : i32
    %c0_i32_0 = arith.constant 0 : i32
    %c0_i32_1 = arith.constant 0 : i32
    return %c0_i32, %c0_i32_0 : i32, i32
  }
  func.func @transform_7(%arg0: i32) -> (i32, i32) {
    %c0_i32 = arith.constant 0 : i32
    %c0_i32_0 = arith.constant 0 : i32
    %c0_i32_1 = arith.constant 0 : i32
    return %c0_i32, %c0_i32_0 : i32, i32
  }
  func.func @transform_8(%arg0: i32) -> (i32, i32) {
    %c0_i32 = arith.constant 0 : i32
    %c0_i32_0 = arith.constant 0 : i32
    %c0_i32_1 = arith.constant 0 : i32
    return %c0_i32, %c0_i32_0 : i32, i32
  }
  func.func @transform_9(%arg0: i32) -> (i32, i32) {
    %c0_i32 = arith.constant 0 : i32
    %c0_i32_0 = arith.constant 0 : i32
    %c0_i32_1 = arith.constant 0 : i32
    return %c0_i32, %c0_i32_0 : i32, i32
  }
  func.func @transform_10(%arg0: i32) -> (i32, i32) {
    %c0_i32 = arith.constant 0 : i32
    %c0_i32_0 = arith.constant 0 : i32
    %c0_i32_1 = arith.constant 0 : i32
    return %c0_i32, %c0_i32_0 : i32, i32
  }
  func.func @transform_11(%arg0: i32) -> (i32, i32) {
    %c0_i32 = arith.constant 0 : i32
    %c0_i32_0 = arith.constant 0 : i32
    %c0_i32_1 = arith.constant 0 : i32
    return %c0_i32, %c0_i32_0 : i32, i32
  }
  func.func @transform_12(%arg0: i32) -> (i32, i32) {
    %c0_i32 = arith.constant 0 : i32
    %c0_i32_0 = arith.constant 0 : i32
    %c0_i32_1 = arith.constant 0 : i32
    return %c0_i32, %c0_i32_0 : i32, i32
  }
  func.func @transform_13(%arg0: i32) -> (i32, i32) {
    %c0_i32 = arith.constant 0 : i32
    %c0_i32_0 = arith.constant 0 : i32
    %c0_i32_1 = arith.constant 0 : i32
    return %c0_i32, %c0_i32_0 : i32, i32
  }
  func.func @transform_14(%arg0: i32) -> (i32, i32) {
    %c0_i32 = arith.constant 0 : i32
    %c0_i32_0 = arith.constant 0 : i32
    %c0_i32_1 = arith.constant 0 : i32
    return %c0_i32, %c0_i32_0 : i32, i32
  }
  func.func @transform_15(%arg0: i32) -> (i32, i32) {
    %c0_i32 = arith.constant 0 : i32
    %c0_i32_0 = arith.constant 0 : i32
    %c0_i32_1 = arith.constant 0 : i32
    return %c0_i32, %c0_i32_0 : i32, i32
  }
  func.func @transform_16(%arg0: i32) -> (i32, i32) {
    %c0_i32 = arith.constant 0 : i32
    %c0_i32_0 = arith.constant 0 : i32
    %c0_i32_1 = arith.constant 0 : i32
    return %c0_i32, %c0_i32_0 : i32, i32
  }
  func.func @transform_17(%arg0: i32) -> (i32, i32) {
    %c0_i32 = arith.constant 0 : i32
    %c0_i32_0 = arith.constant 0 : i32
    %c0_i32_1 = arith.constant 0 : i32
    return %c0_i32, %c0_i32_0 : i32, i32
  }
  func.func @transform_18(%arg0: i32) -> (i32, i32) {
    %c0_i32 = arith.constant 0 : i32
    %c0_i32_0 = arith.constant 0 : i32
    %c0_i32_1 = arith.constant 0 : i32
    return %c0_i32, %c0_i32_0 : i32, i32
  }
  func.func @transform_19(%arg0: i32) -> (i32, i32) {
    %c0_i32 = arith.constant 0 : i32
    %c0_i32_0 = arith.constant 0 : i32
    %c0_i32_1 = arith.constant 0 : i32
    return %c0_i32, %c0_i32_0 : i32, i32
  }
  func.func @transform_20(%arg0: i32) -> (i32, i32, i32) {
    %c0_i32 = arith.constant 0 : i32
    %c0_i32_0 = arith.constant 0 : i32
    %c0_i32_1 = arith.constant 0 : i32
    return %arg0, %c0_i32, %c0_i32_0 : i32, i32, i32
  }
}

</mosaic_0001>

<bundles_post_ra>
// kernel: mpinet2d_forward.1
= control target key start
LH: loop header
LB: loop body
LE: loop exit
PB: predicated region body
PF: predicated region fallthrough
CT: control target
= control target key end

     0   :  { %s11905_s0 = inlined_call_operand.vmem [shape: f32[2,16,128], index: 0, kind: input, shape index: {}]   ;;  %s11906_s1 = inlined_call_operand.vmem [shape: f32[3,16,8], index: 1, kind: input, shape index: {}]   ;;  %s11907_s2 = inlined_call_operand.vmem [shape: f32[3,128,64], index: 2, kind: input, shape index: {}]   ;;  %s11908_s3 = inlined_call_operand.hbm [shape: f32[3,8,16], index: 3, kind: input, shape index: {}]   ;;  %s11909_s4 = inlined_call_operand.vmem [shape: f32[896,128], index: 4, kind: input, shape index: {}]   ;;  %s11910_s5 = inlined_call_operand.vmem [shape: f32[896,128], index: 5, kind: input, shape index: {}]   ;;  %s11911_s6 = inlined_call_operand.hbm [shape: f32[320,128], index: 6, kind: input, shape index: {}]   ;;  %s11912_s7 = inlined_call_operand.hbm [shape: f32[640,128], index: 7, kind: input, shape index: {}]   ;;  %s11913_s8 = inlined_call_operand.hbm [shape: f32[192,128], index: 8, kind: input, shape index: {}]   ;;  %s11914_s9 = inlined_call_operand.vmem [shape: f32[384,128], index: 9, kind: input, shape index: {}]   ;;  %s11915_s10 = inlined_call_operand.vmem [shape: f32[192,64], index: 10, kind: input, shape index: {}]   ;;  %s11916_s11 = inlined_call_operand.vmem [shape: f32[192,64], index: 11, kind: input, shape index: {}]   ;;  %s11917_s12 = inlined_call_operand.hbm [shape: f32[576,128], index: 12, kind: input, shape index: {}]   ;;  %s11918_s13 = inlined_call_operand.hbm [shape: f32[384,128], index: 13, kind: input, shape index: {}]   ;;  %s11919_s14 = inlined_call_operand.hbm [shape: f32[768,128], index: 14, kind: input, shape index: {}]   ;;  %s11920_s15 = inlined_call_operand.hbm [shape: f32[384,128], index: 15, kind: input, shape index: {}]   ;;  %s11921_s16 = inlined_call_operand.hbm [shape: f32[768,128], index: 16, kind: input, shape index: {}]   ;;  %s11922_s17 = inlined_call_operand.hbm [shape: f32[384,128], index: 17, kind: input, shape index: {}]   ;;  %s11923_s18 = inlined_call_operand.hbm [shape: f32[384,128], index: 18, kind: input, shape index: {}]   ;;  %s11924_s19 = inlined_call_operand.vmem [shape: f32[43,128], index: 19, kind: input, shape index: {}]   ;;  %s11925_s20 = inlined_call_operand.vmem [shape: f32[2,16,128], index: 20, kind: output, shape index: {}]  }
   0x1   :  { %11937 = sst [smem:[#allocation27_spill]] %s11905_s0 }
   0x2   :  { %11938 = sst [smem:[#allocation28_spill]] %s11906_s1 }
   0x3   :  { %11939 = sst [smem:[#allocation29_spill]] %s11907_s2 }
   0x4   :  { %11940 = sst [smem:[#allocation30_spill]] %s11908_s3 }
   0x5   :  { %11941 = sst [smem:[#allocation31_spill]] %s11909_s4 }
   0x6   :  { %11942 = sst [smem:[#allocation32_spill]] %s11911_s6 }
   0x7   :  { %11943 = sst [smem:[#allocation33_spill]] %s11914_s9 }
   0x8   :  { %11944 = sst [smem:[#allocation34_spill]] %s11915_s10 }
   0x9   :  { %11945 = sst [smem:[#allocation35_spill]] %s11916_s11 }
   0xa   :  { %11946 = sst [smem:[#allocation36_spill]] %s11925_s20 }
   0xb   :  { %25 = vsyncpa [#allocation4], 0 }
   0xc   :  { %26 = vsyncpa [#allocation6], 0 }
   0xd   :  { %27 = vsyncpa [#allocation9], 0 }
   0xe   :  { %28 = vsyncpa [#allocation12], 0 }
   0xf   :  { %29 = vsyncpa [#allocation15], 0 }
  0x10   :  { %30 = vsyncpa [#allocation18], 0  ;;  %s9797_s1 = smov 0  }
  0x11 LB: > { %11947 = sst [smem:[#allocation26_spill]] %s9672_s1  ;;  %s9803_s22 = sadd.s32 4294967295, %s9672_s1   ;;  %s9672_s1 = sphi %s9797_s1, %s36_s1  }
  0x12   : > { %p6381_p0 = scmp.ge.s32.totalorder %s9672_s1, 1  ;;  %p492_p1 = scmp.lt.s32.totalorder %s9672_s1, 3 }
  0x13   : > { %p11934_p2 = scmp.eq.s32.totalorder %s9803_s22, 0  ;;  %s9674_s24 = smov [#allocation5]  }
  0x14   : > { %p9808_p3 = pnand %p6381_p0, %p492_p1  ;;  %s529_s2 = sshll.u32 %s9674_s24, 4  ;;  %s9812_s2 = int_to_ptr.vmem [resolvable:$true] %s529_s2 }
  0x15   : > { %s9675_s25 = smov [#allocation8]   ;;  %s9676_s27 = smov [#allocation11]  }
  0x16   : > { %s11948_s23 = scalar_select %p9808_p3, 1, 0 }
  0x17   : > { %p9218_p4 = pneg %p9808_p3  ;;  %s555_s3 = sshll.u32 %s9675_s25, 4  ;;  %s9816_s3 = int_to_ptr.vmem [resolvable:$true] %s555_s3 }
  0x18   : > { %s590_s28 = sshll.u32 %s9676_s27, 4  ;;  %s9677_s4 = smov [#allocation14]   ;;  %s9824_s28 = int_to_ptr.vmem [resolvable:$true] %s590_s28 }
  0x19   : > { %p9820_p5 = pnand %p11934_p2, %p9218_p4  ;;  %s9826_s29 = sshll.u32 %s9677_s4, 4  ;;  %s617_s29 = int_to_ptr.vmem [resolvable:$true] %s9826_s29 }
  0x1a   : > { %s11950_s6 = sld [smem:[#allocation32_spill]] }
  0x1b   : > { %p9836_p7 = pneg %p9820_p5 }
  0x20   : > { %s9334_s21 = scalar_lea.hbm %s11950_s6, 5120 }
  0x21   : > { %p9335_p6 = scmp.ne.s32.totalorder %s11950_s6, %s9334_s21  ;;  %p9341_p10 = scmp.lt.u32.totalorder %s9334_s21, %s11950_s6 }
  0x23   : > { %p9337_p8 = pnand %p9836_p7, %p9335_p6 }
  0x25   : > { %p9338_p9 = pneg %p9337_p8 }
  0x27   : > { %p9343_p11 = pnand %p9341_p10, %p9338_p9 }
  0x29   : > { %9346 = shalt.err (!%p9343_p11)
}
  0x2a   : > { %s9347_s30 = scalar_lea.vmem %s9812_s2, 5120  ;;  %p9355_p1 = scmp.lt.s32.totalorder %s9812_s2, %s9812_s2 }
  0x2b   : > { %p9348_p12 = scmp.ne.s32.totalorder %s9812_s2, %s9347_s30  ;;  %p9356_p4 = scmp.lt.s32.totalorder %s9347_s30, %s9347_s30 }
  0x2d   : > { %p9350_p13 = pnand %p9348_p12, %p9836_p7  ;;  %p9357_p6 = por %p9356_p4, %p9355_p1 }
  0x2f   : > { %p9351_p0 = pneg %p9350_p13 }
  0x31   : > { %p9358_p8 = pnand %p9357_p6, %p9351_p0 }
  0x33   : > { %9361 = shalt.err (!%p9358_p8)
}
  0x34   : > { %s9678_s0 = smov 128   ;;  %s9679_s21 = smov 8  }
  0x35   : > { %9224 = dma.hbm_to_vmem [thread:$0]  (!%p9820_p5), %s11950_s6, 5120, %s9812_s2, [#allocation6], %s9678_s0, %s9678_s0, %s9679_s21  }
  0x36   : > { %s9362_s30 = scalar_lea.hbm %s11913_s8, 3072 }
  0x37   : > { %p9363_p9 = scmp.ne.s32.totalorder %s11913_s8, %s9362_s30  ;;  %p9369_p12 = scmp.lt.u32.totalorder %s9362_s30, %s11913_s8 }
  0x39   : > { %p9365_p10 = pnand %p9363_p9, %p9836_p7 }
  0x3b   : > { %p9366_p11 = pneg %p9365_p10 }
  0x3d   : > { %p9371_p13 = pnand %p9369_p12, %p9366_p11 }
  0x3f   : > { %9374 = shalt.err (!%p9371_p13)
}
  0x40   : > { %s9375_s2 = scalar_lea.vmem %s9816_s3, 3072  ;;  %p9383_p6 = scmp.lt.s32.totalorder %s9816_s3, %s9816_s3 }
  0x41   : > { %p9376_p0 = scmp.ne.s32.totalorder %s9816_s3, %s9375_s2  ;;  %p9384_p8 = scmp.lt.s32.totalorder %s9375_s2, %s9375_s2 }
  0x43   : > { %p9378_p1 = pnand %p9376_p0, %p9836_p7  ;;  %p9385_p9 = por %p9384_p8, %p9383_p6 }
  0x45   : > { %p9379_p4 = pneg %p9378_p1 }
  0x47   : > { %p9386_p10 = pnand %p9385_p9, %p9379_p4 }
  0x49   : > { %9389 = shalt.err (!%p9386_p10)
}
  0x4a   : > { %9230 = dma.hbm_to_vmem [thread:$0]  (!%p9820_p5), %s11913_s8, 3072, %s9816_s3, [#allocation9], %s9678_s0, %s9678_s0, %s9679_s21  }
  0x4b   : > { %s9390_s24 = scalar_lea.hbm %s11918_s13, 6144 }
  0x4c   : > { %p9391_p11 = scmp.ne.s32.totalorder %s11918_s13, %s9390_s24  ;;  %p9397_p0 = scmp.lt.u32.totalorder %s9390_s24, %s11918_s13 }
  0x4e   : > { %p9393_p12 = pnand %p9391_p11, %p9836_p7 }
  0x50   : > { %p9394_p13 = pneg %p9393_p12 }
  0x52   : > { %p9399_p1 = pnand %p9397_p0, %p9394_p13 }
  0x54   : > { %9402 = shalt.err (!%p9399_p1)
}
  0x55   : > { %s9403_s3 = scalar_lea.vmem %s9824_s28, 6144  ;;  %p9411_p9 = scmp.lt.s32.totalorder %s9824_s28, %s9824_s28 }
  0x56   : > { %p9404_p4 = scmp.ne.s32.totalorder %s9824_s28, %s9403_s3  ;;  %p9412_p10 = scmp.lt.s32.totalorder %s9403_s3, %s9403_s3 }
  0x58   : > { %p9406_p6 = pnand %p9404_p4, %p9836_p7  ;;  %p9413_p11 = por %p9412_p10, %p9411_p9 }
  0x5a   : > { %p9407_p8 = pneg %p9406_p6 }
  0x5c   : > { %p9414_p12 = pnand %p9413_p11, %p9407_p8 }
  0x5e   : > { %9417 = shalt.err (!%p9414_p12)
}
  0x5f   : > { %9236 = dma.hbm_to_vmem [thread:$0]  (!%p9820_p5), %s11918_s13, 6144, %s9824_s28, [#allocation12], %s9678_s0, %s9678_s0, %s9679_s21  }
  0x60   : > { %s9418_s20 = scalar_lea.hbm %s11920_s15, 6144 }
  0x61   : > { %p9419_p13 = scmp.ne.s32.totalorder %s11920_s15, %s9418_s20  ;;  %p9425_p4 = scmp.lt.u32.totalorder %s9418_s20, %s11920_s15 }
  0x63   : > { %p9421_p0 = pnand %p9419_p13, %p9836_p7 }
  0x65   : > { %p9422_p1 = pneg %p9421_p0 }
  0x67   : > { %p9427_p6 = pnand %p9425_p4, %p9422_p1 }
  0x69   : > { %9430 = shalt.err (!%p9427_p6)
}
  0x6a   : > { %s9431_s30 = scalar_lea.vmem %s617_s29, 6144  ;;  %p9439_p11 = scmp.lt.s32.totalorder %s617_s29, %s617_s29 }
  0x6b   : > { %p9432_p8 = scmp.ne.s32.totalorder %s617_s29, %s9431_s30  ;;  %p9440_p12 = scmp.lt.s32.totalorder %s9431_s30, %s9431_s30 }
  0x6d   : > { %p9434_p9 = pnand %p9432_p8, %p9836_p7  ;;  %p9441_p2 = por %p9440_p12, %p9439_p11 }
  0x6f   : > { %p9435_p10 = pneg %p9434_p9 }
  0x71   : > { %p9442_p3 = pnand %p9441_p2, %p9435_p10 }
  0x73   : > { %9445 = shalt.err (!%p9442_p3)
}
  0x74   : > { %9242 = dma.hbm_to_vmem [thread:$0]  (!%p9820_p5), %s11920_s15, 6144, %s617_s29, [#allocation15], %s9678_s0, %s9678_s0, %s9679_s21  }
  0x75   : > { %s9680_s2 = smov [#allocation17]   ;;  %s9681_s10 = smov [#allocation3]  }
  0x76   : > { %s642_s9 = sshll.u32 %s9680_s2, 4  ;;  %s510_s11 = sshll.u32 %s9681_s10, 4  ;;  %s643_s9 = int_to_ptr.vmem [resolvable:$true] %s642_s9  ;;  %s511_s11 = int_to_ptr.vmem [resolvable:$true] %s510_s11 }
  0x77   : > { %s9446_s25 = scalar_lea.hbm %s11922_s17, 6144 }
  0x78   : > { %p9447_p2 = scmp.ne.s32.totalorder %s11922_s17, %s9446_s25  ;;  %p9453_p0 = scmp.lt.u32.totalorder %s9446_s25, %s11922_s17 }
  0x7a   : > { %p9449_p3 = pnand %p9447_p2, %p9836_p7 }
  0x7c   : > { %p9450_p13 = pneg %p9449_p3 }
  0x7e   : > { %p9455_p1 = pnand %p9453_p0, %p9450_p13 }
  0x80   : > { %9458 = shalt.err (!%p9455_p1)
}
  0x81   : > { %s9459_s29 = scalar_lea.vmem %s643_s9, 6144  ;;  %p9467_p9 = scmp.lt.s32.totalorder %s643_s9, %s643_s9 }
  0x82   : > { %p9460_p4 = scmp.ne.s32.totalorder %s643_s9, %s9459_s29  ;;  %p9468_p10 = scmp.lt.s32.totalorder %s9459_s29, %s9459_s29 }
  0x84   : > { %p9462_p6 = pnand %p9460_p4, %p9836_p7  ;;  %p9469_p11 = por %p9468_p10, %p9467_p9 }
  0x86   : > { %p9463_p8 = pneg %p9462_p6 }
  0x88   : > { %p9470_p12 = pnand %p9469_p11, %p9463_p8 }
  0x8a   : > { %9473 = shalt.err (!%p9470_p12)
}
  0x8b   : > { %9248 = dma.hbm_to_vmem [thread:$0]  (!%p9820_p5), %s11922_s17, 6144, %s643_s9, [#allocation18], %s9678_s0, %s9678_s0, %s9679_s21  }
  0x8c   : > { %s11952_s24 = sld [smem:[#allocation30_spill]] }
  0x92   : > { %s9474_s25 = scalar_lea.hbm %s11952_s24, 384 }
  0x93   : > { %p9475_p2 = scmp.ne.s32.totalorder %s11952_s24, %s9474_s25  ;;  %p9481_p0 = scmp.lt.u32.totalorder %s9474_s25, %s11952_s24 }
  0x95   : > { %p9477_p3 = pnand %p9475_p2, %p9836_p7 }
  0x97   : > { %p9478_p13 = pneg %p9477_p3 }
  0x99   : > { %p9483_p1 = pnand %p9481_p0, %p9478_p13 }
  0x9b   : > { %9486 = shalt.err (!%p9483_p1)
}
  0x9c   : > { %s9487_s29 = scalar_lea.vmem %s511_s11, 384  ;;  %p9495_p9 = scmp.lt.s32.totalorder %s511_s11, %s511_s11 }
  0x9d   : > { %p9488_p4 = scmp.ne.s32.totalorder %s511_s11, %s9487_s29  ;;  %p9496_p10 = scmp.lt.s32.totalorder %s9487_s29, %s9487_s29 }
  0x9f   : > { %p9490_p6 = pnand %p9488_p4, %p9836_p7  ;;  %p9497_p11 = por %p9496_p10, %p9495_p9 }
  0xa1   : > { %p9491_p8 = pneg %p9490_p6 }
  0xa3   : > { %p9498_p12 = pnand %p9497_p11, %p9491_p8 }
  0xa5   : > { %9501 = shalt.err (!%p9498_p12)
}
  0xa6   : > { %9221 = dma.hbm_to_vmem [thread:$0]  (!%p9820_p5), %s11952_s24, 384, %s511_s11, [#allocation4], %s9678_s0, %s9678_s0, %s9679_s21  }
  0xa7   : > { %s9682_s2 = smov [#allocation7]   ;;  %s9683_s20 = smov [#allocation10]  }
  0xa8   : > { %s542_s10 = sshll.u32 %s9682_s2, 4  ;;  %s577_s25 = sshll.u32 %s9683_s20, 4  ;;  %s543_s10 = int_to_ptr.vmem [resolvable:$true] %s542_s10  ;;  %s578_s25 = int_to_ptr.vmem [resolvable:$true] %s577_s25 }
  0xa9   : > { %s9502_s30 = scalar_lea.hbm %s11912_s7, 10240 }
  0xaa   : > { %p9503_p2 = scmp.ne.s32.totalorder %s11912_s7, %s9502_s30  ;;  %p9509_p0 = scmp.lt.u32.totalorder %s9502_s30, %s11912_s7 }
  0xac   : > { %p9505_p3 = pnand %p9503_p2, %p9836_p7 }
  0xae   : > { %p9506_p13 = pneg %p9505_p3 }
  0xb0   : > { %p9511_p1 = pnand %p9509_p0, %p9506_p13 }
  0xb2   : > { %9514 = shalt.err (!%p9511_p1)
}
  0xb3   : > { %s9515_s11 = scalar_lea.vmem %s543_s10, 10240  ;;  %p9523_p9 = scmp.lt.s32.totalorder %s543_s10, %s543_s10 }
  0xb4   : > { %p9516_p4 = scmp.ne.s32.totalorder %s543_s10, %s9515_s11  ;;  %p9524_p10 = scmp.lt.s32.totalorder %s9515_s11, %s9515_s11 }
  0xb6   : > { %p9518_p6 = pnand %p9516_p4, %p9836_p7  ;;  %p9525_p11 = por %p9524_p10, %p9523_p9 }
  0xb8   : > { %p9519_p8 = pneg %p9518_p6 }
  0xba   : > { %p9526_p12 = pnand %p9525_p11, %p9519_p8 }
  0xbc   : > { %9529 = shalt.err (!%p9526_p12)
}
  0xbd   : > { %9227 = dma.hbm_to_vmem [thread:$0]  (!%p9820_p5), %s11912_s7, 10240, %s543_s10, [#allocation6], %s9678_s0, %s9678_s0, %s9679_s21  }
  0xbe   : > { %s9530_s27 = scalar_lea.hbm %s11917_s12, 9216 }
  0xbf   : > { %p9531_p2 = scmp.ne.s32.totalorder %s11917_s12, %s9530_s27  ;;  %p9537_p0 = scmp.lt.u32.totalorder %s9530_s27, %s11917_s12 }
  0xc1   : > { %p9533_p3 = pnand %p9531_p2, %p9836_p7 }
  0xc3   : > { %p9534_p13 = pneg %p9533_p3 }
  0xc5   : > { %p9539_p1 = pnand %p9537_p0, %p9534_p13 }
  0xc7   : > { %9542 = shalt.err (!%p9539_p1)
}
  0xc8   : > { %s9543_s9 = scalar_lea.vmem %s578_s25, 9216  ;;  %p9551_p9 = scmp.lt.s32.totalorder %s578_s25, %s578_s25 }
  0xc9   : > { %p9544_p4 = scmp.ne.s32.totalorder %s578_s25, %s9543_s9  ;;  %p9552_p10 = scmp.lt.s32.totalorder %s9543_s9, %s9543_s9 }
  0xcb   : > { %p9546_p6 = pnand %p9544_p4, %p9836_p7  ;;  %p9553_p11 = por %p9552_p10, %p9551_p9 }
  0xcd   : > { %p9547_p8 = pneg %p9546_p6 }
  0xcf   : > { %p9554_p12 = pnand %p9553_p11, %p9547_p8 }
  0xd1   : > { %9557 = shalt.err (!%p9554_p12)
}
  0xd2   : > { %9233 = dma.hbm_to_vmem [thread:$0]  (!%p9820_p5), %s11917_s12, 9216, %s578_s25, [#allocation9], %s9678_s0, %s9678_s0, %s9679_s21  }
  0xd3   : > { %s9684_s6 = smov [#allocation13]   ;;  %s9685_s2 = smov [#allocation16]  }
  0xd4   : > { %s603_s3 = sshll.u32 %s9684_s6, 4  ;;  %s629_s20 = sshll.u32 %s9685_s2, 4  ;;  %s604_s3 = int_to_ptr.vmem [resolvable:$true] %s603_s3  ;;  %s630_s20 = int_to_ptr.vmem [resolvable:$true] %s629_s20 }
  0xd5   : > { %s9558_s30 = scalar_lea.hbm %s11919_s14, 12288 }
  0xd6   : > { %p9559_p2 = scmp.ne.s32.totalorder %s11919_s14, %s9558_s30  ;;  %p9565_p0 = scmp.lt.u32.totalorder %s9558_s30, %s11919_s14 }
  0xd8   : > { %p9561_p3 = pnand %p9559_p2, %p9836_p7 }
  0xda   : > { %p9562_p13 = pneg %p9561_p3 }
  0xdc   : > { %p9567_p1 = pnand %p9565_p0, %p9562_p13 }
  0xde   : > { %9570 = shalt.err (!%p9567_p1)
}
  0xdf   : > { %s9571_s25 = scalar_lea.vmem %s604_s3, 12288  ;;  %p9579_p9 = scmp.lt.s32.totalorder %s604_s3, %s604_s3 }
  0xe0   : > { %p9572_p4 = scmp.ne.s32.totalorder %s604_s3, %s9571_s25  ;;  %p9580_p10 = scmp.lt.s32.totalorder %s9571_s25, %s9571_s25 }
  0xe2   : > { %p9574_p6 = pnand %p9572_p4, %p9836_p7  ;;  %p9581_p11 = por %p9580_p10, %p9579_p9 }
  0xe4   : > { %p9575_p8 = pneg %p9574_p6 }
  0xe6   : > { %p9582_p12 = pnand %p9581_p11, %p9575_p8 }
  0xe8   : > { %9585 = shalt.err (!%p9582_p12)
}
  0xe9   : > { %9239 = dma.hbm_to_vmem [thread:$0]  (!%p9820_p5), %s11919_s14, 12288, %s604_s3, [#allocation12], %s9678_s0, %s9678_s0, %s9679_s21  }
  0xea   : > { %s9586_s4 = scalar_lea.hbm %s11921_s16, 12288 }
  0xeb   : > { %p9587_p2 = scmp.ne.s32.totalorder %s11921_s16, %s9586_s4  ;;  %p9593_p0 = scmp.lt.u32.totalorder %s9586_s4, %s11921_s16 }
  0xed   : > { %p9589_p3 = pnand %p9587_p2, %p9836_p7 }
  0xef   : > { %p9590_p13 = pneg %p9589_p3 }
  0xf1   : > { %p9595_p1 = pnand %p9593_p0, %p9590_p13 }
  0xf3   : > { %9598 = shalt.err (!%p9595_p1)
}
  0xf4   : > { %s9599_s10 = scalar_lea.vmem %s630_s20, 12288  ;;  %p9607_p9 = scmp.lt.s32.totalorder %s630_s20, %s630_s20 }
  0xf5   : > { %p9600_p4 = scmp.ne.s32.totalorder %s630_s20, %s9599_s10  ;;  %p9608_p10 = scmp.lt.s32.totalorder %s9599_s10, %s9599_s10 }
  0xf7   : > { %p9602_p6 = pnand %p9600_p4, %p9836_p7  ;;  %p9609_p11 = por %p9608_p10, %p9607_p9 }
  0xf9   : > { %p9603_p8 = pneg %p9602_p6 }
  0xfb   : > { %p9610_p12 = pnand %p9609_p11, %p9603_p8 }
  0xfd   : > { %9613 = shalt.err (!%p9610_p12)
}
  0xfe   : > { %9245 = dma.hbm_to_vmem [thread:$0]  (!%p9820_p5), %s11921_s16, 12288, %s630_s20, [#allocation15], %s9678_s0, %s9678_s0, %s9679_s21  }
  0xff   : > { %s9686_s11 = smov [#allocation19]   ;;  %s9614_s4 = scalar_lea.hbm %s11923_s18, 6144 }
 0x100   : > { %s655_s6 = sshll.u32 %s9686_s11, 4  ;;  %p9615_p2 = scmp.ne.s32.totalorder %s11923_s18, %s9614_s4  ;;  %s656_s6 = int_to_ptr.vmem [resolvable:$true] %s655_s6 }
 0x101   : > { %p9621_p0 = scmp.lt.u32.totalorder %s9614_s4, %s11923_s18 }
 0x102   : > { %p9617_p3 = pnand %p9615_p2, %p9836_p7 }
 0x104   : > { %p9618_p13 = pneg %p9617_p3 }
 0x106   : > { %p9623_p1 = pnand %p9621_p0, %p9618_p13 }
 0x108   : > { %9626 = shalt.err (!%p9623_p1)
}
 0x109   : > { %s9627_s20 = scalar_lea.vmem %s656_s6, 6144  ;;  %p9635_p9 = scmp.lt.s32.totalorder %s656_s6, %s656_s6 }
 0x10a   : > { %p9628_p4 = scmp.ne.s32.totalorder %s656_s6, %s9627_s20  ;;  %p9636_p10 = scmp.lt.s32.totalorder %s9627_s20, %s9627_s20 }
 0x10c   : > { %p9630_p6 = pnand %p9628_p4, %p9836_p7  ;;  %p9637_p11 = por %p9636_p10, %p9635_p9 }
 0x10e   : > { %p9631_p8 = pneg %p9630_p6 }
 0x110   : > { %p9638_p12 = pnand %p9637_p11, %p9631_p8 }
 0x112   : > { %9641 = shalt.err (!%p9638_p12)
}
 0x113   : > { %9251 = dma.hbm_to_vmem [thread:$0]  (!%p9820_p5), %s11923_s18, 6144, %s656_s6, [#allocation18], %s9678_s0, %s9678_s0, %s9679_s21  }
 0x114   : > { %p11953_p2 = scmp.ne.s32.totalorder %s11948_s23, 0 }
 0x115   : > { %p11954_p7 = scmp.eq.s32.totalorder (!%p11953_p2), %s9803_s22, 0 }
 0x116   : > { %682 = sbr.rel (%p11953_p2) target bundleno = 10566 (0x2946), region = 100 }
 0x11d   : > { %9647 = dma.done.wait (%p11954_p7), [#allocation4], 384   ;;  %p11955_p3 = pmov %p11954_p7 }
 0x11f   : > { %9649 = vsyncadd (%p11955_p3), [#allocation4], 4294966912  ;;  %p11956_p13 = pmov %p11955_p3 }
 0x120   : > { %p11957_p0 = pmov %p11955_p3 }
 0x121   : > { %9651 = dma.done.wait (%p11956_p13), [#allocation6], 15360  }
 0x122   : > { %9653 = vsyncadd (%p11957_p0), [#allocation6], 4294951936  ;;  %p11958_p1 = pmov %p11957_p0 }
 0x123   : > { %p11959_p5 = pmov %p11957_p0 }
 0x124   : > { %9655 = dma.done.wait (%p11958_p1), [#allocation9], 12288  }
 0x125   : > { %9657 = vsyncadd (%p11959_p5), [#allocation9], 4294955008  ;;  %p11960_p4 = pmov %p11957_p0 }
 0x126   : > { %p11961_p6 = pmov %p11957_p0 }
 0x127   : > { %9659 = dma.done.wait (%p11960_p4), [#allocation12], 18432  }
 0x128   : > { %9661 = vsyncadd (%p11961_p6), [#allocation12], 4294948864  ;;  %p11962_p8 = pmov %p11957_p0 }
 0x129   : > { %p11963_p9 = pmov %p11957_p0 }
 0x12a   : > { %9663 = dma.done.wait (%p11962_p8), [#allocation15], 18432  }
 0x12b   : > { %9665 = vsyncadd (%p11963_p9), [#allocation15], 4294948864  ;;  %p11964_p10 = pmov %p11957_p0 }
 0x12c   : > { %p11965_p11 = pmov %p11957_p0 }
 0x12d   : > { %9667 = dma.done.wait (%p11964_p10), [#allocation18], 12288  }
 0x12e   : > { %9669 = vsyncadd (%p11965_p11), [#allocation18], 4294955008  ;;  %v9687_v0 = vmov 0.0   ;;  %s11966_s26 = sld [smem:[#allocation31_spill]]  ;;  %p780_p12 = scmp.lt.s32.totalorder %s9803_s22, 1  ;;  %vm804_vm0 = vcmask 1041408  }
 0x12f   : > { %792 = vst [vmem:[#allocation2] sm:$0x7] %v9687_v0  ;;  %803 = vst [vmem:[#allocation2 + $0x8] sm:$0x3] %v9687_v0  ;;  %s11967_s20 = sld [smem:[#allocation27_spill]]  ;;  %vm795_vm1 = vcmask 1042432  }
 0x130   : > { %812 = vst [vmem:[#allocation2 + $0x10] sm:$0x1] %v9687_v0  ;;  %823 = vst [vmem:[#allocation2 + $0x5f] sm:$0x1] %v9687_v0  ;;  %s11977_s22 = smov (!%p780_p12, %s9803_s22), 1  ;;  %vm813_vm2 = vcmask 1040384  }
 0x131   : > { %832 = vst [vmem:[#allocation2 + $0x60] sm:$0xc0] %v9687_v0  ;;  %841 = vst [vmem:[#allocation2 + $0x68] sm:$0xe0] %v9687_v0  ;;  %s11936_s3 = sshll.u32 %s11977_s22, 4  ;;  %vm833_vm3 = vcmask 1045504  }
 0x132   : > { %vm842_vm4 = vcmask 1044480   ;;  %vm824_vm5 = vcmask 1046528   ;;  %s9688_s25 = smov 0.0   ;;  %vm2060_vm6 = vcmask 523270   ;;  %s11968_s4 = sld [smem:[#allocation29_spill]]  ;;  %vm9690_vm7 = vmmov 0  }
 0x133   : > { %vm1962_vm8 = vcmask 130048   ;;  %vm2043_vm9 = vcmask 1040896   ;;  %vm2036_vm10 = vcmask 517120   ;;  %vm2051_vm11 = vcmask 523264  }
 0x134   : > { %v880_v1 = vld [vmem:[%s11966_s26 + $0x80] sm:$0xff]  ;;  %v881_v2 = vld [vmem:[%s11966_s26 + $0x88] sm:$0xff]  ;;  %v882_v12 = vld [vmem:[%s11966_s26 + $0x90] sm:$0xff]  ;;  %vm2064_vm12 = vcmask 521216   ;;  %vm2041_vm13 = vcmask 523266   ;;  %vm2058_vm14 = vcmask 1047040  }
 0x135   : > { %v864_v3 = vld [vmem:[%s11966_s26] sm:$0xff]  ;;  %v7947_v4 = vpack.c.bf16 %v881_v2, %v880_v1  ;;  %v865_v5 = vld [vmem:[%s11966_s26 + $0x8] sm:$0xff]  ;;  %v883_v14 = vld [vmem:[%s11966_s26 + $0x98] sm:$0xff]  ;;  %s10269_s10 = scalar_lea.vmem %s11967_s20, %s11936_s3  ;;  %vm2049_vm15 = vcmask 1048065  }
 0x136   : > { %v912_v6 = vld [vmem:[%s11966_s26 + $0x180] sm:$0xff]  ;;  %v913_v7 = vld [vmem:[%s11966_s26 + $0x188] sm:$0xff]  ;;  %v7949_v8 = vpack.c.bf16 %v865_v5, %v864_v3  ;;  %v866_v15 = vld [vmem:[%s11966_s26 + $0x10] sm:$0xff]  ;;  %v7951_v17 = vpack.c.bf16 %v883_v14, %v882_v12 }
 0x137   : > { %v7979_v9 = vpack.c.bf16 %v913_v7, %v912_v6  ;;  %v896_v10 = vld [vmem:[%s11966_s26 + $0x100] sm:$0xff]  ;;  %v897_v11 = vld [vmem:[%s11966_s26 + $0x108] sm:$0xff]  ;;  %7948 = vmatprep.subr.bf16.mxu0 %v7947_v4  ;;  %v867_v16 = vld [vmem:[%s11966_s26 + $0x18] sm:$0xff] }
 0x138   : > { %v7981_v13 = vpack.c.bf16 %v897_v11, %v896_v10  ;;  %7950 = vmatpush3.bf16.msra.mxu0 %v7949_v8  ;;  %v7953_v18 = vpack.c.bf16 %v867_v16, %v866_v15  ;;  %v914_v19 = vld [vmem:[%s11966_s26 + $0x190] sm:$0xff]  ;;  %v915_v20 = vld [vmem:[%s11966_s26 + $0x198] sm:$0xff]  ;;  %v884_v24 = vld [vmem:[%s11966_s26 + $0xa0] sm:$0xff] }
 0x139   : > { %7980 = vmatprep.subr.bf16.mxu1 %v7979_v9  ;;  %v898_v21 = vld [vmem:[%s11966_s26 + $0x110] sm:$0xff]  ;;  %v7983_v22 = vpack.c.bf16 %v915_v20, %v914_v19  ;;  %v899_v23 = vld [vmem:[%s11966_s26 + $0x118] sm:$0xff]  ;;  %v885_v25 = vld [vmem:[%s11966_s26 + $0xa8] sm:$0xff]  ;;  %7952 = vmatprep.subr.bf16.mxu0 %v7951_v17 }
 0x13a   : > { %7982 = vmatpush3.bf16.msra.mxu1 %v7981_v13  ;;  %v7985_v26 = vpack.c.bf16 %v899_v23, %v898_v21  ;;  %v7955_v27 = vpack.c.bf16 %v885_v25, %v884_v24  ;;  %v868_v28 = vld [vmem:[%s11966_s26 + $0x20] sm:$0xff]  ;;  %v869_v29 = vld [vmem:[%s11966_s26 + $0x28] sm:$0xff]  ;;  %v886_v36 = vld [vmem:[%s11966_s26 + $0xb0] sm:$0xff] }
 0x13b   : > { %v916_v30 = vld [vmem:[%s11966_s26 + $0x1a0] sm:$0xff]  ;;  %7984 = vmatprep.subr.bf16.mxu1 %v7983_v22  ;;  %v917_v31 = vld [vmem:[%s11966_s26 + $0x1a8] sm:$0xff]  ;;  %v7957_v34 = vpack.c.bf16 %v869_v29, %v868_v28  ;;  %v887_v37 = vld [vmem:[%s11966_s26 + $0xb8] sm:$0xff] }
 0x13c   : > { %v900_v32 = vld [vmem:[%s11966_s26 + $0x120] sm:$0xff]  ;;  %v901_v33 = vld [vmem:[%s11966_s26 + $0x128] sm:$0xff]  ;;  %7954 = vmatpush3.bf16.msra.mxu0 %v7953_v18  ;;  %v7987_v35 = vpack.c.bf16 %v917_v31, %v916_v30  ;;  %v870_v38 = vld [vmem:[%s11966_s26 + $0x30] sm:$0xff]  ;;  %v7959_v40 = vpack.c.bf16 %v887_v37, %v886_v36 }
 0x13d   : > { %7956 = vmatprep.subr.bf16.mxu0 %v7955_v27  ;;  %v7989_v39 = vpack.c.bf16 %v901_v33, %v900_v32  ;;  %v871_v41 = vld [vmem:[%s11966_s26 + $0x38] sm:$0xff]  ;;  %v918_v42 = vld [vmem:[%s11966_s26 + $0x1b0] sm:$0xff]  ;;  %v888_v47 = vld [vmem:[%s11966_s26 + $0xc0] sm:$0xff] }
 0x13e   : > { %7986 = vmatpush3.bf16.msra.mxu1 %v7985_v26  ;;  %v919_v43 = vld [vmem:[%s11966_s26 + $0x1b8] sm:$0xff]  ;;  %v902_v45 = vld [vmem:[%s11966_s26 + $0x130] sm:$0xff]  ;;  %v889_v48 = vld [vmem:[%s11966_s26 + $0xc8] sm:$0xff]  ;;  %v7961_v49 = vpack.c.bf16 %v871_v41, %v870_v38 }
 0x13f   : > { %7988 = vmatprep.subr.bf16.mxu1 %v7987_v35  ;;  %v7991_v44 = vpack.c.bf16 %v919_v43, %v918_v42  ;;  %v903_v46 = vld [vmem:[%s11966_s26 + $0x138] sm:$0xff]  ;;  %v920_v50 = vld [vmem:[%s11966_s26 + $0x1c0] sm:$0xff]  ;;  %v921_v51 = vld [vmem:[%s11966_s26 + $0x1c8] sm:$0xff]  ;;  %v7963_v53 = vpack.c.bf16 %v889_v48, %v888_v47 }
 0x140   : > { %7958 = vmatpush3.bf16.msra.mxu0 %v7957_v34  ;;  %v7993_v52 = vpack.c.bf16 %v903_v46, %v902_v45  ;;  %v872_v54 = vld [vmem:[%s11966_s26 + $0x40] sm:$0xff]  ;;  %v873_v55 = vld [vmem:[%s11966_s26 + $0x48] sm:$0xff]  ;;  %v7995_v57 = vpack.c.bf16 %v921_v51, %v920_v50  ;;  %v890_v59 = vld [vmem:[%s11966_s26 + $0xd0] sm:$0xff] }
 0x141   : > { %7960 = vmatprep.subr.bf16.mxu0 %v7959_v40  ;;  %v904_v56 = vld [vmem:[%s11966_s26 + $0x140] sm:$0xff]  ;;  %v905_v58 = vld [vmem:[%s11966_s26 + $0x148] sm:$0xff]  ;;  %v891_v60 = vld [vmem:[%s11966_s26 + $0xd8] sm:$0xff]  ;;  %v7965_v63 = vpack.c.bf16 %v873_v55, %v872_v54 }
 0x142   : > { %7990 = vmatpush3.bf16.msra.mxu1 %v7989_v39  ;;  %v922_v61 = vld [vmem:[%s11966_s26 + $0x1d0] sm:$0xff]  ;;  %v923_v62 = vld [vmem:[%s11966_s26 + $0x1d8] sm:$0xff]  ;;  %v7997_v2 = vpack.c.bf16 %v905_v58, %v904_v56  ;;  %v7967_v3 = vpack.c.bf16 %v891_v60, %v890_v59  ;;  %v892_v8 = vld [vmem:[%s11966_s26 + $0xe0] sm:$0xff] }
 0x143   : > { %7992 = vmatprep.subr.bf16.mxu1 %v7991_v44  ;;  %v874_v1 = vld [vmem:[%s11966_s26 + $0x50] sm:$0xff]  ;;  %v875_v4 = vld [vmem:[%s11966_s26 + $0x58] sm:$0xff]  ;;  %v7999_v7 = vpack.c.bf16 %v923_v62, %v922_v61  ;;  %v893_v9 = vld [vmem:[%s11966_s26 + $0xe8] sm:$0xff] }
 0x144   : > { %7962 = vmatpush3.bf16.msra.mxu0 %v7961_v49  ;;  %v906_v5 = vld [vmem:[%s11966_s26 + $0x150] sm:$0xff]  ;;  %v907_v6 = vld [vmem:[%s11966_s26 + $0x158] sm:$0xff]  ;;  %v924_v10 = vld [vmem:[%s11966_s26 + $0x1e0] sm:$0xff]  ;;  %v7969_v12 = vpack.c.bf16 %v875_v4, %v874_v1  ;;  %v7971_v15 = vpack.c.bf16 %v893_v9, %v892_v8 }
 0x145   : > { %7964 = vmatprep.subr.bf16.mxu0 %v7963_v53  ;;  %v925_v11 = vld [vmem:[%s11966_s26 + $0x1e8] sm:$0xff]  ;;  %v8001_v13 = vpack.c.bf16 %v907_v6, %v906_v5  ;;  %v10284_v14 = vld [vmem:[%s10269_s10] sm:$0xff]  ;;  %v894_v24 = vld [vmem:[%s11966_s26 + $0xf0] sm:$0xff] }
 0x146   : > { %7994 = vmatpush3.bf16.msra.mxu1 %v7993_v52  ;;  %v876_v16 = vld [vmem:[%s11966_s26 + $0x60] sm:$0xff]  ;;  %v877_v17 = vld [vmem:[%s11966_s26 + $0x68] sm:$0xff]  ;;  %v796_v19 = vrot.slane %v10284_v14, 5  ;;  %v805_v20 = vrot.slane %v10284_v14, 6  ;;  %v814_v21 = vrot.slane %v10284_v14, 7  ;;  %v8003_v22 = vpack.c.bf16 %v925_v11, %v924_v10  ;;  %v895_v25 = vld [vmem:[%s11966_s26 + $0xf8] sm:$0xff]  ;;  %1120 = vmatprep.mubr.f32.mxu1 %v10284_v14 }
 0x147   : > { %7996 = vmatprep.subr.bf16.mxu1 %v7995_v57  ;;  %v908_v18 = vld [vmem:[%s11966_s26 + $0x160] sm:$0xff]  ;;  %v909_v23 = vld [vmem:[%s11966_s26 + $0x168] sm:$0xff]  ;;  %v926_v26 = vld [vmem:[%s11966_s26 + $0x1f0] sm:$0xff]  ;;  %v7973_v28 = vpack.c.bf16 %v877_v17, %v876_v16  ;;  %v7975_v30 = vpack.c.bf16 %v895_v25, %v894_v24  ;;  %v834_v1 = vrot.slane %v10284_v14, 2 }
 0x148   : > { %7966 = vmatpush3.bf16.msra.mxu0 %v7965_v63  ;;  %v927_v27 = vld [vmem:[%s11966_s26 + $0x1f8] sm:$0xff]  ;;  %801 = vst [vmem:[#allocation2] sm:$0xf8] %v796_v19  ;;  %810 = vst [vmem:[#allocation2 + $0x8] sm:$0xfc] %v805_v20  ;;  %v8005_v29 = vpack.c.bf16 %v909_v23, %v908_v18  ;;  %v878_v31 = vld [vmem:[%s11966_s26 + $0x70] sm:$0xff] }
 0x149   : > { %7968 = vmatprep.subr.bf16.mxu0 %v7967_v3  ;;  %819 = vst [vmem:[#allocation2 + $0x10] sm:$0xfe] %v814_v21  ;;  %v879_v32 = vld [vmem:[%s11966_s26 + $0x78] sm:$0xff]  ;;  %v910_v33 = vld [vmem:[%s11966_s26 + $0x170] sm:$0xff]  ;;  %v8007_v34 = vpack.c.bf16 %v927_v27, %v926_v26  ;;  %v944_v36 = vld [vmem:[%s11966_s26 + $0x280] sm:$0xff] }
 0x14a   : > { %7998 = vmatpush3.bf16.msra.mxu1 %v7997_v2  ;;  %v911_v35 = vld [vmem:[%s11966_s26 + $0x178] sm:$0xff]  ;;  %v945_v37 = vld [vmem:[%s11966_s26 + $0x288] sm:$0xff]  ;;  %v960_v38 = vld [vmem:[%s11966_s26 + $0x300] sm:$0xff]  ;;  %v7977_v40 = vpack.c.bf16 %v879_v32, %v878_v31  ;;  %v843_v2 = vrot.slane %v10284_v14, 3 }
 0x14b   : > { %8000 = vmatprep.subr.bf16.mxu1 %v7999_v7  ;;  %v961_v39 = vld [vmem:[%s11966_s26 + $0x308] sm:$0xff]  ;;  %v928_v41 = vld [vmem:[%s11966_s26 + $0x200] sm:$0xff]  ;;  %v8009_v42 = vpack.c.bf16 %v911_v35, %v910_v33  ;;  %v8011_v43 = vpack.c.bf16 %v945_v37, %v944_v36  ;;  %v946_v45 = vld [vmem:[%s11966_s26 + $0x290] sm:$0xff] }
 0x14c   : > { %7970 = vmatpush3.bf16.msra.mxu0 %v7969_v12  ;;  %v929_v44 = vld [vmem:[%s11966_s26 + $0x208] sm:$0xff]  ;;  %v947_v46 = vld [vmem:[%s11966_s26 + $0x298] sm:$0xff]  ;;  %v8043_v50 = vpack.c.bf16 %v961_v39, %v960_v38  ;;  %v962_v51 = vld [vmem:[%s11966_s26 + $0x310] sm:$0xff] }
 0x14d   : > { %7972 = vmatprep.subr.bf16.mxu0 %v7971_v15  ;;  %v963_v52 = vld [vmem:[%s11966_s26 + $0x318] sm:$0xff]  ;;  %v8013_v53 = vpack.c.bf16 %v929_v44, %v928_v41  ;;  %v8015_v54 = vpack.c.bf16 %v947_v46, %v946_v45  ;;  %v930_v55 = vld [vmem:[%s11966_s26 + $0x210] sm:$0xff]  ;;  %v948_v57 = vld [vmem:[%s11966_s26 + $0x2a0] sm:$0xff] }
 0x14e   : > { %8002 = vmatpush3.bf16.msra.mxu1 %v8001_v13  ;;  %v931_v56 = vld [vmem:[%s11966_s26 + $0x218] sm:$0xff]  ;;  %v949_v58 = vld [vmem:[%s11966_s26 + $0x2a8] sm:$0xff]  ;;  %v8047_v59 = vpack.c.bf16 %v963_v52, %v962_v51  ;;  %v964_v60 = vld [vmem:[%s11966_s26 + $0x320] sm:$0xff] }
 0x14f   : > { %8004 = vmatprep.subr.bf16.mxu1 %v8003_v22  ;;  %v850_v47 = vld [vmem:[#allocation2] sm:$0xff]  ;;  %v851_v48 = vld [vmem:[#allocation2 + $0x8] sm:$0xff]  ;;  %v8017_v62 = vpack.c.bf16 %v931_v56, %v930_v55  ;;  %v8019_v3 = vpack.c.bf16 %v949_v58, %v948_v57  ;;  %v950_v9 = vld [vmem:[%s11966_s26 + $0x2b0] sm:$0xff] }
 0x150   : > { %7974 = vmatpush3.bf16.msra.mxu0 %v7973_v28  ;;  %v852_v49 = vld [vmem:[#allocation2 + $0x10] sm:$0xff]  ;;  %1045 = vmatprep.mubr.f32.mxu0 %v851_v48  ;;  %1344 = vst [vmem:[#allocation2 + $0x8] sm:$0x3] %v9687_v0  ;;  %1334 = vst [vmem:[#allocation2] sm:$0x7] %v9687_v0  ;;  %v965_v61 = vld [vmem:[%s11966_s26 + $0x328] sm:$0xff] }
 0x151   : > { %7976 = vmatprep.subr.bf16.mxu0 %v7975_v30  ;;  %1352 = vst [vmem:[#allocation2 + $0x10] sm:$0x1] %v9687_v0  ;;  %v10384_v63 = vld [vmem:[%s10269_s10 + $0x8] sm:$0xff]  ;;  %v932_v4 = vld [vmem:[%s11966_s26 + $0x220] sm:$0xff]  ;;  %v951_v10 = vld [vmem:[%s11966_s26 + $0x2b8] sm:$0xff]  ;;  %v8051_v11 = vpack.c.bf16 %v965_v61, %v964_v60 }
 0x152   : > { %8006 = vmatpush3.bf16.msra.mxu1 %v8005_v29  ;;  %v933_v5 = vld [vmem:[%s11966_s26 + $0x228] sm:$0xff]  ;;  %v806_v6 = vrot.slane %v10384_v63, 6  ;;  %v797_v7 = vrot.slane %v10384_v63, 5  ;;  %v815_v8 = vrot.slane %v10384_v63, 7  ;;  %v835_v12 = vrot.slane %v10384_v63, 2  ;;  %v966_v16 = vld [vmem:[%s11966_s26 + $0x330] sm:$0xff] }
 0x153   : > { %8008 = vmatprep.subr.bf16.mxu1 %v8007_v34  ;;  %v826_v13 = vrot.slane %v10384_v63, 1  ;;  %v844_v15 = vrot.slane %v10384_v63, 3  ;;  %v967_v17 = vld [vmem:[%s11966_s26 + $0x338] sm:$0xff]  ;;  %v8021_v23 = vpack.c.bf16 %v933_v5, %v932_v4  ;;  %v952_v27 = vld [vmem:[%s11966_s26 + $0x2c0] sm:$0xff]  ;;  %v953_v28 = vld [vmem:[%s11966_s26 + $0x2c8] sm:$0xff] }
 0x154   : > { %7978 = vmatpush3.bf16.msra.mxu0 %v7977_v40  ;;  %v807_v18 = vsel %vm804_vm0, %v805_v20, %v806_v6  ;;  %v798_v22 = vsel %vm795_vm1, %v796_v19, %v797_v7  ;;  %v816_v24 = vsel %vm813_vm2, %v814_v21, %v815_v8  ;;  %v836_v25 = vsel %vm833_vm3, %v834_v1, %v835_v12  ;;  %v934_v19 = vld [vmem:[%s11966_s26 + $0x230] sm:$0xff]  ;;  %v935_v26 = vld [vmem:[%s11966_s26 + $0x238] sm:$0xff]  ;;  %v968_v30 = vld [vmem:[%s11966_s26 + $0x340] sm:$0xff] }
 0x155   : > { %8012 = vmatprep.subr.bf16.mxu0 %v8011_v43  ;;  %840 = vst [vmem:[#allocation2 + $0x60] sm:$0x3f] %v835_v12  ;;  %831 = vst [vmem:[#allocation2 + $0x58] sm:$0x7f] %v826_v13  ;;  %v8023_v20 = vpack.c.bf16 %v951_v10, %v950_v9  ;;  %v845_v21 = vsel %vm842_vm4, %v843_v2, %v844_v15  ;;  %v8055_v29 = vpack.c.bf16 %v967_v17, %v966_v16  ;;  %v969_v31 = vld [vmem:[%s11966_s26 + $0x348] sm:$0xff]  ;;  %v936_v34 = vld [vmem:[%s11966_s26 + $0x240] sm:$0xff]  ;;  %v977_v8 = vlaneseq }
 0x156   : > { %8010 = vmatpush3.bf16.msra.mxu1 %v8009_v42  ;;  %849 = vst [vmem:[#allocation2 + $0x68] sm:$0x1f] %v844_v15  ;;  %v8025_v32 = vpack.c.bf16 %v935_v26, %v934_v19  ;;  %v8027_v33 = vpack.c.bf16 %v953_v28, %v952_v27  ;;  %v937_v35 = vld [vmem:[%s11966_s26 + $0x248] sm:$0xff]  ;;  %v954_v36 = vld [vmem:[%s11966_s26 + $0x2d0] sm:$0xff]  ;;  %v955_v37 = vld [vmem:[%s11966_s26 + $0x2d8] sm:$0xff]  ;;  %v8059_v38 = vpack.c.bf16 %v969_v31, %v968_v30  ;;  %v825_v6 = vrot.slane %v10284_v14, 1 }
 0x157   : > { %8044 = vmatprep.subr.bf16.mxu1 %v8043_v50  ;;  %1046 = vmatmul.mubr.f32.vlgmr.msra.gmra.mrb[0].mxu0 %v850_v47  ;;  %v970_v39 = vld [vmem:[%s11966_s26 + $0x350] sm:$0xff]  ;;  %v971_v40 = vld [vmem:[%s11966_s26 + $0x358] sm:$0xff]  ;;  %v8029_v44 = vpack.c.bf16 %v937_v35, %v936_v34  ;;  %v8031_v45 = vpack.c.bf16 %v955_v37, %v954_v36  ;;  %v956_v48 = vld [vmem:[%s11966_s26 + $0x2e0] sm:$0xff]  ;;  %v10511_v9 = vshrl.u32 %v977_v8, 7 }
 0x158   : > { %8014 = vmatpush3.bf16.msra.mxu0 %v8013_v53  ;;  %1050 = vmatprep.mubr.f32.mxu0 %v807_v18  ;;  %v938_v46 = vld [vmem:[%s11966_s26 + $0x250] sm:$0xff]  ;;  %v939_v47 = vld [vmem:[%s11966_s26 + $0x258] sm:$0xff]  ;;  %v972_v51 = vld [vmem:[%s11966_s26 + $0x360] sm:$0xff]  ;;  %v827_v7 = vsel %vm824_vm5, %v825_v6, %v826_v13 }
 0x159   : > { %1121 = vmatmul.mubr.f32.vlgmr.msra.gmra.mrb[0].mxu1 %v852_v49  ;;  %8016 = vmatprep.subr.bf16.mxu0 %v8015_v54  ;;  %v957_v49 = vld [vmem:[%s11966_s26 + $0x2e8] sm:$0xff]  ;;  %v8033_v53 = vpack.c.bf16 %v939_v47, %v938_v46  ;;  %v940_v55 = vld [vmem:[%s11966_s26 + $0x260] sm:$0xff]  ;;  %v958_v57 = vld [vmem:[%s11966_s26 + $0x2f0] sm:$0xff]  ;;  %v10514_v10 = vsub.s32 0, %v10511_v9 }
 0x15a   : > { %8046 = vmatpush3.bf16.msra.mxu1 %v8043_v50  ;;  %1125 = vmatprep.mubr.f32.mxu1 %v10384_v63  ;;  %v8063_v50 = vpack.c.bf16 %v971_v40, %v970_v39  ;;  %v973_v52 = vld [vmem:[%s11966_s26 + $0x368] sm:$0xff]  ;;  %v8035_v54 = vpack.c.bf16 %v957_v49, %v956_v48  ;;  %v959_v58 = vld [vmem:[%s11966_s26 + $0x2f8] sm:$0xff]  ;;  %v974_v60 = vld [vmem:[%s11966_s26 + $0x370] sm:$0xff] }
 0x15b   : > { %8048 = vmatprep.subr.bf16.mxu1 %v8047_v59  ;;  %1051 = vmatmul.mubr.f32.gmra.mrb[2].mxu0 %v798_v22  ;;  %v941_v56 = vld [vmem:[%s11966_s26 + $0x268] sm:$0xff]  ;;  %v975_v61 = vld [vmem:[%s11966_s26 + $0x378] sm:$0xff]  ;;  %v8039_v1 = vpack.c.bf16 %v959_v58, %v958_v57  ;;  %v942_v2 = vld [vmem:[%s11966_s26 + $0x270] sm:$0xff] }
 0x15c   : > { %8018 = vmatpush3.bf16.msra.mxu0 %v8017_v62  ;;  %1195 = vmatprep.mubr.f32.mxu0 %v836_v25  ;;  %v862_v41 = vld [vmem:[#allocation2 + $0x60] sm:$0xff]  ;;  %v861_v42 = vld [vmem:[#allocation2 + $0x58] sm:$0xff]  ;;  %v8037_v62 = vpack.c.bf16 %v941_v56, %v940_v55  ;;  %v8071_v4 = vpack.c.bf16 %v975_v61, %v974_v60  ;;  %v1449_v47 = vld [vmem:[%s11910_s5 + $0x188] sm:$0xff] }
 0x15d   : > { %8020 = vmatprep.subr.bf16.mxu0 %v8019_v3  ;;  %1126 = vmatmul.mubr.f32.gmra.mrb[2].mxu1 %v816_v24  ;;  %v863_v43 = vld [vmem:[#allocation2 + $0x68] sm:$0xff]  ;;  %1370 = vst [vmem:[#allocation2 + $0x60] sm:$0xc0] %v9687_v0  ;;  %1362 = vst [vmem:[#allocation2 + $0x5f] sm:$0x1] %v9687_v0  ;;  %v943_v3 = vld [vmem:[%s11966_s26 + $0x278] sm:$0xff] }
 0x15e   : > { %8050 = vmatpush3.bf16.msra.mxu1 %v8047_v59  ;;  %7524 = vmatprep.mubr.f32.mxu1 %v845_v21  ;;  %1378 = vst [vmem:[#allocation2 + $0x68] sm:$0xe0] %v9687_v0  ;;  %v8067_v59 = vpack.c.bf16 %v973_v52, %v972_v51  ;;  %v8041_v5 = vpack.c.bf16 %v943_v3, %v942_v2  ;;  %v10519_v14 = vld [vmem:[%s11924_s19] sm:$0x7]  ;;  %v1433_v52 = vld [vmem:[%s11910_s5 + $0x108] sm:$0xff]  ;;  %v1450_v57 = vld [vmem:[%s11910_s5 + $0x190] sm:$0xff] }
 0x15f   : > { %8052 = vmatprep.subr.bf16.mxu1 %v8051_v11  ;;  %v980_v63 = vrot.slane %v10519_v14, %v10514_v10  ;;  %v1448_v46 = vld [vmem:[%s11910_s5 + $0x180] sm:$0xff]  ;;  %v1401_v56 = vld [vmem:[%s11910_s5 + $0x8] sm:$0xff]  ;;  %v1418_v60 = vld [vmem:[%s11910_s5 + $0x90] sm:$0xff] }
 0x160   : > { %8022 = vmatpush3.bf16.msra.mxu0 %v8021_v23  ;;  %v1416_v48 = vld [vmem:[%s11910_s5 + $0x80] sm:$0xff]  ;;  %v8107_v49 = vpack.c.bf16 %v1449_v47, %v1448_v46  ;;  %v1419_v61 = vld [vmem:[%s11910_s5 + $0x98] sm:$0xff]  ;;  %v1434_v2 = vld [vmem:[%s11910_s5 + $0x110] sm:$0xff] }
 0x161   : > { %8024 = vmatprep.subr.bf16.mxu0 %v8023_v20  ;;  %v1432_v51 = vld [vmem:[%s11910_s5 + $0x100] sm:$0xff]  ;;  %v1435_v3 = vld [vmem:[%s11910_s5 + $0x118] sm:$0xff]  ;;  %v1453_v8 = vld [vmem:[%s11910_s5 + $0x1a8] sm:$0xff] }
 0x162   : > { %8054 = vmatpush3.bf16.msra.mxu1 %v8051_v11  ;;  %v1400_v55 = vld [vmem:[%s11910_s5] sm:$0xff]  ;;  %v1403_v6 = vld [vmem:[%s11910_s5 + $0x18] sm:$0xff] }
 0x163   : > { %8056 = vmatprep.subr.bf16.mxu1 %v8055_v29  ;;  %v8077_v58 = vpack.c.bf16 %v1401_v56, %v1400_v55  ;;  %v1441_v56 = vld [vmem:[%s11910_s5 + $0x148] sm:$0xff] }
 0x164   : > { %8026 = vmatpush3.bf16.msra.mxu0 %v8025_v32 }
 0x165   : > { %8028 = vmatprep.subr.bf16.mxu0 %v8027_v33 }
 0x166   : > { %8058 = vmatpush3.bf16.msra.mxu1 %v8055_v29 }
 0x167   : > { %8060 = vmatprep.subr.bf16.mxu1 %v8059_v38 }
 0x168   : > { %8030 = vmatpush3.bf16.msra.mxu0 %v8029_v44 }
 0x169   : > { %8032 = vmatprep.subr.bf16.mxu0 %v8031_v45 }
 0x16a   : > { %8062 = vmatpush3.bf16.msra.mxu1 %v8059_v38 }
 0x16b   : > { %8064 = vmatprep.subr.bf16.mxu1 %v8063_v50 }
 0x16c   : > { %8034 = vmatpush3.bf16.msra.mxu0 %v8033_v53 }
 0x16d   : > { %8036 = vmatprep.subr.bf16.mxu0 %v8035_v54  ;;  %v8109_v54 = vpack.c.bf16 %v1433_v52, %v1432_v51  ;;  %v1424_v52 = vld [vmem:[%s11910_s5 + $0xc0] sm:$0xff] }
 0x16e   : > { %8066 = vmatpush3.bf16.msra.mxu1 %v8063_v50  ;;  %v1417_v50 = vld [vmem:[%s11910_s5 + $0x88] sm:$0xff] }
 0x16f   : > { %8068 = vmatprep.subr.bf16.mxu1 %v8067_v59  ;;  %v8075_v53 = vpack.c.bf16 %v1417_v50, %v1416_v48  ;;  %v1456_v48 = vld [vmem:[%s11910_s5 + $0x1c0] sm:$0xff] }
 0x170   : > { %8038 = vmatpush3.bf16.msra.mxu0 %v8037_v62 }
 0x171   : > { %8040 = vmatprep.subr.bf16.mxu0 %v8039_v1  ;;  %v8079_v1 = vpack.c.bf16 %v1419_v61, %v1418_v60 }
 0x172   : > { %8070 = vmatpush3.bf16.msra.mxu1 %v8067_v59  ;;  %v1451_v59 = vld [vmem:[%s11910_s5 + $0x198] sm:$0xff] }
 0x173   : > { %8072 = vmatprep.subr.bf16.mxu1 %v8071_v4  ;;  %v8111_v62 = vpack.c.bf16 %v1451_v59, %v1450_v57  ;;  %v1408_v57 = vld [vmem:[%s11910_s5 + $0x40] sm:$0xff] }
 0x174   : > { %8042 = vmatpush3.bf16.msra.mxu0 %v8041_v5  ;;  %v8113_v5 = vpack.c.bf16 %v1435_v3, %v1434_v2  ;;  %v1426_v3 = vld [vmem:[%s11910_s5 + $0xd0] sm:$0xff] }
 0x175   : > { %8076 = vmatprep.subr.bf16.mxu0 %v8075_v53  ;;  %v1425_v53 = vld [vmem:[%s11910_s5 + $0xc8] sm:$0xff] }
 0x176   : > { %8074 = vmatpush3.bf16.msra.mxu1 %v8071_v4  ;;  %v1402_v4 = vld [vmem:[%s11910_s5 + $0x10] sm:$0xff]  ;;  %v8091_v55 = vpack.c.bf16 %v1425_v53, %v1424_v52 }
 0x177   : > { %1196 = vmatmul.mubr.f32.vlgmr.msra.gmra.mrb[4].mxu0 %v827_v7  ;;  %8108 = vmatprep.subr.bf16.mxu1 %v8107_v49  ;;  %v1452_v7 = vld [vmem:[%s11910_s5 + $0x1a0] sm:$0xff]  ;;  %v1457_v49 = vld [vmem:[%s11910_s5 + $0x1c8] sm:$0xff] }
 0x178   : > { %1200 = vmatprep.mubr.f32.mxu0 %v862_v41  ;;  %8078 = vmatpush3.bf16.msra.mxu0 %v8077_v58  ;;  %v8123_v51 = vpack.c.bf16 %v1457_v49, %v1456_v48  ;;  %v1409_v58 = vld [vmem:[%s11910_s5 + $0x48] sm:$0xff] }
 0x179   : > { %7525 = vmatmul.mubr.f32.vlgmr.msra.gmra.mrb[4].mxu1 %v863_v43  ;;  %8080 = vmatprep.subr.bf16.mxu0 %v8079_v1  ;;  %v8093_v61 = vpack.c.bf16 %v1409_v58, %v1408_v57  ;;  %v1459_v1 = vld [vmem:[%s11910_s5 + $0x1d8] sm:$0xff] }
 0x17a   : > { %8110 = vmatpush3.bf16.msra.mxu1 %v8109_v54  ;;  %v1440_v54 = vld [vmem:[%s11910_s5 + $0x140] sm:$0xff] }
 0x17b   : > { %1201 = vmatmul.mubr.f32.gmra.mrb[6].mxu0 %v861_v42  ;;  %8112 = vmatprep.subr.bf16.mxu1 %v8111_v62  ;;  %v8125_v60 = vpack.c.bf16 %v1441_v56, %v1440_v54  ;;  %v1458_v62 = vld [vmem:[%s11910_s5 + $0x1d0] sm:$0xff] }
 0x17c   : > { %v8127_v2 = vpack.c.bf16 %v1459_v1, %v1458_v62 }
 0x17e   : > { %8114 = vmatpush3.bf16.msra.mxu1 %v8113_v5  ;;  %v1442_v5 = vld [vmem:[%s11910_s5 + $0x150] sm:$0xff] }
 0x22a   : > { %v6497_v11 = vpop.f32.mrb[0].mxu0 }
 0x22b   : > { %v6498_v12 = vpop.f32.mrb[1].mxu0 }
 0x22c   : > { %v6535_v13 = vpop.f32.mrb[0].mxu1  ;;  %v6499_v15 = vadd.f32 %v6498_v12, %v6497_v11  ;;  %v8081_v11 = vpack.c.bf16 %v1403_v6, %v1402_v4  ;;  %v1427_v4 = vld [vmem:[%s11910_s5 + $0xd8] sm:$0xff] }
 0x22d   : > { %v6536_v16 = vpop.f32.mrb[1].mxu1  ;;  %v8095_v6 = vpack.c.bf16 %v1427_v4, %v1426_v3 }
 0x22e   : > { %v6537_v17 = vadd.f32 %v6536_v16, %v6535_v13  ;;  %v1048_v18 = vadd.f32 %v6499_v15, %v980_v63  ;;  %v6500_v23 = vpop.f32.mrb[2].mxu0  ;;  %8082 = vmatpush3.bf16.msra.mxu0 %v8081_v11  ;;  %v1411_v11 = vld [vmem:[%s11910_s5 + $0x58] sm:$0xff] }
 0x22f   : > { %v6501_v24 = vpop.f32.mrb[3].mxu0 }
 0x230   : > { %v1123_v22 = vadd.f32 %v6537_v17, %v1048_v18  ;;  %v6538_v25 = vpop.f32.mrb[2].mxu1  ;;  %v6502_v20 = vadd.f32 %v6501_v24, %v6500_v23  ;;  %v1421_v23 = vld [vmem:[%s11910_s5 + $0xa8] sm:$0xff]  ;;  %v1436_v24 = vld [vmem:[%s11910_s5 + $0x120] sm:$0xff] }
 0x231   : > { %v6539_v19 = vpop.f32.mrb[3].mxu1 }
 0x232   : > { %v6540_v26 = vadd.f32 %v6539_v19, %v6538_v25  ;;  %v1053_v21 = vadd.f32 %v6502_v20, %v980_v63  ;;  %v8115_v63 = vpack.c.bf16 %v1453_v8, %v1452_v7  ;;  %v1437_v20 = vld [vmem:[%s11910_s5 + $0x128] sm:$0xff]  ;;  %v1404_v19 = vld [vmem:[%s11910_s5 + $0x20] sm:$0xff]  ;;  %v1443_v7 = vld [vmem:[%s11910_s5 + $0x158] sm:$0xff] }
 0x233   : > { %v1410_v8 = vld [vmem:[%s11910_s5 + $0x50] sm:$0xff] }
 0x234   : > { %v1128_v27 = vadd.f32 %v6540_v26, %v1053_v21  ;;  %8116 = vmatprep.subr.bf16.mxu1 %v8115_v63  ;;  %v1405_v26 = vld [vmem:[%s11910_s5 + $0x28] sm:$0xff]  ;;  %v8129_v63 = vpack.c.bf16 %v1443_v7, %v1442_v5 }
 0x24a   : > { %v6573_v28 = vpop.f32.mrb[4].mxu0 }
 0x24b   : > { %v6574_v29 = vpop.f32.mrb[5].mxu0 }
 0x24c   : > { %v7526_v30 = vpop.f32.mrb[4].mxu1  ;;  %v6575_v31 = vadd.f32 %v6574_v29, %v6573_v28  ;;  %v8117_v28 = vpack.c.bf16 %v1437_v20, %v1436_v24  ;;  %v8085_v29 = vpack.c.bf16 %v1405_v26, %v1404_v19  ;;  %v1445_v24 = vld [vmem:[%s11910_s5 + $0x168] sm:$0xff] }
 0x24d   : > { %v1272_v32 = vpop.f32.mrb[5].mxu1  ;;  %v1413_v20 = vld [vmem:[%s11910_s5 + $0x68] sm:$0xff] }
 0x24e   : > { %v6576_v33 = vpop.f32.mrb[6].mxu0  ;;  %v1198_v34 = vadd.f32 %v6575_v31, %v1123_v22  ;;  %v1420_v22 = vld [vmem:[%s11910_s5 + $0xa0] sm:$0xff]  ;;  %v1455_v31 = vld [vmem:[%s11910_s5 + $0x1b8] sm:$0xff]  ;;  %8118 = vmatpush3.bf16.msra.mxu1 %v8117_v28 }
 0x24f   : > { %v6577_v35 = vpop.f32.mrb[7].mxu0  ;;  %v8083_v25 = vpack.c.bf16 %v1421_v23, %v1420_v22  ;;  %v1444_v22 = vld [vmem:[%s11910_s5 + $0x160] sm:$0xff] }
 0x250   : > { %v6578_v36 = vadd.f32 %v6577_v35, %v6576_v33  ;;  %v1273_v37 = vadd.f32 %v1272_v32, %v1198_v34  ;;  %v1422_v35 = vld [vmem:[%s11910_s5 + $0xb0] sm:$0xff]  ;;  %v8133_v19 = vpack.c.bf16 %v1445_v24, %v1444_v22 }
 0x251   : > { %8084 = vmatprep.subr.bf16.mxu0 %v8083_v25  ;;  %v1412_v25 = vld [vmem:[%s11910_s5 + $0x60] sm:$0xff]  ;;  %v1466_v22 = vld [vmem:[%s11910_s5 + $0x210] sm:$0xff] }
 0x252   : > { %v1203_v38 = vadd.f32 %v6578_v36, %v1128_v27  ;;  %v10523_v40 = vmax.f32 %v1273_v37, 0.0  ;;  %8086 = vmatpush3.bf16.msra.mxu0 %v8085_v29  ;;  %v1423_v36 = vld [vmem:[%s11910_s5 + $0xb8] sm:$0xff]  ;;  %v1438_v37 = vld [vmem:[%s11910_s5 + $0x130] sm:$0xff]  ;;  %v8101_v26 = vpack.c.bf16 %v1413_v20, %v1412_v25 }
 0x253   : > { %v1430_v29 = vld [vmem:[%s11910_s5 + $0xf0] sm:$0xff]  ;;  %v1467_v20 = vld [vmem:[%s11910_s5 + $0x218] sm:$0xff] }
 0x254   : > { %v1278_v39 = vadd.f32 %v7526_v30, %v1203_v38  ;;  %v1293_v44 = vmul.f32 %v10523_v40, %v10523_v40  ;;  %v1454_v30 = vld [vmem:[%s11910_s5 + $0x1b0] sm:$0xff]  ;;  %v8087_v38 = vpack.c.bf16 %v1423_v36, %v1422_v35  ;;  %v1415_v35 = vld [vmem:[%s11910_s5 + $0x78] sm:$0xff] }
 0x255   : > { %v8119_v34 = vpack.c.bf16 %v1455_v31, %v1454_v30  ;;  %v1431_v30 = vld [vmem:[%s11910_s5 + $0xf8] sm:$0xff]  ;;  %v1446_v31 = vld [vmem:[%s11910_s5 + $0x170] sm:$0xff] }
 0x256   : > { %v10525_v41 = vmax.f32 %v1278_v39, 0.0  ;;  %v1439_v39 = vld [vmem:[%s11910_s5 + $0x138] sm:$0xff]  ;;  %8088 = vmatprep.subr.bf16.mxu0 %v8087_v38  ;;  %v1496_v38 = vld [vmem:[%s11910_s5 + $0x300] sm:$0xff] }
 0x257   : > { %8120 = vmatprep.subr.bf16.mxu1 %v8119_v34  ;;  %v8121_v46 = vpack.c.bf16 %v1439_v39, %v1438_v37  ;;  %v1414_v34 = vld [vmem:[%s11910_s5 + $0x70] sm:$0xff]  ;;  %v1497_v39 = vld [vmem:[%s11910_s5 + $0x308] sm:$0xff] }
 0x258   : > { %v1283_v42 = vadd.f32 %v10525_v41, %v10523_v40  ;;  %v1294_v43 = vmul.f32 %v10525_v41, %v10525_v41  ;;  %v8105_v37 = vpack.c.bf16 %v1415_v35, %v1414_v34  ;;  %v8145_v34 = vpack.c.bf16 %v1467_v20, %v1466_v22  ;;  %v1468_v35 = vld [vmem:[%s11910_s5 + $0x220] sm:$0xff]  ;;  %v1494_v22 = vld [vmem:[%s11910_s5 + $0x2f0] sm:$0xff] }
 0x259   : > { %8122 = vmatpush3.bf16.msra.mxu1 %v8121_v46 }
 0x25a   : > { %1284 = vadd.xlane.f32.xlu0 %v1283_v42  ;;  %v1295_v45 = vadd.f32 %v1294_v43, %v1293_v44  ;;  %v1406_v42 = vld [vmem:[%s11910_s5 + $0x30] sm:$0xff]  ;;  %v1407_v43 = vld [vmem:[%s11910_s5 + $0x38] sm:$0xff]  ;;  %8124 = vmatprep.subr.bf16.mxu1 %v8123_v51 }
 0x25b   : > { %v8089_v47 = vpack.c.bf16 %v1407_v43, %v1406_v42  ;;  %v10731_v42 = vpack.c.bf16 %v1497_v39, %v1496_v38  ;;  %v1480_v43 = vld [vmem:[%s11910_s5 + $0x280] sm:$0xff]  ;;  %v1469_v39 = vld [vmem:[%s11910_s5 + $0x228] sm:$0xff] }
 0x25d   : > { %8090 = vmatpush3.bf16.msra.mxu0 %v8089_v47  ;;  %8126 = vmatpush3.bf16.msra.mxu1 %v8125_v60 }
 0x25e   : > { %1296 = vadd.xlane.f32.xlu0 %v1295_v45  ;;  %8092 = vmatprep.subr.bf16.mxu0 %v8091_v55  ;;  %v10747_v55 = vsub.s32 2, %v10511_v9 }
 0x25f   : > { %8128 = vmatprep.subr.bf16.mxu1 %v8127_v2 }
 0x261   : > { %8094 = vmatpush3.bf16.msra.mxu0 %v8093_v61  ;;  %8130 = vmatpush3.bf16.msra.mxu1 %v8129_v63  ;;  %v1464_v63 = vld [vmem:[%s11910_s5 + $0x200] sm:$0xff] }
 0x262   : > { %8096 = vmatprep.subr.bf16.mxu0 %v8095_v6 }
 0x2e7   : > { %v1285_v12 = vpop.xlane.xlu0 %1284 }
 0x2e8   : > { %v1286_v13 = vrot.slane %v1285_v12, 4 }
 0x2ea   : > { %v1287_v15 = vadd.f32 %v1286_v13, %v1285_v12  ;;  %v8097_v12 = vpack.c.bf16 %v1411_v11, %v1410_v8  ;;  %v1460_v13 = vld [vmem:[%s11910_s5 + $0x1e0] sm:$0xff] }
 0x2eb   : > { %v1297_v16 = vpop.xlane.xlu0 %1296 }
 0x2ec   : > { %v1288_v17 = vrot.slane %v1287_v15, 2  ;;  %v1298_v18 = vrot.slane %v1297_v16, 4  ;;  %8098 = vmatpush3.bf16.msra.mxu0 %v8097_v12  ;;  %v1465_v12 = vld [vmem:[%s11910_s5 + $0x208] sm:$0xff] }
 0x2ed   : > { %v8141_v25 = vpack.c.bf16 %v1465_v12, %v1464_v63 }
 0x2ee   : > { %v1299_v21 = vadd.f32 %v1298_v18, %v1297_v16  ;;  %v1289_v27 = vadd.f32 %v1288_v17, %v1287_v15  ;;  %v1461_v15 = vld [vmem:[%s11910_s5 + $0x1e8] sm:$0xff]  ;;  %v1428_v17 = vld [vmem:[%s11910_s5 + $0xe0] sm:$0xff] }
 0x2ef   : > { %v8131_v16 = vpack.c.bf16 %v1461_v15, %v1460_v13  ;;  %v1429_v18 = vld [vmem:[%s11910_s5 + $0xe8] sm:$0xff]  ;;  %v1498_v13 = vld [vmem:[%s11910_s5 + $0x310] sm:$0xff]  ;;  %v1499_v15 = vld [vmem:[%s11910_s5 + $0x318] sm:$0xff] }
 0x2f0   : > { %v1300_v32 = vrot.slane %v1299_v21, 2  ;;  %v1290_v33 = vrot.slane %v1289_v27, 1  ;;  %v8099_v23 = vpack.c.bf16 %v1429_v18, %v1428_v17  ;;  %v1483_v17 = vld [vmem:[%s11910_s5 + $0x298] sm:$0xff] }
 0x2f1   : > { %8132 = vmatprep.subr.bf16.mxu1 %v8131_v16  ;;  %v1482_v16 = vld [vmem:[%s11910_s5 + $0x290] sm:$0xff] }
 0x2f2   : > { %v1291_v44 = vadd.f32 %v1290_v33, %v1289_v27  ;;  %v1301_v45 = vadd.f32 %v1300_v32, %v1299_v21  ;;  %8100 = vmatprep.subr.bf16.mxu0 %v8099_v23  ;;  %v1462_v21 = vld [vmem:[%s11910_s5 + $0x1f0] sm:$0xff]  ;;  %v1463_v27 = vld [vmem:[%s11910_s5 + $0x1f8] sm:$0xff]  ;;  %8134 = vmatpush3.bf16.msra.mxu1 %v8133_v19  ;;  %v8103_v32 = vpack.c.bf16 %v1431_v30, %v1430_v29  ;;  %v1501_v29 = vld [vmem:[%s11910_s5 + $0x328] sm:$0xff] }
 0x2f3   : > { %8102 = vmatpush3.bf16.msra.mxu0 %v8101_v26  ;;  %v8135_v28 = vpack.c.bf16 %v1463_v27, %v1462_v21  ;;  %v1447_v33 = vld [vmem:[%s11910_s5 + $0x178] sm:$0xff]  ;;  %v8175_v21 = vpack.c.bf16 %v1499_v15, %v1498_v13  ;;  %v8143_v27 = vpack.c.bf16 %v1483_v17, %v1482_v16  ;;  %v1484_v30 = vld [vmem:[%s11910_s5 + $0x2a0] sm:$0xff]  ;;  %v1477_v16 = vld [vmem:[%s11910_s5 + $0x268] sm:$0xff] }
 0x2f4   : > { %9090 = vpush %v1291_v44  ;;  %v1302_v50 = vrot.slane %v1301_v45, 1  ;;  %v8137_v36 = vpack.c.bf16 %v1447_v33, %v1446_v31  ;;  %8104 = vmatprep.subr.bf16.mxu0 %v8103_v32  ;;  %v1481_v44 = vld [vmem:[%s11910_s5 + $0x288] sm:$0xff]  ;;  %v1476_v13 = vld [vmem:[%s11910_s5 + $0x260] sm:$0xff]  ;;  %v1510_v17 = vld [vmem:[%s11910_s5 + $0x370] sm:$0xff] }
 0x2f5   : > { %8136 = vmatprep.subr.bf16.mxu1 %v8135_v28  ;;  %v1500_v28 = vld [vmem:[%s11910_s5 + $0x320] sm:$0xff]  ;;  %v1485_v31 = vld [vmem:[%s11910_s5 + $0x2a8] sm:$0xff] }
 0x2f6   : > { %v1303_v59 = vadd.f32 %v1302_v50, %v1301_v45  ;;  %8138 = vmatpush3.bf16.msra.mxu1 %v8137_v36  ;;  %v8139_v45 = vpack.c.bf16 %v1481_v44, %v1480_v43  ;;  %v10743_v50 = vsub.s32 1, %v10511_v9  ;;  %v8147_v38 = vpack.c.bf16 %v1485_v31, %v1484_v30  ;;  %v1503_v43 = vld [vmem:[%s11910_s5 + $0x338] sm:$0xff]  ;;  %v1486_v44 = vld [vmem:[%s11910_s5 + $0x2b0] sm:$0xff] }
 0x2f7   : > { %8106 = vmatpush3.bf16.msra.mxu0 %v8105_v37  ;;  %8172 = vmatprep.subr.bf16.mxu1 %v10731_v42  ;;  %v8179_v37 = vpack.c.bf16 %v1501_v29, %v1500_v28  ;;  %v10931_v29 = vld [vmem:[%s11924_s19 + $0x3] sm:$0x7] }
 0x2f8   : > { %9092 = vpush %v1303_v59  ;;  %8140 = vmatprep.subr.bf16.mxu0 %v8139_v45  ;;  %v1487_v45 = vld [vmem:[%s11910_s5 + $0x2b8] sm:$0xff] }
 0x325   : > { %s9091_s9 = spop %9090 }
 0x326   : > { %s1305_s20 = smul.f32 0.00048828125, %s9091_s9 }
 0x328   : > { %s1307_s1 = smul.f32 %s1305_s20, %s1305_s20  ;;  %v1316_v51 = vstv %s1305_s20 }
 0x329   : > { %s9093_s23 = spop %9092 }
 0x32a   : > { %s1306_s0 = smul.f32 0.00048828125, %s9093_s23 }
 0x32c   : > { %s1308_s21 = ssub.f32 %s1306_s0, %s1307_s1 }
 0x32e   : > { %s1309_s11 = smax.f32 %s9688_s25, %s1308_s21 }
 0x32f   : > { %s1310_s6 = sadd.f32 1e-05, %s1309_s11 }
 0x331   : > { %v1311_v46 = vstv %s1310_s6 }
 0x332   : > { %9300 = vrsqrt.f32 %v1311_v46  ;;  %v8149_v46 = vpack.c.bf16 %v1469_v39, %v1468_v35 }
 0x33c   : > { %v9301_v47 = vpop.eup %9300 }
 0x33d   : > { %9094 = vpush %v9301_v47 }
 0x36e   : > { %s9095_s2 = spop %9094 }
 0x36f   : > { %v1314_v48 = vstv %s9095_s2  ;;  %s9691_s2 = smov 64  }
 0x370   : > { %v1315_v49 = vmul.f32 %v1314_v48, %v10519_v14  ;;  %v1470_v48 = vld [vmem:[%s11910_s5 + $0x230] sm:$0xff] }
 0x372   : > { %v1317_v52 = vmul.f32 %v1316_v51, %v1315_v49  ;;  %v1325_v54 = vrot.slane %v1315_v49, %v10743_v50  ;;  %v8151_v49 = vpack.c.bf16 %v1487_v45, %v1486_v44  ;;  %v1471_v51 = vld [vmem:[%s11910_s5 + $0x238] sm:$0xff] }
 0x374   : > { %v1319_v53 = vrot.slane %v1317_v52, 7  ;;  %v1326_v57 = vmul.f32 %v1325_v54, %v10523_v40  ;;  %v1327_v58 = vmul.f32 %v1325_v54, %v10525_v41  ;;  %v1504_v52 = vld [vmem:[%s11910_s5 + $0x340] sm:$0xff] }
 0x375   : > { %v1488_v54 = vld [vmem:[%s11910_s5 + $0x2c0] sm:$0xff] }
 0x376   : > { %v1321_v56 = vsub.f32 %v10519_v14, %v1319_v53  ;;  %v1505_v53 = vld [vmem:[%s11910_s5 + $0x348] sm:$0xff] }
 0x378   : > { %v1331_v59 = vrot.slane %v1321_v56, %v10747_v55  ;;  %v1489_v56 = vld [vmem:[%s11910_s5 + $0x2c8] sm:$0xff] }
 0x37a   : > { %v10753_v60 = vadd.f32 %v1331_v59, %v1326_v57  ;;  %v10755_v61 = vadd.f32 %v1331_v59, %v1327_v58  ;;  %v8153_v57 = vpack.c.bf16 %v1471_v51, %v1470_v48  ;;  %v8187_v58 = vpack.c.bf16 %v1505_v53, %v1504_v52  ;;  %v1472_v59 = vld [vmem:[%s11910_s5 + $0x240] sm:$0xff] }
 0x37c   : > { %v1337_v62 = vrot.slane %v10753_v60, 5  ;;  %v1345_v1 = vrot.slane %v10753_v60, 6  ;;  %1360 = vst [vmem:[#allocation2 + $0x18] sm:$0xff] %v10753_v60  ;;  %1656 = vmatprep.mubr.f32.mxu1 %v10753_v60  ;;  %v1354_v9 = vrot.slane %v10755_v61, 7  ;;  %v1379_v14 = vrot.slane %v10753_v60, 3 }
 0x37d   : > { %v1380_v40 = vrot.slane %v10755_v61, 3  ;;  %2314 = vst [vmem:[#allocation2 + $0x1f] sm:$0x1] %v9687_v0  ;;  %v1353_v41 = vrot.slane %v10753_v60, 7  ;;  %v1371_v2 = vrot.slane %v10753_v60, 2  ;;  %v1372_v3 = vrot.slane %v10755_v61, 2 }
 0x37e   : > { %1342 = vst [vmem:[#allocation2] sm:$0xf8] %v1337_v62  ;;  %1350 = vst [vmem:[#allocation2 + $0x8] sm:$0xfc] %v1345_v1  ;;  %v1363_v6 = vrot.slane %v10753_v60, 1  ;;  %v1364_v7 = vrot.slane %v10755_v61, 1  ;;  %v8155_v60 = vpack.c.bf16 %v1489_v56, %v1488_v54 }
 0x37f   : > { %v1381_v4 = vsel %vm842_vm4, %v1379_v14, %v1380_v40  ;;  %1385 = vst [vmem:[#allocation2 + $0x68] sm:$0x1f] %v1380_v40  ;;  %v1355_v5 = vsel %vm813_vm2, %v1353_v41, %v1354_v9  ;;  %1358 = vst [vmem:[#allocation2 + $0x10] sm:$0xfe] %v1353_v41  ;;  %v1373_v8 = vsel %vm833_vm3, %v1371_v2, %v1372_v3  ;;  %v1346_v18 = vrot.slane %v10755_v61, 6  ;;  %v1490_v9 = vld [vmem:[%s11910_s5 + $0x2d0] sm:$0xff] }
 0x380   : > { %1359 = vst [vmem:[#allocation2 + $0x48] sm:$0xff] %v1355_v5  ;;  %1377 = vst [vmem:[#allocation2 + $0x60] sm:$0x3f] %v1372_v3  ;;  %v10777_v11 = vsel %vm824_vm5, %v1363_v6, %v1364_v7  ;;  %v1338_v19 = vrot.slane %v10755_v61, 5  ;;  %v1491_v14 = vld [vmem:[%s11910_s5 + $0x2d8] sm:$0xff]  ;;  %v1474_v2 = vld [vmem:[%s11910_s5 + $0x250] sm:$0xff] }
 0x381   : > { %5279 = vst [vmem:[#allocation2 + $0x4f] sm:$0x1] %v9687_v0  ;;  %1376 = vst [vmem:[#allocation2 + $0x28] sm:$0xff] %v1373_v8  ;;  %v1347_v33 = vsel %vm804_vm0, %v1345_v1, %v1346_v18  ;;  %v1507_v1 = vld [vmem:[%s11910_s5 + $0x358] sm:$0xff]  ;;  %v8159_v3 = vpack.c.bf16 %v1491_v14, %v1490_v9  ;;  %v1509_v6 = vld [vmem:[%s11910_s5 + $0x368] sm:$0xff]  ;;  %vm2758_vm3 = vcmask 64512  }
 0x382   : > { %1369 = vst [vmem:[#allocation2 + $0x58] sm:$0x7f] %v1364_v7  ;;  %4562 = vst [vmem:[#allocation2 + $0x2f] sm:$0x1] %v9687_v0  ;;  %v1339_v36 = vsel %vm795_vm1, %v1337_v62, %v1338_v19  ;;  %v1506_v62 = vld [vmem:[%s11910_s5 + $0x350] sm:$0xff]  ;;  %v1492_v7 = vld [vmem:[%s11910_s5 + $0x2e0] sm:$0xff] }
 0x383   : > { %1368 = vst [vmem:[#allocation2 + $0x20] sm:$0xff] %v10777_v11  ;;  %v8191_v41 = vpack.c.bf16 %v1507_v1, %v1506_v62  ;;  %v1511_v18 = vld [vmem:[%s11910_s5 + $0x378] sm:$0xff]  ;;  %v1478_v19 = vld [vmem:[%s11910_s5 + $0x270] sm:$0xff]  ;;  %vm2832_vm1 = vcmask 516096   ;;  %vm2847_vm4 = vcmask 518144  }
 0x384   : > { %2318 = vst [vmem:[#allocation2 + $0x20] sm:$0xc0] %v9687_v0 }
 0x385   : > { %v1386_v23 = vld [vmem:[#allocation2] sm:$0xff]  ;;  %v1387_v24 = vld [vmem:[#allocation2 + $0x8] sm:$0xff] }
 0x386   : > { %1581 = vmatprep.mubr.f32.mxu0 %v1387_v24  ;;  %v1388_v26 = vld [vmem:[#allocation2 + $0x10] sm:$0xff]  ;;  %v8165_v24 = vpack.c.bf16 %v1477_v16, %v1476_v13  ;;  %2037 = vst.msk [vmem:[#allocation2] sm:$0x3] %vm2036_vm10, %v9687_v0 }
 0x387   : > { %1657 = vmatmul.mubr.f32.vlgmr.msra.gmra.mrb[6].mxu1 %v1388_v26  ;;  %2061 = vst.msk [vmem:[#allocation2 + $0x10] sm:$0xc0] %vm2060_vm6, %v9687_v0  ;;  %1582 = vmatmul.mubr.f32.vlgmr.msra.gmra.mrb[8].mxu0 %v1386_v23  ;;  %v10821_v32 = vld [vmem:[#allocation2 + $0x60] sm:$0xff]  ;;  %v1495_v23 = vld [vmem:[%s11910_s5 + $0x2f8] sm:$0xff]  ;;  %v1876_v13 = vld [vmem:[%s11968_s4 + $0x30] sm:$0xff]  ;;  %vm2837_vm6 = vcmask 519169  }
 0x388   : > { %8174 = vmatpush3.bf16.msra.mxu1 %v10731_v42  ;;  %1661 = vmatprep.mubr.f32.mxu1 %v10755_v61  ;;  %5299 = vst [vmem:[#allocation2 + $0x67] sm:$0x1] %v9687_v0  ;;  %v1502_v42 = vld [vmem:[%s11910_s5 + $0x330] sm:$0xff]  ;;  %v1473_v61 = vld [vmem:[%s11910_s5 + $0x248] sm:$0xff]  ;;  %v8167_v20 = vpack.c.bf16 %v1495_v23, %v1494_v22  ;;  %v1479_v26 = vld [vmem:[%s11910_s5 + $0x278] sm:$0xff] }
 0x389   : > { %8142 = vmatpush3.bf16.msra.mxu0 %v8141_v25  ;;  %1586 = vmatprep.mubr.f32.mxu0 %v1347_v33  ;;  %v8183_v47 = vpack.c.bf16 %v1503_v43, %v1502_v42  ;;  %v8157_v40 = vpack.c.bf16 %v1473_v61, %v1472_v59  ;;  %v8199_v25 = vpack.c.bf16 %v1511_v18, %v1510_v17  ;;  %v1397_v28 = vld [vmem:[#allocation2 + $0x58] sm:$0xff]  ;;  %v1878_v17 = vld [vmem:[%s11968_s4 + $0x40] sm:$0xff]  ;;  %v1879_v18 = vld [vmem:[%s11968_s4 + $0x48] sm:$0xff] }
 0x38a   : > { %8176 = vmatprep.subr.bf16.mxu1 %v8175_v21  ;;  %8144 = vmatprep.subr.bf16.mxu0 %v8143_v27  ;;  %v1399_v27 = vld [vmem:[#allocation2 + $0x68] sm:$0xff]  ;;  %v1516_v33 = vrot.slane %v10931_v29, %v10514_v10  ;;  %v8219_v22 = vpack.c.bf16 %v1879_v18, %v1878_v17  ;;  %2044 = vst.msk [vmem:[#allocation2] sm:$0x1] %vm2043_vm9, %v9687_v0 }
 0x38b   : > { %1662 = vmatmul.mubr.f32.gmra.mrb[8].mxu1 %v1355_v5  ;;  %1587 = vmatmul.mubr.f32.gmra.mrb[10].mxu0 %v1339_v36  ;;  %v1508_v5 = vld [vmem:[%s11910_s5 + $0x360] sm:$0xff]  ;;  %v2085_v18 = vld [vmem:[#allocation5 + $0x80] sm:$0xff] }
 0x38c   : > { %8178 = vmatpush3.bf16.msra.mxu1 %v8175_v21  ;;  %7559 = vmatprep.mubr.f32.mxu1 %v1381_v4  ;;  %v1475_v4 = vld [vmem:[%s11910_s5 + $0x258] sm:$0xff]  ;;  %v8195_v12 = vpack.c.bf16 %v1509_v6, %v1508_v5  ;;  %v8169_v21 = vpack.c.bf16 %v1479_v26, %v1478_v19 }
 0x38d   : > { %8146 = vmatpush3.bf16.msra.mxu0 %v8145_v34  ;;  %1731 = vmatprep.mubr.f32.mxu0 %v1373_v8  ;;  %v1493_v8 = vld [vmem:[%s11910_s5 + $0x2e8] sm:$0xff]  ;;  %v8161_v63 = vpack.c.bf16 %v1475_v4, %v1474_v2  ;;  %v1870_v2 = vld [vmem:[%s11968_s4] sm:$0xff]  ;;  %v1872_v4 = vld [vmem:[%s11968_s4 + $0x10] sm:$0xff] }
 0x38e   : > { %8180 = vmatprep.subr.bf16.mxu1 %v8179_v37  ;;  %8148 = vmatprep.subr.bf16.mxu0 %v8147_v38  ;;  %v8163_v15 = vpack.c.bf16 %v1493_v8, %v1492_v7  ;;  %v1873_v6 = vld [vmem:[%s11968_s4 + $0x18] sm:$0xff]  ;;  %v1874_v8 = vld [vmem:[%s11968_s4 + $0x20] sm:$0xff] }
 0x38f   : > { %v8207_v7 = vpack.c.bf16 %v1873_v6, %v1872_v4  ;;  %v2103_v6 = vld [vmem:[#allocation5 + $0x110] sm:$0xff] }
 0x390   : > { %8182 = vmatpush3.bf16.msra.mxu1 %v8179_v37 }
 0x391   : > { %8150 = vmatpush3.bf16.msra.mxu0 %v8149_v46  ;;  %8184 = vmatprep.subr.bf16.mxu1 %v8183_v47 }
 0x392   : > { %8152 = vmatprep.subr.bf16.mxu0 %v8151_v49 }
 0x394   : > { %8186 = vmatpush3.bf16.msra.mxu1 %v8183_v47 }
 0x395   : > { %8154 = vmatpush3.bf16.msra.mxu0 %v8153_v57  ;;  %8188 = vmatprep.subr.bf16.mxu1 %v8187_v58 }
 0x396   : > { %8156 = vmatprep.subr.bf16.mxu0 %v8155_v60 }
 0x398   : > { %8190 = vmatpush3.bf16.msra.mxu1 %v8187_v58 }
 0x399   : > { %8158 = vmatpush3.bf16.msra.mxu0 %v8157_v40  ;;  %8192 = vmatprep.subr.bf16.mxu1 %v8191_v41 }
 0x39a   : > { %8160 = vmatprep.subr.bf16.mxu0 %v8159_v3  ;;  %v1871_v3 = vld [vmem:[%s11968_s4 + $0x8] sm:$0xff] }
 0x39b   : > { %v8203_v5 = vpack.c.bf16 %v1871_v3, %v1870_v2 }
 0x39c   : > { %8194 = vmatpush3.bf16.msra.mxu1 %v8191_v41 }
 0x39d   : > { %8162 = vmatpush3.bf16.msra.mxu0 %v8161_v63  ;;  %8196 = vmatprep.subr.bf16.mxu1 %v8195_v12  ;;  %v1875_v63 = vld [vmem:[%s11968_s4 + $0x28] sm:$0xff] }
 0x39e   : > { %8164 = vmatprep.subr.bf16.mxu0 %v8163_v15  ;;  %v1877_v15 = vld [vmem:[%s11968_s4 + $0x38] sm:$0xff] }
 0x39f   : > { %v8215_v16 = vpack.c.bf16 %v1877_v15, %v1876_v13  ;;  %v2107_v15 = vld [vmem:[#allocation5 + $0x130] sm:$0xff] }
 0x3a0   : > { %8198 = vmatpush3.bf16.msra.mxu1 %v8195_v12  ;;  %v8211_v12 = vpack.c.bf16 %v1875_v63, %v1874_v8  ;;  %v2105_v63 = vld [vmem:[#allocation5 + $0x120] sm:$0xff] }
 0x3a1   : > { %8166 = vmatpush3.bf16.msra.mxu0 %v8165_v24  ;;  %8200 = vmatprep.subr.bf16.mxu1 %v8199_v25 }
 0x3a2   : > { %8168 = vmatprep.subr.bf16.mxu0 %v8167_v20 }
 0x3a4   : > { %8202 = vmatpush3.bf16.msra.mxu1 %v8199_v25 }
 0x3a5   : > { %8170 = vmatpush3.bf16.msra.mxu0 %v8169_v21 }
 0x3a6   : > { %8204 = vmatprep.subr.bf16.mxu0 %v8203_v5 }
 0x3a7   : > { %7560 = vmatmul.mubr.f32.vlgmr.msra.gmra.mrb[10].mxu1 %v1399_v27 }
 0x3a8   : > { %1732 = vmatmul.mubr.f32.vlgmr.msra.gmra.mrb[12].mxu0 %v10777_v11  ;;  %7601 = vmatprep.mubr.msk.f32.mxu1 %vm9690_vm7, %v9687_v0 }
 0x3a9   : > { %1736 = vmatprep.mubr.f32.mxu0 %v10821_v32  ;;  %8206 = vmatpush3.bf16.msra.mxu0 %v8203_v5  ;;  %v1961_v5 = vld [vmem:[#allocation3] sm:$0xff] }
 0x3aa   : > { %8208 = vmatprep.subr.bf16.mxu0 %v8207_v7 }
 0x3ac   : > { %1737 = vmatmul.mubr.f32.gmra.mrb[14].mxu0 %v1397_v28  ;;  %v1880_v28 = vld [vmem:[%s11968_s4 + $0x50] sm:$0xff] }
 0x3ad   : > { %8210 = vmatpush3.bf16.msra.mxu0 %v8207_v7  ;;  %v2104_v7 = vld [vmem:[#allocation5 + $0x118] sm:$0xff] }
 0x3ae   : > { %8212 = vmatprep.subr.bf16.mxu0 %v8211_v12  ;;  %v8274_v8 = vpack.c.bf16 %v2104_v7, %v2103_v6  ;;  %v2084_v6 = vld [vmem:[#allocation5 + $0x78] sm:$0xff] }
 0x3b1   : > { %8214 = vmatpush3.bf16.msra.mxu0 %v8211_v12  ;;  %v2106_v12 = vld [vmem:[#allocation5 + $0x128] sm:$0xff] }
 0x3b2   : > { %8216 = vmatprep.subr.bf16.mxu0 %v8215_v16  ;;  %v8277_v13 = vpack.c.bf16 %v2106_v12, %v2105_v63 }
 0x3b5   : > { %8218 = vmatpush3.bf16.msra.mxu0 %v8215_v16  ;;  %v2108_v16 = vld [vmem:[#allocation5 + $0x138] sm:$0xff] }
 0x3b6   : > { %8220 = vmatprep.subr.bf16.mxu0 %v8219_v22  ;;  %v8280_v17 = vpack.c.bf16 %v2108_v16, %v2107_v15 }
 0x3b9   : > { %8222 = vmatpush3.bf16.msra.mxu0 %v8219_v22  ;;  %v2086_v22 = vld [vmem:[#allocation5 + $0x88] sm:$0xff] }
 0x45a   : > { %v6667_v30 = vpop.f32.mrb[6].mxu1  ;;  %v6629_v31 = vpop.f32.mrb[8].mxu0 }
 0x45b   : > { %v6668_v34 = vpop.f32.mrb[7].mxu1  ;;  %v6630_v35 = vpop.f32.mrb[9].mxu0 }
 0x45c   : > { %v6669_v36 = vadd.f32 %v6668_v34, %v6667_v30  ;;  %v6631_v37 = vadd.f32 %v6630_v35, %v6629_v31  ;;  %v1881_v30 = vld [vmem:[%s11968_s4 + $0x58] sm:$0xff] }
 0x45d   : > { %v8223_v34 = vpack.c.bf16 %v1881_v30, %v1880_v28  ;;  %v2072_v28 = vld [vmem:[#allocation5 + $0x18] sm:$0xff]  ;;  %v2089_v30 = vld [vmem:[#allocation5 + $0xa0] sm:$0xff] }
 0x45e   : > { %v1584_v38 = vadd.f32 %v6631_v37, %v1516_v33  ;;  %v6670_v11 = vpop.f32.mrb[8].mxu1  ;;  %v6632_v39 = vpop.f32.mrb[10].mxu0  ;;  %v1882_v37 = vld [vmem:[%s11968_s4 + $0x60] sm:$0xff] }
 0x45f   : > { %v6671_v32 = vpop.f32.mrb[9].mxu1  ;;  %v6633_v42 = vpop.f32.mrb[11].mxu0  ;;  %8224 = vmatprep.subr.bf16.mxu0 %v8223_v34 }
 0x460   : > { %v6672_v43 = vadd.f32 %v6671_v32, %v6670_v11  ;;  %v6634_v44 = vadd.f32 %v6633_v42, %v6632_v39  ;;  %v1659_v45 = vadd.f32 %v6669_v36, %v1584_v38  ;;  %8226 = vmatpush3.bf16.msra.mxu0 %v8223_v34  ;;  %v1883_v38 = vld [vmem:[%s11968_s4 + $0x68] sm:$0xff]  ;;  %v1884_v42 = vld [vmem:[%s11968_s4 + $0x70] sm:$0xff] }
 0x461   : > { %v8227_v39 = vpack.c.bf16 %v1883_v38, %v1882_v37  ;;  %v2091_v37 = vld [vmem:[#allocation5 + $0xb0] sm:$0xff]  ;;  %v2092_v38 = vld [vmem:[#allocation5 + $0xb8] sm:$0xff] }
 0x462   : > { %v1589_v46 = vadd.f32 %v6634_v44, %v1516_v33 }
 0x463   : > { %8228 = vmatprep.subr.bf16.mxu0 %v8227_v39 }
 0x464   : > { %v1664_v47 = vadd.f32 %v6672_v43, %v1589_v46  ;;  %8230 = vmatpush3.bf16.msra.mxu0 %v8227_v39  ;;  %v1885_v43 = vld [vmem:[%s11968_s4 + $0x78] sm:$0xff]  ;;  %v8250_v39 = vpack.c.bf16 %v2092_v38, %v2091_v37  ;;  %v2327_v37 = vld [vmem:[#allocation7] sm:$0xff] }
 0x465   : > { %v8231_v44 = vpack.c.bf16 %v1885_v43, %v1884_v42  ;;  %v2076_v42 = vld [vmem:[#allocation5 + $0x38] sm:$0xff]  ;;  %v2093_v43 = vld [vmem:[#allocation5 + $0xc0] sm:$0xff] }
 0x467   : > { %8232 = vmatprep.subr.bf16.mxu0 %v8231_v44 }
 0x468   : > { %8234 = vmatpush3.bf16.msra.mxu0 %v8231_v44  ;;  %v2094_v44 = vld [vmem:[#allocation5 + $0xc8] sm:$0xff] }
 0x47a   : > { %v7561_v48 = vpop.f32.mrb[10].mxu1 }
 0x47b   : > { %v6705_v49 = vpop.f32.mrb[12].mxu0  ;;  %v1808_v51 = vpop.f32.mrb[11].mxu1 }
 0x47c   : > { %v6706_v52 = vpop.f32.mrb[13].mxu0 }
 0x47d   : > { %v6707_v53 = vadd.f32 %v6706_v52, %v6705_v49 }
 0x47f   : > { %v1734_v54 = vadd.f32 %v6707_v53, %v1659_v45  ;;  %v6708_v56 = vpop.f32.mrb[14].mxu0 }
 0x480   : > { %v6709_v57 = vpop.f32.mrb[15].mxu0 }
 0x481   : > { %v1809_v58 = vadd.f32 %v1808_v51, %v1734_v54  ;;  %v6710_v59 = vadd.f32 %v6709_v57, %v6708_v56 }
 0x483   : > { %v1739_v60 = vadd.f32 %v6710_v59, %v1664_v47  ;;  %v10935_v62 = vmax.f32 %v1809_v58, 0.0 }
 0x485   : > { %v1814_v61 = vadd.f32 %v7561_v48, %v1739_v60  ;;  %v1829_v40 = vmul.f32 %v10935_v62, %v10935_v62 }
 0x487   : > { %v10937_v1 = vmax.f32 %v1814_v61, 0.0 }
 0x489   : > { %v1819_v9 = vadd.f32 %v10937_v1, %v10935_v62  ;;  %v1830_v14 = vmul.f32 %v10937_v1, %v10937_v1 }
 0x48b   : > { %1820 = vadd.xlane.f32.xlu1 %v1819_v9  ;;  %v1831_v41 = vadd.f32 %v1830_v14, %v1829_v40  ;;  %v2101_v14 = vld [vmem:[#allocation5 + $0x100] sm:$0xff]  ;;  %v2102_v40 = vld [vmem:[#allocation5 + $0x108] sm:$0xff] }
 0x48f   : > { %1832 = vadd.xlane.f32.xlu1 %v1831_v41  ;;  %v8271_v41 = vpack.c.bf16 %v2102_v40, %v2101_v14  ;;  %v2081_v14 = vld [vmem:[#allocation5 + $0x60] sm:$0xff]  ;;  %v2082_v40 = vld [vmem:[#allocation5 + $0x68] sm:$0xff] }
 0x518   : > { %v1821_v23 = vpop.xlane.xlu1 %1820 }
 0x519   : > { %v1822_v24 = vrot.slane %v1821_v23, 4 }
 0x51b   : > { %v1823_v25 = vadd.f32 %v1822_v24, %v1821_v23  ;;  %v2069_v23 = vld [vmem:[#allocation5] sm:$0xff]  ;;  %v8238_v24 = vpack.c.bf16 %v2086_v22, %v2085_v18 }
 0x51c   : > { %v1833_v20 = vpop.xlane.xlu1 %1832 }
 0x51d   : > { %v1824_v19 = vrot.slane %v1823_v25, 2  ;;  %v1834_v26 = vrot.slane %v1833_v20, 4 }
 0x51f   : > { %v1835_v21 = vadd.f32 %v1834_v26, %v1833_v20  ;;  %v1825_v27 = vadd.f32 %v1824_v19, %v1823_v25  ;;  %v2070_v25 = vld [vmem:[#allocation5 + $0x8] sm:$0xff]  ;;  %v2087_v20 = vld [vmem:[#allocation5 + $0x90] sm:$0xff]  ;;  %v2088_v19 = vld [vmem:[#allocation5 + $0x98] sm:$0xff] }
 0x520   : > { %v8240_v26 = vpack.c.bf16 %v2070_v25, %v2069_v23 }
 0x521   : > { %v1836_v31 = vrot.slane %v1835_v21, 2  ;;  %v1826_v33 = vrot.slane %v1825_v27, 1 }
 0x523   : > { %v1827_v35 = vadd.f32 %v1826_v33, %v1825_v27  ;;  %v1837_v36 = vadd.f32 %v1836_v31, %v1835_v21  ;;  %v8242_v21 = vpack.c.bf16 %v2088_v19, %v2087_v20  ;;  %v2071_v27 = vld [vmem:[#allocation5 + $0x10] sm:$0xff]  ;;  %v2090_v31 = vld [vmem:[#allocation5 + $0xa8] sm:$0xff]  ;;  %v11039_v19 = vld [vmem:[%s11924_s19 + $0x6] sm:$0x7] }
 0x524   : > { %v8244_v33 = vpack.c.bf16 %v2072_v28, %v2071_v27  ;;  %v8246_v34 = vpack.c.bf16 %v2090_v31, %v2089_v30 }
 0x525   : > { %9096 = vpush %v1827_v35  ;;  %v1838_v11 = vrot.slane %v1837_v36, 1  ;;  %v2073_v35 = vld [vmem:[#allocation5 + $0x20] sm:$0xff] }
 0x527   : > { %v1839_v32 = vadd.f32 %v1838_v11, %v1837_v36  ;;  %v2074_v36 = vld [vmem:[#allocation5 + $0x28] sm:$0xff] }
 0x528   : > { %v8248_v11 = vpack.c.bf16 %v2074_v36, %v2073_v35  ;;  %v2343_v35 = vld [vmem:[#allocation7 + $0x80] sm:$0xff]  ;;  %v2344_v36 = vld [vmem:[#allocation7 + $0x88] sm:$0xff] }
 0x529   : > { %9098 = vpush %v1839_v32  ;;  %v2075_v32 = vld [vmem:[#allocation5 + $0x30] sm:$0xff]  ;;  %v8282_v38 = vpack.c.bf16 %v2344_v36, %v2343_v35  ;;  %v2382_v36 = vld [vmem:[#allocation7 + $0x1b8] sm:$0xff] }
 0x556   : > { %s9097_s29 = spop %9096 }
 0x557   : > { %s1841_s9 = smul.f32 0.00048828125, %s9097_s29 }
 0x559   : > { %s1843_s20 = smul.f32 %s1841_s9, %s1841_s9  ;;  %v1852_v49 = vstv %s1841_s9 }
 0x55a   : > { %s9099_s1 = spop %9098 }
 0x55b   : > { %s1842_s23 = smul.f32 0.00048828125, %s9099_s1 }
 0x55d   : > { %s1844_s0 = ssub.f32 %s1842_s23, %s1843_s20 }
 0x55f   : > { %s1845_s21 = smax.f32 %s9688_s25, %s1844_s0 }
 0x560   : > { %s1846_s11 = sadd.f32 1e-05, %s1845_s21 }
 0x562   : > { %v1847_v45 = vstv %s1846_s11 }
 0x563   : > { %9302 = vrsqrt.f32 %v1847_v45  ;;  %v8252_v45 = vpack.c.bf16 %v2076_v42, %v2075_v32  ;;  %v2376_v32 = vld [vmem:[#allocation7 + $0x188] sm:$0xff] }
 0x56d   : > { %v9303_v46 = vpop.eup %9302 }
 0x56e   : > { %9100 = vpush %v9303_v46  ;;  %v8254_v46 = vpack.c.bf16 %v2094_v44, %v2093_v43  ;;  %v2359_v44 = vld [vmem:[#allocation7 + $0x100] sm:$0xff] }
 0x59f   : > { %s9101_s6 = spop %9100 }
 0x5a0   : > { %v1850_v47 = vstv %s9101_s6 }
 0x5a1   : > { %v1851_v48 = vmul.f32 %v1850_v47, %v10931_v29  ;;  %v2077_v47 = vld [vmem:[#allocation5 + $0x40] sm:$0xff] }
 0x5a3   : > { %v1853_v51 = vmul.f32 %v1852_v49, %v1851_v48  ;;  %v1861_v53 = vrot.slane %v1851_v48, %v10743_v50  ;;  %v2078_v48 = vld [vmem:[#allocation5 + $0x48] sm:$0xff]  ;;  %v2095_v49 = vld [vmem:[#allocation5 + $0xd0] sm:$0xff] }
 0x5a5   : > { %v1855_v52 = vrot.slane %v1853_v51, 7  ;;  %v1862_v56 = vmul.f32 %v1861_v53, %v10935_v62  ;;  %v1863_v57 = vmul.f32 %v1861_v53, %v10937_v1  ;;  %v9689_v1 = vmov 0.0|0.0   ;;  %v2096_v51 = vld [vmem:[#allocation5 + $0xd8] sm:$0xff] }
 0x5a6   : > { %8235 = vmatprep.subr.bf16.mxu1 %v9689_v1  ;;  %8270 = vmatprep.subr.bf16.mxu0 %v9689_v1  ;;  %v8258_v53 = vpack.c.bf16 %v2096_v51, %v2095_v49  ;;  %v2329_v49 = vld [vmem:[#allocation7 + $0x10] sm:$0xff]  ;;  %v2330_v51 = vld [vmem:[#allocation7 + $0x18] sm:$0xff] }
 0x5a7   : > { %v1857_v54 = vsub.f32 %v10931_v29, %v1855_v52  ;;  %v8256_v52 = vpack.c.bf16 %v2078_v48, %v2077_v47  ;;  %v2346_v48 = vld [vmem:[#allocation7 + $0x98] sm:$0xff] }
 0x5a9   : > { %v1867_v58 = vrot.slane %v1857_v54, %v10747_v55  ;;  %v2079_v54 = vld [vmem:[#allocation5 + $0x50] sm:$0xff] }
 0x5ab   : > { %v11000_v59 = vadd.f32 %v1867_v58, %v1863_v57  ;;  %v11002_v60 = vadd.f32 %v1867_v58, %v1862_v56  ;;  %v2080_v56 = vld [vmem:[#allocation5 + $0x58] sm:$0xff]  ;;  %v2097_v58 = vld [vmem:[#allocation5 + $0xe0] sm:$0xff] }
 0x5ac   : > { %v8260_v57 = vpack.c.bf16 %v2080_v56, %v2079_v54  ;;  %v2377_v54 = vld [vmem:[#allocation7 + $0x190] sm:$0xff]  ;;  %v2378_v56 = vld [vmem:[#allocation7 + $0x198] sm:$0xff] }
 0x5ad   : > { %v5291_v61 = vrot.slane %v11000_v59, 7  ;;  %5298 = vst [vmem:[#allocation2 + $0x58] sm:$0xff] %v11000_v59  ;;  %v5301_v9 = vrot.slane %v11000_v59, 1  ;;  %7594 = vmatprep.mubr.f32.mxu0 %v11002_v60  ;;  %v5290_v29 = vrot.slane %v11002_v60, 7 }
 0x5ae   : > { %7595 = vmatmul.mubr.f32.vlgmr.msra.gmra.mrb[16].mxu0 %v11000_v59  ;;  %v2855_v59 = vld [vmem:[#allocation8 + $0x20] sm:$0xff] }
 0x5af   : > { %5306 = vst [vmem:[#allocation2 + $0x60] sm:$0x7f] %v5301_v9  ;;  %v5292_v62 = vsel %vm813_vm2, %v5290_v29, %v5291_v61  ;;  %7620 = vmatprep.mubr.msk.f32.mxu0 %vm9690_vm7, %v9687_v0  ;;  %8272 = vmatpush3.bf16.msra.mxu0 %v8271_v41  ;;  %v2098_v61 = vld [vmem:[#allocation5 + $0xe8] sm:$0xff]  ;;  %v8264_v41 = vpack.c.bf16 %v2082_v40, %v2081_v14 }
 0x5b0   : > { %5296 = vst [vmem:[#allocation2 + $0x50] sm:$0xff] %v5292_v62  ;;  %8273 = vmatprep.subr.bf16.mxu0 %v9689_v1  ;;  %v8262_v62 = vpack.c.bf16 %v2098_v61, %v2097_v58  ;;  %v8318_v58 = vpack.c.bf16 %v2378_v56, %v2377_v54  ;;  %v2362_v61 = vld [vmem:[#allocation7 + $0x118] sm:$0xff]  ;;  %v2368_v54 = vld [vmem:[#allocation7 + $0x148] sm:$0xff] }
 0x5b3   : > { %8275 = vmatpush3.bf16.msra.mxu0 %v8274_v8 }
 0x5b4   : > { %8276 = vmatprep.subr.bf16.mxu0 %v9689_v1 }
 0x5b7   : > { %8278 = vmatpush3.bf16.msra.mxu0 %v8277_v13 }
 0x5b8   : > { %8279 = vmatprep.subr.bf16.mxu0 %v9689_v1 }
 0x5bb   : > { %8281 = vmatpush3.bf16.msra.mxu0 %v8280_v17 }
 0x681   : > { %v7596_v2 = vpop.f32.mrb[16].mxu0 }
 0x682   : > { %v1952_v3 = vpop.f32.mrb[17].mxu0 }
 0x683   : > { %v8236_v4 = vpack.c.bf16 %v7596_v2, %v1952_v3  ;;  %v2099_v2 = vld [vmem:[#allocation5 + $0xf0] sm:$0xff]  ;;  %v2100_v3 = vld [vmem:[#allocation5 + $0xf8] sm:$0xff] }
 0x685   : > { %8237 = vmatpush3.bf16.msra.mxu1 %v8236_v4  ;;  %v8266_v4 = vpack.c.bf16 %v2100_v3, %v2099_v2 }
 0x686   : > { %8239 = vmatprep.subr.bf16.mxu1 %v8238_v24 }
 0x688   : > { %7602 = vmatmul.mubr.msk.f32.vlgmr.msra.gmra.mrb[12].mxu1 %vm1962_vm8, %v1961_v5  ;;  %v2083_v5 = vld [vmem:[#allocation5 + $0x70] sm:$0xff]  ;;  %vm2842_vm8 = vcmask 1043968  }
 0x689   : > { %8241 = vmatpush3.bf16.msra.mxu1 %v8240_v26  ;;  %v8268_v7 = vpack.c.bf16 %v2084_v6, %v2083_v5  ;;  %v2348_v5 = vld [vmem:[#allocation7 + $0xa8] sm:$0xff] }
 0x68a   : > { %8243 = vmatprep.subr.bf16.mxu1 %v8242_v21  ;;  %v2113_v21 = vrot.slane %v11039_v19, %v10514_v10 }
 0x68d   : > { %8245 = vmatpush3.bf16.msra.mxu1 %v8244_v33 }
 0x68e   : > { %8247 = vmatprep.subr.bf16.mxu1 %v8246_v34 }
 0x691   : > { %8249 = vmatpush3.bf16.msra.mxu1 %v8248_v11  ;;  %v2328_v11 = vld [vmem:[#allocation7 + $0x8] sm:$0xff] }
 0x692   : > { %8251 = vmatprep.subr.bf16.mxu1 %v8250_v39  ;;  %v2375_v39 = vld [vmem:[#allocation7 + $0x180] sm:$0xff]  ;;  %v8284_v42 = vpack.c.bf16 %v2328_v11, %v2327_v37  ;;  %v2365_v37 = vld [vmem:[#allocation7 + $0x130] sm:$0xff] }
 0x693   : > { %v8314_v43 = vpack.c.bf16 %v2376_v32, %v2375_v39 }
 0x695   : > { %8253 = vmatpush3.bf16.msra.mxu1 %v8252_v45  ;;  %v2360_v45 = vld [vmem:[#allocation7 + $0x108] sm:$0xff]  ;;  %8315 = vmatprep.subr.bf16.mxu0 %v8314_v43  ;;  %v2351_v43 = vld [vmem:[#allocation7 + $0xc0] sm:$0xff] }
 0x696   : > { %8255 = vmatprep.subr.bf16.mxu1 %v8254_v46  ;;  %v2345_v46 = vld [vmem:[#allocation7 + $0x90] sm:$0xff]  ;;  %v8316_v47 = vpack.c.bf16 %v2360_v45, %v2359_v44  ;;  %v2352_v44 = vld [vmem:[#allocation7 + $0xc8] sm:$0xff] }
 0x697   : > { %v8298_v45 = vpack.c.bf16 %v2352_v44, %v2351_v43 }
 0x699   : > { %8257 = vmatpush3.bf16.msra.mxu1 %v8256_v52  ;;  %v8286_v52 = vpack.c.bf16 %v2346_v48, %v2345_v46  ;;  %v2335_v46 = vld [vmem:[#allocation7 + $0x40] sm:$0xff] }
 0x69a   : > { %8259 = vmatprep.subr.bf16.mxu1 %v8258_v53  ;;  %v8288_v53 = vpack.c.bf16 %v2330_v51, %v2329_v49  ;;  %v2383_v48 = vld [vmem:[#allocation7 + $0x1c0] sm:$0xff] }
 0x69d   : > { %8261 = vmatpush3.bf16.msra.mxu1 %v8260_v57  ;;  %v2361_v57 = vld [vmem:[#allocation7 + $0x110] sm:$0xff] }
 0x69e   : > { %8263 = vmatprep.subr.bf16.mxu1 %v8262_v62  ;;  %v8320_v62 = vpack.c.bf16 %v2362_v61, %v2361_v57  ;;  %v2354_v61 = vld [vmem:[#allocation7 + $0xd8] sm:$0xff] }
 0x6a1   : > { %8265 = vmatpush3.bf16.msra.mxu1 %v8264_v41 }
 0x6a2   : > { %8267 = vmatprep.subr.bf16.mxu1 %v8266_v4  ;;  %v2347_v4 = vld [vmem:[#allocation7 + $0xa0] sm:$0xff] }
 0x6a3   : > { %v8290_v6 = vpack.c.bf16 %v2348_v5, %v2347_v4  ;;  %v2369_v4 = vld [vmem:[#allocation7 + $0x150] sm:$0xff]  ;;  %v2370_v5 = vld [vmem:[#allocation7 + $0x158] sm:$0xff] }
 0x6a5   : > { %8269 = vmatpush3.bf16.msra.mxu1 %v8268_v7  ;;  %v2331_v7 = vld [vmem:[#allocation7 + $0x20] sm:$0xff] }
 0x6a6   : > { %8283 = vmatprep.subr.bf16.mxu1 %v8282_v38  ;;  %v2366_v38 = vld [vmem:[#allocation7 + $0x138] sm:$0xff] }
 0x6a7   : > { %v8328_v39 = vpack.c.bf16 %v2366_v38, %v2365_v37 }
 0x75b   : > { %v2032_v8 = vpop.f32.mrb[12].mxu1 }
 0x75c   : > { %v2039_v63 = vrot.slane %v2032_v8, 6  ;;  %v2062_v12 = vrot.slane %v2032_v8, 2  ;;  %v7603_v13 = vpop.f32.mrb[13].mxu1  ;;  %v2054_v15 = vrot.slane %v2032_v8, 1  ;;  %v2045_v16 = vrot.slane %v2032_v8, 7  ;;  %2052 = vst.msk [vmem:[#allocation2 + $0x8] sm:$0xff] %vm2051_vm11, %v2032_v8 }
 0x75d   : > { %2053 = vst.msk [vmem:[#allocation2 + $0xf] sm:$0x1] %vm2043_vm9, %v9687_v0  ;;  %v2332_v8 = vld [vmem:[#allocation7 + $0x28] sm:$0xff] }
 0x75e   : > { %2065 = vst.msk [vmem:[#allocation2 + $0x10] sm:$0x3f] %vm2064_vm12, %v2062_v12  ;;  %2055 = vrot.lane.b32.xlu0 %v2054_v15, %s9691_s2  ;;  %2046 = vrot.lane.b32.xlu1 %v2045_v16, %s9691_s2  ;;  %v8292_v15 = vpack.c.bf16 %v2332_v8, %v2331_v7  ;;  %v2380_v16 = vld [vmem:[#allocation7 + $0x1a8] sm:$0xff]  ;;  %v8336_v7 = vpack.c.bf16 %v2370_v5, %v2369_v4  ;;  %v2355_v8 = vld [vmem:[#allocation7 + $0xe0] sm:$0xff]  ;;  %vm2954_vm12 = vcmask 1043456  }
 0x75f   : > { %2042 = vst.msk [vmem:[#allocation2] sm:$0xfc] %vm2041_vm13, %v2039_v63  ;;  %v2379_v63 = vld [vmem:[#allocation7 + $0x1a0] sm:$0xff]  ;;  %v2396_v4 = vld [vmem:[#allocation7 + $0x228] sm:$0xff]  ;;  %vm3347_vm13 = vcmask 31744  }
 0x765   : > { %v2068_v17 = vld [vmem:[#allocation2 + $0x10] sm:$0xff] }
 0x766   : > { %7621 = vmatmul.mubr.msk.f32.vlgmr.msra.gmra.mrb[18].mxu0 %vm2051_vm11, %v2068_v17  ;;  %v2363_v17 = vld [vmem:[#allocation7 + $0x120] sm:$0xff] }
 0x767   : > { %8317 = vmatpush3.bf16.msra.mxu0 %v8316_v47  ;;  %v2336_v47 = vld [vmem:[#allocation7 + $0x48] sm:$0xff] }
 0x768   : > { %8319 = vmatprep.subr.bf16.mxu0 %v8318_v58  ;;  %v8300_v51 = vpack.c.bf16 %v2336_v47, %v2335_v46  ;;  %v2353_v58 = vld [vmem:[#allocation7 + $0xd0] sm:$0xff] }
 0x76b   : > { %8321 = vmatpush3.bf16.msra.mxu0 %v8320_v62  ;;  %v8302_v62 = vpack.c.bf16 %v2354_v61, %v2353_v58  ;;  %v2393_v58 = vld [vmem:[#allocation7 + $0x210] sm:$0xff]  ;;  %v2394_v61 = vld [vmem:[#allocation7 + $0x218] sm:$0xff] }
 0x7d0   : > { %v2056_v18 = vpop.permute.xlu0 %2055  ;;  %v2047_v22 = vpop.permute.xlu1 %2046 }
 0x7d1   : > { %2059 = vst.msk [vmem:[#allocation2 + $0x8] sm:$0x7f] %vm2058_vm14, %v2056_v18  ;;  %v2364_v18 = vld [vmem:[#allocation7 + $0x128] sm:$0xff]  ;;  %vm3430_vm14 = vcmask 1041920  }
 0x7d2   : > { %2050 = vst.msk [vmem:[#allocation2] sm:$0xfe] %vm2049_vm15, %v2047_v22  ;;  %v8322_v22 = vpack.c.bf16 %v2380_v16, %v2379_v63  ;;  %v2356_v63 = vld [vmem:[#allocation7 + $0xe8] sm:$0xff]  ;;  %v2387_v16 = vld [vmem:[#allocation7 + $0x1e0] sm:$0xff]  ;;  %vm3858_vm15 = vcmask 519168  }
 0x7d4   : > { %8323 = vmatprep.subr.bf16.mxu0 %v8322_v22  ;;  %v2371_v22 = vld [vmem:[#allocation7 + $0x160] sm:$0xff] }
 0x7d8   : > { %v2067_v23 = vld [vmem:[#allocation2 + $0x8] sm:$0xff] }
 0x7d9   : > { %v2066_v24 = vld [vmem:[#allocation2] sm:$0xff]  ;;  %2309 = vst [vmem:[#allocation2 + $0x8] sm:$0x1] %v9687_v0  ;;  %2181 = vmatprep.mubr.f32.mxu1 %v2067_v23  ;;  %v8324_v23 = vpack.c.bf16 %v2364_v18, %v2363_v17  ;;  %v2388_v18 = vld [vmem:[#allocation7 + $0x1e8] sm:$0xff] }
 0x7da   : > { %2304 = vst [vmem:[#allocation2] sm:$0x3] %v9687_v0  ;;  %2182 = vmatmul.mubr.f32.vlgmr.msra.gmra.mrb[14].mxu1 %v2066_v24 }
 0x7db   : > { %8285 = vmatpush3.bf16.msra.mxu1 %v8284_v42  ;;  %8325 = vmatpush3.bf16.msra.mxu0 %v8324_v23  ;;  %v2372_v23 = vld [vmem:[#allocation7 + $0x168] sm:$0xff] }
 0x7dc   : > { %8287 = vmatprep.subr.bf16.mxu1 %v8286_v52  ;;  %v2384_v52 = vld [vmem:[#allocation7 + $0x1c8] sm:$0xff] }
 0x7dd   : > { %v8330_v56 = vpack.c.bf16 %v2384_v52, %v2383_v48 }
 0x7df   : > { %8289 = vmatpush3.bf16.msra.mxu1 %v8288_v53  ;;  %v2367_v53 = vld [vmem:[#allocation7 + $0x140] sm:$0xff] }
 0x7e0   : > { %8291 = vmatprep.subr.bf16.mxu1 %v8290_v6  ;;  %v8332_v57 = vpack.c.bf16 %v2368_v54, %v2367_v53 }
 0x7e3   : > { %8293 = vmatpush3.bf16.msra.mxu1 %v8292_v15  ;;  %v2340_v15 = vld [vmem:[#allocation7 + $0x68] sm:$0xff] }
 0x839   : > { %v2253_v25 = vpop.f32.mrb[18].mxu0 }
 0x83a   : > { %v7622_v20 = vpop.f32.mrb[19].mxu0 }
 0x83b   : > { %v2349_v20 = vld [vmem:[#allocation7 + $0xb0] sm:$0xff] }
 0x8ad   : > { %v6782_v26 = vpop.f32.mrb[14].mxu1 }
 0x8ae   : > { %v6783_v27 = vpop.f32.mrb[15].mxu1 }
 0x8af   : > { %v6784_v28 = vadd.f32 %v6783_v27, %v6782_v26  ;;  %v2350_v26 = vld [vmem:[#allocation7 + $0xb8] sm:$0xff]  ;;  %v2333_v27 = vld [vmem:[#allocation7 + $0x30] sm:$0xff] }
 0x8b1   : > { %v2184_v30 = vadd.f32 %v6784_v28, %v2113_v21  ;;  %v8294_v21 = vpack.c.bf16 %v2350_v26, %v2349_v20  ;;  %v2334_v28 = vld [vmem:[#allocation7 + $0x38] sm:$0xff]  ;;  %v2357_v20 = vld [vmem:[#allocation7 + $0xf0] sm:$0xff] }
 0x8b2   : > { %v8296_v35 = vpack.c.bf16 %v2334_v28, %v2333_v27  ;;  %v2358_v26 = vld [vmem:[#allocation7 + $0xf8] sm:$0xff]  ;;  %v2341_v27 = vld [vmem:[#allocation7 + $0x70] sm:$0xff] }
 0x8b3   : > { %v2254_v31 = vadd.f32 %v2253_v25, %v2184_v30  ;;  %v2381_v30 = vld [vmem:[#allocation7 + $0x1b0] sm:$0xff]  ;;  %8295 = vmatprep.subr.bf16.mxu1 %v8294_v21  ;;  %v8310_v21 = vpack.c.bf16 %v2358_v26, %v2357_v20  ;;  %v2342_v28 = vld [vmem:[#allocation7 + $0x78] sm:$0xff]  ;;  %v11081_v26 = vld [vmem:[%s11924_s19 + $0x9] sm:$0x7] }
 0x8b4   : > { %v8326_v11 = vpack.c.bf16 %v2382_v36, %v2381_v30  ;;  %8297 = vmatpush3.bf16.msra.mxu1 %v8296_v35  ;;  %v2389_v30 = vld [vmem:[#allocation7 + $0x1f0] sm:$0xff]  ;;  %v2374_v36 = vld [vmem:[#allocation7 + $0x178] sm:$0xff] }
 0x8b5   : > { %v11043_v33 = vmax.f32 %v2254_v31, 0.0  ;;  %8299 = vmatprep.subr.bf16.mxu1 %v8298_v45  ;;  %v2373_v35 = vld [vmem:[#allocation7 + $0x170] sm:$0xff] }
 0x8b6   : > { %8327 = vmatprep.subr.bf16.mxu0 %v8326_v11  ;;  %v8344_v38 = vpack.c.bf16 %v2374_v36, %v2373_v35 }
 0x8b7   : > { %2258 = vadd.xlane.f32.xlu1 %v11043_v33  ;;  %v2267_v34 = vmul.f32 %v11043_v33, %v11043_v33  ;;  %8329 = vmatpush3.bf16.msra.mxu0 %v8328_v39 }
 0x8b8   : > { %8301 = vmatpush3.bf16.msra.mxu1 %v8300_v51  ;;  %8331 = vmatprep.subr.bf16.mxu0 %v8330_v56 }
 0x8b9   : > { %2268 = vadd.xlane.f32.xlu0 %v2267_v34  ;;  %8303 = vmatprep.subr.bf16.mxu1 %v8302_v62 }
 0x8bb   : > { %8333 = vmatpush3.bf16.msra.mxu0 %v8332_v57  ;;  %v2391_v57 = vld [vmem:[#allocation7 + $0x200] sm:$0xff] }
 0x944   : > { %v2259_v14 = vpop.xlane.xlu1 %2258 }
 0x945   : > { %v2260_v40 = vrot.slane %v2259_v14, 4 }
 0x946   : > { %v2269_v41 = vpop.xlane.xlu0 %2268 }
 0x947   : > { %v2261_v2 = vadd.f32 %v2260_v40, %v2259_v14  ;;  %v2270_v3 = vrot.slane %v2269_v41, 4  ;;  %v2337_v14 = vld [vmem:[#allocation7 + $0x50] sm:$0xff]  ;;  %v2338_v40 = vld [vmem:[#allocation7 + $0x58] sm:$0xff] }
 0x949   : > { %v2262_v12 = vrot.slane %v2261_v2, 2  ;;  %v2271_v13 = vadd.f32 %v2270_v3, %v2269_v41  ;;  %v2385_v41 = vld [vmem:[#allocation7 + $0x1d0] sm:$0xff]  ;;  %v2386_v3 = vld [vmem:[#allocation7 + $0x1d8] sm:$0xff] }
 0x94a   : > { %v8334_v6 = vpack.c.bf16 %v2386_v3, %v2385_v41  ;;  %v2395_v3 = vld [vmem:[#allocation7 + $0x220] sm:$0xff] }
 0x94b   : > { %v2272_v24 = vrot.slane %v2271_v13, 2  ;;  %v2263_v25 = vadd.f32 %v2262_v12, %v2261_v2  ;;  %v8304_v2 = vpack.c.bf16 %v2338_v40, %v2337_v14  ;;  %v8306_v12 = vpack.c.bf16 %v2356_v63, %v2355_v8  ;;  %v2399_v63 = vld [vmem:[#allocation7 + $0x240] sm:$0xff] }
 0x94c   : > { %8335 = vmatprep.subr.bf16.mxu0 %v8334_v6  ;;  %v8353_v5 = vpack.c.bf16 %v2396_v4, %v2395_v3  ;;  %v2397_v6 = vld [vmem:[#allocation7 + $0x230] sm:$0xff]  ;;  %v6422_v3 = vld [vmem:[%s11968_s4 + $0xd0] sm:$0xff] }
 0x94d   : > { %v2264_v31 = vrot.slane %v2263_v25, 1  ;;  %v2273_v34 = vadd.f32 %v2272_v24, %v2271_v13  ;;  %8305 = vmatpush3.bf16.msra.mxu1 %v8304_v2  ;;  %v2339_v13 = vld [vmem:[#allocation7 + $0x60] sm:$0xff]  ;;  %8337 = vmatpush3.bf16.msra.mxu0 %v8336_v7  ;;  %v8338_v24 = vpack.c.bf16 %v2388_v18, %v2387_v16  ;;  %v8350_v2 = vpack.c.bf16 %v2394_v61, %v2393_v58  ;;  %v2398_v7 = vld [vmem:[#allocation7 + $0x238] sm:$0xff]  ;;  %v6423_v4 = vld [vmem:[%s11968_s4 + $0xd8] sm:$0xff] }
 0x94e   : > { %v8308_v17 = vpack.c.bf16 %v2340_v15, %v2339_v13  ;;  %8307 = vmatprep.subr.bf16.mxu1 %v8306_v12  ;;  %v8356_v8 = vpack.c.bf16 %v2398_v7, %v2397_v6  ;;  %v2400_v12 = vld [vmem:[#allocation7 + $0x248] sm:$0xff]  ;;  %v2401_v15 = vld [vmem:[#allocation7 + $0x250] sm:$0xff]  ;;  %v2402_v16 = vld [vmem:[#allocation7 + $0x258] sm:$0xff]  ;;  %v8386_v7 = vpack.c.bf16 %v6423_v4, %v6422_v3 }
 0x94f   : > { %v2265_v32 = vadd.f32 %v2264_v31, %v2263_v25  ;;  %v2274_v42 = vrot.slane %v2273_v34, 1  ;;  %v8340_v25 = vpack.c.bf16 %v2372_v23, %v2371_v22  ;;  %8339 = vmatprep.subr.bf16.mxu0 %v8338_v24  ;;  %v8312_v31 = vpack.c.bf16 %v2342_v28, %v2341_v27  ;;  %v2403_v18 = vld [vmem:[#allocation7 + $0x260] sm:$0xff]  ;;  %v2404_v22 = vld [vmem:[#allocation7 + $0x268] sm:$0xff]  ;;  %v2405_v24 = vld [vmem:[#allocation7 + $0x270] sm:$0xff] }
 0x950   : > { %v8359_v13 = vpack.c.bf16 %v2400_v12, %v2399_v63  ;;  %v8365_v23 = vpack.c.bf16 %v2404_v22, %v2403_v18  ;;  %v2411_v28 = vrot.slane %v11081_v26, %v10514_v10  ;;  %v6424_v12 = vld [vmem:[%s11968_s4 + $0xe0] sm:$0xff]  ;;  %v6426_v22 = vld [vmem:[%s11968_s4 + $0xf0] sm:$0xff] }
 0x951   : > { %9102 = vpush %v2265_v32  ;;  %v2275_v49 = vadd.f32 %v2274_v42, %v2273_v34  ;;  %8309 = vmatpush3.bf16.msra.mxu1 %v8308_v17  ;;  %8341 = vmatpush3.bf16.msra.mxu0 %v8340_v25  ;;  %v2390_v34 = vld [vmem:[#allocation7 + $0x1f8] sm:$0xff]  ;;  %v8362_v17 = vpack.c.bf16 %v2402_v16, %v2401_v15 }
 0x952   : > { %8311 = vmatprep.subr.bf16.mxu1 %v8310_v21  ;;  %v8342_v37 = vpack.c.bf16 %v2390_v34, %v2389_v30  ;;  %v2406_v25 = vld [vmem:[#allocation7 + $0x278] sm:$0xff] }
 0x953   : > { %9104 = vpush %v2275_v49  ;;  %v8368_v20 = vpack.c.bf16 %v2406_v25, %v2405_v24  ;;  %v2866_v3 = vld [vmem:[#allocation8 + $0x78] sm:$0xff] }
 0x954   : > { %8343 = vmatprep.subr.bf16.mxu0 %v8342_v37 }
 0x955   : > { %8313 = vmatpush3.bf16.msra.mxu1 %v8312_v31  ;;  %8345 = vmatpush3.bf16.msra.mxu0 %v8344_v38 }
 0x956   : > { %8346 = vmatprep.subr.bf16.mxu1 %v9689_v1  ;;  %8370 = vmatprep.subr.bf16.mxu0 %v9689_v1 }
 0x982   : > { %s9103_s30 = spop %9102 }
 0x983   : > { %s2277_s28 = smul.f32 0.0009765625, %s9103_s30 }
 0x984   : > { %s9105_s29 = spop %9104 }
 0x985   : > { %s2279_s9 = smul.f32 %s2277_s28, %s2277_s28  ;;  %v2288_v43 = vstv %s2277_s28 }
 0x986   : > { %s2278_s20 = smul.f32 0.0009765625, %s9105_s29 }
 0x988   : > { %s2280_s1 = ssub.f32 %s2278_s20, %s2279_s9 }
 0x98a   : > { %s2281_s23 = smax.f32 %s9688_s25, %s2280_s1 }
 0x98b   : > { %s2282_s0 = sadd.f32 1e-05, %s2281_s23 }
 0x98d   : > { %v2283_v11 = vstv %s2282_s0 }
 0x98e   : > { %9304 = vrsqrt.f32 %v2283_v11 }
 0x998   : > { %v9305_v39 = vpop.eup %9304 }
 0x999   : > { %9106 = vpush %v9305_v39 }
 0x9ca   : > { %s9107_s21 = spop %9106 }
 0x9cb   : > { %v2286_v32 = vstv %s9107_s21 }
 0x9cc   : > { %v2287_v42 = vmul.f32 %v2286_v32, %v11039_v19 }
 0x9ce   : > { %v2289_v44 = vmul.f32 %v2288_v43, %v2287_v42  ;;  %v2297_v46 = vrot.slane %v2287_v42, %v10743_v50  ;;  %v6412_v43 = vld [vmem:[%s11968_s4 + $0x80] sm:$0xff] }
 0x9d0   : > { %v2291_v45 = vrot.slane %v2289_v44, 7  ;;  %v2298_v48 = vmul.f32 %v2297_v46, %v11043_v33  ;;  %v6413_v44 = vld [vmem:[%s11968_s4 + $0x88] sm:$0xff] }
 0x9d1   : > { %v8371_v46 = vpack.c.bf16 %v6413_v44, %v6412_v43 }
 0x9d2   : > { %v2293_v47 = vsub.f32 %v11039_v19, %v2291_v45  ;;  %v2392_v19 = vld [vmem:[#allocation7 + $0x208] sm:$0xff] }
 0x9d3   : > { %v8347_v33 = vpack.c.bf16 %v2392_v19, %v2391_v57  ;;  %v6414_v45 = vld [vmem:[%s11968_s4 + $0x90] sm:$0xff]  ;;  %v6420_v57 = vld [vmem:[%s11968_s4 + $0xc0] sm:$0xff]  ;;  %v6421_v19 = vld [vmem:[%s11968_s4 + $0xc8] sm:$0xff] }
 0x9d4   : > { %v2302_v49 = vrot.slane %v2293_v47, %v10747_v55  ;;  %v6415_v47 = vld [vmem:[%s11968_s4 + $0x98] sm:$0xff] }
 0x9d6   : > { %v2303_v51 = vadd.f32 %v2302_v49, %v2298_v48  ;;  %v8374_v48 = vpack.c.bf16 %v6415_v47, %v6414_v45  ;;  %v6416_v49 = vld [vmem:[%s11968_s4 + $0xa0] sm:$0xff]  ;;  %v2851_v45 = vld [vmem:[#allocation8] sm:$0xff]  ;;  %v2853_v47 = vld [vmem:[#allocation8 + $0x10] sm:$0xff] }
 0x9d8   : > { %v2306_v52 = vrot.slane %v2303_v51, 6  ;;  %v2310_v53 = vrot.slane %v2303_v51, 7  ;;  %2313 = vst [vmem:[#allocation2 + $0x10] sm:$0xff] %v2303_v51  ;;  %v2315_v54 = vrot.slane %v2303_v51, 1  ;;  %v2319_v56 = vrot.slane %v2303_v51, 2 }
 0x9d9   : > { %3009 = vst [vmem:[#allocation2 + $0x13] sm:$0x1] %v9687_v0  ;;  %4552 = vst [vmem:[#allocation2 + $0x17] sm:$0x1] %v9687_v0 }
 0x9da   : > { %2308 = vst [vmem:[#allocation2] sm:$0xfc] %v2306_v52  ;;  %2312 = vst [vmem:[#allocation2 + $0x8] sm:$0xfe] %v2310_v53  ;;  %v6418_v53 = vld [vmem:[%s11968_s4 + $0xb0] sm:$0xff] }
 0x9db   : > { %2317 = vst [vmem:[#allocation2 + $0x18] sm:$0x7f] %v2315_v54  ;;  %2321 = vst [vmem:[#allocation2 + $0x20] sm:$0x3f] %v2319_v56  ;;  %v6419_v54 = vld [vmem:[%s11968_s4 + $0xb8] sm:$0xff] }
 0x9dc   : > { %v8380_v56 = vpack.c.bf16 %v6419_v54, %v6418_v53  ;;  %v2857_v53 = vld [vmem:[#allocation8 + $0x30] sm:$0xff]  ;;  %v2858_v54 = vld [vmem:[#allocation8 + $0x38] sm:$0xff] }
 0x9e1   : > { %v2322_v62 = vld [vmem:[#allocation2] sm:$0xff]  ;;  %v2323_v14 = vld [vmem:[#allocation2 + $0x8] sm:$0xff] }
 0x9e2   : > { %v2325_v40 = vld [vmem:[#allocation2 + $0x18] sm:$0xff]  ;;  %2844 = vst.msk [vmem:[#allocation2 + $0xb] sm:$0x1] %vm2832_vm1, %v9687_v0  ;;  %2833 = vst.msk [vmem:[#allocation2] sm:$0x1] %vm2832_vm1, %v9687_v0  ;;  %2476 = vmatprep.mubr.f32.mxu1 %v2323_v14  ;;  %v2326_v41 = vld [vmem:[#allocation2 + $0x20] sm:$0xff] }
 0x9e3   : > { %2546 = vmatprep.mubr.f32.mxu0 %v2325_v40  ;;  %2477 = vmatmul.mubr.f32.vlgmr.msra.gmra.mrb[16].mxu1 %v2322_v62  ;;  %3861 = vst.msk [vmem:[#allocation2 + $0x23] sm:$0x1] %vm2832_vm1, %v9687_v0 }
 0x9e4   : > { %2547 = vmatmul.mubr.f32.vlgmr.msra.gmra.mrb[20].mxu0 %v2303_v51  ;;  %8348 = vmatpush3.bf16.msra.mxu1 %v8347_v33  ;;  %v6417_v51 = vld [vmem:[%s11968_s4 + $0xa8] sm:$0xff]  ;;  %v8383_v33 = vpack.c.bf16 %v6421_v19, %v6420_v57  ;;  %v2860_v19 = vld [vmem:[#allocation8 + $0x48] sm:$0xff] }
 0x9e5   : > { %7655 = vmatprep.mubr.msk.f32.mxu1 %vm9690_vm7, %v9687_v0  ;;  %8349 = vmatprep.subr.bf16.mxu1 %v9689_v1  ;;  %v8377_v52 = vpack.c.bf16 %v6417_v51, %v6416_v49  ;;  %v2854_v49 = vld [vmem:[#allocation8 + $0x18] sm:$0xff]  ;;  %v2859_v57 = vld [vmem:[#allocation8 + $0x40] sm:$0xff] }
 0x9e6   : > { %7690 = vmatprep.mubr.msk.f32.mxu0 %vm9690_vm7, %v9687_v0  ;;  %8372 = vmatpush3.bf16.msra.mxu0 %v8371_v46  ;;  %v2852_v46 = vld [vmem:[#allocation8 + $0x8] sm:$0xff]  ;;  %v8398_v51 = vpack.c.bf16 %v2854_v49, %v2853_v47 }
 0x9e7   : > { %8373 = vmatprep.subr.bf16.mxu0 %v9689_v1 }
 0x9e8   : > { %8351 = vmatpush3.bf16.msra.mxu1 %v8350_v2 }
 0x9e9   : > { %8352 = vmatprep.subr.bf16.mxu1 %v9689_v1 }
 0x9ea   : > { %8375 = vmatpush3.bf16.msra.mxu0 %v8374_v48  ;;  %v8395_v48 = vpack.c.bf16 %v2852_v46, %v2851_v45 }
 0x9eb   : > { %8376 = vmatprep.subr.bf16.mxu0 %v9689_v1 }
 0x9ec   : > { %8354 = vmatpush3.bf16.msra.mxu1 %v8353_v5 }
 0x9ed   : > { %8355 = vmatprep.subr.bf16.mxu1 %v9689_v1 }
 0x9ee   : > { %8378 = vmatpush3.bf16.msra.mxu0 %v8377_v52 }
 0x9ef   : > { %8379 = vmatprep.subr.bf16.mxu0 %v9689_v1 }
 0x9f0   : > { %8357 = vmatpush3.bf16.msra.mxu1 %v8356_v8 }
 0x9f1   : > { %8358 = vmatprep.subr.bf16.mxu1 %v9689_v1 }
 0x9f2   : > { %8381 = vmatpush3.bf16.msra.mxu0 %v8380_v56  ;;  %v8404_v56 = vpack.c.bf16 %v2858_v54, %v2857_v53 }
 0x9f3   : > { %8382 = vmatprep.subr.bf16.mxu0 %v9689_v1 }
 0x9f4   : > { %8360 = vmatpush3.bf16.msra.mxu1 %v8359_v13  ;;  %v6425_v13 = vld [vmem:[%s11968_s4 + $0xe8] sm:$0xff] }
 0x9f5   : > { %8361 = vmatprep.subr.bf16.mxu1 %v9689_v1 }
 0x9f6   : > { %8384 = vmatpush3.bf16.msra.mxu0 %v8383_v33  ;;  %v8407_v33 = vpack.c.bf16 %v2860_v19, %v2859_v57 }
 0x9f7   : > { %8385 = vmatprep.subr.bf16.mxu0 %v9689_v1 }
 0x9f8   : > { %8363 = vmatpush3.bf16.msra.mxu1 %v8362_v17  ;;  %v8389_v17 = vpack.c.bf16 %v6425_v13, %v6424_v12  ;;  %v2871_v13 = vld [vmem:[#allocation8 + $0xa0] sm:$0xff] }
 0x9f9   : > { %8364 = vmatprep.subr.bf16.mxu1 %v9689_v1 }
 0x9fa   : > { %8387 = vmatpush3.bf16.msra.mxu0 %v8386_v7 }
 0x9fb   : > { %8388 = vmatprep.subr.bf16.mxu0 %v9689_v1 }
 0x9fc   : > { %8366 = vmatpush3.bf16.msra.mxu1 %v8365_v23  ;;  %v6427_v23 = vld [vmem:[%s11968_s4 + $0xf8] sm:$0xff] }
 0x9fd   : > { %8367 = vmatprep.subr.bf16.mxu1 %v9689_v1  ;;  %v8392_v24 = vpack.c.bf16 %v6427_v23, %v6426_v22 }
 0x9fe   : > { %8390 = vmatpush3.bf16.msra.mxu0 %v8389_v17  ;;  %v2873_v17 = vld [vmem:[#allocation8 + $0xb0] sm:$0xff] }
 0x9ff   : > { %8391 = vmatprep.subr.bf16.mxu0 %v9689_v1 }
 0xa00   : > { %8369 = vmatpush3.bf16.msra.mxu1 %v8368_v20 }
 0xa01   : > { %7693 = vmatprep.subr.mxu1 %v9687_v0 }
 0xa02   : > { %8393 = vmatpush3.bf16.msra.mxu0 %v8392_v24 }
 0xa03   : > { %7656 = vmatmul.mubr.f32.vlgmr.msra.gmra.mrb[18].mxu1 %v2326_v41 }
 0xa04   : > { %7695 = vmatprep.mubr.msk.f32.mxu1 %vm9690_vm7, %v9687_v0 }
 0xab6   : > { %v6826_v21 = vpop.f32.mrb[16].mxu1 }
 0xab7   : > { %v6861_v27 = vpop.f32.mrb[20].mxu0  ;;  %v6827_v30 = vpop.f32.mrb[17].mxu1 }
 0xab8   : > { %v6862_v31 = vpop.f32.mrb[21].mxu0  ;;  %v6828_v34 = vadd.f32 %v6827_v30, %v6826_v21 }
 0xab9   : > { %v6863_v35 = vadd.f32 %v6862_v31, %v6861_v27 }
 0xaba   : > { %v2479_v36 = vadd.f32 %v6828_v34, %v2411_v28 }
 0xabc   : > { %v2549_v37 = vadd.f32 %v6863_v35, %v2479_v36 }
 0xad6   : > { %v2618_v38 = vpop.f32.mrb[18].mxu1 }
 0xad7   : > { %v2619_v11 = vadd.f32 %v2618_v38, %v2549_v37  ;;  %v7657_v39 = vpop.f32.mrb[19].mxu1 }
 0xad8   : > { %v5300_v39 = vrot.slane %v11002_v60, 1 }
 0xad9   : > { %v11085_v32 = vmax.f32 %v2619_v11, 0.0 }
 0xada   : > { %v5302_v43 = vsel %vm824_vm5, %v5300_v39, %v5301_v9  ;;  %v2856_v9 = vld [vmem:[#allocation8 + $0x28] sm:$0xff] }
 0xadb   : > { %2623 = vadd.xlane.f32.xlu0 %v11085_v32  ;;  %v2632_v42 = vmul.f32 %v11085_v32, %v11085_v32  ;;  %v8401_v52 = vpack.c.bf16 %v2856_v9, %v2855_v59 }
 0xadd   : > { %2633 = vadd.xlane.f32.xlu1 %v2632_v42 }
 0xb68   : > { %v2624_v58 = vpop.xlane.xlu0 %2623 }
 0xb69   : > { %v2625_v61 = vrot.slane %v2624_v58, 4 }
 0xb6a   : > { %v2634_v62 = vpop.xlane.xlu1 %2633 }
 0xb6b   : > { %v2626_v14 = vadd.f32 %v2625_v61, %v2624_v58  ;;  %v2635_v40 = vrot.slane %v2634_v62, 4  ;;  %v2861_v58 = vld [vmem:[#allocation8 + $0x50] sm:$0xff]  ;;  %v2862_v61 = vld [vmem:[#allocation8 + $0x58] sm:$0xff] }
 0xb6d   : > { %v2627_v41 = vrot.slane %v2626_v14, 2  ;;  %v2636_v2 = vadd.f32 %v2635_v40, %v2634_v62  ;;  %v8410_v62 = vpack.c.bf16 %v2862_v61, %v2861_v58  ;;  %v2864_v40 = vld [vmem:[#allocation8 + $0x68] sm:$0xff] }
 0xb6f   : > { %v2637_v5 = vrot.slane %v2636_v2, 2  ;;  %v2628_v6 = vadd.f32 %v2627_v41, %v2626_v14  ;;  %v2863_v14 = vld [vmem:[#allocation8 + $0x60] sm:$0xff] }
 0xb70   : > { %v8413_v41 = vpack.c.bf16 %v2864_v40, %v2863_v14 }
 0xb71   : > { %v2629_v8 = vrot.slane %v2628_v6, 1  ;;  %v2638_v63 = vadd.f32 %v2637_v5, %v2636_v2  ;;  %v2865_v2 = vld [vmem:[#allocation8 + $0x70] sm:$0xff]  ;;  %v2867_v5 = vld [vmem:[#allocation8 + $0x80] sm:$0xff] }
 0xb72   : > { %v8416_v4 = vpack.c.bf16 %v2866_v3, %v2865_v2 }
 0xb73   : > { %v2630_v15 = vadd.f32 %v2629_v8, %v2628_v6  ;;  %v2639_v16 = vrot.slane %v2638_v63, 1  ;;  %v2868_v6 = vld [vmem:[#allocation8 + $0x88] sm:$0xff]  ;;  %v2869_v8 = vld [vmem:[#allocation8 + $0x90] sm:$0xff] }
 0xb74   : > { %v8419_v7 = vpack.c.bf16 %v2868_v6, %v2867_v5 }
 0xb75   : > { %9108 = vpush %v2630_v15  ;;  %v2640_v18 = vadd.f32 %v2639_v16, %v2638_v63  ;;  %v2870_v63 = vld [vmem:[#allocation8 + $0x98] sm:$0xff]  ;;  %v2872_v15 = vld [vmem:[#allocation8 + $0xa8] sm:$0xff] }
 0xb76   : > { %v8422_v12 = vpack.c.bf16 %v2870_v63, %v2869_v8  ;;  %v8425_v16 = vpack.c.bf16 %v2872_v15, %v2871_v13 }
 0xb77   : > { %9110 = vpush %v2640_v18  ;;  %v2874_v18 = vld [vmem:[#allocation8 + $0xb8] sm:$0xff] }
 0xb78   : > { %v8428_v22 = vpack.c.bf16 %v2874_v18, %v2873_v17 }
 0xba6   : > { %s9109_s20 = spop %9108 }
 0xba7   : > { %s2642_s1 = smul.f32 0.0009765625, %s9109_s20  ;;  %s11969_s20 = sld [smem:[#allocation33_spill]] }
 0xba8   : > { %s9111_s23 = spop %9110 }
 0xba9   : > { %s2644_s0 = smul.f32 %s2642_s1, %s2642_s1  ;;  %v2653_v28 = vstv %s2642_s1 }
 0xbaa   : > { %s2643_s21 = smul.f32 0.0009765625, %s9111_s23 }
 0xbac   : > { %s2645_s11 = ssub.f32 %s2643_s21, %s2644_s0 }
 0xbad   : > { %v3017_v46 = vld [vmem:[%s11969_s20 + $0x8] sm:$0xff]  ;;  %v3034_v47 = vld [vmem:[%s11969_s20 + $0x90] sm:$0xff]  ;;  %v3019_v9 = vld [vmem:[%s11969_s20 + $0x18] sm:$0xff] }
 0xbae   : > { %s2646_s6 = smax.f32 %s9688_s25, %s2645_s11  ;;  %v3018_v59 = vld [vmem:[%s11969_s20 + $0x10] sm:$0xff]  ;;  %v3037_v53 = vld [vmem:[%s11969_s20 + $0xa8] sm:$0xff]  ;;  %v3020_v61 = vld [vmem:[%s11969_s20 + $0x20] sm:$0xff] }
 0xbaf   : > { %s2647_s10 = sadd.f32 1e-05, %s2646_s6  ;;  %v8436_v54 = vpack.c.bf16 %v3019_v9, %v3018_v59  ;;  %v3039_v5 = vld [vmem:[%s11969_s20 + $0xb8] sm:$0xff]  ;;  %v3040_v17 = vld [vmem:[%s11969_s20 + $0xc0] sm:$0xff]  ;;  %v3041_v18 = vld [vmem:[%s11969_s20 + $0xc8] sm:$0xff] }
 0xbb0   : > { %v3023_v8 = vld [vmem:[%s11969_s20 + $0x38] sm:$0xff] }
 0xbb1   : > { %v2648_v25 = vstv %s2647_s10 }
 0xbb2   : > { %9306 = vrsqrt.f32 %v2648_v25 }
 0xbbc   : > { %v9307_v20 = vpop.eup %9306 }
 0xbbd   : > { %9112 = vpush %v9307_v20 }
 0xbee   : > { %s9113_s27 = spop %9112 }
 0xbef   : > { %v2651_v21 = vstv %s9113_s27 }
 0xbf0   : > { %v2652_v27 = vmul.f32 %v2651_v21, %v11081_v26 }
 0xbf2   : > { %v2654_v30 = vmul.f32 %v2653_v28, %v2652_v27  ;;  %v2662_v34 = vrot.slane %v2652_v27, %v10743_v50 }
 0xbf4   : > { %v2656_v31 = vrot.slane %v2654_v30, 7  ;;  %v2663_v36 = vmul.f32 %v2662_v34, %v11085_v32  ;;  %v11186_v30 = vld [vmem:[%s11924_s19 + $0xc] sm:$0x7] }
 0xbf6   : > { %v2658_v35 = vsub.f32 %v11081_v26, %v2656_v31  ;;  %v2757_v26 = vld [vmem:[#allocation3 + $0x8] sm:$0xf]  ;;  %v2879_v31 = vrot.slane %v11186_v30, %v10514_v10 }
 0xbf8   : > { %v2667_v37 = vrot.slane %v2658_v35, %v10747_v55 }
 0xbfa   : > { %v11151_v38 = vadd.f32 %v2667_v37, %v2663_v36 }
 0xbfc   : > { %7691 = vmatmul.mubr.f32.vlgmr.msra.gmra.mrb[22].mxu0 %v11151_v38  ;;  %v4563_v11 = vrot.slane %v11151_v38, 1 }
 0xbfe   : > { %4565 = vst [vmem:[#allocation2 + $0x28] sm:$0x7f] %v4563_v11 }
 0xc05   : > { %v11156_v42 = vld [vmem:[#allocation2 + $0x28] sm:$0xff] }
 0xc06   : > { %5305 = vst [vmem:[#allocation2 + $0x28] sm:$0xff] %v5302_v43 }
 0xccf   : > { %v2752_v32 = vpop.f32.mrb[22].mxu0 }
 0xcd0   : > { %v7692_v44 = vpop.f32.mrb[23].mxu0  ;;  %7694 = vmatpush3.msra.mxu1 %v2752_v32  ;;  %v3033_v32 = vld [vmem:[%s11969_s20 + $0x88] sm:$0xff] }
 0xcd1   : > { %7696 = vmatmul.mubr.msk.f32.vlgmr.msra.gmra.mrb[20].mxu1 %vm2758_vm3, %v2757_v26  ;;  %8394 = vmatprep.subr.bf16.mxu1 %v9689_v1  ;;  %v3032_v26 = vld [vmem:[%s11969_s20 + $0x80] sm:$0xff] }
 0xcd2   : > { %8396 = vmatpush1.bf16.msra.mxu1 %v8395_v48  ;;  %v3016_v44 = vld [vmem:[%s11969_s20] sm:$0xff]  ;;  %v8430_v45 = vpack.c.bf16 %v3033_v32, %v3032_v26  ;;  %v3035_v48 = vld [vmem:[%s11969_s20 + $0x98] sm:$0xff]  ;;  %v3029_v32 = vld [vmem:[%s11969_s20 + $0x68] sm:$0xff] }
 0xcd3   : > { %8397 = vmatprep.subr.bf16.mxu1 %v9689_v1  ;;  %v8432_v49 = vpack.c.bf16 %v3017_v46, %v3016_v44  ;;  %v3028_v26 = vld [vmem:[%s11969_s20 + $0x60] sm:$0xff]  ;;  %v3047_v46 = vld [vmem:[%s11969_s20 + $0xf8] sm:$0xff] }
 0xcd4   : > { %8431 = vmatprep.subr.bf16.mxu0 %v8430_v45  ;;  %v8456_v44 = vpack.c.bf16 %v3029_v32, %v3028_v26  ;;  %v3046_v45 = vld [vmem:[%s11969_s20 + $0xf0] sm:$0xff] }
 0xcd5   : > { %8433 = vmatpush3.bf16.msra.mxu0 %v8432_v49  ;;  %v3031_v49 = vld [vmem:[%s11969_s20 + $0x78] sm:$0xff] }
 0xcd6   : > { %8399 = vmatpush1.bf16.msra.mxu1 %v8398_v51  ;;  %v8434_v51 = vpack.c.bf16 %v3035_v48, %v3034_v47  ;;  %v8458_v47 = vpack.c.bf16 %v3047_v46, %v3046_v45  ;;  %v3030_v48 = vld [vmem:[%s11969_s20 + $0x70] sm:$0xff] }
 0xcd7   : > { %8400 = vmatprep.subr.bf16.mxu1 %v9689_v1 }
 0xcd8   : > { %8435 = vmatprep.subr.bf16.mxu0 %v8434_v51  ;;  %v8460_v51 = vpack.c.bf16 %v3031_v49, %v3030_v48 }
 0xcd9   : > { %8437 = vmatpush3.bf16.msra.mxu0 %v8436_v54 }
 0xcda   : > { %8402 = vmatpush1.bf16.msra.mxu1 %v8401_v52  ;;  %v3036_v52 = vld [vmem:[%s11969_s20 + $0xa0] sm:$0xff] }
 0xcdb   : > { %8403 = vmatprep.subr.bf16.mxu1 %v9689_v1 }
 0xcde   : > { %8405 = vmatpush1.bf16.msra.mxu1 %v8404_v56  ;;  %v8438_v56 = vpack.c.bf16 %v3037_v53, %v3036_v52 }
 0xcdf   : > { %8406 = vmatprep.subr.bf16.mxu1 %v9689_v1 }
 0xce0   : > { %8439 = vmatprep.subr.bf16.mxu0 %v8438_v56 }
 0xce2   : > { %8408 = vmatpush1.bf16.msra.mxu1 %v8407_v33 }
 0xce3   : > { %8409 = vmatprep.subr.bf16.mxu1 %v9689_v1 }
 0xce6   : > { %8411 = vmatpush1.bf16.msra.mxu1 %v8410_v62  ;;  %v3021_v62 = vld [vmem:[%s11969_s20 + $0x28] sm:$0xff] }
 0xce7   : > { %8412 = vmatprep.subr.bf16.mxu1 %v9689_v1 }
 0xcea   : > { %8414 = vmatpush1.bf16.msra.mxu1 %v8413_v41  ;;  %v8440_v41 = vpack.c.bf16 %v3021_v62, %v3020_v61 }
 0xceb   : > { %8415 = vmatprep.subr.bf16.mxu1 %v9689_v1 }
 0xcec   : > { %8441 = vmatpush3.bf16.msra.mxu0 %v8440_v41  ;;  %v3048_v41 = vld [vmem:[%s11969_s20 + $0x100] sm:$0xff] }
 0xcee   : > { %8417 = vmatpush1.bf16.msra.mxu1 %v8416_v4  ;;  %v3038_v4 = vld [vmem:[%s11969_s20 + $0xb0] sm:$0xff] }
 0xcef   : > { %8418 = vmatprep.subr.bf16.mxu1 %v9689_v1  ;;  %v8442_v6 = vpack.c.bf16 %v3039_v5, %v3038_v4  ;;  %v3051_v4 = vld [vmem:[%s11969_s20 + $0x118] sm:$0xff] }
 0xcf1   : > { %8443 = vmatprep.subr.bf16.mxu0 %v8442_v6 }
 0xcf2   : > { %8420 = vmatpush1.bf16.msra.mxu1 %v8419_v7  ;;  %v3022_v7 = vld [vmem:[%s11969_s20 + $0x30] sm:$0xff] }
 0xcf3   : > { %8421 = vmatprep.subr.bf16.mxu1 %v9689_v1  ;;  %v8444_v13 = vpack.c.bf16 %v3023_v8, %v3022_v7  ;;  %v3052_v8 = vld [vmem:[%s11969_s20 + $0x120] sm:$0xff] }
 0xcf5   : > { %8445 = vmatpush3.bf16.msra.mxu0 %v8444_v13  ;;  %v3054_v13 = vld [vmem:[%s11969_s20 + $0x130] sm:$0xff] }
 0xcf6   : > { %8423 = vmatpush1.bf16.msra.mxu1 %v8422_v12 }
 0xcf7   : > { %8424 = vmatprep.subr.bf16.mxu1 %v9689_v1 }
 0xcfa   : > { %8426 = vmatpush1.bf16.msra.mxu1 %v8425_v16 }
 0xcfb   : > { %8427 = vmatprep.subr.bf16.mxu1 %v9689_v1 }
 0xcfe   : > { %8429 = vmatpush1.bf16.msra.mxu1 %v8428_v22  ;;  %v8446_v22 = vpack.c.bf16 %v3041_v18, %v3040_v17  ;;  %v3056_v17 = vld [vmem:[%s11969_s20 + $0x140] sm:$0xff]  ;;  %v3057_v18 = vld [vmem:[%s11969_s20 + $0x148] sm:$0xff] }
 0xcff   : > { %8486 = vmatprep.subr.bf16.mxu1 %v9689_v1 }
 0xd00   : > { %8447 = vmatprep.subr.bf16.mxu0 %v8446_v22  ;;  %v8475_v22 = vpack.c.bf16 %v3057_v18, %v3056_v17  ;;  %v6442_v17 = vld [vmem:[%s11968_s4 + $0x160] sm:$0xff]  ;;  %v6443_v18 = vld [vmem:[%s11968_s4 + $0x168] sm:$0xff] }
 0xda4   : > { %v2828_v23 = vpop.f32.mrb[20].mxu1 }
 0xda5   : > { %v2835_v24 = vrot.slane %v2828_v23, 7  ;;  %v2845_v25 = vrot.slane %v2828_v23, 1  ;;  %2839 = vrot.lane.b32.xlu0 %v2828_v23, %s9691_s2  ;;  %v7697_v20 = vpop.f32.mrb[21].mxu1  ;;  %v3024_v23 = vld [vmem:[%s11969_s20 + $0x40] sm:$0xff] }
 0xda7   : > { %2848 = vst.msk [vmem:[#allocation2 + $0x8] sm:$0x7] %vm2847_vm4, %v2845_v25 }
 0xda8   : > { %2838 = vst.msk [vmem:[#allocation2] sm:$0xe] %vm2837_vm6, %v2835_v24  ;;  %v3025_v24 = vld [vmem:[%s11969_s20 + $0x48] sm:$0xff] }
 0xda9   : > { %v8448_v20 = vpack.c.bf16 %v3025_v24, %v3024_v23  ;;  %v3058_v23 = vld [vmem:[%s11969_s20 + $0x150] sm:$0xff]  ;;  %v3059_v24 = vld [vmem:[%s11969_s20 + $0x158] sm:$0xff] }
 0xdab   : > { %8449 = vmatpush3.bf16.msra.mxu0 %v8448_v20  ;;  %v3060_v20 = vld [vmem:[%s11969_s20 + $0x160] sm:$0xff] }
 0xdae   : > { %v2850_v21 = vld [vmem:[#allocation2 + $0x8] sm:$0xf] }
 0xdaf   : > { %6429 = vmatprep.mubr.msk.f32.mxu1 %vm2051_vm11, %v2850_v21 }
 0xe17   : > { %v2840_v27 = vpop.permute.xlu0 %2839 }
 0xe18   : > { %2843 = vst.msk [vmem:[#allocation2] sm:$0xf] %vm2842_vm8, %v2840_v27  ;;  %v3042_v27 = vld [vmem:[%s11969_s20 + $0xd0] sm:$0xff] }
 0xe1f   : > { %v2849_v28 = vld [vmem:[#allocation2] sm:$0xf] }
 0xe20   : > { %3003 = vst [vmem:[#allocation2] sm:$0x1] %v9687_v0  ;;  %2948 = vmatmul.mubr.f32.vlgmr.msra.gmra.mrb[22].mxu1 %v2849_v28  ;;  %v3043_v28 = vld [vmem:[%s11969_s20 + $0xd8] sm:$0xff] }
 0xe21   : > { %7765 = vmatprep.mubr.msk.f32.mxu1 %vm9690_vm7, %v9687_v0 }
 0xef3   : > { %v2949_v34 = vpop.f32.mrb[22].mxu1 }
 0xef4   : > { %v2950_v35 = vadd.f32 %v2949_v34, %v2879_v31  ;;  %v2951_v36 = vpop.f32.mrb[23].mxu1  ;;  %v8450_v31 = vpack.c.bf16 %v3043_v28, %v3042_v27  ;;  %v3026_v34 = vld [vmem:[%s11969_s20 + $0x50] sm:$0xff] }
 0xef5   : > { %v3062_v28 = vld [vmem:[%s11969_s20 + $0x170] sm:$0xff] }
 0xef6   : > { %v11190_v37 = vmax.f32 %v2950_v35, 0.0  ;;  %v3027_v35 = vld [vmem:[%s11969_s20 + $0x58] sm:$0xff]  ;;  %8451 = vmatprep.subr.bf16.mxu0 %v8450_v31 }
 0xef7   : > { %v8452_v36 = vpack.c.bf16 %v3027_v35, %v3026_v34  ;;  %v3063_v31 = vld [vmem:[%s11969_s20 + $0x178] sm:$0xff] }
 0xef8   : > { %v2955_v11 = vsel %vm2954_vm12, %v11190_v37, 0.0  ;;  %v2965_v39 = vmul.f32 %v11190_v37, %v11190_v37  ;;  %v8484_v34 = vpack.c.bf16 %v3063_v31, %v3062_v28 }
 0xef9   : > { %2956 = vadd.xlane.f32.xlu1 %v2955_v11  ;;  %8453 = vmatpush3.bf16.msra.mxu0 %v8452_v36  ;;  %v3044_v11 = vld [vmem:[%s11969_s20 + $0xe0] sm:$0xff] }
 0xefa   : > { %v2966_v43 = vsel %vm2954_vm12, %v2965_v39, 0.0  ;;  %v3045_v39 = vld [vmem:[%s11969_s20 + $0xe8] sm:$0xff] }
 0xefd   : > { %2967 = vadd.xlane.f32.xlu1 %v2966_v43  ;;  %v8454_v43 = vpack.c.bf16 %v3045_v39, %v3044_v11  ;;  %v11369_v39 = vld [vmem:[%s11924_s19 + $0xf] sm:$0x7] }
 0xeff   : > { %8455 = vmatprep.subr.bf16.mxu0 %v8454_v43  ;;  %v3068_v43 = vrot.slane %v11369_v39, %v10514_v10 }
 0xf00   : > { %8457 = vmatpush3.bf16.msra.mxu0 %v8456_v44 }
 0xf01   : > { %8459 = vmatprep.subr.bf16.mxu0 %v8458_v47 }
 0xf04   : > { %8461 = vmatpush3.bf16.msra.mxu0 %v8460_v51  ;;  %v6430_v51 = vld [vmem:[%s11968_s4 + $0x100] sm:$0xff] }
 0xf05   : > { %8462 = vmatprep.subr.bf16.mxu0 %v9689_v1 }
 0xf86   : > { %v2957_v57 = vpop.xlane.xlu1 %2956 }
 0xf87   : > { %v2958_v19 = vrot.slane %v2957_v57, 4 }
 0xf89   : > { %v2959_v33 = vadd.f32 %v2958_v19, %v2957_v57 }
 0xf8a   : > { %v2968_v58 = vpop.xlane.xlu1 %2967 }
 0xf8b   : > { %v2960_v14 = vrot.slane %v2959_v33, 2  ;;  %v2969_v40 = vrot.slane %v2968_v58, 4 }
 0xf8d   : > { %v2970_v2 = vadd.f32 %v2969_v40, %v2968_v58  ;;  %v2961_v3 = vadd.f32 %v2960_v14, %v2959_v33 }
 0xf8f   : > { %v2971_v63 = vrot.slane %v2970_v2, 2  ;;  %v2962_v12 = vrot.slane %v2961_v3, 1 }
 0xf91   : > { %v2963_v15 = vadd.f32 %v2962_v12, %v2961_v3  ;;  %v2972_v16 = vadd.f32 %v2971_v63, %v2970_v2  ;;  %v3049_v2 = vld [vmem:[%s11969_s20 + $0x108] sm:$0xff] }
 0xf92   : > { %v3053_v63 = vld [vmem:[%s11969_s20 + $0x128] sm:$0xff] }
 0xf93   : > { %9114 = vpush %v2963_v15  ;;  %v2973_v25 = vrot.slane %v2972_v16, 1  ;;  %v8469_v12 = vpack.c.bf16 %v3053_v63, %v3052_v8  ;;  %v3055_v15 = vld [vmem:[%s11969_s20 + $0x138] sm:$0xff] }
 0xf94   : > { %v6441_v8 = vld [vmem:[%s11968_s4 + $0x158] sm:$0xff] }
 0xf95   : > { %v2974_v21 = vadd.f32 %v2973_v25, %v2972_v16  ;;  %v8472_v16 = vpack.c.bf16 %v3055_v15, %v3054_v13  ;;  %v8478_v25 = vpack.c.bf16 %v3059_v24, %v3058_v23 }
 0xf97   : > { %9116 = vpush %v2974_v21  ;;  %v3061_v21 = vld [vmem:[%s11969_s20 + $0x168] sm:$0xff] }
 0xf98   : > { %v8481_v27 = vpack.c.bf16 %v3061_v21, %v3060_v20  ;;  %v6445_v20 = vld [vmem:[%s11968_s4 + $0x178] sm:$0xff] }
 0xfc4   : > { %s9115_s0 = spop %9114 }
 0xfc5   : > { %s2976_s21 = smul.f32 0.001953125, %s9115_s0 }
 0xfc7   : > { %s2978_s11 = smul.f32 %s2976_s21, %s2976_s21  ;;  %v2987_v54 = vstv %s2976_s21 }
 0xfc8   : > { %s9117_s6 = spop %9116 }
 0xfc9   : > { %s2977_s10 = smul.f32 0.001953125, %s9117_s6 }
 0xfcb   : > { %s2979_s27 = ssub.f32 %s2977_s10, %s2978_s11  ;;  %s11970_s11 = sld [smem:[#allocation34_spill]] }
 0xfcd   : > { %s2980_s30 = smax.f32 %s9688_s25, %s2979_s27 }
 0xfce   : > { %s2981_s28 = sadd.f32 1e-05, %s2980_s30 }
 0xfd0   : > { %v2982_v59 = vstv %s2981_s28 }
 0xfd1   : > { %9308 = vrsqrt.f32 %v2982_v59  ;;  %v6431_v59 = vld [vmem:[%s11968_s4 + $0x108] sm:$0xff] }
 0xfdb   : > { %v9309_v9 = vpop.eup %9308 }
 0xfdc   : > { %9118 = vpush %v9309_v9  ;;  %v6432_v9 = vld [vmem:[%s11968_s4 + $0x110] sm:$0xff] }
0x100d   : > { %s9119_s29 = spop %9118 }
0x100e   : > { %v2985_v52 = vstv %s9119_s29 }
0x100f   : > { %v2986_v53 = vmul.f32 %v2985_v52, %v11186_v30  ;;  %v8487_v52 = vpack.c.bf16 %v6431_v59, %v6430_v51  ;;  %v3440_v51 = vld [vmem:[%s11970_s11 + $0x10] sm:$0xff] }
0x1011   : > { %v2988_v56 = vmul.f32 %v2987_v54, %v2986_v53  ;;  %v2996_v19 = vrot.slane %v2986_v53, %v10743_v50  ;;  %v6433_v53 = vld [vmem:[%s11968_s4 + $0x118] sm:$0xff]  ;;  %8488 = vmatpush3.bf16.msra.mxu1 %v8487_v52 }
0x1012   : > { %v8490_v54 = vpack.c.bf16 %v6433_v53, %v6432_v9  ;;  %8489 = vmatprep.subr.bf16.mxu1 %v9689_v1  ;;  %v3441_v9 = vld [vmem:[%s11970_s11 + $0x18] sm:$0xff]  ;;  %v3442_v53 = vld [vmem:[%s11970_s11 + $0x20] sm:$0xff] }
0x1013   : > { %v2990_v57 = vrot.slane %v2988_v56, 7  ;;  %v2997_v58 = vmul.f32 %v2996_v19, %v11190_v37  ;;  %v3050_v37 = vld [vmem:[%s11969_s20 + $0x110] sm:$0xff]  ;;  %v6434_v56 = vld [vmem:[%s11968_s4 + $0x120] sm:$0xff]  ;;  %v8514_v52 = vpack.c.bf16 %v3441_v9, %v3440_v51 }
0x1014   : > { %v8466_v7 = vpack.c.bf16 %v3051_v4, %v3050_v37 }
0x1015   : > { %v2992_v33 = vsub.f32 %v11186_v30, %v2990_v57  ;;  %v8463_v30 = vpack.c.bf16 %v3049_v2, %v3048_v41  ;;  %v6435_v57 = vld [vmem:[%s11968_s4 + $0x128] sm:$0xff]  ;;  %8491 = vmatpush3.bf16.msra.mxu1 %v8490_v54 }
0x1016   : > { %v8493_v19 = vpack.c.bf16 %v6435_v57, %v6434_v56  ;;  %8492 = vmatprep.subr.bf16.mxu1 %v9689_v1  ;;  %v3443_v54 = vld [vmem:[%s11970_s11 + $0x28] sm:$0xff]  ;;  %v3444_v57 = vld [vmem:[%s11970_s11 + $0x30] sm:$0xff] }
0x1017   : > { %v3001_v61 = vrot.slane %v2992_v33, %v10747_v55  ;;  %v6436_v33 = vld [vmem:[%s11968_s4 + $0x130] sm:$0xff]  ;;  %v8517_v56 = vpack.c.bf16 %v3443_v54, %v3442_v53 }
0x1019   : > { %v3002_v62 = vadd.f32 %v3001_v61, %v2997_v58  ;;  %v6437_v58 = vld [vmem:[%s11968_s4 + $0x138] sm:$0xff]  ;;  %8494 = vmatpush3.bf16.msra.mxu1 %v8493_v19 }
0x101a   : > { %v8496_v61 = vpack.c.bf16 %v6437_v58, %v6436_v33  ;;  %8495 = vmatprep.subr.bf16.mxu1 %v9689_v1  ;;  %v3445_v19 = vld [vmem:[%s11970_s11 + $0x38] sm:$0xff]  ;;  %v3446_v58 = vld [vmem:[%s11970_s11 + $0x40] sm:$0xff] }
0x101b   : > { %v3005_v14 = vrot.slane %v3002_v62, 7  ;;  %3008 = vst [vmem:[#allocation2 + $0x8] sm:$0xf] %v3002_v62  ;;  %v3010_v40 = vrot.slane %v3002_v62, 1  ;;  %v6438_v62 = vld [vmem:[%s11968_s4 + $0x140] sm:$0xff]  ;;  %v8520_v33 = vpack.c.bf16 %v3445_v19, %v3444_v57 }
0x101d   : > { %3007 = vst [vmem:[#allocation2] sm:$0xe] %v3005_v14  ;;  %3012 = vst [vmem:[#allocation2 + $0x10] sm:$0x7] %v3010_v40  ;;  %v6439_v14 = vld [vmem:[%s11968_s4 + $0x148] sm:$0xff]  ;;  %8497 = vmatpush3.bf16.msra.mxu1 %v8496_v61 }
0x101e   : > { %v8499_v40 = vpack.c.bf16 %v6439_v14, %v6438_v62  ;;  %8498 = vmatprep.subr.bf16.mxu1 %v9689_v1  ;;  %v3447_v61 = vld [vmem:[%s11970_s11 + $0x48] sm:$0xff]  ;;  %v3448_v14 = vld [vmem:[%s11970_s11 + $0x50] sm:$0xff] }
0x101f   : > { %v8523_v62 = vpack.c.bf16 %v3447_v61, %v3446_v58 }
0x1021   : > { %8500 = vmatpush3.bf16.msra.mxu1 %v8499_v40  ;;  %v3449_v40 = vld [vmem:[%s11970_s11 + $0x58] sm:$0xff] }
0x1022   : > { %v3014_v3 = vld [vmem:[#allocation2 + $0x8] sm:$0xf]  ;;  %8501 = vmatprep.subr.bf16.mxu1 %v9689_v1 }
0x1023   : > { %3133 = vmatprep.mubr.f32.mxu0 %v3014_v3  ;;  %3840 = vst.msk [vmem:[#allocation2 + $0xb] sm:$0x1] %vm2832_vm1, %v9687_v0  ;;  %3432 = vst.msk [vmem:[#allocation2 + $0x9] sm:$0x1] %vm2832_vm1, %v9687_v0 }
0x1024   : > { %v3013_v5 = vld [vmem:[#allocation2] sm:$0xf]  ;;  %v3015_v6 = vld [vmem:[#allocation2 + $0x10] sm:$0xf] }
0x1025   : > { %3424 = vst.msk [vmem:[#allocation2] sm:$0x1] %vm2832_vm1, %v9687_v0  ;;  %3134 = vmatmul.mubr.f32.vlgmr.msra.gmra.mrb[24].mxu0 %v3013_v5  ;;  %3845 = vst.msk [vmem:[#allocation2 + $0x10] sm:$0x1] %vm2832_vm1, %v9687_v0 }
0x1026   : > { %8464 = vmatpush3.bf16.msra.mxu0 %v8463_v30  ;;  %7730 = vmatprep.mubr.msk.f32.mxu0 %vm9690_vm7, %v9687_v0 }
0x1027   : > { %8465 = vmatprep.subr.bf16.mxu0 %v9689_v1 }
0x102a   : > { %8467 = vmatpush3.bf16.msra.mxu0 %v8466_v7  ;;  %v6440_v7 = vld [vmem:[%s11968_s4 + $0x150] sm:$0xff] }
0x102b   : > { %8468 = vmatprep.subr.bf16.mxu0 %v9689_v1  ;;  %v8502_v63 = vpack.c.bf16 %v6441_v8, %v6440_v7  ;;  %v3455_v7 = vld [vmem:[%s11970_s11 + $0x88] sm:$0xff] }
0x102d   : > { %8503 = vmatpush3.bf16.msra.mxu1 %v8502_v63  ;;  %v3456_v63 = vld [vmem:[%s11970_s11 + $0x90] sm:$0xff] }
0x102e   : > { %8470 = vmatpush3.bf16.msra.mxu0 %v8469_v12  ;;  %8504 = vmatprep.subr.bf16.mxu1 %v9689_v1 }
0x102f   : > { %8471 = vmatprep.subr.bf16.mxu0 %v9689_v1 }
0x1032   : > { %8473 = vmatpush3.bf16.msra.mxu0 %v8472_v16 }
0x1033   : > { %8474 = vmatprep.subr.bf16.mxu0 %v9689_v1 }
0x1036   : > { %8476 = vmatpush3.bf16.msra.mxu0 %v8475_v22  ;;  %v8505_v22 = vpack.c.bf16 %v6443_v18, %v6442_v17  ;;  %v3460_v18 = vld [vmem:[%s11970_s11 + $0xb0] sm:$0xff] }
0x1037   : > { %8477 = vmatprep.subr.bf16.mxu0 %v9689_v1 }
0x1038   : > { %8506 = vmatpush3.bf16.msra.mxu1 %v8505_v22  ;;  %v3461_v22 = vld [vmem:[%s11970_s11 + $0xb8] sm:$0xff] }
0x1039   : > { %8507 = vmatprep.subr.bf16.mxu1 %v9689_v1 }
0x103a   : > { %8479 = vmatpush3.bf16.msra.mxu0 %v8478_v25  ;;  %v6444_v25 = vld [vmem:[%s11968_s4 + $0x170] sm:$0xff] }
0x103b   : > { %8480 = vmatprep.subr.bf16.mxu0 %v9689_v1  ;;  %v8508_v21 = vpack.c.bf16 %v6445_v20, %v6444_v25 }
0x103d   : > { %8509 = vmatpush3.bf16.msra.mxu1 %v8508_v21 }
0x103e   : > { %8482 = vmatpush3.bf16.msra.mxu0 %v8481_v27  ;;  %7768 = vmatprep.subr.mxu1 %v9687_v0 }
0x103f   : > { %8483 = vmatprep.subr.bf16.mxu0 %v9689_v1 }
0x1042   : > { %8485 = vmatpush3.bf16.msra.mxu0 %v8484_v34 }
0x1043   : > { %8510 = vmatprep.subr.bf16.mxu0 %v9689_v1 }
0x1045   : > { %7731 = vmatmul.mubr.f32.vlgmr.msra.gmra.mrb[26].mxu0 %v3015_v6 }
0x10f8   : > { %v6932_v35 = vpop.f32.mrb[24].mxu0 }
0x10f9   : > { %v6933_v36 = vpop.f32.mrb[25].mxu0 }
0x10fa   : > { %v6934_v11 = vadd.f32 %v6933_v36, %v6932_v35 }
0x10fc   : > { %v3136_v26 = vadd.f32 %v6934_v11, %v3068_v43 }
0x1118   : > { %v3205_v32 = vpop.f32.mrb[26].mxu0 }
0x1119   : > { %v3206_v44 = vadd.f32 %v3205_v32, %v3136_v26  ;;  %v7732_v45 = vpop.f32.mrb[27].mxu0 }
0x111b   : > { %v11373_v46 = vmax.f32 %v3206_v44, 0.0 }
0x111d   : > { %v3210_v47 = vsel %vm2954_vm12, %v11373_v46, 0.0  ;;  %v3220_v48 = vmul.f32 %v11373_v46, %v11373_v46 }
0x111e   : > { %3211 = vadd.xlane.f32.xlu1 %v3210_v47  ;;  %v3346_v47 = vld [vmem:[#allocation3 + $0x10] sm:$0x3] }
0x111f   : > { %v3221_v49 = vsel %vm2954_vm12, %v3220_v48, 0.0 }
0x1122   : > { %3222 = vadd.xlane.f32.xlu1 %v3221_v49 }
0x11ab   : > { %v3212_v41 = vpop.xlane.xlu1 %3211 }
0x11ac   : > { %v3213_v2 = vrot.slane %v3212_v41, 4 }
0x11ae   : > { %v3214_v3 = vadd.f32 %v3213_v2, %v3212_v41  ;;  %v8526_v41 = vpack.c.bf16 %v3449_v40, %v3448_v14  ;;  %v3450_v2 = vld [vmem:[%s11970_s11 + $0x60] sm:$0xff] }
0x11af   : > { %v3223_v30 = vpop.xlane.xlu1 %3222 }
0x11b0   : > { %v3215_v37 = vrot.slane %v3214_v3, 2  ;;  %v3224_v4 = vrot.slane %v3223_v30, 4 }
0x11b2   : > { %v3225_v5 = vadd.f32 %v3224_v4, %v3223_v30  ;;  %v3216_v6 = vadd.f32 %v3215_v37, %v3214_v3  ;;  %v3451_v3 = vld [vmem:[%s11970_s11 + $0x68] sm:$0xff]  ;;  %v3452_v37 = vld [vmem:[%s11970_s11 + $0x70] sm:$0xff]  ;;  %v3453_v4 = vld [vmem:[%s11970_s11 + $0x78] sm:$0xff] }
0x11b3   : > { %v8529_v30 = vpack.c.bf16 %v3451_v3, %v3450_v2 }
0x11b4   : > { %v3226_v12 = vrot.slane %v3225_v5, 2  ;;  %v3217_v13 = vrot.slane %v3216_v6, 1 }
0x11b6   : > { %v3218_v15 = vadd.f32 %v3217_v13, %v3216_v6  ;;  %v3227_v16 = vadd.f32 %v3226_v12, %v3225_v5  ;;  %v8532_v5 = vpack.c.bf16 %v3453_v4, %v3452_v37  ;;  %v3454_v6 = vld [vmem:[%s11970_s11 + $0x80] sm:$0xff]  ;;  %v3457_v12 = vld [vmem:[%s11970_s11 + $0x98] sm:$0xff] }
0x11b7   : > { %v8535_v8 = vpack.c.bf16 %v3455_v7, %v3454_v6  ;;  %v8538_v13 = vpack.c.bf16 %v3457_v12, %v3456_v63 }
0x11b8   : > { %9120 = vpush %v3218_v15  ;;  %v3228_v23 = vrot.slane %v3227_v16, 1  ;;  %v3458_v15 = vld [vmem:[%s11970_s11 + $0xa0] sm:$0xff] }
0x11ba   : > { %v3229_v24 = vadd.f32 %v3228_v23, %v3227_v16  ;;  %v3459_v16 = vld [vmem:[%s11970_s11 + $0xa8] sm:$0xff]  ;;  %v8544_v23 = vpack.c.bf16 %v3461_v22, %v3460_v18 }
0x11bb   : > { %v8541_v17 = vpack.c.bf16 %v3459_v16, %v3458_v15 }
0x11bc   : > { %9122 = vpush %v3229_v24 }
0x11e9   : > { %s9121_s6 = spop %9120 }
0x11ea   : > { %s3231_s10 = smul.f32 0.001953125, %s9121_s6 }
0x11ec   : > { %s3233_s27 = smul.f32 %s3231_s10, %s3231_s10  ;;  %v3242_v35 = vstv %s3231_s10 }
0x11ed   : > { %s9123_s30 = spop %9122 }
0x11ee   : > { %s3232_s28 = smul.f32 0.001953125, %s9123_s30 }
0x11f0   : > { %s3234_s29 = ssub.f32 %s3232_s28, %s3233_s27 }
0x11f2   : > { %s3235_s9 = smax.f32 %s9688_s25, %s3234_s29 }
0x11f3   : > { %s3236_s1 = sadd.f32 1e-05, %s3235_s9  ;;  %s11971_s9 = sld [smem:[#allocation35_spill]] }
0x11f5   : > { %v3237_v27 = vstv %s3236_s1 }
0x11f6   : > { %9310 = vrsqrt.f32 %v3237_v27 }
0x11f9   : > { %v3603_v58 = vld [vmem:[%s11971_s9 + $0x8] sm:$0xff]  ;;  %v3604_v61 = vld [vmem:[%s11971_s9 + $0x10] sm:$0xff]  ;;  %v3605_v14 = vld [vmem:[%s11971_s9 + $0x18] sm:$0xff] }
0x11fa   : > { %v8550_v40 = vpack.c.bf16 %v3605_v14, %v3604_v61  ;;  %v3607_v2 = vld [vmem:[%s11971_s9 + $0x28] sm:$0xff]  ;;  %v3609_v37 = vld [vmem:[%s11971_s9 + $0x38] sm:$0xff] }
0x11fb   : > { %v3611_v6 = vld [vmem:[%s11971_s9 + $0x48] sm:$0xff]  ;;  %v3613_v63 = vld [vmem:[%s11971_s9 + $0x58] sm:$0xff] }
0x11fc   : > { %v3615_v15 = vld [vmem:[%s11971_s9 + $0x68] sm:$0xff]  ;;  %v3617_v18 = vld [vmem:[%s11971_s9 + $0x78] sm:$0xff] }
0x11fd   : > { %v3906_v61 = vld [vmem:[#allocation10 + $0x100] sm:$0xff] }
0x1200   : > { %v9311_v28 = vpop.eup %9310 }
0x1201   : > { %9124 = vpush %v9311_v28 }
0x1232   : > { %s9125_s23 = spop %9124 }
0x1233   : > { %v3240_v31 = vstv %s9125_s23 }
0x1234   : > { %v3241_v34 = vmul.f32 %v3240_v31, %v11369_v39  ;;  %v11548_v31 = vld [vmem:[%s11924_s19 + $0x12] sm:$0x7] }
0x1236   : > { %v3243_v36 = vmul.f32 %v3242_v35, %v3241_v34  ;;  %v3251_v43 = vrot.slane %v3241_v34, %v10743_v50  ;;  %v3466_v34 = vrot.slane %v11548_v31, %v10514_v10 }
0x1238   : > { %v3245_v11 = vrot.slane %v3243_v36, 7  ;;  %v3252_v32 = vmul.f32 %v3251_v43, %v11373_v46  ;;  %v3439_v46 = vld [vmem:[%s11970_s11 + $0x8] sm:$0xff] }
0x123a   : > { %v3247_v26 = vsub.f32 %v11369_v39, %v3245_v11  ;;  %v3438_v39 = vld [vmem:[%s11970_s11] sm:$0xff] }
0x123b   : > { %v8511_v59 = vpack.c.bf16 %v3439_v46, %v3438_v39 }
0x123c   : > { %v3256_v44 = vrot.slane %v3247_v26, %v10747_v55 }
0x123d   : > { %8512 = vmatpush1.bf16.msra.mxu0 %v8511_v59 }
0x123e   : > { %v11442_v45 = vadd.f32 %v3256_v44, %v3252_v32  ;;  %8513 = vmatprep.subr.bf16.mxu0 %v9689_v1 }
0x1240   : > { %7766 = vmatmul.mubr.f32.vlgmr.msra.gmra.mrb[24].mxu1 %v11442_v45 }
0x1241   : > { %7770 = vmatprep.mubr.msk.f32.mxu1 %vm9690_vm7, %v9687_v0  ;;  %8515 = vmatpush1.bf16.msra.mxu0 %v8514_v52 }
0x1242   : > { %8516 = vmatprep.subr.bf16.mxu0 %v9689_v1 }
0x1245   : > { %8518 = vmatpush1.bf16.msra.mxu0 %v8517_v56 }
0x1246   : > { %8519 = vmatprep.subr.bf16.mxu0 %v9689_v1 }
0x1249   : > { %8521 = vmatpush1.bf16.msra.mxu0 %v8520_v33  ;;  %v3602_v33 = vld [vmem:[%s11971_s9] sm:$0xff] }
0x124a   : > { %8522 = vmatprep.subr.bf16.mxu0 %v9689_v1 }
0x124d   : > { %8524 = vmatpush1.bf16.msra.mxu0 %v8523_v62  ;;  %v8547_v62 = vpack.c.bf16 %v3603_v58, %v3602_v33  ;;  %v3847_v33 = vrot.slane %v11442_v45, 7 }
0x124e   : > { %8525 = vmatprep.subr.bf16.mxu0 %v9689_v1 }
0x1251   : > { %8527 = vmatpush1.bf16.msra.mxu0 %v8526_v41  ;;  %v3606_v41 = vld [vmem:[%s11971_s9 + $0x20] sm:$0xff] }
0x1252   : > { %8528 = vmatprep.subr.bf16.mxu0 %v9689_v1  ;;  %v8553_v3 = vpack.c.bf16 %v3607_v2, %v3606_v41  ;;  %v3925_v41 = vld [vmem:[#allocation10 + $0x198] sm:$0xff] }
0x1255   : > { %8530 = vmatpush1.bf16.msra.mxu0 %v8529_v30  ;;  %v3608_v30 = vld [vmem:[%s11971_s9 + $0x30] sm:$0xff] }
0x1256   : > { %8531 = vmatprep.subr.bf16.mxu0 %v9689_v1  ;;  %v8556_v4 = vpack.c.bf16 %v3609_v37, %v3608_v30  ;;  %v3908_v30 = vld [vmem:[#allocation10 + $0x110] sm:$0xff]  ;;  %v3909_v37 = vld [vmem:[#allocation10 + $0x118] sm:$0xff] }
0x1259   : > { %8533 = vmatpush1.bf16.msra.mxu0 %v8532_v5  ;;  %v3610_v5 = vld [vmem:[%s11971_s9 + $0x40] sm:$0xff] }
0x125a   : > { %8534 = vmatprep.subr.bf16.mxu0 %v9689_v1  ;;  %v8559_v7 = vpack.c.bf16 %v3611_v6, %v3610_v5  ;;  %v3926_v5 = vld [vmem:[#allocation10 + $0x1a0] sm:$0xff]  ;;  %v3927_v6 = vld [vmem:[#allocation10 + $0x1a8] sm:$0xff] }
0x125d   : > { %8536 = vmatpush1.bf16.msra.mxu0 %v8535_v8  ;;  %v3612_v8 = vld [vmem:[%s11971_s9 + $0x50] sm:$0xff] }
0x125e   : > { %8537 = vmatprep.subr.bf16.mxu0 %v9689_v1  ;;  %v8562_v12 = vpack.c.bf16 %v3613_v63, %v3612_v8  ;;  %v8622_v8 = vpack.c.bf16 %v3927_v6, %v3926_v5  ;;  %v3910_v63 = vld [vmem:[#allocation10 + $0x120] sm:$0xff] }
0x1261   : > { %8539 = vmatpush1.bf16.msra.mxu0 %v8538_v13  ;;  %v3614_v13 = vld [vmem:[%s11971_s9 + $0x60] sm:$0xff] }
0x1262   : > { %8540 = vmatprep.subr.bf16.mxu0 %v9689_v1  ;;  %v8565_v16 = vpack.c.bf16 %v3615_v15, %v3614_v13  ;;  %v3928_v15 = vld [vmem:[#allocation10 + $0x1b0] sm:$0xff] }
0x1265   : > { %8542 = vmatpush1.bf16.msra.mxu0 %v8541_v17  ;;  %v3616_v17 = vld [vmem:[%s11971_s9 + $0x70] sm:$0xff] }
0x1266   : > { %8543 = vmatprep.subr.bf16.mxu0 %v9689_v1  ;;  %v8568_v22 = vpack.c.bf16 %v3617_v18, %v3616_v17 }
0x1269   : > { %8545 = vmatpush1.bf16.msra.mxu0 %v8544_v23  ;;  %v3618_v23 = vld [vmem:[%s11971_s9 + $0x80] sm:$0xff] }
0x126a   : > { %7773 = vmatprep.subr.mxu0 %v9687_v0 }
0x1313   : > { %v3341_v48 = vpop.f32.mrb[24].mxu1 }
0x1314   : > { %v7767_v49 = vpop.f32.mrb[25].mxu1  ;;  %7769 = vmatpush3.msk.msra.mxu1 %vm2954_vm12, %v3341_v48 }
0x1315   : > { %7771 = vmatmul.mubr.msk.f32.vlgmr.msra.gmra.mrb[26].mxu1 %vm3347_vm13, %v3346_v47  ;;  %8546 = vmatprep.subr.bf16.mxu1 %v9689_v1 }
0x1316   : > { %8548 = vmatpush1.bf16.msra.mxu1 %v8547_v62  ;;  %v3907_v62 = vld [vmem:[#allocation10 + $0x108] sm:$0xff] }
0x1317   : > { %8549 = vmatprep.subr.bf16.mxu1 %v9689_v1  ;;  %v8616_v2 = vpack.c.bf16 %v3907_v62, %v3906_v61 }
0x131a   : > { %8551 = vmatpush1.bf16.msra.mxu1 %v8550_v40  ;;  %v3924_v40 = vld [vmem:[#allocation10 + $0x190] sm:$0xff] }
0x131b   : > { %8552 = vmatprep.subr.bf16.mxu1 %v9689_v1 }
0x131e   : > { %8554 = vmatpush1.bf16.msra.mxu1 %v8553_v3  ;;  %v8618_v3 = vpack.c.bf16 %v3925_v41, %v3924_v40 }
0x131f   : > { %8555 = vmatprep.subr.bf16.mxu1 %v9689_v1 }
0x1322   : > { %8557 = vmatpush1.bf16.msra.mxu1 %v8556_v4 }
0x1323   : > { %8558 = vmatprep.subr.bf16.mxu1 %v9689_v1 }
0x1326   : > { %8560 = vmatpush1.bf16.msra.mxu1 %v8559_v7  ;;  %v8620_v7 = vpack.c.bf16 %v3909_v37, %v3908_v30 }
0x1327   : > { %8561 = vmatprep.subr.bf16.mxu1 %v9689_v1 }
0x132a   : > { %8563 = vmatpush1.bf16.msra.mxu1 %v8562_v12  ;;  %v3911_v12 = vld [vmem:[#allocation10 + $0x128] sm:$0xff] }
0x132b   : > { %8564 = vmatprep.subr.bf16.mxu1 %v9689_v1  ;;  %v8624_v17 = vpack.c.bf16 %v3911_v12, %v3910_v63 }
0x132e   : > { %8566 = vmatpush1.bf16.msra.mxu1 %v8565_v16  ;;  %v3929_v16 = vld [vmem:[#allocation10 + $0x1b8] sm:$0xff] }
0x132f   : > { %8567 = vmatprep.subr.bf16.mxu1 %v9689_v1  ;;  %v8626_v18 = vpack.c.bf16 %v3929_v16, %v3928_v15 }
0x1332   : > { %8569 = vmatpush1.bf16.msra.mxu1 %v8568_v22  ;;  %v3912_v22 = vld [vmem:[#allocation10 + $0x130] sm:$0xff] }
0x1333   : > { %8570 = vmatprep.subr.bf16.mxu1 %v9689_v1 }
0x13e8   : > { %v3420_v24 = vpop.f32.mrb[26].mxu1 }
0x13e9   : > { %3425 = vst.msk [vmem:[#allocation2 + $0x1] sm:$0x1] %vm2832_vm1, %v3420_v24  ;;  %v3433_v25 = vrot.slane %v3420_v24, 1  ;;  %3427 = vrot.lane.b32.xlu1 %v3420_v24, %s9691_s2  ;;  %v7772_v20 = vpop.f32.mrb[27].mxu1  ;;  %v3619_v24 = vld [vmem:[%s11971_s9 + $0x88] sm:$0xff] }
0x13ea   : > { %v3620_v20 = vld [vmem:[%s11971_s9 + $0x90] sm:$0xff] }
0x13eb   : > { %3435 = vst.msk [vmem:[#allocation2 + $0x8] sm:$0x1] %vm2832_vm1, %v3433_v25  ;;  %v8571_v25 = vpack.c.bf16 %v3619_v24, %v3618_v23  ;;  %v3913_v23 = vld [vmem:[#allocation10 + $0x138] sm:$0xff]  ;;  %v3930_v24 = vld [vmem:[#allocation10 + $0x1c0] sm:$0xff] }
0x13ed   : > { %8572 = vmatpush1.bf16.msra.mxu1 %v8571_v25  ;;  %v3931_v25 = vld [vmem:[#allocation10 + $0x1c8] sm:$0xff] }
0x13ee   : > { %8573 = vmatprep.subr.bf16.mxu1 %v9689_v1 }
0x13f2   : > { %v3437_v21 = vld [vmem:[#allocation2 + $0x8] sm:$0x3] }
0x13f3   : > { %6448 = vmatprep.mubr.msk.f32.mxu0 %vm2051_vm11, %v3437_v21  ;;  %3596 = vst.msk [vmem:[#allocation2 + $0x9] sm:$0x1] %vm2832_vm1, %v9687_v0  ;;  %v3621_v21 = vld [vmem:[%s11971_s9 + $0x98] sm:$0xff] }
0x145b   : > { %v3428_v27 = vpop.permute.xlu1 %3427 }
0x145c   : > { %3431 = vst.msk [vmem:[#allocation2] sm:$0x3] %vm3430_vm14, %v3428_v27  ;;  %v8574_v27 = vpack.c.bf16 %v3621_v21, %v3620_v20  ;;  %v8628_v21 = vpack.c.bf16 %v3913_v23, %v3912_v22 }
0x145e   : > { %8575 = vmatpush1.bf16.msra.mxu1 %v8574_v27  ;;  %v4558_v27 = vrot.slane %v11151_v38, 7 }
0x145f   : > { %8576 = vmatprep.subr.bf16.mxu1 %v9689_v1 }
0x1463   : > { %v3436_v28 = vld [vmem:[#allocation2] sm:$0x3] }
0x1464   : > { %3589 = vst.msk [vmem:[#allocation2] sm:$0x1] %vm2832_vm1, %v9687_v0  ;;  %3535 = vmatmul.mubr.f32.vlgmr.msra.gmra.mrb[28].mxu0 %v3436_v28 }
0x1465   : > { %7775 = vmatprep.mubr.msk.f32.mxu0 %vm9690_vm7, %v9687_v0 }
0x1537   : > { %v3536_v35 = vpop.f32.mrb[28].mxu0 }
0x1538   : > { %v3537_v36 = vadd.f32 %v3536_v35, %v3466_v34  ;;  %v3538_v11 = vpop.f32.mrb[29].mxu0  ;;  %v3622_v35 = vld [vmem:[%s11971_s9 + $0xa0] sm:$0xff] }
0x153a   : > { %v11552_v43 = vmax.f32 %v3537_v36, 0.0  ;;  %v3623_v36 = vld [vmem:[%s11971_s9 + $0xa8] sm:$0xff] }
0x153b   : > { %v8577_v11 = vpack.c.bf16 %v3623_v36, %v3622_v35  ;;  %v3915_v35 = vld [vmem:[#allocation10 + $0x148] sm:$0xff]  ;;  %v3932_v36 = vld [vmem:[#allocation10 + $0x1d0] sm:$0xff] }
0x153c   : > { %v3541_v26 = vsel %vm2036_vm10, %v11552_v43, 0.0  ;;  %v3551_v32 = vmul.f32 %v11552_v43, %v11552_v43 }
0x153d   : > { %3542 = vadd.xlane.f32.xlu0 %v3541_v26  ;;  %8578 = vmatpush1.bf16.msra.mxu1 %v8577_v11 }
0x153e   : > { %v3552_v44 = vsel %vm2036_vm10, %v3551_v32, 0.0  ;;  %8579 = vmatprep.subr.bf16.mxu1 %v9689_v1 }
0x153f   : > { %3553 = vadd.xlane.f32.xlu1 %v3552_v44  ;;  %v3624_v44 = vld [vmem:[%s11971_s9 + $0xb0] sm:$0xff] }
0x15ca   : > { %v3543_v47 = vpop.xlane.xlu0 %3542 }
0x15cb   : > { %v3544_v48 = vrot.slane %v3543_v47, 4 }
0x15cc   : > { %v3554_v49 = vpop.xlane.xlu1 %3553 }
0x15cd   : > { %v3545_v39 = vadd.f32 %v3544_v48, %v3543_v47  ;;  %v3555_v46 = vrot.slane %v3554_v49, 4  ;;  %v3625_v47 = vld [vmem:[%s11971_s9 + $0xb8] sm:$0xff] }
0x15cf   : > { %v3546_v51 = vrot.slane %v3545_v39, 2  ;;  %v3556_v59 = vadd.f32 %v3555_v46, %v3554_v49  ;;  %v8580_v49 = vpack.c.bf16 %v3625_v47, %v3624_v44  ;;  %v3922_v46 = vld [vmem:[#allocation10 + $0x180] sm:$0xff] }
0x15d1   : > { %v3557_v9 = vrot.slane %v3556_v59, 2  ;;  %v3547_v52 = vadd.f32 %v3546_v51, %v3545_v39  ;;  %8581 = vmatpush1.bf16.msra.mxu1 %v8580_v49  ;;  %v3923_v51 = vld [vmem:[#allocation10 + $0x188] sm:$0xff]  ;;  %v3917_v49 = vld [vmem:[#allocation10 + $0x158] sm:$0xff] }
0x15d3   : > { %v3548_v53 = vrot.slane %v3547_v52, 1  ;;  %v3558_v54 = vadd.f32 %v3557_v9, %v3556_v59 }
0x15d5   : > { %v3549_v56 = vadd.f32 %v3548_v53, %v3547_v52  ;;  %v3559_v57 = vrot.slane %v3558_v54, 1  ;;  %v8614_v52 = vpack.c.bf16 %v3923_v51, %v3922_v46  ;;  %v3935_v46 = vld [vmem:[#allocation10 + $0x1e8] sm:$0xff] }
0x15d7   : > { %9126 = vpush %v3549_v56  ;;  %v3560_v19 = vadd.f32 %v3559_v57, %v3558_v54  ;;  %8615 = vmatprep.subr.bf16.mxu1 %v8614_v52  ;;  %v3919_v52 = vld [vmem:[#allocation10 + $0x168] sm:$0xff] }
0x15d9   : > { %9128 = vpush %v3560_v19 }
0x1608   : > { %s9127_s6 = spop %9126 }
0x1609   : > { %s11620_s10 = smul.f32 0.0078125, %s9127_s6 }
0x160a   : > { %s9129_s27 = spop %9128 }
0x160b   : > { %s3564_s23 = smul.f32 %s11620_s10, %s11620_s10  ;;  %v3573_v48 = vstv %s11620_s10 }
0x160c   : > { %s3563_s0 = smul.f32 0.0078125, %s9129_s27 }
0x160e   : > { %s3565_s21 = ssub.f32 %s3563_s0, %s3564_s23 }
0x1610   : > { %s3566_s6 = smax.f32 %s9688_s25, %s3565_s21 }
0x1611   : > { %s3567_s3 = sadd.f32 1e-05, %s3566_s6 }
0x1613   : > { %v3568_v28 = vstv %s3567_s3 }
0x1614   : > { %9312 = vrsqrt.f32 %v3568_v28  ;;  %v8630_v28 = vpack.c.bf16 %v3931_v25, %v3930_v24 }
0x161e   : > { %v9313_v34 = vpop.eup %9312 }
0x161f   : > { %9130 = vpush %v9313_v34  ;;  %v3914_v34 = vld [vmem:[#allocation10 + $0x140] sm:$0xff] }
0x1620   : > { %v8632_v44 = vpack.c.bf16 %v3915_v35, %v3914_v34 }
0x1650   : > { %s9131_s1 = spop %9130 }
0x1651   : > { %v3571_v26 = vstv %s9131_s1 }
0x1652   : > { %v3572_v32 = vmul.f32 %v3571_v26, %v11548_v31  ;;  %v3933_v26 = vld [vmem:[#allocation10 + $0x1d8] sm:$0xff] }
0x1653   : > { %v8634_v47 = vpack.c.bf16 %v3933_v26, %v3932_v36 }
0x1654   : > { %v3574_v39 = vmul.f32 %v3573_v48, %v3572_v32  ;;  %v3582_v9 = vrot.slane %v3572_v32, %v10743_v50  ;;  %v3916_v48 = vld [vmem:[#allocation10 + $0x150] sm:$0xff] }
0x1655   : > { %v8636_v51 = vpack.c.bf16 %v3917_v49, %v3916_v48  ;;  %v3890_v48 = vld [vmem:[#allocation10 + $0x80] sm:$0xff]  ;;  %v3891_v49 = vld [vmem:[#allocation10 + $0x88] sm:$0xff] }
0x1656   : > { %v3576_v59 = vrot.slane %v3574_v39, 7  ;;  %v3583_v54 = vmul.f32 %v3582_v9, %v11552_v43  ;;  %v3862_v43 = vrot.slane %v11442_v45, 1  ;;  %v3934_v39 = vld [vmem:[#allocation10 + $0x1e0] sm:$0xff] }
0x1657   : > { %v3918_v9 = vld [vmem:[#allocation10 + $0x160] sm:$0xff] }
0x1658   : > { %v3578_v53 = vsub.f32 %v11548_v31, %v3576_v59  ;;  %v8638_v59 = vpack.c.bf16 %v3935_v46, %v3934_v39  ;;  %v3874_v39 = vld [vmem:[#allocation10] sm:$0xff]  ;;  %v8582_v46 = vpack.c.bf16 %v3891_v49, %v3890_v48 }
0x1659   : > { %v3938_v49 = vld [vmem:[#allocation10 + $0x200] sm:$0xff] }
0x165a   : > { %v3587_v56 = vrot.slane %v3578_v53, %v10747_v55  ;;  %v3936_v53 = vld [vmem:[#allocation10 + $0x1f0] sm:$0xff] }
0x165c   : > { %v3588_v57 = vadd.f32 %v3587_v56, %v3583_v54  ;;  %v3937_v54 = vld [vmem:[#allocation10 + $0x1f8] sm:$0xff] }
0x165e   : > { %3592 = vrot.lane.b32.xlu0 %v3588_v57, %s9691_s2  ;;  %3590 = vst.msk [vmem:[#allocation2 + $0x1] sm:$0x1] %vm2832_vm1, %v3588_v57  ;;  %v3597_v19 = vrot.slane %v3588_v57, 1  ;;  %v8640_v57 = vpack.c.bf16 %v3919_v52, %v3918_v9  ;;  %v3893_v9 = vld [vmem:[#allocation10 + $0x98] sm:$0xff] }
0x1660   : > { %3599 = vst.msk [vmem:[#allocation2 + $0x8] sm:$0x1] %vm2832_vm1, %v3597_v19  ;;  %v8642_v19 = vpack.c.bf16 %v3937_v54, %v3936_v53  ;;  %v3876_v54 = vld [vmem:[#allocation10 + $0x10] sm:$0xff] }
0x1662   : > { %3848 = vrot.lane.b32.xlu0 %v3847_v33, %s9691_s2  ;;  %v3920_v33 = vld [vmem:[#allocation10 + $0x170] sm:$0xff] }
0x1666   : > { %3854 = vrot.lane.b32.xlu0 %v11442_v45, %s9691_s2 }
0x1667   : > { %v3601_v31 = vld [vmem:[#allocation2 + $0x8] sm:$0x3] }
0x1668   : > { %6449 = vmatprep.mubr.msk.f32.mxu1 %vm2051_vm11, %v3601_v31  ;;  %v3921_v31 = vld [vmem:[#allocation10 + $0x178] sm:$0xff] }
0x166a   : > { %3863 = vrot.lane.b32.xlu0 %v3862_v43, %s9691_s2  ;;  %v8644_v43 = vpack.c.bf16 %v3921_v31, %v3920_v33  ;;  %v3895_v33 = vld [vmem:[#allocation10 + $0xa8] sm:$0xff] }
0x16d0   : > { %v3593_v58 = vpop.permute.xlu0 %3592 }
0x16d1   : > { %3595 = vst.msk [vmem:[#allocation2] sm:$0x3] %vm3430_vm14, %v3593_v58  ;;  %vm3866_vm14 = vcmask 1042944   ;;  %v3626_v58 = vld [vmem:[%s11924_s19 + $0x15] sm:$0x7] }
0x16d2   : > { %v3630_v61 = vrot.slane %v3626_v58, %v10514_v10 }
0x16d4   : > { %v11664_v14 = vpop.permute.xlu0 %3848 }
0x16d5   : > { %3853 = vst.msk [vmem:[#allocation2 + $0x10] sm:$0xe] %vm2837_vm6, %v11664_v14 }
0x16d8   : > { %v3855_v45 = vpop.permute.xlu0 %3854  ;;  %v3600_v4 = vld [vmem:[#allocation2] sm:$0x3] }
0x16d9   : > { %3857 = vst.msk [vmem:[#allocation2 + $0x10] sm:$0xf] %vm2842_vm8, %v3855_v45  ;;  %3699 = vmatmul.mubr.f32.vlgmr.msra.gmra.mrb[28].mxu1 %v3600_v4 }
0x16da   : > { %3859 = vst.msk [vmem:[#allocation2 + $0x18] sm:$0xf] %vm3858_vm15, %v3855_v45  ;;  %8617 = vmatpush3.bf16.msra.mxu1 %v8616_v2 }
0x16db   : > { %3831 = vst.msk [vmem:[#allocation2] sm:$0x1] %vm2832_vm1, %v9687_v0  ;;  %8619 = vmatprep.subr.bf16.mxu1 %v8618_v3 }
0x16dc   : > { %3860 = vst.msk [vmem:[#allocation2 + $0x1b] sm:$0x1] %vm2043_vm9, %v9687_v0  ;;  %v3864_v13 = vpop.permute.xlu0 %3863 }
0x16dd   : > { %3867 = vst.msk [vmem:[#allocation2 + $0x18] sm:$0x7] %vm3866_vm14, %v3864_v13 }
0x16de   : > { %3868 = vst.msk [vmem:[#allocation2 + $0x20] sm:$0x7] %vm2847_vm4, %v3864_v13  ;;  %8621 = vmatpush3.bf16.msra.mxu1 %v8620_v7 }
0x16df   : > { %8623 = vmatprep.subr.bf16.mxu1 %v8622_v8 }
0x16e0   : > { %v3871_v20 = vld [vmem:[#allocation2 + $0x10] sm:$0xf] }
0x16e1   : > { %4219 = vst [vmem:[#allocation2 + $0x13] sm:$0x1] %v9687_v0 }
0x16e2   : > { %8625 = vmatpush3.bf16.msra.mxu1 %v8624_v17 }
0x16e3   : > { %8627 = vmatprep.subr.bf16.mxu1 %v8626_v18 }
0x16e4   : > { %v3872_v11 = vld [vmem:[#allocation2 + $0x18] sm:$0xf] }
0x16e5   : > { %v11676_v32 = vld [vmem:[#allocation2 + $0x20] sm:$0xf]  ;;  %4088 = vmatprep.mubr.f32.mxu1 %v3872_v11  ;;  %4556 = vst [vmem:[#allocation2 + $0x18] sm:$0x1] %v9687_v0  ;;  %4560 = vst [vmem:[#allocation2 + $0x18] sm:$0xfe] %v4558_v27 }
0x16e6   : > { %5297 = vst [vmem:[#allocation2 + $0x20] sm:$0xff] %v11002_v60  ;;  %8629 = vmatpush3.bf16.msra.mxu1 %v8628_v21 }
0x16e7   : > { %8631 = vmatprep.subr.bf16.mxu1 %v8630_v28 }
0x16ea   : > { %8633 = vmatpush3.bf16.msra.mxu1 %v8632_v44 }
0x16eb   : > { %8635 = vmatprep.subr.bf16.mxu1 %v8634_v47 }
0x16ec   : > { %v11680_v56 = vld [vmem:[#allocation2 + $0x18] sm:$0xff] }
0x16ed   : > { %5287 = vst [vmem:[#allocation2 + $0x18] sm:$0x1] %v9687_v0  ;;  %5295 = vst [vmem:[#allocation2 + $0x18] sm:$0xfe] %v5290_v29 }
0x16ee   : > { %8637 = vmatpush3.bf16.msra.mxu1 %v8636_v51  ;;  %v3875_v51 = vld [vmem:[#allocation10 + $0x8] sm:$0xff] }
0x16ef   : > { %8639 = vmatprep.subr.bf16.mxu1 %v8638_v59  ;;  %v3892_v59 = vld [vmem:[#allocation10 + $0x90] sm:$0xff]  ;;  %v8584_v52 = vpack.c.bf16 %v3875_v51, %v3874_v39  ;;  %v3939_v39 = vld [vmem:[#allocation10 + $0x208] sm:$0xff] }
0x16f0   : > { %v8586_v53 = vpack.c.bf16 %v3893_v9, %v3892_v59  ;;  %v3940_v51 = vld [vmem:[#allocation10 + $0x210] sm:$0xff]  ;;  %v3941_v59 = vld [vmem:[#allocation10 + $0x218] sm:$0xff] }
0x16f2   : > { %8641 = vmatpush3.bf16.msra.mxu1 %v8640_v57  ;;  %v3877_v57 = vld [vmem:[#allocation10 + $0x18] sm:$0xff] }
0x16f3   : > { %8643 = vmatprep.subr.bf16.mxu1 %v8642_v19  ;;  %v3894_v19 = vld [vmem:[#allocation10 + $0xa0] sm:$0xff]  ;;  %v8588_v31 = vpack.c.bf16 %v3877_v57, %v3876_v54  ;;  %v3944_v57 = vld [vmem:[#allocation10 + $0x230] sm:$0xff] }
0x16f6   : > { %8645 = vmatpush3.bf16.msra.mxu1 %v8644_v43  ;;  %v8590_v43 = vpack.c.bf16 %v3895_v33, %v3894_v19  ;;  %v3945_v19 = vld [vmem:[#allocation10 + $0x238] sm:$0xff] }
0x16f7   : > { %v8656_v33 = vpack.c.bf16 %v3945_v19, %v3944_v57  ;;  %v4232_v57 = vld [vmem:[#allocation11 + $0x30] sm:$0xff]  ;;  %v4233_v19 = vld [vmem:[#allocation11 + $0x38] sm:$0xff] }
0x16f9   : > { %4089 = vmatmul.mubr.f32.vlgmr.msra.gmra.mrb[30].mxu1 %v3871_v20 }
0x17ac   : > { %v3700_v62 = vpop.f32.mrb[28].mxu1 }
0x17ad   : > { %v3701_v60 = vadd.f32 %v3700_v62, %v3630_v61  ;;  %v3702_v29 = vpop.f32.mrb[29].mxu1  ;;  %v3879_v61 = vld [vmem:[#allocation10 + $0x28] sm:$0xff]  ;;  %v3896_v62 = vld [vmem:[#allocation10 + $0xb0] sm:$0xff] }
0x17af   : > { %v3704_v40 = vmax.f32 %v3701_v60, 0.0  ;;  %v3897_v60 = vld [vmem:[#allocation10 + $0xb8] sm:$0xff] }
0x17b1   : > { %v3705_v41 = vsel %vm2036_vm10, %v3704_v40, 0.0  ;;  %v3715_v2 = vmul.f32 %v3704_v40, %v3704_v40 }
0x17b2   : > { %3706 = vadd.xlane.f32.xlu1 %v3705_v41  ;;  %v3880_v41 = vld [vmem:[#allocation10 + $0x30] sm:$0xff] }
0x17b3   : > { %v3716_v3 = vsel %vm2036_vm10, %v3715_v2, 0.0  ;;  %vm3754_vm10 = vcmask 15360   ;;  %v3881_v2 = vld [vmem:[#allocation10 + $0x38] sm:$0xff] }
0x17b6   : > { %3717 = vadd.xlane.f32.xlu1 %v3716_v3  ;;  %v3898_v3 = vld [vmem:[#allocation10 + $0xc0] sm:$0xff] }
0x17cc   : > { %v7040_v30 = vpop.f32.mrb[30].mxu1 }
0x17cd   : > { %v7041_v37 = vpop.f32.mrb[31].mxu1 }
0x17ce   : > { %v11691_v45 = vadd.f32 %v7041_v37, %v7040_v30  ;;  %v3899_v30 = vld [vmem:[#allocation10 + $0xc8] sm:$0xff]  ;;  %v8596_v37 = vpack.c.bf16 %v3881_v2, %v3880_v41 }
0x183f   : > { %v3707_v4 = vpop.xlane.xlu1 %3706 }
0x1840   : > { %v3708_v5 = vrot.slane %v3707_v4, 4 }
0x1842   : > { %v3709_v6 = vadd.f32 %v3708_v5, %v3707_v4  ;;  %v8598_v4 = vpack.c.bf16 %v3899_v30, %v3898_v3  ;;  %v3882_v5 = vld [vmem:[#allocation10 + $0x40] sm:$0xff] }
0x1843   : > { %v3718_v7 = vpop.xlane.xlu1 %3717 }
0x1844   : > { %v3710_v8 = vrot.slane %v3709_v6, 2  ;;  %v3719_v63 = vrot.slane %v3718_v7, 4 }
0x1846   : > { %v3720_v12 = vadd.f32 %v3719_v63, %v3718_v7  ;;  %v3711_v13 = vadd.f32 %v3710_v8, %v3709_v6  ;;  %v3883_v6 = vld [vmem:[#allocation10 + $0x48] sm:$0xff]  ;;  %v3900_v7 = vld [vmem:[#allocation10 + $0xd0] sm:$0xff]  ;;  %v3901_v8 = vld [vmem:[#allocation10 + $0xd8] sm:$0xff] }
0x1847   : > { %v8600_v63 = vpack.c.bf16 %v3883_v6, %v3882_v5  ;;  %v4243_v5 = vld [vmem:[#allocation11 + $0x88] sm:$0xff]  ;;  %v4226_v6 = vld [vmem:[#allocation11] sm:$0xff] }
0x1848   : > { %v3721_v15 = vrot.slane %v3720_v12, 2  ;;  %v3712_v16 = vrot.slane %v3711_v13, 1 }
0x184a   : > { %v3713_v17 = vadd.f32 %v3712_v16, %v3711_v13  ;;  %v3722_v18 = vadd.f32 %v3721_v15, %v3720_v12  ;;  %v8602_v12 = vpack.c.bf16 %v3901_v8, %v3900_v7  ;;  %v3884_v13 = vld [vmem:[#allocation10 + $0x50] sm:$0xff]  ;;  %v3885_v15 = vld [vmem:[#allocation10 + $0x58] sm:$0xff]  ;;  %v3902_v16 = vld [vmem:[#allocation10 + $0xe0] sm:$0xff] }
0x184b   : > { %v4258_v8 = vld [vmem:[#allocation11 + $0x100] sm:$0xff] }
0x184c   : > { %9132 = vpush %v3713_v17  ;;  %v3723_v22 = vrot.slane %v3722_v18, 1  ;;  %v3903_v17 = vld [vmem:[#allocation10 + $0xe8] sm:$0xff] }
0x184e   : > { %v3724_v23 = vadd.f32 %v3723_v22, %v3722_v18  ;;  %v8604_v18 = vpack.c.bf16 %v3885_v15, %v3884_v13  ;;  %v8606_v22 = vpack.c.bf16 %v3903_v17, %v3902_v16  ;;  %v4244_v15 = vld [vmem:[#allocation11 + $0x90] sm:$0xff]  ;;  %v4245_v16 = vld [vmem:[#allocation11 + $0x98] sm:$0xff] }
0x184f   : > { %v4228_v17 = vld [vmem:[#allocation11 + $0x10] sm:$0xff] }
0x1850   : > { %9134 = vpush %v3724_v23  ;;  %v3886_v23 = vld [vmem:[#allocation10 + $0x60] sm:$0xff] }
0x187d   : > { %s9133_s30 = spop %9132 }
0x187e   : > { %s3726_s28 = smul.f32 0.0078125, %s9133_s30  ;;  %s11972_s30 = sld [smem:[#allocation28_spill]] }
0x1880   : > { %s3728_s27 = smul.f32 %s3726_s28, %s3726_s28  ;;  %v3737_v27 = vstv %s3726_s28 }
0x1881   : > { %s9135_s29 = spop %9134 }
0x1882   : > { %s3727_s1 = smul.f32 0.0078125, %s9135_s29 }
0x1884   : > { %s3729_s3 = ssub.f32 %s3727_s1, %s3728_s27  ;;  %v3753_v47 = vld [vmem:[%s11972_s30] sm:$0xf] }
0x1886   : > { %s3730_s23 = smax.f32 %s9688_s25, %s3729_s3 }
0x1887   : > { %s3731_s0 = sadd.f32 1e-05, %s3730_s23 }
0x1889   : > { %v3732_v24 = vstv %s3731_s0 }
0x188a   : > { %9314 = vrsqrt.f32 %v3732_v24  ;;  %v3887_v24 = vld [vmem:[#allocation10 + $0x68] sm:$0xff] }
0x1894   : > { %v9315_v25 = vpop.eup %9314 }
0x1895   : > { %9136 = vpush %v9315_v25  ;;  %v8608_v25 = vpack.c.bf16 %v3887_v24, %v3886_v23  ;;  %v4260_v23 = vld [vmem:[#allocation11 + $0x110] sm:$0xff]  ;;  %v4261_v24 = vld [vmem:[#allocation11 + $0x118] sm:$0xff] }
0x18c6   : > { %s9137_s21 = spop %9136 }
0x18c7   : > { %v3735_v20 = vstv %s9137_s21 }
0x18c8   : > { %v3736_v21 = vmul.f32 %v3735_v20, %v3626_v58  ;;  %v3904_v20 = vld [vmem:[#allocation10 + $0xf0] sm:$0xff] }
0x18ca   : > { %v3738_v28 = vmul.f32 %v3737_v27, %v3736_v21  ;;  %v3746_v35 = vrot.slane %v3736_v21, %v10743_v50  ;;  %v3905_v21 = vld [vmem:[#allocation10 + $0xf8] sm:$0xff]  ;;  %v3888_v27 = vld [vmem:[#allocation10 + $0x70] sm:$0xff] }
0x18cc   : > { %v3740_v34 = vrot.slane %v3738_v28, 7  ;;  %v3747_v11 = vmul.f32 %v3746_v35, %v3704_v40  ;;  %v8594_v40 = vpack.c.bf16 %v3897_v60, %v3896_v62  ;;  %v8610_v28 = vpack.c.bf16 %v3905_v21, %v3904_v20 }
0x18cd   : > { %v8694_v20 = vpack.c.bf16 %v4261_v24, %v4260_v23  ;;  %v4254_v23 = vld [vmem:[#allocation11 + $0xe0] sm:$0xff]  ;;  %v4255_v24 = vld [vmem:[#allocation11 + $0xe8] sm:$0xff] }
0x18ce   : > { %v3742_v36 = vsub.f32 %v3626_v58, %v3740_v34  ;;  %v3878_v58 = vld [vmem:[#allocation10 + $0x20] sm:$0xff]  ;;  %v3889_v34 = vld [vmem:[#allocation10 + $0x78] sm:$0xff] }
0x18cf   : > { %v8592_v29 = vpack.c.bf16 %v3879_v61, %v3878_v58  ;;  %v8612_v35 = vpack.c.bf16 %v3889_v34, %v3888_v27 }
0x18d0   : > { %v3751_v26 = vrot.slane %v3742_v36, %v10747_v55 }
0x18d2   : > { %v3752_v44 = vadd.f32 %v3751_v26, %v3747_v11 }
0x18d4   : > { %7774 = vmatpush3.msk.msra.mxu0 %vm804_vm0, %v3752_v44  ;;  %vm3851_vm0 = vcmask 1043969  }
0x18d5   : > { %7776 = vmatmul.mubr.msk.f32.vlgmr.msra.gmra.mrb[30].mxu0 %vm3754_vm10, %v3753_v47  ;;  %8583 = vmatprep.subr.bf16.mxu0 %v8582_v46  ;;  %v8647_v46 = vpack.c.bf16 %v3939_v39, %v3938_v49 }
0x18d6   : > { %8585 = vmatpush3.bf16.msra.mxu0 %v8584_v52  ;;  %v8650_v52 = vpack.c.bf16 %v3941_v59, %v3940_v51  ;;  %v4263_v51 = vld [vmem:[#allocation11 + $0x128] sm:$0xff] }
0x18d7   : > { %8587 = vmatprep.subr.bf16.mxu0 %v8586_v53  ;;  %v3943_v53 = vld [vmem:[#allocation10 + $0x228] sm:$0xff] }
0x18da   : > { %8589 = vmatpush3.bf16.msra.mxu0 %v8588_v31  ;;  %v11722_v31 = vld [vmem:[%s11924_s19 + $0x18] sm:$0x7] }
0x18db   : > { %8591 = vmatprep.subr.bf16.mxu0 %v8590_v43  ;;  %v3950_v58 = vrot.slane %v11722_v31, %v10514_v10 }
0x18de   : > { %8593 = vmatpush3.bf16.msra.mxu0 %v8592_v29 }
0x18df   : > { %8595 = vmatprep.subr.bf16.mxu0 %v8594_v40 }
0x18e2   : > { %8597 = vmatpush3.bf16.msra.mxu0 %v8596_v37 }
0x18e3   : > { %8599 = vmatprep.subr.bf16.mxu0 %v8598_v4  ;;  %v4242_v4 = vld [vmem:[#allocation11 + $0x80] sm:$0xff] }
0x18e4   : > { %v8658_v7 = vpack.c.bf16 %v4243_v5, %v4242_v4  ;;  %v4266_v4 = vld [vmem:[#allocation11 + $0x140] sm:$0xff] }
0x18e6   : > { %8601 = vmatpush3.bf16.msra.mxu0 %v8600_v63  ;;  %v4259_v63 = vld [vmem:[#allocation11 + $0x108] sm:$0xff]  ;;  %8659 = vmatprep.subr.bf16.mxu1 %v8658_v7 }
0x18e7   : > { %8603 = vmatprep.subr.bf16.mxu0 %v8602_v12  ;;  %v8691_v13 = vpack.c.bf16 %v4259_v63, %v4258_v8  ;;  %v4267_v7 = vld [vmem:[#allocation11 + $0x148] sm:$0xff]  ;;  %v4252_v8 = vld [vmem:[#allocation11 + $0xd0] sm:$0xff]  ;;  %v4253_v63 = vld [vmem:[#allocation11 + $0xd8] sm:$0xff] }
0x18ea   : > { %8605 = vmatpush3.bf16.msra.mxu0 %v8604_v18  ;;  %v8662_v18 = vpack.c.bf16 %v4245_v16, %v4244_v15  ;;  %v4237_v15 = vld [vmem:[#allocation11 + $0x58] sm:$0xff]  ;;  %v4268_v16 = vld [vmem:[#allocation11 + $0x150] sm:$0xff] }
0x18eb   : > { %8607 = vmatprep.subr.bf16.mxu0 %v8606_v22  ;;  %v4229_v22 = vld [vmem:[#allocation11 + $0x18] sm:$0xff] }
0x18ee   : > { %8609 = vmatpush3.bf16.msra.mxu0 %v8608_v25  ;;  %v8664_v25 = vpack.c.bf16 %v4229_v22, %v4228_v17 }
0x18ef   : > { %8611 = vmatprep.subr.bf16.mxu0 %v8610_v28 }
0x18f2   : > { %8613 = vmatpush3.bf16.msra.mxu0 %v8612_v35 }
0x18f3   : > { %8646 = vmatprep.subr.bf16.mxu0 %v9689_v1 }
0x19a8   : > { %v3827_v36 = vpop.f32.mrb[30].mxu0 }
0x19a9   : > { %v3833_v11 = vrot.slane %v3827_v36, 7  ;;  %v3841_v26 = vrot.slane %v3827_v36, 1  ;;  %3836 = vrot.lane.b32.xlu1 %v3827_v36, %s9691_s2  ;;  %v7777_v44 = vpop.f32.mrb[31].mxu0  ;;  %v4246_v36 = vld [vmem:[#allocation11 + $0xa0] sm:$0xff] }
0x19aa   : > { %v4230_v44 = vld [vmem:[#allocation11 + $0x20] sm:$0xff] }
0x19ab   : > { %3835 = vst.msk [vmem:[#allocation2] sm:$0xe] %vm2837_vm6, %v3833_v11  ;;  %v4247_v11 = vld [vmem:[#allocation11 + $0xa8] sm:$0xff] }
0x19ac   : > { %3843 = vst.msk [vmem:[#allocation2 + $0x8] sm:$0x7] %vm2847_vm4, %v3841_v26  ;;  %v8666_v26 = vpack.c.bf16 %v4247_v11, %v4246_v36  ;;  %v4256_v36 = vld [vmem:[#allocation11 + $0xf0] sm:$0xff]  ;;  %v4257_v11 = vld [vmem:[#allocation11 + $0xf8] sm:$0xff] }
0x19ad   : > { %3844 = vst.msk [vmem:[#allocation2 + $0x8] sm:$0x1] %vm2043_vm9, %v9687_v0 }
0x19ae   : > { %3852 = vst.msk [vmem:[#allocation2 + $0x8] sm:$0xe] %vm3851_vm0, %v11664_v14  ;;  %v3942_v14 = vld [vmem:[#allocation10 + $0x220] sm:$0xff] }
0x19af   : > { %v8653_v54 = vpack.c.bf16 %v3943_v53, %v3942_v14  ;;  %v4248_v14 = vld [vmem:[#allocation11 + $0xb0] sm:$0xff]  ;;  %v4249_v53 = vld [vmem:[#allocation11 + $0xb8] sm:$0xff] }
0x19b5   : > { %v3870_v47 = vld [vmem:[#allocation2 + $0x8] sm:$0xf] }
0x19b6   : > { %4018 = vmatprep.mubr.f32.mxu0 %v3870_v47  ;;  %v4231_v47 = vld [vmem:[#allocation11 + $0x28] sm:$0xff] }
0x1a1b   : > { %v3837_v48 = vpop.permute.xlu1 %3836 }
0x1a1c   : > { %3839 = vst.msk [vmem:[#allocation2] sm:$0xf] %vm2842_vm8, %v3837_v48  ;;  %v4262_v48 = vld [vmem:[#allocation11 + $0x120] sm:$0xff] }
0x1a1d   : > { %v8697_v59 = vpack.c.bf16 %v4263_v51, %v4262_v48  ;;  %v4272_v48 = vld [vmem:[#allocation11 + $0x170] sm:$0xff] }
0x1a23   : > { %v3869_v9 = vld [vmem:[#allocation2] sm:$0xf] }
0x1a24   : > { %4019 = vmatmul.mubr.f32.vlgmr.msra.gmra.mrb[32].mxu0 %v3869_v9  ;;  %4213 = vst [vmem:[#allocation2] sm:$0x1] %v9687_v0 }
0x1a25   : > { %8648 = vmatpush3.bf16.msra.mxu0 %v8647_v46  ;;  %7794 = vmatprep.mubr.msk.f32.mxu0 %vm9690_vm7, %v9687_v0  ;;  %v8668_v46 = vpack.c.bf16 %v4231_v47, %v4230_v44  ;;  %v8686_v44 = vpack.c.bf16 %v4257_v11, %v4256_v36  ;;  %v4241_v47 = vld [vmem:[#allocation11 + $0x78] sm:$0xff]  ;;  %v4605_v36 = vld [vmem:[#allocation13 + $0x108] sm:$0xff] }
0x1a26   : > { %8649 = vmatprep.subr.bf16.mxu0 %v9689_v1 }
0x1a29   : > { %8651 = vmatpush3.bf16.msra.mxu0 %v8650_v52 }
0x1a2a   : > { %8652 = vmatprep.subr.bf16.mxu0 %v9689_v1 }
0x1a2d   : > { %8654 = vmatpush3.bf16.msra.mxu0 %v8653_v54  ;;  %v8670_v54 = vpack.c.bf16 %v4249_v53, %v4248_v14 }
0x1a2e   : > { %8655 = vmatprep.subr.bf16.mxu0 %v9689_v1 }
0x1a31   : > { %8657 = vmatpush3.bf16.msra.mxu0 %v8656_v33  ;;  %v4264_v33 = vld [vmem:[#allocation11 + $0x130] sm:$0xff] }
0x1a32   : > { %8690 = vmatprep.subr.bf16.mxu0 %v9689_v1 }
0x1a34   : > { %7795 = vmatmul.mubr.msk.f32.vlgmr.msra.gmra.mrb[34].mxu0 %vm2051_vm11, %v11676_v32 }
0x1a35   : > { %7829 = vmatprep.mubr.msk.f32.mxu0 %vm9690_vm7, %v9687_v0  ;;  %8692 = vmatpush3.bf16.msra.mxu0 %v8691_v13  ;;  %v4236_v13 = vld [vmem:[#allocation11 + $0x50] sm:$0xff] }
0x1a36   : > { %8693 = vmatprep.subr.bf16.mxu0 %v9689_v1  ;;  %v8680_v17 = vpack.c.bf16 %v4237_v15, %v4236_v13 }
0x1a39   : > { %8695 = vmatpush3.bf16.msra.mxu0 %v8694_v20  ;;  %v4238_v20 = vld [vmem:[#allocation11 + $0x60] sm:$0xff] }
0x1a3a   : > { %8696 = vmatprep.subr.bf16.mxu0 %v9689_v1 }
0x1a3d   : > { %8698 = vmatpush3.bf16.msra.mxu0 %v8697_v59 }
0x1a3e   : > { %8699 = vmatprep.subr.bf16.mxu0 %v9689_v1 }
0x1af7   : > { %v7005_v43 = vpop.f32.mrb[32].mxu0 }
0x1af8   : > { %v7006_v61 = vpop.f32.mrb[33].mxu0 }
0x1af9   : > { %v7007_v62 = vadd.f32 %v7006_v61, %v7005_v43  ;;  %v8672_v61 = vpack.c.bf16 %v4233_v19, %v4232_v57 }
0x1afb   : > { %v4021_v60 = vadd.f32 %v7007_v62, %v3950_v58  ;;  %v4265_v62 = vld [vmem:[#allocation11 + $0x138] sm:$0xff] }
0x1afd   : > { %v4091_v29 = vadd.f32 %v11691_v45, %v4021_v60  ;;  %v4227_v45 = vld [vmem:[#allocation11 + $0x8] sm:$0xff]  ;;  %v8700_v60 = vpack.c.bf16 %v4265_v62, %v4264_v33 }
0x1afe   : > { %v8660_v12 = vpack.c.bf16 %v4227_v45, %v4226_v6  ;;  %v8703_v45 = vpack.c.bf16 %v4267_v7, %v4266_v4 }
0x1aff   : > { %8701 = vmatpush3.bf16.msra.mxu0 %v8700_v60 }
0x1b00   : > { %8661 = vmatpush3.bf16.msra.mxu1 %v8660_v12  ;;  %8702 = vmatprep.subr.bf16.mxu0 %v9689_v1  ;;  %v8678_v12 = vpack.c.bf16 %v4253_v63, %v4252_v8 }
0x1b01   : > { %8663 = vmatprep.subr.bf16.mxu1 %v8662_v18  ;;  %v4269_v18 = vld [vmem:[#allocation11 + $0x158] sm:$0xff] }
0x1b02   : > { %v8706_v22 = vpack.c.bf16 %v4269_v18, %v4268_v16 }
0x1b03   : > { %8704 = vmatpush3.bf16.msra.mxu0 %v8703_v45 }
0x1b04   : > { %8665 = vmatpush3.bf16.msra.mxu1 %v8664_v25  ;;  %8705 = vmatprep.subr.bf16.mxu0 %v9689_v1  ;;  %v8682_v25 = vpack.c.bf16 %v4255_v24, %v4254_v23 }
0x1b05   : > { %8667 = vmatprep.subr.bf16.mxu1 %v8666_v26  ;;  %v4240_v26 = vld [vmem:[#allocation11 + $0x70] sm:$0xff] }
0x1b07   : > { %v4160_v40 = vpop.f32.mrb[34].mxu0  ;;  %8707 = vmatpush3.bf16.msra.mxu0 %v8706_v22 }
0x1b08   : > { %v4161_v41 = vadd.f32 %v4160_v40, %v4091_v29  ;;  %v7796_v32 = vpop.f32.mrb[35].mxu0  ;;  %8669 = vmatpush3.bf16.msra.mxu1 %v8668_v46  ;;  %8708 = vmatprep.subr.bf16.mxu0 %v9689_v1 }
0x1b09   : > { %8671 = vmatprep.subr.bf16.mxu1 %v8670_v54  ;;  %v4251_v32 = vld [vmem:[#allocation11 + $0xc8] sm:$0xff] }
0x1b0a   : > { %v11727_v2 = vmax.f32 %v4161_v41, 0.0  ;;  %v4250_v41 = vld [vmem:[#allocation11 + $0xc0] sm:$0xff] }
0x1b0c   : > { %v4165_v3 = vsel %vm2954_vm12, %v11727_v2, 0.0  ;;  %v4175_v30 = vmul.f32 %v11727_v2, %v11727_v2  ;;  %8673 = vmatpush3.bf16.msra.mxu1 %v8672_v61 }
0x1b0d   : > { %4166 = vadd.xlane.f32.xlu0 %v4165_v3  ;;  %v8674_v3 = vpack.c.bf16 %v4251_v32, %v4250_v41 }
0x1b0e   : > { %v4176_v37 = vsel %vm2954_vm12, %v4175_v30, 0.0  ;;  %v4234_v30 = vld [vmem:[#allocation11 + $0x40] sm:$0xff] }
0x1b0f   : > { %4177 = vadd.xlane.f32.xlu1 %v4176_v37  ;;  %v4235_v37 = vld [vmem:[#allocation11 + $0x48] sm:$0xff]  ;;  %8675 = vmatprep.subr.bf16.mxu1 %v8674_v3 }
0x1b10   : > { %v8676_v6 = vpack.c.bf16 %v4235_v37, %v4234_v30 }
0x1b12   : > { %8677 = vmatpush3.bf16.msra.mxu1 %v8676_v6 }
0x1b13   : > { %8679 = vmatprep.subr.bf16.mxu1 %v8678_v12 }
0x1b16   : > { %8681 = vmatpush3.bf16.msra.mxu1 %v8680_v17 }
0x1b17   : > { %8683 = vmatprep.subr.bf16.mxu1 %v8682_v25 }
0x1b9a   : > { %v4167_v21 = vpop.xlane.xlu0 %4166 }
0x1b9b   : > { %v4168_v27 = vrot.slane %v4167_v21, 4 }
0x1b9c   : > { %v4178_v28 = vpop.xlane.xlu1 %4177 }
0x1b9d   : > { %v4169_v34 = vadd.f32 %v4168_v27, %v4167_v21  ;;  %v4179_v35 = vrot.slane %v4178_v28, 4  ;;  %v4239_v21 = vld [vmem:[#allocation11 + $0x68] sm:$0xff]  ;;  %v4270_v27 = vld [vmem:[#allocation11 + $0x160] sm:$0xff] }
0x1b9f   : > { %v4170_v49 = vrot.slane %v4169_v34, 2  ;;  %v4180_v39 = vadd.f32 %v4179_v35, %v4178_v28  ;;  %v8684_v28 = vpack.c.bf16 %v4239_v21, %v4238_v20 }
0x1ba1   : > { %v4181_v9 = vrot.slane %v4180_v39, 2  ;;  %v4171_v52 = vadd.f32 %v4170_v49, %v4169_v34  ;;  %v4271_v34 = vld [vmem:[#allocation11 + $0x168] sm:$0xff]  ;;  %8685 = vmatpush3.bf16.msra.mxu1 %v8684_v28  ;;  %v4273_v49 = vld [vmem:[#allocation11 + $0x178] sm:$0xff] }
0x1ba2   : > { %v8709_v35 = vpack.c.bf16 %v4271_v34, %v4270_v27  ;;  %v8712_v46 = vpack.c.bf16 %v4273_v49, %v4272_v48  ;;  %8687 = vmatprep.subr.bf16.mxu1 %v8686_v44  ;;  %v4620_v27 = vld [vmem:[#allocation13 + $0x180] sm:$0xff]  ;;  %v4621_v28 = vld [vmem:[#allocation13 + $0x188] sm:$0xff]  ;;  %v4623_v44 = vld [vmem:[#allocation13 + $0x198] sm:$0xff] }
0x1ba3   : > { %v4172_v43 = vrot.slane %v4171_v52, 1  ;;  %v4182_v58 = vadd.f32 %v4181_v9, %v4180_v39  ;;  %v8688_v39 = vpack.c.bf16 %v4241_v47, %v4240_v26  ;;  %v8746_v34 = vpack.c.bf16 %v4621_v28, %v4620_v27  ;;  %v4622_v26 = vld [vmem:[#allocation13 + $0x190] sm:$0xff]  ;;  %v4607_v49 = vld [vmem:[#allocation13 + $0x118] sm:$0xff]  ;;  %v4592_v28 = vld [vmem:[#allocation13 + $0xa0] sm:$0xff] }
0x1ba4   : > { %8710 = vmatpush3.bf16.msra.mxu0 %v8709_v35  ;;  %v4604_v35 = vld [vmem:[#allocation13 + $0x100] sm:$0xff]  ;;  %v4606_v47 = vld [vmem:[#allocation13 + $0x110] sm:$0xff]  ;;  %v8750_v48 = vpack.c.bf16 %v4623_v44, %v4622_v26  ;;  %v4595_v44 = vld [vmem:[#allocation13 + $0xb8] sm:$0xff] }
0x1ba5   : > { %v4173_v29 = vadd.f32 %v4172_v43, %v4171_v52  ;;  %v4183_v40 = vrot.slane %v4182_v58, 1  ;;  %8711 = vmatprep.subr.bf16.mxu0 %v9689_v1  ;;  %8689 = vmatpush3.bf16.msra.mxu1 %v8688_v39  ;;  %v8748_v11 = vpack.c.bf16 %v4605_v36, %v4604_v35  ;;  %v8752_v39 = vpack.c.bf16 %v4607_v49, %v4606_v47  ;;  %v4574_v27 = vld [vmem:[#allocation13 + $0x10] sm:$0xff]  ;;  %v4576_v36 = vld [vmem:[#allocation13 + $0x20] sm:$0xff] }
0x1ba6   : > { %7832 = vmatprep.subr.mxu1 %v9687_v0  ;;  %v4594_v26 = vld [vmem:[#allocation13 + $0xb0] sm:$0xff] }
0x1ba7   : > { %9138 = vpush %v4173_v29  ;;  %v4184_v5 = vadd.f32 %v4183_v40, %v4182_v58  ;;  %v4578_v49 = vld [vmem:[#allocation13 + $0x30] sm:$0xff] }
0x1ba8   : > { %8713 = vmatpush3.bf16.msra.mxu0 %v8712_v46  ;;  %v4624_v46 = vld [vmem:[#allocation13 + $0x1a0] sm:$0xff] }
0x1ba9   : > { %9140 = vpush %v4184_v5  ;;  %8747 = vmatprep.subr.bf16.mxu0 %v8746_v34  ;;  %v4593_v34 = vld [vmem:[#allocation13 + $0xa8] sm:$0xff] }
0x1baa   : > { %v8722_v35 = vpack.c.bf16 %v4593_v34, %v4592_v28 }
0x1bd8   : > { %s9139_s27 = spop %9138 }
0x1bd9   : > { %s4186_s29 = smul.f32 0.001953125, %s9139_s27 }
0x1bda   : > { %s9141_s1 = spop %9140 }
0x1bdb   : > { %s4188_s3 = smul.f32 %s4186_s29, %s4186_s29  ;;  %v4197_v14 = vstv %s4186_s29 }
0x1bdc   : > { %s4187_s23 = smul.f32 0.001953125, %s9141_s1 }
0x1bde   : > { %s4189_s0 = ssub.f32 %s4187_s23, %s4188_s3 }
0x1be0   : > { %s4190_s21 = smax.f32 %s9688_s25, %s4189_s0 }
0x1be1   : > { %s4191_s10 = sadd.f32 1e-05, %s4190_s21 }
0x1be3   : > { %v4192_v51 = vstv %s4191_s10 }
0x1be4   : > { %9316 = vrsqrt.f32 %v4192_v51  ;;  %v4625_v51 = vld [vmem:[#allocation13 + $0x1a8] sm:$0xff] }
0x1bee   : > { %v9317_v59 = vpop.eup %9316 }
0x1bef   : > { %9142 = vpush %v9317_v59  ;;  %v4608_v59 = vld [vmem:[#allocation13 + $0x120] sm:$0xff] }
0x1c20   : > { %s9143_s6 = spop %9142 }
0x1c21   : > { %v4195_v9 = vstv %s9143_s6 }
0x1c22   : > { %v4196_v52 = vmul.f32 %v4195_v9, %v11722_v31  ;;  %v8754_v9 = vpack.c.bf16 %v4625_v51, %v4624_v46  ;;  %v4596_v46 = vld [vmem:[#allocation13 + $0xc0] sm:$0xff]  ;;  %v4597_v51 = vld [vmem:[#allocation13 + $0xc8] sm:$0xff] }
0x1c24   : > { %v4198_v53 = vmul.f32 %v4197_v14, %v4196_v52  ;;  %v4206_v57 = vrot.slane %v4196_v52, %v10743_v50  ;;  %v4609_v52 = vld [vmem:[#allocation13 + $0x128] sm:$0xff] }
0x1c25   : > { %v8756_v14 = vpack.c.bf16 %v4609_v52, %v4608_v59  ;;  %v4580_v52 = vld [vmem:[#allocation13 + $0x40] sm:$0xff] }
0x1c26   : > { %v4200_v54 = vrot.slane %v4198_v53, 7  ;;  %v4207_v33 = vmul.f32 %v4206_v57, %v11727_v2  ;;  %v4626_v53 = vld [vmem:[#allocation13 + $0x1b0] sm:$0xff] }
0x1c27   : > { %v4610_v57 = vld [vmem:[#allocation13 + $0x130] sm:$0xff] }
0x1c28   : > { %v4202_v19 = vsub.f32 %v11722_v31, %v4200_v54  ;;  %v11755_v31 = vld [vmem:[%s11924_s19 + $0x1b] sm:$0x7]  ;;  %v4627_v54 = vld [vmem:[#allocation13 + $0x1b8] sm:$0xff] }
0x1c29   : > { %v4278_v32 = vrot.slane %v11755_v31, %v10514_v10 }
0x1c2a   : > { %v4211_v43 = vrot.slane %v4202_v19, %v10747_v55  ;;  %v8758_v19 = vpack.c.bf16 %v4627_v54, %v4626_v53  ;;  %v4598_v53 = vld [vmem:[#allocation13 + $0xd0] sm:$0xff]  ;;  %v4599_v54 = vld [vmem:[#allocation13 + $0xd8] sm:$0xff] }
0x1c2c   : > { %v4212_v58 = vadd.f32 %v4211_v43, %v4207_v33  ;;  %v4611_v33 = vld [vmem:[#allocation13 + $0x138] sm:$0xff] }
0x1c2d   : > { %v8760_v43 = vpack.c.bf16 %v4611_v33, %v4610_v57  ;;  %v4582_v33 = vld [vmem:[#allocation13 + $0x50] sm:$0xff] }
0x1c2e   : > { %v4215_v61 = vrot.slane %v4212_v58, 7  ;;  %v4220_v62 = vrot.slane %v4212_v58, 1  ;;  %4218 = vst [vmem:[#allocation2 + $0x8] sm:$0xf] %v4212_v58  ;;  %v4628_v58 = vld [vmem:[#allocation13 + $0x1c0] sm:$0xff] }
0x1c30   : > { %4222 = vst [vmem:[#allocation2 + $0x10] sm:$0x7] %v4220_v62  ;;  %4217 = vst [vmem:[#allocation2] sm:$0xe] %v4215_v61  ;;  %v4629_v61 = vld [vmem:[#allocation13 + $0x1c8] sm:$0xff]  ;;  %v4612_v62 = vld [vmem:[#allocation13 + $0x140] sm:$0xff] }
0x1c35   : > { %v4224_v60 = vld [vmem:[#allocation2 + $0x8] sm:$0xf] }
0x1c36   : > { %4343 = vmatprep.mubr.f32.mxu1 %v4224_v60  ;;  %v8762_v60 = vpack.c.bf16 %v4629_v61, %v4628_v58  ;;  %v4614_v61 = vld [vmem:[#allocation13 + $0x150] sm:$0xff] }
0x1c37   : > { %v4223_v29 = vld [vmem:[#allocation2] sm:$0xf]  ;;  %v4225_v40 = vld [vmem:[#allocation2 + $0x10] sm:$0xf] }
0x1c38   : > { %4344 = vmatmul.mubr.f32.vlgmr.msra.gmra.mrb[32].mxu1 %v4223_v29  ;;  %4546 = vst [vmem:[#allocation2] sm:$0x1] %v9687_v0  ;;  %7830 = vmatmul.mubr.f32.vlgmr.msra.gmra.mrb[36].mxu0 %v4225_v40  ;;  %v4613_v29 = vld [vmem:[#allocation13 + $0x148] sm:$0xff] }
0x1c39   : > { %4807 = vmatprep.mubr.f32.mxu0 %v11680_v56  ;;  %7834 = vmatprep.mubr.msk.f32.mxu1 %vm9690_vm7, %v9687_v0  ;;  %v8764_v40 = vpack.c.bf16 %v4613_v29, %v4612_v62  ;;  %v4615_v62 = vld [vmem:[#allocation13 + $0x158] sm:$0xff]  ;;  %v4600_v29 = vld [vmem:[#allocation13 + $0xe0] sm:$0xff] }
0x1c3a   : > { %8749 = vmatpush3.bf16.msra.mxu0 %v8748_v11  ;;  %v4577_v11 = vld [vmem:[#allocation13 + $0x28] sm:$0xff] }
0x1c3b   : > { %8751 = vmatprep.subr.bf16.mxu0 %v8750_v48  ;;  %v8724_v47 = vpack.c.bf16 %v4577_v11, %v4576_v36  ;;  %v8726_v48 = vpack.c.bf16 %v4595_v44, %v4594_v26  ;;  %v4654_v36 = vld [vmem:[#allocation13 + $0x290] sm:$0xff]  ;;  %v4655_v11 = vld [vmem:[#allocation13 + $0x298] sm:$0xff] }
0x1c3c   : > { %v8782_v44 = vpack.c.bf16 %v4655_v11, %v4654_v36 }
0x1c3e   : > { %8753 = vmatpush3.bf16.msra.mxu0 %v8752_v39  ;;  %v4579_v39 = vld [vmem:[#allocation13 + $0x38] sm:$0xff] }
0x1c3f   : > { %8755 = vmatprep.subr.bf16.mxu0 %v8754_v9  ;;  %v8728_v59 = vpack.c.bf16 %v4579_v39, %v4578_v49  ;;  %v8730_v9 = vpack.c.bf16 %v4597_v51, %v4596_v46  ;;  %v4656_v49 = vld [vmem:[#allocation13 + $0x2a0] sm:$0xff]  ;;  %v4657_v51 = vld [vmem:[#allocation13 + $0x2a8] sm:$0xff] }
0x1c42   : > { %8757 = vmatpush3.bf16.msra.mxu0 %v8756_v14  ;;  %v4581_v14 = vld [vmem:[#allocation13 + $0x48] sm:$0xff] }
0x1c43   : > { %8759 = vmatprep.subr.bf16.mxu0 %v8758_v19  ;;  %v8732_v57 = vpack.c.bf16 %v4581_v14, %v4580_v52  ;;  %v8734_v19 = vpack.c.bf16 %v4599_v54, %v4598_v53  ;;  %v4640_v52 = vld [vmem:[#allocation13 + $0x220] sm:$0xff]  ;;  %v4641_v14 = vld [vmem:[#allocation13 + $0x228] sm:$0xff]  ;;  %v4658_v53 = vld [vmem:[#allocation13 + $0x2b0] sm:$0xff] }
0x1c44   : > { %v4659_v54 = vld [vmem:[#allocation13 + $0x2b8] sm:$0xff] }
0x1c46   : > { %8761 = vmatpush3.bf16.msra.mxu0 %v8760_v43  ;;  %v4583_v43 = vld [vmem:[#allocation13 + $0x58] sm:$0xff] }
0x1c47   : > { %8763 = vmatprep.subr.bf16.mxu0 %v8762_v60  ;;  %v8736_v58 = vpack.c.bf16 %v4583_v43, %v4582_v33  ;;  %v8768_v60 = vpack.c.bf16 %v4615_v62, %v4614_v61  ;;  %v4642_v33 = vld [vmem:[#allocation13 + $0x230] sm:$0xff]  ;;  %v4643_v43 = vld [vmem:[#allocation13 + $0x238] sm:$0xff]  ;;  %v4661_v61 = vld [vmem:[#allocation13 + $0x2c8] sm:$0xff] }
0x1c48   : > { %v8792_v62 = vpack.c.bf16 %v4643_v43, %v4642_v33 }
0x1c4a   : > { %8765 = vmatpush3.bf16.msra.mxu0 %v8764_v40  ;;  %v4601_v40 = vld [vmem:[#allocation13 + $0xe8] sm:$0xff] }
0x1d0b   : > { %v7084_v2 = vpop.f32.mrb[32].mxu1  ;;  %v4415_v41 = vpop.f32.mrb[36].mxu0 }
0x1d0c   : > { %v7085_v3 = vpop.f32.mrb[33].mxu1  ;;  %v7831_v30 = vpop.f32.mrb[37].mxu0 }
0x1d0d   : > { %v7086_v37 = vadd.f32 %v7085_v3, %v7084_v2  ;;  %v4630_v2 = vld [vmem:[#allocation13 + $0x1d0] sm:$0xff] }
0x1d0f   : > { %v4346_v4 = vadd.f32 %v7086_v37, %v4278_v32 }
0x1d11   : > { %v4416_v5 = vadd.f32 %v4415_v41, %v4346_v4  ;;  %v4631_v41 = vld [vmem:[#allocation13 + $0x1d8] sm:$0xff] }
0x1d12   : > { %v8766_v32 = vpack.c.bf16 %v4631_v41, %v4630_v2  ;;  %v8738_v2 = vpack.c.bf16 %v4601_v40, %v4600_v29  ;;  %v4584_v41 = vld [vmem:[#allocation13 + $0x60] sm:$0xff]  ;;  %v4645_v29 = vld [vmem:[#allocation13 + $0x248] sm:$0xff]  ;;  %v4662_v40 = vld [vmem:[#allocation13 + $0x2d0] sm:$0xff] }
0x1d13   : > { %v11759_v6 = vmax.f32 %v4416_v5, 0.0 }
0x1d14   : > { %8767 = vmatprep.subr.bf16.mxu0 %v8766_v32  ;;  %v4585_v32 = vld [vmem:[#allocation13 + $0x68] sm:$0xff] }
0x1d15   : > { %v4420_v56 = vsel %vm2954_vm12, %v11759_v6, 0.0  ;;  %v4430_v7 = vmul.f32 %v11759_v6, %v11759_v6  ;;  %8769 = vmatpush3.bf16.msra.mxu0 %v8768_v60 }
0x1d16   : > { %4421 = vadd.xlane.f32.xlu0 %v4420_v56 }
0x1d17   : > { %v4431_v45 = vsel %vm2954_vm12, %v4430_v7, 0.0 }
0x1d1a   : > { %4432 = vadd.xlane.f32.xlu0 %v4431_v45 }
0x1da3   : > { %v4422_v8 = vpop.xlane.xlu0 %4421 }
0x1da4   : > { %v4423_v63 = vrot.slane %v4422_v8, 4 }
0x1da6   : > { %v4424_v12 = vadd.f32 %v4423_v63, %v4422_v8  ;;  %v4588_v63 = vld [vmem:[#allocation13 + $0x80] sm:$0xff] }
0x1da7   : > { %v4433_v13 = vpop.xlane.xlu0 %4432 }
0x1da8   : > { %v4425_v15 = vrot.slane %v4424_v12, 2  ;;  %v4434_v16 = vrot.slane %v4433_v13, 4 }
0x1daa   : > { %v4435_v17 = vadd.f32 %v4434_v16, %v4433_v13  ;;  %v4426_v18 = vadd.f32 %v4425_v15, %v4424_v12  ;;  %v4589_v12 = vld [vmem:[#allocation13 + $0x88] sm:$0xff]  ;;  %v4572_v13 = vld [vmem:[#allocation13] sm:$0xff] }
0x1dab   : > { %v4573_v15 = vld [vmem:[#allocation13 + $0x8] sm:$0xff] }
0x1dac   : > { %v4436_v22 = vrot.slane %v4435_v17, 2  ;;  %v4427_v23 = vrot.slane %v4426_v18, 1 }
0x1dae   : > { %v4428_v24 = vadd.f32 %v4427_v23, %v4426_v18  ;;  %v4437_v25 = vadd.f32 %v4436_v22, %v4435_v17  ;;  %v4590_v18 = vld [vmem:[#allocation13 + $0x90] sm:$0xff]  ;;  %v4591_v22 = vld [vmem:[#allocation13 + $0x98] sm:$0xff]  ;;  %v8714_v23 = vpack.c.bf16 %v4589_v12, %v4588_v63 }
0x1daf   : > { %v4586_v63 = vld [vmem:[#allocation13 + $0x70] sm:$0xff] }
0x1db0   : > { %9144 = vpush %v4428_v24  ;;  %v4438_v20 = vrot.slane %v4437_v25, 1 }
0x1db2   : > { %v4439_v21 = vadd.f32 %v4438_v20, %v4437_v25  ;;  %v6453_v25 = vld [vmem:[%s11972_s30 + $0x10] sm:$0xff]  ;;  %v8716_v20 = vpack.c.bf16 %v4573_v15, %v4572_v13  ;;  %v4587_v13 = vld [vmem:[#allocation13 + $0x78] sm:$0xff]  ;;  %v4634_v15 = vld [vmem:[#allocation13 + $0x1f0] sm:$0xff] }
0x1db4   : > { %9146 = vpush %v4439_v21  ;;  %v8718_v21 = vpack.c.bf16 %v4591_v22, %v4590_v18  ;;  %v4618_v22 = vld [vmem:[#allocation13 + $0x170] sm:$0xff] }
0x1de1   : > { %s9145_s27 = spop %9144 }
0x1de2   : > { %s4441_s29 = smul.f32 0.001953125, %s9145_s27 }
0x1de4   : > { %s4443_s1 = smul.f32 %s4441_s29, %s4441_s29  ;;  %v4452_v5 = vstv %s4441_s29 }
0x1de5   : > { %s9147_s3 = spop %9146 }
0x1de6   : > { %s4442_s23 = smul.f32 0.001953125, %s9147_s3 }
0x1de8   : > { %s4444_s0 = ssub.f32 %s4442_s23, %s4443_s1 }
0x1dea   : > { %s4445_s21 = smax.f32 %s9688_s25, %s4444_s0 }
0x1deb   : > { %s4446_s10 = sadd.f32 1e-05, %s4445_s21 }
0x1ded   : > { %v4447_v3 = vstv %s4446_s10 }
0x1dee   : > { %9318 = vrsqrt.f32 %v4447_v3  ;;  %v4632_v3 = vld [vmem:[#allocation13 + $0x1e0] sm:$0xff] }
0x1df8   : > { %v9319_v30 = vpop.eup %9318 }
0x1df9   : > { %9148 = vpush %v9319_v30  ;;  %v8740_v30 = vpack.c.bf16 %v4585_v32, %v4584_v41 }
0x1e2a   : > { %s9149_s6 = spop %9148 }
0x1e2b   : > { %v4450_v37 = vstv %s9149_s6 }
0x1e2c   : > { %v4451_v4 = vmul.f32 %v4450_v37, %v11755_v31  ;;  %v4633_v37 = vld [vmem:[#allocation13 + $0x1e8] sm:$0xff] }
0x1e2e   : > { %v4453_v56 = vmul.f32 %v4452_v5, %v4451_v4  ;;  %v4461_v45 = vrot.slane %v4451_v4, %v10743_v50  ;;  %v4616_v4 = vld [vmem:[#allocation13 + $0x160] sm:$0xff]  ;;  %v4617_v5 = vld [vmem:[#allocation13 + $0x168] sm:$0xff] }
0x1e30   : > { %v4455_v7 = vrot.slane %v4453_v56, 7  ;;  %v4462_v16 = vmul.f32 %v4461_v45, %v11759_v6  ;;  %v8770_v56 = vpack.c.bf16 %v4633_v37, %v4632_v3  ;;  %v4602_v45 = vld [vmem:[#allocation13 + $0xf0] sm:$0xff]  ;;  %v4664_v37 = vld [vmem:[#allocation13 + $0x2e0] sm:$0xff] }
0x1e31   : > { %v4646_v3 = vld [vmem:[#allocation13 + $0x250] sm:$0xff] }
0x1e32   : > { %v4457_v8 = vsub.f32 %v11755_v31, %v4455_v7  ;;  %v4575_v31 = vld [vmem:[#allocation13 + $0x18] sm:$0xff]  ;;  %v8772_v7 = vpack.c.bf16 %v4617_v5, %v4616_v4  ;;  %8771 = vmatprep.subr.bf16.mxu0 %v8770_v56  ;;  %v4665_v4 = vld [vmem:[#allocation13 + $0x2e8] sm:$0xff] }
0x1e33   : > { %v8720_v6 = vpack.c.bf16 %v4575_v31, %v4574_v27  ;;  %v8802_v56 = vpack.c.bf16 %v4665_v4, %v4664_v37  ;;  %v4980_v4 = vld [vmem:[#allocation14 + $0x128] sm:$0xff] }
0x1e34   : > { %v4466_v17 = vrot.slane %v4457_v8, %v10747_v55  ;;  %v4603_v8 = vld [vmem:[#allocation13 + $0xf8] sm:$0xff]  ;;  %8773 = vmatpush3.bf16.msra.mxu0 %v8772_v7  ;;  %v4648_v7 = vld [vmem:[#allocation13 + $0x260] sm:$0xff] }
0x1e35   : > { %v8742_v12 = vpack.c.bf16 %v4603_v8, %v4602_v45  ;;  %v4649_v45 = vld [vmem:[#allocation13 + $0x268] sm:$0xff]  ;;  %v4666_v8 = vld [vmem:[#allocation13 + $0x2f0] sm:$0xff] }
0x1e36   : > { %v4467_v24 = vadd.f32 %v4466_v17, %v4462_v16  ;;  %v4635_v16 = vld [vmem:[#allocation13 + $0x1f8] sm:$0xff]  ;;  %v8744_v17 = vpack.c.bf16 %v4587_v13, %v4586_v63 }
0x1e37   : > { %v8774_v18 = vpack.c.bf16 %v4635_v16, %v4634_v15  ;;  %v4667_v63 = vld [vmem:[#allocation13 + $0x2f8] sm:$0xff]  ;;  %v4650_v15 = vld [vmem:[#allocation13 + $0x270] sm:$0xff] }
0x1e38   : > { %7833 = vmatpush3.msk.msra.mxu1 %vm2954_vm12, %v4467_v24  ;;  %v4652_v24 = vld [vmem:[#allocation13 + $0x280] sm:$0xff]  ;;  %v8806_v13 = vpack.c.bf16 %v4667_v63, %v4666_v8  ;;  %v4651_v16 = vld [vmem:[#allocation13 + $0x278] sm:$0xff] }
0x1e39   : > { %7835 = vmatmul.mubr.msk.f32.vlgmr.msra.gmra.mrb[34].mxu1 %vm3347_vm13, %v6453_v25  ;;  %8715 = vmatprep.subr.bf16.mxu1 %v8714_v23  ;;  %v4619_v23 = vld [vmem:[#allocation13 + $0x178] sm:$0xff] }
0x1e3a   : > { %8717 = vmatpush3.bf16.msra.mxu1 %v8716_v20  ;;  %v8776_v25 = vpack.c.bf16 %v4619_v23, %v4618_v22  ;;  %v4653_v20 = vld [vmem:[#allocation13 + $0x288] sm:$0xff]  ;;  %8775 = vmatprep.subr.bf16.mxu0 %v8774_v18  ;;  %v11787_v18 = vld [vmem:[%s11924_s19 + $0x1e] sm:$0x7] }
0x1e3b   : > { %8719 = vmatprep.subr.bf16.mxu1 %v8718_v21  ;;  %v8778_v21 = vpack.c.bf16 %v4653_v20, %v4652_v24  ;;  %v4672_v24 = vrot.slane %v11787_v18, %v10514_v10  ;;  %v4966_v8 = vld [vmem:[#allocation14 + $0xb8] sm:$0xff] }
0x1e3c   : > { %8777 = vmatpush3.bf16.msra.mxu0 %v8776_v25 }
0x1e3e   : > { %8721 = vmatpush3.bf16.msra.mxu1 %v8720_v6  ;;  %v4636_v6 = vld [vmem:[#allocation13 + $0x200] sm:$0xff] }
0x1e3f   : > { %8723 = vmatprep.subr.bf16.mxu1 %v8722_v35  ;;  %v4637_v35 = vld [vmem:[#allocation13 + $0x208] sm:$0xff] }
0x1e40   : > { %v8780_v26 = vpack.c.bf16 %v4637_v35, %v4636_v6 }
0x1e42   : > { %8725 = vmatpush3.bf16.msra.mxu1 %v8724_v47  ;;  %v4638_v47 = vld [vmem:[#allocation13 + $0x210] sm:$0xff] }
0x1e43   : > { %8727 = vmatprep.subr.bf16.mxu1 %v8726_v48  ;;  %v4639_v48 = vld [vmem:[#allocation13 + $0x218] sm:$0xff] }
0x1e46   : > { %8729 = vmatpush3.bf16.msra.mxu1 %v8728_v59  ;;  %v8784_v59 = vpack.c.bf16 %v4639_v48, %v4638_v47  ;;  %v4943_v47 = vld [vmem:[#allocation14] sm:$0xff] }
0x1e47   : > { %8731 = vmatprep.subr.bf16.mxu1 %v8730_v9  ;;  %v8786_v9 = vpack.c.bf16 %v4657_v51, %v4656_v49  ;;  %v4944_v49 = vld [vmem:[#allocation14 + $0x8] sm:$0xff] }
0x1e48   : > { %v8812_v51 = vpack.c.bf16 %v4944_v49, %v4943_v47  ;;  %v4969_v47 = vld [vmem:[#allocation14 + $0xd0] sm:$0xff] }
0x1e4a   : > { %8733 = vmatpush3.bf16.msra.mxu1 %v8732_v57  ;;  %v8788_v57 = vpack.c.bf16 %v4641_v14, %v4640_v52  ;;  %v4962_v52 = vld [vmem:[#allocation14 + $0x98] sm:$0xff]  ;;  %v4945_v14 = vld [vmem:[#allocation14 + $0x10] sm:$0xff] }
0x1e4b   : > { %8735 = vmatprep.subr.bf16.mxu1 %v8734_v19  ;;  %v8790_v19 = vpack.c.bf16 %v4659_v54, %v4658_v53  ;;  %v4946_v54 = vld [vmem:[#allocation14 + $0x18] sm:$0xff] }
0x1e4c   : > { %v8816_v33 = vpack.c.bf16 %v4946_v54, %v4945_v14  ;;  %v4971_v14 = vld [vmem:[#allocation14 + $0xe0] sm:$0xff] }
0x1e4e   : > { %8737 = vmatpush3.bf16.msra.mxu1 %v8736_v58  ;;  %v4660_v58 = vld [vmem:[#allocation13 + $0x2c0] sm:$0xff] }
0x1e4f   : > { %8739 = vmatprep.subr.bf16.mxu1 %v8738_v2  ;;  %v8794_v60 = vpack.c.bf16 %v4661_v61, %v4660_v58  ;;  %v4663_v2 = vld [vmem:[#allocation13 + $0x2d8] sm:$0xff] }
0x1e50   : > { %v8798_v32 = vpack.c.bf16 %v4663_v2, %v4662_v40 }
0x1e52   : > { %8741 = vmatpush3.bf16.msra.mxu1 %v8740_v30  ;;  %v4647_v30 = vld [vmem:[#allocation13 + $0x258] sm:$0xff] }
0x1e53   : > { %8743 = vmatprep.subr.bf16.mxu1 %v8742_v12  ;;  %v8800_v5 = vpack.c.bf16 %v4647_v30, %v4646_v3  ;;  %v8804_v12 = vpack.c.bf16 %v4649_v45, %v4648_v7  ;;  %v4948_v3 = vld [vmem:[#allocation14 + $0x28] sm:$0xff]  ;;  %v4979_v30 = vld [vmem:[#allocation14 + $0x120] sm:$0xff]  ;;  %v4965_v45 = vld [vmem:[#allocation14 + $0xb0] sm:$0xff] }
0x1e54   : > { %v8849_v7 = vpack.c.bf16 %v4980_v4, %v4979_v30 }
0x1e56   : > { %8745 = vmatpush3.bf16.msra.mxu1 %v8744_v17  ;;  %v8808_v17 = vpack.c.bf16 %v4651_v16, %v4650_v15  ;;  %v4949_v15 = vld [vmem:[#allocation14 + $0x30] sm:$0xff]  ;;  %v4950_v16 = vld [vmem:[#allocation14 + $0x38] sm:$0xff] }
0x1e57   : > { %8779 = vmatprep.subr.bf16.mxu1 %v8778_v21 }
0x1f0c   : > { %v4542_v27 = vpop.f32.mrb[34].mxu1 }
0x1f0d   : > { %v4548_v31 = vrot.slane %v4542_v27, 7  ;;  %v4553_v28 = vrot.slane %v4542_v27, 1  ;;  %v7836_v34 = vpop.f32.mrb[35].mxu1  ;;  %4737 = vmatprep.mubr.f32.mxu1 %v4542_v27 }
0x1f0f   : > { %4550 = vst [vmem:[#allocation2] sm:$0xfe] %v4548_v31  ;;  %4555 = vst [vmem:[#allocation2 + $0x10] sm:$0x7f] %v4553_v28 }
0x1f16   : > { %v4566_v39 = vld [vmem:[#allocation2] sm:$0xff]  ;;  %v4568_v46 = vld [vmem:[#allocation2 + $0x10] sm:$0xff] }
0x1f17   : > { %4738 = vmatmul.mubr.f32.vlgmr.msra.gmra.mrb[36].mxu1 %v4566_v39  ;;  %4930 = vst [vmem:[#allocation2] sm:$0x1] %v9687_v0  ;;  %4808 = vmatmul.mubr.f32.vlgmr.msra.gmra.mrb[38].mxu0 %v4568_v46  ;;  %4936 = vst [vmem:[#allocation2 + $0x17] sm:$0x1] %v9687_v0  ;;  %v4975_v39 = vld [vmem:[#allocation14 + $0x100] sm:$0xff]  ;;  %v4976_v46 = vld [vmem:[#allocation14 + $0x108] sm:$0xff] }
0x1f18   : > { %8781 = vmatpush3.bf16.msra.mxu1 %v8780_v26  ;;  %4877 = vmatprep.mubr.f32.mxu1 %v11156_v42  ;;  %v4644_v42 = vld [vmem:[#allocation13 + $0x240] sm:$0xff] }
0x1f19   : > { %8783 = vmatprep.subr.bf16.mxu1 %v8782_v44  ;;  %v8796_v41 = vpack.c.bf16 %v4645_v29, %v4644_v42  ;;  %v4959_v26 = vld [vmem:[#allocation14 + $0x80] sm:$0xff]  ;;  %v4960_v44 = vld [vmem:[#allocation14 + $0x88] sm:$0xff] }
0x1f1a   : > { %v8810_v48 = vpack.c.bf16 %v4960_v44, %v4959_v26  ;;  %v4963_v42 = vld [vmem:[#allocation14 + $0xa0] sm:$0xff]  ;;  %v4964_v29 = vld [vmem:[#allocation14 + $0xa8] sm:$0xff] }
0x1f1c   : > { %8785 = vmatpush3.bf16.msra.mxu1 %v8784_v59  ;;  %v8843_v59 = vpack.c.bf16 %v4976_v46, %v4975_v39  ;;  %8811 = vmatprep.subr.bf16.mxu0 %v8810_v48  ;;  %v4970_v48 = vld [vmem:[#allocation14 + $0xd8] sm:$0xff]  ;;  %v4953_v39 = vld [vmem:[#allocation14 + $0x50] sm:$0xff] }
0x1f1d   : > { %8787 = vmatprep.subr.bf16.mxu1 %v8786_v9  ;;  %v4961_v9 = vld [vmem:[#allocation14 + $0x90] sm:$0xff]  ;;  %8813 = vmatpush3.bf16.msra.mxu0 %v8812_v51  ;;  %v8830_v49 = vpack.c.bf16 %v4970_v48, %v4969_v47  ;;  %v4954_v46 = vld [vmem:[#allocation14 + $0x58] sm:$0xff] }
0x1f1e   : > { %v8814_v53 = vpack.c.bf16 %v4962_v52, %v4961_v9  ;;  %v4985_v51 = vld [vmem:[#allocation14 + $0x150] sm:$0xff]  ;;  %v4986_v9 = vld [vmem:[#allocation14 + $0x158] sm:$0xff] }
0x1f1f   : > { %v8858_v52 = vpack.c.bf16 %v4986_v9, %v4985_v51 }
0x1f20   : > { %8789 = vmatpush3.bf16.msra.mxu1 %v8788_v57  ;;  %v4977_v57 = vld [vmem:[#allocation14 + $0x110] sm:$0xff]  ;;  %8815 = vmatprep.subr.bf16.mxu0 %v8814_v53  ;;  %v4972_v53 = vld [vmem:[#allocation14 + $0xe8] sm:$0xff] }
0x1f21   : > { %8791 = vmatprep.subr.bf16.mxu1 %v8790_v19  ;;  %v4978_v19 = vld [vmem:[#allocation14 + $0x118] sm:$0xff]  ;;  %8817 = vmatpush3.bf16.msra.mxu0 %v8816_v33  ;;  %v8834_v54 = vpack.c.bf16 %v4972_v53, %v4971_v14  ;;  %v4987_v33 = vld [vmem:[#allocation14 + $0x160] sm:$0xff] }
0x1f22   : > { %v8846_v43 = vpack.c.bf16 %v4978_v19, %v4977_v57  ;;  %v4955_v57 = vld [vmem:[#allocation14 + $0x60] sm:$0xff]  ;;  %v4956_v19 = vld [vmem:[#allocation14 + $0x68] sm:$0xff]  ;;  %v6456_v14 = vld [vmem:[%s11972_s30 + $0x20] sm:$0xff] }
0x1f23   : > { %v5367_v53 = vld [vmem:[#allocation16 + $0x180] sm:$0xff] }
0x1f24   : > { %8793 = vmatpush3.bf16.msra.mxu1 %v8792_v62 }
0x1f25   : > { %8795 = vmatprep.subr.bf16.mxu1 %v8794_v60 }
0x1f28   : > { %8797 = vmatpush3.bf16.msra.mxu1 %v8796_v41  ;;  %v8818_v41 = vpack.c.bf16 %v4964_v29, %v4963_v42  ;;  %v4957_v42 = vld [vmem:[#allocation14 + $0x70] sm:$0xff] }
0x1f29   : > { %8799 = vmatprep.subr.bf16.mxu1 %v8798_v32  ;;  %v4947_v32 = vld [vmem:[#allocation14 + $0x20] sm:$0xff] }
0x1f2a   : > { %v8820_v37 = vpack.c.bf16 %v4948_v3, %v4947_v32  ;;  %8819 = vmatprep.subr.bf16.mxu0 %v8818_v41  ;;  %v4990_v41 = vld [vmem:[#allocation14 + $0x178] sm:$0xff] }
0x1f2c   : > { %8801 = vmatpush3.bf16.msra.mxu1 %v8800_v5  ;;  %8821 = vmatpush3.bf16.msra.mxu0 %v8820_v37 }
0x1f2d   : > { %8803 = vmatprep.subr.bf16.mxu1 %v8802_v56 }
0x1f30   : > { %8805 = vmatpush3.bf16.msra.mxu1 %v8804_v12 }
0x1f31   : > { %8807 = vmatprep.subr.bf16.mxu1 %v8806_v13  ;;  %v8822_v13 = vpack.c.bf16 %v4966_v8, %v4965_v45 }
0x1f33   : > { %8823 = vmatprep.subr.bf16.mxu0 %v8822_v13 }
0x1f34   : > { %8809 = vmatpush3.bf16.msra.mxu1 %v8808_v17  ;;  %v4981_v17 = vld [vmem:[#allocation14 + $0x130] sm:$0xff] }
0x1f35   : > { %8842 = vmatprep.subr.bf16.mxu1 %v9689_v1 }
0x1f37   : > { %4878 = vmatmul.mubr.f32.vlgmr.msra.gmra.mrb[38].mxu1 %v11151_v38 }
0x1f38   : > { %7869 = vmatprep.mubr.msk.f32.mxu1 %vm9690_vm7, %v9687_v0  ;;  %8844 = vmatpush3.bf16.msra.mxu1 %v8843_v59  ;;  %v8832_v59 = vpack.c.bf16 %v4954_v46, %v4953_v39 }
0x1f39   : > { %8845 = vmatprep.subr.bf16.mxu1 %v9689_v1 }
0x1f3c   : > { %8847 = vmatpush3.bf16.msra.mxu1 %v8846_v43  ;;  %v8836_v43 = vpack.c.bf16 %v4956_v19, %v4955_v57  ;;  %v5351_v19 = vld [vmem:[#allocation16 + $0x100] sm:$0xff] }
0x1f3d   : > { %8848 = vmatprep.subr.bf16.mxu1 %v9689_v1 }
0x1f40   : > { %8850 = vmatpush3.bf16.msra.mxu1 %v8849_v7 }
0x1f41   : > { %8851 = vmatprep.subr.bf16.mxu1 %v9689_v1 }
0x1fea   : > { %v7138_v22 = vpop.f32.mrb[36].mxu1  ;;  %v7173_v23 = vpop.f32.mrb[38].mxu0 }
0x1feb   : > { %v7139_v25 = vpop.f32.mrb[37].mxu1  ;;  %v7174_v20 = vpop.f32.mrb[39].mxu0 }
0x1fec   : > { %v7140_v21 = vadd.f32 %v7139_v25, %v7138_v22  ;;  %v7175_v27 = vadd.f32 %v7174_v20, %v7173_v23  ;;  %v8824_v22 = vpack.c.bf16 %v4950_v16, %v4949_v15  ;;  %v4982_v23 = vld [vmem:[#allocation14 + $0x138] sm:$0xff] }
0x1fed   : > { %v8852_v20 = vpack.c.bf16 %v4982_v23, %v4981_v17  ;;  %v5310_v23 = vld [vmem:[#allocation2 + $0x18] sm:$0xff] }
0x1fee   : > { %v4740_v31 = vadd.f32 %v7140_v21, %v4672_v24  ;;  %8825 = vmatpush3.bf16.msra.mxu0 %v8824_v22  ;;  %v4967_v21 = vld [vmem:[#allocation14 + $0xc0] sm:$0xff] }
0x1fef   : > { %8853 = vmatpush3.bf16.msra.mxu1 %v8852_v20 }
0x1ff0   : > { %v4810_v28 = vadd.f32 %v7175_v27, %v4740_v31  ;;  %v4968_v27 = vld [vmem:[#allocation14 + $0xc8] sm:$0xff]  ;;  %8854 = vmatprep.subr.bf16.mxu1 %v9689_v1 }
0x200a   : > { %v7208_v38 = vpop.f32.mrb[38].mxu1 }
0x200b   : > { %v7209_v34 = vpop.f32.mrb[39].mxu1 }
0x200c   : > { %v7210_v6 = vadd.f32 %v7209_v34, %v7208_v38  ;;  %v4951_v38 = vld [vmem:[#allocation14 + $0x40] sm:$0xff]  ;;  %v4952_v34 = vld [vmem:[#allocation14 + $0x48] sm:$0xff] }
0x200e   : > { %v4880_v35 = vadd.f32 %v7210_v6, %v4810_v28  ;;  %v8826_v28 = vpack.c.bf16 %v4968_v27, %v4967_v21  ;;  %v4983_v6 = vld [vmem:[#allocation14 + $0x140] sm:$0xff] }
0x2010   : > { %v11791_v36 = vmax.f32 %v4880_v35, 0.0  ;;  %v8828_v35 = vpack.c.bf16 %v4952_v34, %v4951_v38  ;;  %8827 = vmatprep.subr.bf16.mxu0 %v8826_v28 }
0x2012   : > { %4884 = vadd.xlane.f32.xlu0 %v11791_v36  ;;  %v4893_v11 = vmul.f32 %v11791_v36, %v11791_v36  ;;  %8829 = vmatpush3.bf16.msra.mxu0 %v8828_v35 }
0x2013   : > { %8831 = vmatprep.subr.bf16.mxu0 %v8830_v49 }
0x2016   : > { %4894 = vadd.xlane.f32.xlu0 %v4893_v11  ;;  %v4984_v11 = vld [vmem:[#allocation14 + $0x148] sm:$0xff]  ;;  %8833 = vmatpush3.bf16.msra.mxu0 %v8832_v59 }
0x2017   : > { %v8855_v44 = vpack.c.bf16 %v4984_v11, %v4983_v6  ;;  %8835 = vmatprep.subr.bf16.mxu0 %v8834_v54  ;;  %v5368_v54 = vld [vmem:[#allocation16 + $0x188] sm:$0xff] }
0x2018   : > { %v8898_v57 = vpack.c.bf16 %v5368_v54, %v5367_v53  ;;  %v5341_v53 = vld [vmem:[#allocation16 + $0xb0] sm:$0xff]  ;;  %v5342_v54 = vld [vmem:[#allocation16 + $0xb8] sm:$0xff] }
0x2019   : > { %8856 = vmatpush3.bf16.msra.mxu1 %v8855_v44 }
0x201a   : > { %8857 = vmatprep.subr.bf16.mxu1 %v9689_v1  ;;  %8837 = vmatpush3.bf16.msra.mxu0 %v8836_v43 }
0x201d   : > { %8859 = vmatpush3.bf16.msra.mxu1 %v8858_v52 }
0x201e   : > { %8860 = vmatprep.subr.bf16.mxu1 %v9689_v1 }
0x209f   : > { %v4885_v58 = vpop.xlane.xlu0 %4884 }
0x20a0   : > { %v4886_v61 = vrot.slane %v4885_v58, 4 }
0x20a2   : > { %v4887_v62 = vadd.f32 %v4886_v61, %v4885_v58  ;;  %v4988_v58 = vld [vmem:[#allocation14 + $0x168] sm:$0xff] }
0x20a3   : > { %v4895_v60 = vpop.xlane.xlu0 %4894  ;;  %v8861_v61 = vpack.c.bf16 %v4988_v58, %v4987_v33  ;;  %v5352_v33 = vld [vmem:[#allocation16 + $0x108] sm:$0xff]  ;;  %v5369_v58 = vld [vmem:[#allocation16 + $0x190] sm:$0xff] }
0x20a4   : > { %v4888_v40 = vrot.slane %v4887_v62, 2  ;;  %v4896_v2 = vrot.slane %v4895_v60, 4  ;;  %v8900_v43 = vpack.c.bf16 %v5352_v33, %v5351_v19  ;;  %v8878_v19 = vpack.c.bf16 %v5342_v54, %v5341_v53  ;;  %v5325_v33 = vld [vmem:[#allocation16 + $0x30] sm:$0xff]  ;;  %v5316_v53 = vld [vmem:[#allocation2 + $0x50] sm:$0xff]  ;;  %v5383_v54 = vld [vmem:[#allocation16 + $0x200] sm:$0xff] }
0x20a5   : > { %8862 = vmatpush3.bf16.msra.mxu1 %v8861_v61  ;;  %v5370_v61 = vld [vmem:[#allocation16 + $0x198] sm:$0xff] }
0x20a6   : > { %v4897_v5 = vadd.f32 %v4896_v2, %v4895_v60  ;;  %v4889_v56 = vadd.f32 %v4888_v40, %v4887_v62  ;;  %v4973_v62 = vld [vmem:[#allocation14 + $0xf0] sm:$0xff]  ;;  %v4974_v60 = vld [vmem:[#allocation14 + $0xf8] sm:$0xff]  ;;  %8863 = vmatprep.subr.bf16.mxu1 %v9689_v1 }
0x20a7   : > { %v8838_v29 = vpack.c.bf16 %v4974_v60, %v4973_v62  ;;  %v4958_v40 = vld [vmem:[#allocation14 + $0x78] sm:$0xff]  ;;  %v4989_v2 = vld [vmem:[#allocation14 + $0x170] sm:$0xff]  ;;  %v8902_v60 = vpack.c.bf16 %v5370_v61, %v5369_v58  ;;  %v5343_v58 = vld [vmem:[#allocation16 + $0xc0] sm:$0xff] }
0x20a8   : > { %v4898_v63 = vrot.slane %v4897_v5, 2  ;;  %v4890_v12 = vrot.slane %v4889_v56, 1  ;;  %v8840_v32 = vpack.c.bf16 %v4958_v40, %v4957_v42  ;;  %v8864_v3 = vpack.c.bf16 %v4990_v41, %v4989_v2  ;;  %v5353_v62 = vld [vmem:[#allocation16 + $0x110] sm:$0xff]  ;;  %v5354_v42 = vld [vmem:[#allocation16 + $0x118] sm:$0xff]  ;;  %v5371_v40 = vld [vmem:[#allocation16 + $0x1a0] sm:$0xff] }
0x20a9   : > { %8839 = vmatprep.subr.bf16.mxu0 %v8838_v29  ;;  %v8904_v29 = vpack.c.bf16 %v5354_v42, %v5353_v62  ;;  %v5372_v2 = vld [vmem:[#allocation16 + $0x1a8] sm:$0xff]  ;;  %v5355_v41 = vld [vmem:[#allocation16 + $0x120] sm:$0xff] }
0x20aa   : > { %v4891_v24 = vadd.f32 %v4890_v12, %v4889_v56  ;;  %v4899_v25 = vadd.f32 %v4898_v63, %v4897_v5  ;;  %8841 = vmatpush3.bf16.msra.mxu0 %v8840_v32  ;;  %8865 = vmatpush3.bf16.msra.mxu1 %v8864_v3  ;;  %v8906_v32 = vpack.c.bf16 %v5372_v2, %v5371_v40  ;;  %v5356_v3 = vld [vmem:[#allocation16 + $0x128] sm:$0xff]  ;;  %v5327_v42 = vld [vmem:[#allocation16 + $0x40] sm:$0xff]  ;;  %v5345_v40 = vld [vmem:[#allocation16 + $0xd0] sm:$0xff] }
0x20ab   : > { %8899 = vmatprep.subr.bf16.mxu1 %v8898_v57  ;;  %v5344_v61 = vld [vmem:[#allocation16 + $0xc8] sm:$0xff]  ;;  %v5346_v2 = vld [vmem:[#allocation16 + $0xd8] sm:$0xff] }
0x20ac   : > { %9150 = vpush %v4891_v24  ;;  %v4900_v31 = vrot.slane %v4899_v25, 1 }
0x20ae   : > { %v4901_v26 = vadd.f32 %v4900_v31, %v4899_v25 }
0x20b0   : > { %9152 = vpush %v4901_v26 }
0x20dd   : > { %s9151_s1 = spop %9150 }
0x20de   : > { %s4903_s3 = smul.f32 0.0009765625, %s9151_s1 }
0x20e0   : > { %s4905_s23 = smul.f32 %s4903_s3, %s4903_s3  ;;  %v4914_v1 = vstv %s4903_s3 }
0x20e1   : > { %s9153_s0 = spop %9152 }
0x20e2   : > { %s4904_s21 = smul.f32 0.0009765625, %s9153_s0 }
0x20e4   : > { %s4906_s10 = ssub.f32 %s4904_s21, %s4905_s23 }
0x20e6   : > { %s4907_s6 = smax.f32 %s9688_s25, %s4906_s10 }
0x20e7   : > { %s4908_s2 = sadd.f32 1e-05, %s4907_s6 }
0x20e9   : > { %v4909_v30 = vstv %s4908_s2 }
0x20ea   : > { %9320 = vrsqrt.f32 %v4909_v30  ;;  %v8908_v30 = vpack.c.bf16 %v5356_v3, %v5355_v41  ;;  %v5377_v3 = vld [vmem:[#allocation16 + $0x1d0] sm:$0xff] }
0x20f4   : > { %v9321_v37 = vpop.eup %9320 }
0x20f5   : > { %9154 = vpush %v9321_v37  ;;  %v5373_v37 = vld [vmem:[#allocation16 + $0x1b0] sm:$0xff] }
0x2126   : > { %s9155_s28 = spop %9154 }
0x2127   : > { %v4912_v4 = vstv %s9155_s28 }
0x2128   : > { %v4913_v5 = vmul.f32 %v4912_v4, %v11787_v18  ;;  %v5374_v4 = vld [vmem:[#allocation16 + $0x1b8] sm:$0xff] }
0x212a   : > { %v4915_v56 = vmul.f32 %v4914_v1, %v4913_v5  ;;  %v4923_v45 = vrot.slane %v4913_v5, %v10743_v50  ;;  %v5357_v5 = vld [vmem:[#allocation16 + $0x130] sm:$0xff]  ;;  %v8910_v1 = vpack.c.bf16 %v5374_v4, %v5373_v37 }
0x212b   : > { %v5361_v4 = vld [vmem:[#allocation16 + $0x150] sm:$0xff] }
0x212c   : > { %v4917_v7 = vrot.slane %v4915_v56, 7  ;;  %v4924_v63 = vmul.f32 %v4923_v45, %v11791_v36  ;;  %v5358_v56 = vld [vmem:[#allocation16 + $0x138] sm:$0xff]  ;;  %v5375_v45 = vld [vmem:[#allocation16 + $0x1c0] sm:$0xff] }
0x212e   : > { %v4919_v8 = vsub.f32 %v11787_v18, %v4917_v7  ;;  %v11813_v18 = vld [vmem:[%s11924_s19 + $0x21] sm:$0x7]  ;;  %v8912_v7 = vpack.c.bf16 %v5358_v56, %v5357_v5  ;;  %v5379_v56 = vld [vmem:[#allocation16 + $0x1e0] sm:$0xff] }
0x212f   : > { %v4995_v25 = vrot.slane %v11813_v18, %v10514_v10  ;;  %v5362_v5 = vld [vmem:[#allocation16 + $0x158] sm:$0xff] }
0x2130   : > { %v4928_v12 = vrot.slane %v4919_v8, %v10747_v55  ;;  %v5376_v8 = vld [vmem:[#allocation16 + $0x1c8] sm:$0xff] }
0x2132   : > { %v4929_v13 = vadd.f32 %v4928_v12, %v4924_v63  ;;  %v5359_v63 = vld [vmem:[#allocation16 + $0x140] sm:$0xff]  ;;  %v8914_v12 = vpack.c.bf16 %v5376_v8, %v5375_v45 }
0x2133   : > { %v5363_v8 = vld [vmem:[#allocation16 + $0x160] sm:$0xff] }
0x2134   : > { %v4932_v15 = vrot.slane %v4929_v13, 7  ;;  %v4937_v16 = vrot.slane %v4929_v13, 1  ;;  %5060 = vmatprep.mubr.f32.mxu0 %v4929_v13  ;;  %v5360_v13 = vld [vmem:[#allocation16 + $0x148] sm:$0xff] }
0x2136   : > { %4934 = vst [vmem:[#allocation2] sm:$0xfe] %v4932_v15  ;;  %4939 = vst [vmem:[#allocation2 + $0x10] sm:$0x7f] %v4937_v16  ;;  %v8916_v15 = vpack.c.bf16 %v5360_v13, %v5359_v63  ;;  %v5364_v63 = vld [vmem:[#allocation16 + $0x168] sm:$0xff]  ;;  %v5329_v13 = vld [vmem:[#allocation16 + $0x50] sm:$0xff] }
0x213d   : > { %v4940_v17 = vld [vmem:[#allocation2] sm:$0xff]  ;;  %v4942_v22 = vld [vmem:[#allocation2 + $0x10] sm:$0xff] }
0x213e   : > { %5061 = vmatmul.mubr.f32.vlgmr.msra.gmra.mrb[40].mxu0 %v4940_v17  ;;  %5267 = vst [vmem:[#allocation2] sm:$0x1] %v9687_v0  ;;  %7870 = vmatmul.mubr.f32.vlgmr.msra.gmra.mrb[40].mxu1 %v4942_v22 }
0x213f   : > { %5559 = vmatprep.mubr.f32.mxu1 %v5310_v23  ;;  %7874 = vmatprep.mubr.msk.f32.mxu0 %vm2758_vm3, %v6456_v14  ;;  %v5324_v14 = vld [vmem:[#allocation16 + $0x28] sm:$0xff] }
0x2140   : > { %8901 = vmatpush3.bf16.msra.mxu1 %v8900_v43  ;;  %v5326_v43 = vld [vmem:[#allocation16 + $0x38] sm:$0xff] }
0x2141   : > { %8903 = vmatprep.subr.bf16.mxu1 %v8902_v60  ;;  %v8880_v62 = vpack.c.bf16 %v5326_v43, %v5325_v33  ;;  %v8882_v60 = vpack.c.bf16 %v5344_v61, %v5343_v58  ;;  %v5402_v33 = vld [vmem:[#allocation16 + $0x298] sm:$0xff]  ;;  %v5385_v61 = vld [vmem:[#allocation16 + $0x210] sm:$0xff] }
0x2144   : > { %8905 = vmatpush3.bf16.msra.mxu1 %v8904_v29  ;;  %v5328_v29 = vld [vmem:[#allocation16 + $0x48] sm:$0xff] }
0x2145   : > { %8907 = vmatprep.subr.bf16.mxu1 %v8906_v32  ;;  %v8884_v41 = vpack.c.bf16 %v5328_v29, %v5327_v42  ;;  %v8886_v32 = vpack.c.bf16 %v5346_v2, %v5345_v40  ;;  %v5403_v29 = vld [vmem:[#allocation16 + $0x2a0] sm:$0xff]  ;;  %v5404_v40 = vld [vmem:[#allocation16 + $0x2a8] sm:$0xff] }
0x2148   : > { %8909 = vmatpush3.bf16.msra.mxu1 %v8908_v30  ;;  %v5378_v30 = vld [vmem:[#allocation16 + $0x1d8] sm:$0xff] }
0x2149   : > { %8911 = vmatprep.subr.bf16.mxu1 %v8910_v1  ;;  %v8918_v37 = vpack.c.bf16 %v5378_v30, %v5377_v3  ;;  %v8920_v1 = vpack.c.bf16 %v5362_v5, %v5361_v4  ;;  %v5388_v3 = vld [vmem:[#allocation16 + $0x228] sm:$0xff]  ;;  %v5405_v30 = vld [vmem:[#allocation16 + $0x2b0] sm:$0xff]  ;;  %v9332_v4 = vld [vmem:[#allocation2 + $0x28] sm:$0xff] }
0x214c   : > { %8913 = vmatpush3.bf16.msra.mxu1 %v8912_v7  ;;  %v5380_v7 = vld [vmem:[#allocation16 + $0x1e8] sm:$0xff] }
0x214d   : > { %8915 = vmatprep.subr.bf16.mxu1 %v8914_v12  ;;  %v8922_v45 = vpack.c.bf16 %v5380_v7, %v5379_v56  ;;  %v8924_v12 = vpack.c.bf16 %v5364_v63, %v5363_v8  ;;  %v5389_v56 = vld [vmem:[#allocation16 + $0x230] sm:$0xff]  ;;  %v5390_v7 = vld [vmem:[#allocation16 + $0x238] sm:$0xff]  ;;  %v5408_v8 = vld [vmem:[#allocation16 + $0x2c8] sm:$0xff] }
0x214e   : > { %v8944_v63 = vpack.c.bf16 %v5390_v7, %v5389_v56 }
0x2150   : > { %8917 = vmatpush3.bf16.msra.mxu1 %v8916_v15  ;;  %v5330_v15 = vld [vmem:[#allocation16 + $0x58] sm:$0xff] }
0x2151   : > { %8919 = vmatprep.subr.bf16.mxu1 %v8918_v37  ;;  %v5406_v37 = vld [vmem:[#allocation16 + $0x2b8] sm:$0xff] }
0x2154   : > { %8921 = vmatpush3.bf16.msra.mxu1 %v8920_v1  ;;  %v8942_v1 = vpack.c.bf16 %v5406_v37, %v5405_v30 }
0x2155   : > { %8923 = vmatprep.subr.bf16.mxu1 %v8922_v45  ;;  %v5407_v45 = vld [vmem:[#allocation16 + $0x2c0] sm:$0xff] }
0x2158   : > { %8925 = vmatpush3.bf16.msra.mxu1 %v8924_v12  ;;  %v8946_v12 = vpack.c.bf16 %v5408_v8, %v5407_v45  ;;  %v5740_v45 = vld [vmem:[#allocation17 + $0x80] sm:$0xff]  ;;  %v5741_v8 = vld [vmem:[#allocation17 + $0x88] sm:$0xff] }
0x2211   : > { %v7243_v36 = vpop.f32.mrb[40].mxu0  ;;  %v5132_v24 = vpop.f32.mrb[40].mxu1 }
0x2212   : > { %v7244_v20 = vpop.f32.mrb[41].mxu0  ;;  %v7871_v21 = vpop.f32.mrb[41].mxu1 }
0x2213   : > { %v7245_v27 = vadd.f32 %v7244_v20, %v7243_v36 }
0x2215   : > { %v5063_v31 = vadd.f32 %v7245_v27, %v4995_v25  ;;  %v5335_v27 = vld [vmem:[#allocation16 + $0x80] sm:$0xff] }
0x2217   : > { %v5133_v28 = vadd.f32 %v5132_v24, %v5063_v31  ;;  %v5336_v31 = vld [vmem:[#allocation16 + $0x88] sm:$0xff] }
0x2219   : > { %v11817_v38 = vmax.f32 %v5133_v28, 0.0 }
0x221b   : > { %5137 = vadd.xlane.f32.xlu1 %v11817_v38  ;;  %v5146_v34 = vmul.f32 %v11817_v38, %v11817_v38 }
0x221d   : > { %5147 = vadd.xlane.f32.xlu0 %v5146_v34 }
0x22a8   : > { %v5138_v6 = vpop.xlane.xlu1 %5137 }
0x22a9   : > { %v5139_v35 = vrot.slane %v5138_v6, 4 }
0x22aa   : > { %v5148_v11 = vpop.xlane.xlu0 %5147 }
0x22ab   : > { %v5140_v26 = vadd.f32 %v5139_v35, %v5138_v6  ;;  %v5149_v44 = vrot.slane %v5148_v11, 4  ;;  %v5319_v6 = vld [vmem:[#allocation16] sm:$0xff]  ;;  %v5320_v35 = vld [vmem:[#allocation16 + $0x8] sm:$0xff] }
0x22ad   : > { %v5141_v47 = vrot.slane %v5140_v26, 2  ;;  %v5150_v48 = vadd.f32 %v5149_v44, %v5148_v11  ;;  %v5337_v11 = vld [vmem:[#allocation16 + $0x90] sm:$0xff] }
0x22af   : > { %v5151_v49 = vrot.slane %v5150_v48, 2  ;;  %v5142_v39 = vadd.f32 %v5141_v47, %v5140_v26  ;;  %v5338_v26 = vld [vmem:[#allocation16 + $0x98] sm:$0xff]  ;;  %v8866_v47 = vpack.c.bf16 %v5336_v31, %v5335_v27  ;;  %v5331_v31 = vld [vmem:[#allocation16 + $0x60] sm:$0xff] }
0x22b1   : > { %v5143_v46 = vrot.slane %v5142_v39, 1  ;;  %v5152_v51 = vadd.f32 %v5151_v49, %v5150_v48  ;;  %v6457_v48 = vld [vmem:[%s11972_s30 + $0x28] sm:$0xff]  ;;  %v8868_v49 = vpack.c.bf16 %v5320_v35, %v5319_v6  ;;  %v5349_v6 = vld [vmem:[#allocation16 + $0xf0] sm:$0xff]  ;;  %v5350_v35 = vld [vmem:[#allocation16 + $0xf8] sm:$0xff] }
0x22b3   : > { %v5144_v59 = vadd.f32 %v5143_v46, %v5142_v39  ;;  %v5153_v9 = vrot.slane %v5152_v51, 1  ;;  %v8870_v39 = vpack.c.bf16 %v5338_v26, %v5337_v11  ;;  %v5322_v46 = vld [vmem:[#allocation16 + $0x18] sm:$0xff]  ;;  %v5333_v11 = vld [vmem:[#allocation16 + $0x70] sm:$0xff]  ;;  %v8894_v26 = vpack.c.bf16 %v5350_v35, %v5349_v6 }
0x22b4   : > { %v5414_v6 = vld [vmem:[#allocation16 + $0x2f8] sm:$0xff] }
0x22b5   : > { %9156 = vpush %v5144_v59  ;;  %v5154_v52 = vadd.f32 %v5153_v9, %v5152_v51  ;;  %v5339_v51 = vld [vmem:[#allocation16 + $0xa0] sm:$0xff] }
0x22b7   : > { %9158 = vpush %v5154_v52  ;;  %v5323_v52 = vld [vmem:[#allocation16 + $0x20] sm:$0xff] }
0x22b8   : > { %v8876_v57 = vpack.c.bf16 %v5324_v14, %v5323_v52 }
0x22e6   : > { %s9157_s23 = spop %9156 }
0x22e7   : > { %s5156_s0 = smul.f32 0.0009765625, %s9157_s23 }
0x22e8   : > { %s9159_s21 = spop %9158 }
0x22e9   : > { %s5158_s10 = smul.f32 %s5156_s0, %s5156_s0  ;;  %v5167_v36 = vstv %s5156_s0  ;;  %s11973_s0 = sshll.u32 %s11977_s22, 4 }
0x22ea   : > { %s5157_s6 = smul.f32 0.0009765625, %s9159_s21 }
0x22ec   : > { %s5159_s2 = ssub.f32 %s5157_s6, %s5158_s10 }
0x22ee   : > { %s5160_s28 = smax.f32 %s9688_s25, %s5159_s2 }
0x22ef   : > { %s5161_s27 = sadd.f32 1e-05, %s5160_s28 }
0x22f1   : > { %v5162_v16 = vstv %s5161_s27 }
0x22f2   : > { %9322 = vrsqrt.f32 %v5162_v16  ;;  %v8888_v16 = vpack.c.bf16 %v5330_v15, %v5329_v13  ;;  %v5391_v13 = vld [vmem:[#allocation16 + $0x240] sm:$0xff]  ;;  %v5392_v15 = vld [vmem:[#allocation16 + $0x248] sm:$0xff] }
0x22fc   : > { %v9323_v17 = vpop.eup %9322 }
0x22fd   : > { %9160 = vpush %v9323_v17  ;;  %v5381_v17 = vld [vmem:[#allocation16 + $0x1f0] sm:$0xff] }
0x232e   : > { %s9161_s29 = spop %9160 }
0x232f   : > { %v5165_v22 = vstv %s9161_s29 }
0x2330   : > { %v5166_v23 = vmul.f32 %v5165_v22, %v11813_v18  ;;  %v5382_v22 = vld [vmem:[#allocation16 + $0x1f8] sm:$0xff] }
0x2332   : > { %v5168_v24 = vmul.f32 %v5167_v36, %v5166_v23  ;;  %v5176_v20 = vrot.slane %v5166_v23, %v10743_v50  ;;  %v8926_v23 = vpack.c.bf16 %v5382_v22, %v5381_v17  ;;  %v5365_v36 = vld [vmem:[#allocation16 + $0x170] sm:$0xff]  ;;  %v5410_v17 = vld [vmem:[#allocation16 + $0x2d8] sm:$0xff]  ;;  %v8948_v22 = vpack.c.bf16 %v5392_v15, %v5391_v13  ;;  %v5725_v13 = vld [vmem:[#allocation17 + $0x8] sm:$0xff] }
0x2333   : > { %v5756_v15 = vld [vmem:[#allocation17 + $0x100] sm:$0xff] }
0x2334   : > { %v5170_v25 = vrot.slane %v5168_v24, 7  ;;  %v5177_v28 = vmul.f32 %v5176_v20, %v11817_v38  ;;  %v5340_v38 = vld [vmem:[#allocation16 + $0xa8] sm:$0xff]  ;;  %v5366_v24 = vld [vmem:[#allocation16 + $0x178] sm:$0xff]  ;;  %8927 = vmatprep.subr.bf16.mxu1 %v8926_v23 }
0x2335   : > { %v8874_v9 = vpack.c.bf16 %v5340_v38, %v5339_v51  ;;  %v5348_v20 = vld [vmem:[#allocation16 + $0xe8] sm:$0xff] }
0x2336   : > { %v5172_v21 = vsub.f32 %v11813_v18, %v5170_v25  ;;  %v5321_v18 = vld [vmem:[#allocation16 + $0x10] sm:$0xff]  ;;  %v5347_v25 = vld [vmem:[#allocation16 + $0xe0] sm:$0xff] }
0x2337   : > { %v8872_v59 = vpack.c.bf16 %v5322_v46, %v5321_v18  ;;  %v8890_v27 = vpack.c.bf16 %v5348_v20, %v5347_v25  ;;  %v5411_v25 = vld [vmem:[#allocation16 + $0x2e0] sm:$0xff]  ;;  %v5412_v20 = vld [vmem:[#allocation16 + $0x2e8] sm:$0xff] }
0x2338   : > { %v5181_v34 = vrot.slane %v5172_v21, %v10747_v55  ;;  %v8928_v21 = vpack.c.bf16 %v5366_v24, %v5365_v36  ;;  %v5393_v36 = vld [vmem:[#allocation16 + $0x250] sm:$0xff]  ;;  %v5394_v24 = vld [vmem:[#allocation16 + $0x258] sm:$0xff] }
0x233a   : > { %v5182_v44 = vadd.f32 %v5181_v34, %v5177_v28  ;;  %v5332_v28 = vld [vmem:[#allocation16 + $0x68] sm:$0xff]  ;;  %8929 = vmatpush3.bf16.msra.mxu1 %v8928_v21  ;;  %v8952_v21 = vpack.c.bf16 %v5394_v24, %v5393_v36  ;;  %v5743_v36 = vld [vmem:[#allocation17 + $0x98] sm:$0xff]  ;;  %v5726_v24 = vld [vmem:[#allocation17 + $0x10] sm:$0xff] }
0x233b   : > { %v8892_v34 = vpack.c.bf16 %v5332_v28, %v5331_v31  ;;  %v5395_v31 = vld [vmem:[#allocation16 + $0x260] sm:$0xff]  ;;  %v5396_v28 = vld [vmem:[#allocation16 + $0x268] sm:$0xff] }
0x233c   : > { %7872 = vmatprep.subr.mxu0 %v5182_v44  ;;  %v8956_v35 = vpack.c.bf16 %v5396_v28, %v5395_v31 }
0x233d   : > { %7873 = vmatpush3.msra.mxu0 %v5182_v44  ;;  %v5334_v44 = vld [vmem:[#allocation16 + $0x78] sm:$0xff] }
0x233e   : > { %7875 = vmatmul.mubr.msk.f32.vlgmr.msra.gmra.mrb[42].mxu0 %vm2758_vm3, %v6457_v48  ;;  %8867 = vmatprep.subr.bf16.mxu0 %v8866_v47  ;;  %v5399_v47 = vld [vmem:[#allocation16 + $0x280] sm:$0xff]  ;;  %v5400_v48 = vld [vmem:[#allocation16 + $0x288] sm:$0xff] }
0x233f   : > { %8869 = vmatpush3.bf16.msra.mxu0 %v8868_v49  ;;  %v8896_v49 = vpack.c.bf16 %v5334_v44, %v5333_v11  ;;  %v5398_v44 = vld [vmem:[#allocation16 + $0x278] sm:$0xff] }
0x2340   : > { %8871 = vmatprep.subr.bf16.mxu0 %v8870_v39  ;;  %v8930_v39 = vpack.c.bf16 %v5400_v48, %v5399_v47  ;;  %v9333_v48 = vld [vmem:[#allocation2 + $0x20] sm:$0xff] }
0x2343   : > { %8873 = vmatpush3.bf16.msra.mxu0 %v8872_v59 }
0x2344   : > { %8875 = vmatprep.subr.bf16.mxu0 %v8874_v9 }
0x2347   : > { %8877 = vmatpush3.bf16.msra.mxu0 %v8876_v57  ;;  %v5384_v57 = vld [vmem:[#allocation16 + $0x208] sm:$0xff] }
0x2348   : > { %8879 = vmatprep.subr.bf16.mxu0 %v8878_v19  ;;  %v5401_v19 = vld [vmem:[#allocation16 + $0x290] sm:$0xff]  ;;  %v8932_v43 = vpack.c.bf16 %v5384_v57, %v5383_v54 }
0x2349   : > { %v8934_v58 = vpack.c.bf16 %v5402_v33, %v5401_v19 }
0x234b   : > { %8881 = vmatpush3.bf16.msra.mxu0 %v8880_v62  ;;  %v5386_v62 = vld [vmem:[#allocation16 + $0x218] sm:$0xff] }
0x234c   : > { %8883 = vmatprep.subr.bf16.mxu0 %v8882_v60  ;;  %v8936_v2 = vpack.c.bf16 %v5386_v62, %v5385_v61 }
0x234f   : > { %8885 = vmatpush3.bf16.msra.mxu0 %v8884_v41  ;;  %v8938_v41 = vpack.c.bf16 %v5404_v40, %v5403_v29 }
0x2350   : > { %8887 = vmatprep.subr.bf16.mxu0 %v8886_v32  ;;  %v5387_v32 = vld [vmem:[#allocation16 + $0x220] sm:$0xff] }
0x2351   : > { %v8940_v5 = vpack.c.bf16 %v5388_v3, %v5387_v32 }
0x2353   : > { %8889 = vmatpush3.bf16.msra.mxu0 %v8888_v16  ;;  %v5409_v16 = vld [vmem:[#allocation16 + $0x2d0] sm:$0xff] }
0x2354   : > { %8891 = vmatprep.subr.bf16.mxu0 %v8890_v27  ;;  %v8950_v23 = vpack.c.bf16 %v5410_v17, %v5409_v16  ;;  %v8954_v27 = vpack.c.bf16 %v5412_v20, %v5411_v25  ;;  %v5757_v16 = vld [vmem:[#allocation17 + $0x108] sm:$0xff]  ;;  %v5727_v20 = vld [vmem:[#allocation17 + $0x18] sm:$0xff] }
0x2355   : > { %v8968_v31 = vpack.c.bf16 %v5727_v20, %v5726_v24  ;;  %v5752_v24 = vld [vmem:[#allocation17 + $0xe0] sm:$0xff] }
0x2356   : > { %v5768_v20 = vld [vmem:[#allocation17 + $0x160] sm:$0xff] }
0x2357   : > { %8893 = vmatpush3.bf16.msra.mxu0 %v8892_v34  ;;  %v5413_v34 = vld [vmem:[#allocation16 + $0x2f0] sm:$0xff] }
0x2358   : > { %8895 = vmatprep.subr.bf16.mxu0 %v8894_v26  ;;  %v8958_v11 = vpack.c.bf16 %v5414_v6, %v5413_v34  ;;  %v5397_v26 = vld [vmem:[#allocation16 + $0x270] sm:$0xff] }
0x2359   : > { %v8960_v47 = vpack.c.bf16 %v5398_v44, %v5397_v26  ;;  %v5744_v44 = vld [vmem:[#allocation17 + $0xa0] sm:$0xff] }
0x235b   : > { %8897 = vmatpush3.bf16.msra.mxu0 %v8896_v49  ;;  %v5318_v49 = vld [vmem:[#allocation2 + $0x60] sm:$0xff] }
0x235c   : > { %8931 = vmatprep.subr.bf16.mxu0 %v8930_v39  ;;  %v5317_v39 = vld [vmem:[#allocation2 + $0x58] sm:$0xff] }
0x2411   : > { %v7876_v18 = vpop.f32.mrb[42].mxu0 }
0x2412   : > { %v5271_v46 = vrot.slane %v7876_v18, 7  ;;  %v5281_v51 = vrot.slane %v7876_v18, 1  ;;  %v5258_v38 = vpop.f32.mrb[43].mxu0 }
0x2413   : > { %v5270_v59 = vrot.slane %v5258_v38, 7  ;;  %v5280_v9 = vrot.slane %v5258_v38, 1  ;;  %5484 = vmatprep.mubr.f32.mxu0 %v5258_v38  ;;  %v11843_v38 = vld [vmem:[%s11924_s19 + $0x24] sm:$0x7] }
0x2414   : > { %5286 = vst [vmem:[#allocation2 + $0x48] sm:$0x7f] %v5281_v51 }
0x2415   : > { %v5272_v52 = vsel %vm813_vm2, %v5270_v59, %v5271_v46  ;;  %v5282_v14 = vsel %vm824_vm5, %v5280_v9, %v5281_v51  ;;  %5275 = vst [vmem:[#allocation2] sm:$0xfe] %v5270_v59 }
0x2416   : > { %5560 = vmatmul.mubr.f32.vlgmr.msra.gmra.mrb[42].mxu1 %v5282_v14 }
0x2417   : > { %5564 = vmatprep.mubr.f32.mxu1 %v5316_v53 }
0x241b   : > { %v5315_v60 = vld [vmem:[#allocation2 + $0x48] sm:$0xff] }
0x241c   : > { %v5307_v42 = vld [vmem:[#allocation2] sm:$0xff]  ;;  %5565 = vmatmul.mubr.f32.gmra.mrb[44].mxu1 %v5315_v60  ;;  %5710 = vst [vmem:[#allocation2 + $0x4f] sm:$0x1] %v9687_v0 }
0x241d   : > { %5485 = vmatmul.mubr.f32.vlgmr.msra.gmra.mrb[44].mxu0 %v5307_v42  ;;  %5698 = vst [vmem:[#allocation2] sm:$0x1] %v9687_v0 }
0x241e   : > { %8933 = vmatpush3.bf16.msra.mxu0 %v8932_v43  ;;  %5489 = vmatprep.mubr.f32.mxu0 %v7876_v18 }
0x241f   : > { %8935 = vmatprep.subr.bf16.mxu0 %v8934_v58 }
0x2421   : > { %5490 = vmatmul.mubr.f32.gmra.mrb[46].mxu0 %v5272_v52  ;;  %v5419_v52 = vrot.slane %v11843_v38, %v10514_v10 }
0x2422   : > { %8937 = vmatpush3.bf16.msra.mxu0 %v8936_v2  ;;  %5634 = vmatprep.mubr.f32.mxu0 %v9332_v4 }
0x2423   : > { %8939 = vmatprep.subr.bf16.mxu0 %v8938_v41 }
0x2426   : > { %8941 = vmatpush3.bf16.msra.mxu0 %v8940_v5 }
0x2427   : > { %8943 = vmatprep.subr.bf16.mxu0 %v8942_v1 }
0x242a   : > { %8945 = vmatpush3.bf16.msra.mxu0 %v8944_v63  ;;  %v5724_v63 = vld [vmem:[#allocation17] sm:$0xff] }
0x242b   : > { %8947 = vmatprep.subr.bf16.mxu0 %v8946_v12  ;;  %v8962_v12 = vpack.c.bf16 %v5741_v8, %v5740_v45  ;;  %v8964_v17 = vpack.c.bf16 %v5725_v13, %v5724_v63  ;;  %v5750_v63 = vld [vmem:[#allocation17 + $0xd0] sm:$0xff] }
0x242c   : > { %v5766_v13 = vld [vmem:[#allocation17 + $0x150] sm:$0xff] }
0x242d   : > { %8963 = vmatprep.subr.bf16.mxu1 %v8962_v12  ;;  %v5751_v12 = vld [vmem:[#allocation17 + $0xd8] sm:$0xff] }
0x242e   : > { %8949 = vmatpush3.bf16.msra.mxu0 %v8948_v22  ;;  %v8994_v22 = vpack.c.bf16 %v5757_v16, %v5756_v15  ;;  %8965 = vmatpush3.bf16.msra.mxu1 %v8964_v17  ;;  %v8982_v15 = vpack.c.bf16 %v5751_v12, %v5750_v63  ;;  %v5734_v16 = vld [vmem:[#allocation17 + $0x50] sm:$0xff]  ;;  %v5735_v17 = vld [vmem:[#allocation17 + $0x58] sm:$0xff] }
0x242f   : > { %8951 = vmatprep.subr.bf16.mxu0 %v8950_v23  ;;  %v5742_v23 = vld [vmem:[#allocation17 + $0x90] sm:$0xff] }
0x2430   : > { %v8966_v25 = vpack.c.bf16 %v5743_v36, %v5742_v23  ;;  %v8984_v23 = vpack.c.bf16 %v5735_v17, %v5734_v16 }
0x2432   : > { %8953 = vmatpush3.bf16.msra.mxu0 %v8952_v21  ;;  %v5758_v21 = vld [vmem:[#allocation17 + $0x110] sm:$0xff]  ;;  %8967 = vmatprep.subr.bf16.mxu1 %v8966_v25  ;;  %v5753_v25 = vld [vmem:[#allocation17 + $0xe8] sm:$0xff] }
0x2433   : > { %8955 = vmatprep.subr.bf16.mxu0 %v8954_v27  ;;  %v5759_v27 = vld [vmem:[#allocation17 + $0x118] sm:$0xff]  ;;  %8969 = vmatpush3.bf16.msra.mxu1 %v8968_v31  ;;  %v5737_v31 = vld [vmem:[#allocation17 + $0x68] sm:$0xff] }
0x2434   : > { %v8998_v28 = vpack.c.bf16 %v5759_v27, %v5758_v21  ;;  %v8986_v21 = vpack.c.bf16 %v5753_v25, %v5752_v24  ;;  %v5736_v27 = vld [vmem:[#allocation17 + $0x60] sm:$0xff] }
0x2435   : > { %v6006_v24 = vld [vmem:[#allocation19] sm:$0xff] }
0x2436   : > { %8957 = vmatpush3.bf16.msra.mxu0 %v8956_v35 }
0x2437   : > { %8959 = vmatprep.subr.bf16.mxu0 %v8958_v11 }
0x243a   : > { %8961 = vmatpush3.bf16.msra.mxu0 %v8960_v47  ;;  %v5745_v47 = vld [vmem:[#allocation17 + $0xa8] sm:$0xff] }
0x243b   : > { %8995 = vmatprep.subr.bf16.mxu0 %v8994_v22 }
0x243d   : > { %5635 = vmatmul.mubr.f32.vlgmr.msra.gmra.mrb[48].mxu0 %v9333_v48  ;;  %v5760_v48 = vld [vmem:[#allocation17 + $0x120] sm:$0xff] }
0x243e   : > { %5639 = vmatprep.mubr.f32.mxu0 %v5318_v49  ;;  %8997 = vmatpush3.bf16.msra.mxu0 %v8994_v22  ;;  %v8970_v49 = vpack.c.bf16 %v5745_v47, %v5744_v44  ;;  %v5767_v22 = vld [vmem:[#allocation17 + $0x158] sm:$0xff] }
0x243f   : > { %8999 = vmatprep.subr.bf16.mxu0 %v8998_v28  ;;  %v9014_v36 = vpack.c.bf16 %v5767_v22, %v5766_v13  ;;  %v5739_v47 = vld [vmem:[#allocation17 + $0x78] sm:$0xff] }
0x2440   : > { %8971 = vmatprep.subr.bf16.mxu1 %v8970_v49  ;;  %v5771_v49 = vld [vmem:[#allocation17 + $0x178] sm:$0xff] }
0x2441   : > { %5640 = vmatmul.mubr.f32.gmra.mrb[50].mxu0 %v5317_v39  ;;  %v5728_v39 = vld [vmem:[#allocation17 + $0x20] sm:$0xff] }
0x2442   : > { %9001 = vmatpush3.bf16.msra.mxu0 %v8998_v28  ;;  %v5769_v28 = vld [vmem:[#allocation17 + $0x168] sm:$0xff] }
0x24e9   : > { %v7336_v18 = vpop.f32.mrb[42].mxu1 }
0x24ea   : > { %v7337_v46 = vpop.f32.mrb[43].mxu1 }
0x24eb   : > { %v7338_v51 = vadd.f32 %v7337_v46, %v7336_v18  ;;  %v5729_v18 = vld [vmem:[#allocation17 + $0x28] sm:$0xff] }
0x24ec   : > { %v5761_v46 = vld [vmem:[#allocation17 + $0x128] sm:$0xff] }
0x24ef   : > { %v7339_v59 = vpop.f32.mrb[44].mxu1 }
0x24f0   : > { %v7298_v9 = vpop.f32.mrb[44].mxu0  ;;  %v7340_v14 = vpop.f32.mrb[45].mxu1 }
0x24f1   : > { %v7299_v53 = vpop.f32.mrb[45].mxu0  ;;  %v7341_v54 = vadd.f32 %v7340_v14, %v7339_v59 }
0x24f2   : > { %v7300_v57 = vadd.f32 %v7299_v53, %v7298_v9  ;;  %v8972_v9 = vpack.c.bf16 %v5729_v18, %v5728_v39 }
0x24f4   : > { %v5487_v19 = vadd.f32 %v7300_v57, %v5419_v52  ;;  %v7301_v33 = vpop.f32.mrb[46].mxu0  ;;  %8973 = vmatpush3.bf16.msra.mxu1 %v8972_v9  ;;  %v5747_v57 = vld [vmem:[#allocation17 + $0xb8] sm:$0xff] }
0x24f5   : > { %v7302_v43 = vpop.f32.mrb[47].mxu0 }
0x24f6   : > { %v5562_v58 = vadd.f32 %v7338_v51, %v5487_v19  ;;  %v7303_v61 = vadd.f32 %v7302_v43, %v7301_v33  ;;  %v5762_v19 = vld [vmem:[#allocation17 + $0x130] sm:$0xff] }
0x24f7   : > { %v5730_v43 = vld [vmem:[#allocation17 + $0x30] sm:$0xff] }
0x24f8   : > { %v5492_v62 = vadd.f32 %v7303_v61, %v5419_v52  ;;  %v9002_v52 = vpack.c.bf16 %v5761_v46, %v5760_v48  ;;  %v5763_v61 = vld [vmem:[#allocation17 + $0x138] sm:$0xff]  ;;  %v5770_v48 = vld [vmem:[#allocation17 + $0x170] sm:$0xff] }
0x24f9   : > { %v9022_v18 = vpack.c.bf16 %v5771_v49, %v5770_v48 }
0x24fa   : > { %v5567_v60 = vadd.f32 %v7341_v54, %v5492_v62  ;;  %9003 = vmatprep.subr.bf16.mxu0 %v9002_v52  ;;  %v5746_v54 = vld [vmem:[#allocation17 + $0xb0] sm:$0xff] }
0x24fb   : > { %9005 = vmatpush3.bf16.msra.mxu0 %v9002_v52  ;;  %v8974_v33 = vpack.c.bf16 %v5747_v57, %v5746_v54 }
0x24fd   : > { %8975 = vmatprep.subr.bf16.mxu1 %v8974_v33 }
0x2510   : > { %v7374_v42 = vpop.f32.mrb[48].mxu0 }
0x2511   : > { %v7375_v29 = vpop.f32.mrb[49].mxu0 }
0x2512   : > { %v7376_v40 = vadd.f32 %v7375_v29, %v7374_v42  ;;  %v9006_v29 = vpack.c.bf16 %v5763_v61, %v5762_v19 }
0x2514   : > { %v5637_v2 = vadd.f32 %v7376_v40, %v5562_v58  ;;  %v7377_v41 = vpop.f32.mrb[50].mxu0  ;;  %v5731_v58 = vld [vmem:[#allocation17 + $0x38] sm:$0xff]  ;;  %9007 = vmatprep.subr.bf16.mxu0 %v9006_v29 }
0x2515   : > { %v7378_v32 = vpop.f32.mrb[51].mxu0  ;;  %v8976_v42 = vpack.c.bf16 %v5731_v58, %v5730_v43  ;;  %9009 = vmatpush3.bf16.msra.mxu0 %v9006_v29 }
0x2516   : > { %v7379_v3 = vadd.f32 %v7378_v32, %v7377_v41  ;;  %v11847_v30 = vmax.f32 %v5637_v2, 0.0  ;;  %v5748_v41 = vld [vmem:[#allocation17 + $0xc0] sm:$0xff]  ;;  %v5749_v32 = vld [vmem:[#allocation17 + $0xc8] sm:$0xff] }
0x2517   : > { %8977 = vmatpush3.bf16.msra.mxu1 %v8976_v42 }
0x2518   : > { %v5642_v37 = vadd.f32 %v7379_v3, %v5567_v60  ;;  %v5657_v1 = vmul.f32 %v11847_v30, %v11847_v30  ;;  %v5764_v3 = vld [vmem:[#allocation17 + $0x140] sm:$0xff] }
0x251a   : > { %v11849_v4 = vmax.f32 %v5642_v37, 0.0  ;;  %v8978_v37 = vpack.c.bf16 %v5749_v32, %v5748_v41 }
0x251c   : > { %v5647_v5 = vadd.f32 %v11849_v4, %v11847_v30  ;;  %v5658_v56 = vmul.f32 %v11849_v4, %v11849_v4  ;;  %8979 = vmatprep.subr.bf16.mxu1 %v8978_v37 }
0x251e   : > { %5648 = vadd.xlane.f32.xlu1 %v5647_v5  ;;  %v5659_v7 = vadd.f32 %v5658_v56, %v5657_v1  ;;  %v5732_v5 = vld [vmem:[#allocation17 + $0x40] sm:$0xff]  ;;  %v5733_v1 = vld [vmem:[#allocation17 + $0x48] sm:$0xff] }
0x251f   : > { %v5765_v56 = vld [vmem:[#allocation17 + $0x148] sm:$0xff]  ;;  %v8980_v45 = vpack.c.bf16 %v5733_v1, %v5732_v5 }
0x2520   : > { %5660 = vadd.xlane.f32.xlu0 %v5659_v7  ;;  %v9010_v8 = vpack.c.bf16 %v5765_v56, %v5764_v3 }
0x2521   : > { %8981 = vmatpush3.bf16.msra.mxu1 %v8980_v45 }
0x2522   : > { %9011 = vmatprep.subr.bf16.mxu0 %v9010_v8  ;;  %8983 = vmatprep.subr.bf16.mxu1 %v8982_v15 }
0x2523   : > { %9013 = vmatpush3.bf16.msra.mxu0 %v9010_v8 }
0x2524   : > { %9015 = vmatprep.subr.bf16.mxu0 %v9014_v36 }
0x2525   : > { %8985 = vmatpush3.bf16.msra.mxu1 %v8984_v23  ;;  %v6022_v23 = vld [vmem:[#allocation19 + $0x80] sm:$0xff] }
0x2526   : > { %8987 = vmatprep.subr.bf16.mxu1 %v8986_v21  ;;  %v6038_v21 = vld [vmem:[#allocation19 + $0x100] sm:$0xff] }
0x2527   : > { %9017 = vmatpush3.bf16.msra.mxu0 %v9014_v36  ;;  %v6023_v36 = vld [vmem:[#allocation19 + $0x88] sm:$0xff] }
0x2528   : > { %v9026_v25 = vpack.c.bf16 %v6023_v36, %v6022_v23  ;;  %v6032_v23 = vld [vmem:[#allocation19 + $0xd0] sm:$0xff]  ;;  %v6033_v36 = vld [vmem:[#allocation19 + $0xd8] sm:$0xff] }
0x25ab   : > { %v5649_v34 = vpop.xlane.xlu1 %5648 }
0x25ac   : > { %v5650_v6 = vrot.slane %v5649_v34, 4 }
0x25ad   : > { %v5661_v35 = vpop.xlane.xlu0 %5660 }
0x25ae   : > { %v5651_v11 = vadd.f32 %v5650_v6, %v5649_v34  ;;  %v5662_v26 = vrot.slane %v5661_v35, 4  ;;  %v8988_v34 = vpack.c.bf16 %v5737_v31, %v5736_v27  ;;  %v9018_v6 = vpack.c.bf16 %v5769_v28, %v5768_v20  ;;  %v6007_v20 = vld [vmem:[#allocation19 + $0x8] sm:$0xff] }
0x25af   : > { %v6039_v27 = vld [vmem:[#allocation19 + $0x108] sm:$0xff]  ;;  %v9028_v31 = vpack.c.bf16 %v6007_v20, %v6006_v24  ;;  %v6048_v24 = vld [vmem:[#allocation19 + $0x150] sm:$0xff] }
0x25b0   : > { %v5652_v51 = vrot.slane %v5651_v11, 2  ;;  %v5663_v59 = vadd.f32 %v5662_v26, %v5661_v35  ;;  %v5754_v35 = vld [vmem:[#allocation17 + $0xf0] sm:$0xff]  ;;  %8989 = vmatpush3.bf16.msra.mxu1 %v8988_v34  ;;  %9019 = vmatprep.subr.bf16.mxu0 %v9018_v6  ;;  %v9058_v28 = vpack.c.bf16 %v6039_v27, %v6038_v21  ;;  %v6017_v21 = vld [vmem:[#allocation19 + $0x58] sm:$0xff] }
0x25b1   : > { %v5738_v26 = vld [vmem:[#allocation17 + $0x70] sm:$0xff]  ;;  %9021 = vmatpush3.bf16.msra.mxu0 %v9018_v6  ;;  %v6025_v6 = vld [vmem:[#allocation19 + $0x98] sm:$0xff] }
0x25b2   : > { %v5664_v14 = vrot.slane %v5663_v59, 2  ;;  %v5653_v53 = vadd.f32 %v5652_v51, %v5651_v11  ;;  %v5755_v11 = vld [vmem:[#allocation17 + $0xf8] sm:$0xff]  ;;  %v8992_v39 = vpack.c.bf16 %v5739_v47, %v5738_v26  ;;  %9023 = vmatprep.subr.bf16.mxu0 %v9022_v18  ;;  %v6024_v34 = vld [vmem:[#allocation19 + $0x90] sm:$0xff] }
0x25b3   : > { %v8990_v44 = vpack.c.bf16 %v5755_v11, %v5754_v35  ;;  %v6008_v35 = vld [vmem:[#allocation19 + $0x10] sm:$0xff]  ;;  %v9030_v11 = vpack.c.bf16 %v6025_v6, %v6024_v34  ;;  %v6009_v26 = vld [vmem:[#allocation19 + $0x18] sm:$0xff]  ;;  %v6034_v34 = vld [vmem:[#allocation19 + $0xe0] sm:$0xff] }
0x25b4   : > { %v5654_v62 = vrot.slane %v5653_v53, 1  ;;  %v5665_v60 = vadd.f32 %v5664_v14, %v5663_v59  ;;  %v6041_v47 = vld [vmem:[#allocation19 + $0x118] sm:$0xff]  ;;  %v9032_v48 = vpack.c.bf16 %v6009_v26, %v6008_v35  ;;  %v6016_v20 = vld [vmem:[#allocation19 + $0x50] sm:$0xff]  ;;  %v6035_v6 = vld [vmem:[#allocation19 + $0xe8] sm:$0xff] }
0x25b5   : > { %8991 = vmatprep.subr.bf16.mxu1 %v8990_v44  ;;  %9025 = vmatpush3.bf16.msra.mxu0 %v9022_v18  ;;  %v6040_v44 = vld [vmem:[#allocation19 + $0x110] sm:$0xff]  ;;  %v6049_v27 = vld [vmem:[#allocation19 + $0x158] sm:$0xff]  ;;  %v6050_v35 = vld [vmem:[#allocation19 + $0x160] sm:$0xff] }
0x25b6   : > { %v5655_v40 = vadd.f32 %v5654_v62, %v5653_v53  ;;  %v5666_v2 = vrot.slane %v5665_v60, 1  ;;  %8993 = vmatpush3.bf16.msra.mxu1 %v8992_v39  ;;  %9059 = vmatprep.subr.bf16.mxu0 %v9058_v28  ;;  %v9062_v49 = vpack.c.bf16 %v6041_v47, %v6040_v44  ;;  %v6018_v26 = vld [vmem:[#allocation19 + $0x60] sm:$0xff]  ;;  %v6019_v44 = vld [vmem:[#allocation19 + $0x68] sm:$0xff] }
0x25b7   : > { %9027 = vmatprep.subr.bf16.mxu1 %v9026_v25  ;;  %v9046_v25 = vpack.c.bf16 %v6033_v36, %v6032_v23  ;;  %v6051_v47 = vld [vmem:[#allocation19 + $0x168] sm:$0xff] }
0x25b8   : > { %9162 = vpush %v5655_v40  ;;  %v5667_v7 = vadd.f32 %v5666_v2, %v5665_v60 }
0x25ba   : > { %9164 = vpush %v5667_v7 }
0x25e9   : > { %s9163_s21 = spop %9162 }
0x25ea   : > { %s5669_s10 = smul.f32 0.00048828125, %s9163_s21 }
0x25eb   : > { %s9165_s6 = spop %9164 }
0x25ec   : > { %s5671_s2 = smul.f32 %s5669_s10, %s5669_s10  ;;  %v5680_v52 = vstv %s5669_s10 }
0x25ed   : > { %s5670_s28 = smul.f32 0.00048828125, %s9165_s6 }
0x25ef   : > { %s5672_s27 = ssub.f32 %s5670_s28, %s5671_s2 }
0x25f1   : > { %s5673_s29 = smax.f32 %s9688_s25, %s5672_s27 }
0x25f2   : > { %s5674_s1 = sadd.f32 1e-05, %s5673_s29 }
0x25f4   : > { %v5675_v46 = vstv %s5674_s1 }
0x25f5   : > { %9324 = vrsqrt.f32 %v5675_v46 }
0x25ff   : > { %v9325_v51 = vpop.eup %9324 }
0x2600   : > { %9166 = vpush %v9325_v51 }
0x2631   : > { %s9167_s3 = spop %9166 }
0x2632   : > { %v5678_v59 = vstv %s9167_s3 }
0x2633   : > { %v5679_v9 = vmul.f32 %v5678_v59, %v11843_v38 }
0x2635   : > { %v5681_v14 = vmul.f32 %v5680_v52, %v5679_v9  ;;  %v5689_v54 = vrot.slane %v5679_v9, %v10743_v50  ;;  %v6026_v9 = vld [vmem:[#allocation19 + $0xa0] sm:$0xff]  ;;  %v6027_v52 = vld [vmem:[#allocation19 + $0xa8] sm:$0xff] }
0x2637   : > { %v5683_v53 = vrot.slane %v5681_v14, 7  ;;  %v5690_v19 = vmul.f32 %v5689_v54, %v11847_v30  ;;  %v5691_v33 = vmul.f32 %v5689_v54, %v11849_v4  ;;  %v11871_v4 = vld [vmem:[%s11924_s19 + $0x27] sm:$0x7] }
0x2638   : > { %v5776_v3 = vrot.slane %v11871_v4, %v10514_v10  ;;  %v6042_v14 = vld [vmem:[#allocation19 + $0x120] sm:$0xff] }
0x2639   : > { %v5685_v57 = vsub.f32 %v11843_v38, %v5683_v53  ;;  %v9034_v53 = vpack.c.bf16 %v6027_v52, %v6026_v9  ;;  %v6010_v54 = vld [vmem:[#allocation19 + $0x20] sm:$0xff]  ;;  %v6052_v9 = vld [vmem:[#allocation19 + $0x170] sm:$0xff]  ;;  %v6053_v52 = vld [vmem:[#allocation19 + $0x178] sm:$0xff] }
0x263b   : > { %v5695_v43 = vrot.slane %v5685_v57, %v10747_v55  ;;  %v6011_v57 = vld [vmem:[#allocation19 + $0x28] sm:$0xff] }
0x263d   : > { %v5696_v58 = vadd.f32 %v5695_v43, %v5690_v19  ;;  %v5697_v61 = vadd.f32 %v5695_v43, %v5691_v33  ;;  %v6043_v19 = vld [vmem:[#allocation19 + $0x128] sm:$0xff] }
0x263f   : > { %v5701_v62 = vrot.slane %v5696_v58, 7  ;;  %v5711_v60 = vrot.slane %v5696_v58, 1  ;;  %v5712_v42 = vrot.slane %v5697_v61, 1  ;;  %5841 = vmatprep.mubr.f32.mxu1 %v5696_v58  ;;  %v5702_v40 = vrot.slane %v5697_v61, 7 }
0x2640   : > { %v9036_v58 = vpack.c.bf16 %v6011_v57, %v6010_v54 }
0x2641   : > { %v5713_v29 = vsel %vm824_vm5, %v5711_v60, %v5712_v42  ;;  %5717 = vst [vmem:[#allocation2 + $0x48] sm:$0x7f] %v5712_v42  ;;  %5706 = vst [vmem:[#allocation2] sm:$0xfe] %v5701_v62  ;;  %v5703_v30 = vsel %vm813_vm2, %v5701_v62, %v5702_v40  ;;  %v6028_v42 = vld [vmem:[#allocation19 + $0xb0] sm:$0xff] }
0x2642   : > { %7909 = vmatprep.mubr.f32.mxu0 %v5713_v29  ;;  %v6029_v29 = vld [vmem:[#allocation19 + $0xb8] sm:$0xff]  ;;  %v6044_v40 = vld [vmem:[#allocation19 + $0x130] sm:$0xff] }
0x2648   : > { %v5718_v2 = vld [vmem:[#allocation2] sm:$0xff]  ;;  %v5723_v38 = vld [vmem:[#allocation2 + $0x48] sm:$0xff] }
0x2649   : > { %5842 = vmatmul.mubr.f32.vlgmr.msra.gmra.mrb[46].mxu1 %v5718_v2  ;;  %5980 = vst [vmem:[#allocation2] sm:$0x1] %v9687_v0  ;;  %7910 = vmatmul.mubr.f32.vlgmr.msra.gmra.mrb[52].mxu0 %v5723_v38  ;;  %5992 = vst [vmem:[#allocation2 + $0x4f] sm:$0x1] %v9687_v0  ;;  %v9038_v2 = vpack.c.bf16 %v6029_v29, %v6028_v42  ;;  %v6012_v38 = vld [vmem:[#allocation19 + $0x30] sm:$0xff] }
0x264a   : > { %5846 = vmatprep.mubr.f32.mxu1 %v5697_v61  ;;  %9029 = vmatpush3.bf16.msra.mxu1 %v9028_v31  ;;  %v9066_v61 = vpack.c.bf16 %v6043_v19, %v6042_v14  ;;  %v9048_v31 = vpack.c.bf16 %v6017_v21, %v6016_v20 }
0x264b   : > { %9061 = vmatpush3.bf16.msra.mxu0 %v9058_v28  ;;  %9031 = vmatprep.subr.bf16.mxu1 %v9030_v11  ;;  %v9078_v28 = vpack.c.bf16 %v6049_v27, %v6048_v24  ;;  %v9050_v11 = vpack.c.bf16 %v6035_v6, %v6034_v34 }
0x264c   : > { %9063 = vmatprep.subr.bf16.mxu0 %v9062_v49 }
0x264d   : > { %5847 = vmatmul.mubr.f32.gmra.mrb[48].mxu1 %v5703_v30  ;;  %v6013_v30 = vld [vmem:[#allocation19 + $0x38] sm:$0xff] }
0x264e   : > { %9033 = vmatpush3.bf16.msra.mxu1 %v9032_v48  ;;  %v9052_v48 = vpack.c.bf16 %v6019_v44, %v6018_v26 }
0x264f   : > { %9065 = vmatpush3.bf16.msra.mxu0 %v9062_v49  ;;  %9035 = vmatprep.subr.bf16.mxu1 %v9034_v53  ;;  %v9082_v49 = vpack.c.bf16 %v6051_v47, %v6050_v35  ;;  %v9086_v53 = vpack.c.bf16 %v6053_v52, %v6052_v9 }
0x2650   : > { %9067 = vmatprep.subr.bf16.mxu0 %v9066_v61 }
0x2652   : > { %9037 = vmatpush3.bf16.msra.mxu1 %v9036_v58 }
0x2653   : > { %9069 = vmatpush3.bf16.msra.mxu0 %v9066_v61  ;;  %9039 = vmatprep.subr.bf16.mxu1 %v9038_v2 }
0x271c   : > { %v7412_v41 = vpop.f32.mrb[46].mxu1  ;;  %v7911_v32 = vpop.f32.mrb[52].mxu0 }
0x271d   : > { %v7413_v37 = vpop.f32.mrb[47].mxu1  ;;  %v5918_v5 = vpop.f32.mrb[53].mxu0 }
0x271e   : > { %v7414_v1 = vadd.f32 %v7413_v37, %v7412_v41  ;;  %v6045_v41 = vld [vmem:[#allocation19 + $0x138] sm:$0xff]  ;;  %v9040_v37 = vpack.c.bf16 %v6013_v30, %v6012_v38 }
0x2720   : > { %v5844_v56 = vadd.f32 %v7414_v1, %v5776_v3  ;;  %v7415_v7 = vpop.f32.mrb[48].mxu1  ;;  %9041 = vmatpush3.bf16.msra.mxu1 %v9040_v37 }
0x2721   : > { %v7416_v0 = vpop.f32.mrb[49].mxu1 }
0x2722   : > { %v5919_v45 = vadd.f32 %v5918_v5, %v5844_v56  ;;  %v7417_v8 = vadd.f32 %v7416_v0, %v7415_v7  ;;  %v9070_v5 = vpack.c.bf16 %v6045_v41, %v6044_v40  ;;  %v6030_v7 = vld [vmem:[#allocation19 + $0xc0] sm:$0xff]  ;;  %v6031_v0 = vld [vmem:[#allocation19 + $0xc8] sm:$0xff] }
0x2724   : > { %v5849_v63 = vadd.f32 %v7417_v8, %v5776_v3  ;;  %v11875_v12 = vmax.f32 %v5919_v45, 0.0  ;;  %9071 = vmatprep.subr.bf16.mxu0 %v9070_v5  ;;  %v6046_v45 = vld [vmem:[#allocation19 + $0x140] sm:$0xff]  ;;  %v9042_v8 = vpack.c.bf16 %v6031_v0, %v6030_v7 }
0x2725   : > { %9073 = vmatpush3.bf16.msra.mxu0 %v9070_v5 }
0x2726   : > { %v5924_v13 = vadd.f32 %v7911_v32, %v5849_v63  ;;  %v5939_v10 = vmul.f32 %v11875_v12, %v11875_v12  ;;  %v6014_v63 = vld [vmem:[#allocation19 + $0x40] sm:$0xff]  ;;  %9043 = vmatprep.subr.bf16.mxu1 %v9042_v8 }
0x2728   : > { %v11877_v15 = vmax.f32 %v5924_v13, 0.0  ;;  %v6015_v13 = vld [vmem:[#allocation19 + $0x48] sm:$0xff] }
0x272a   : > { %v5929_v16 = vadd.f32 %v11877_v15, %v11875_v12  ;;  %v5940_v17 = vmul.f32 %v11877_v15, %v11877_v15 }
0x272c   : > { %5930 = vadd.xlane.f32.xlu1 %v5929_v16  ;;  %v5941_v22 = vadd.f32 %v5940_v17, %v5939_v10  ;;  %v6047_v16 = vld [vmem:[#allocation19 + $0x148] sm:$0xff]  ;;  %v9044_v17 = vpack.c.bf16 %v6015_v13, %v6014_v63 }
0x272e   : > { %5942 = vadd.xlane.f32.xlu0 %v5941_v22  ;;  %v9074_v22 = vpack.c.bf16 %v6047_v16, %v6046_v45  ;;  %9045 = vmatpush3.bf16.msra.mxu1 %v9044_v17 }
0x272f   : > { %9047 = vmatprep.subr.bf16.mxu1 %v9046_v25 }
0x2730   : > { %9075 = vmatprep.subr.bf16.mxu0 %v9074_v22 }
0x2731   : > { %9077 = vmatpush3.bf16.msra.mxu0 %v9074_v22 }
0x2732   : > { %9049 = vmatpush3.bf16.msra.mxu1 %v9048_v31  ;;  %9079 = vmatprep.subr.bf16.mxu0 %v9078_v28 }
0x2733   : > { %9051 = vmatprep.subr.bf16.mxu1 %v9050_v11 }
0x2735   : > { %9081 = vmatpush3.bf16.msra.mxu0 %v9078_v28 }
0x2736   : > { %9053 = vmatpush3.bf16.msra.mxu1 %v9052_v48  ;;  %9083 = vmatprep.subr.bf16.mxu0 %v9082_v49 }
0x2739   : > { %9085 = vmatpush3.bf16.msra.mxu0 %v9082_v49 }
0x273a   : > { %9087 = vmatprep.subr.bf16.mxu0 %v9086_v53 }
0x273d   : > { %9089 = vmatpush3.bf16.msra.mxu0 %v9086_v53 }
0x27b9   : > { %v5931_v39 = vpop.xlane.xlu1 %5930 }
0x27ba   : > { %v5932_v18 = vrot.slane %v5931_v39, 4 }
0x27bb   : > { %v5943_v46 = vpop.xlane.xlu0 %5942 }
0x27bc   : > { %v5933_v51 = vadd.f32 %v5932_v18, %v5931_v39  ;;  %v5944_v59 = vrot.slane %v5943_v46, 4  ;;  %v6036_v39 = vld [vmem:[#allocation19 + $0xf0] sm:$0xff]  ;;  %v6037_v18 = vld [vmem:[#allocation19 + $0xf8] sm:$0xff] }
0x27be   : > { %v5934_v33 = vrot.slane %v5933_v51, 2  ;;  %v5945_v43 = vadd.f32 %v5944_v59, %v5943_v46  ;;  %v6020_v46 = vld [vmem:[#allocation19 + $0x70] sm:$0xff]  ;;  %v6021_v59 = vld [vmem:[#allocation19 + $0x78] sm:$0xff] }
0x27bf   : > { %v9056_v14 = vpack.c.bf16 %v6021_v59, %v6020_v46 }
0x27c0   : > { %v5935_v62 = vadd.f32 %v5934_v33, %v5933_v51  ;;  %v5946_v60 = vrot.slane %v5945_v43, 2  ;;  %v9054_v51 = vpack.c.bf16 %v6037_v18, %v6036_v39 }
0x27c2   : > { %v5947_v32 = vadd.f32 %v5946_v60, %v5945_v43  ;;  %v5936_v3 = vrot.slane %v5935_v62, 1  ;;  %9055 = vmatprep.subr.bf16.mxu1 %v9054_v51 }
0x27c3   : > { %9057 = vmatpush3.bf16.msra.mxu1 %v9056_v14 }
0x27c4   : > { %v5937_v1 = vadd.f32 %v5936_v3, %v5935_v62  ;;  %v5948_v56 = vrot.slane %v5947_v32, 1 }
0x27c6   : > { %9168 = vpush %v5937_v1  ;;  %v5949_v10 = vadd.f32 %v5948_v56, %v5947_v32  ;;  %v6460_v1 = vld [vmem:[%s11924_s19 + $0x2a] ss:$0 sm:$0xff] }
0x27c8   : > { %9170 = vpush %v5949_v10 }
0x27f7   : > { %s9169_s21 = spop %9168 }
0x27f8   : > { %s5951_s10 = smul.f32 0.00048828125, %s9169_s21 }
0x27f9   : > { %s9171_s6 = spop %9170 }
0x27fa   : > { %s5953_s2 = smul.f32 %s5951_s10, %s5951_s10  ;;  %v5962_v43 = vstv %s5951_s10 }
0x27fb   : > { %s5952_s28 = smul.f32 0.00048828125, %s9171_s6  ;;  %s11974_s6 = sld [smem:[#allocation36_spill]] }
0x27fd   : > { %s5954_s27 = ssub.f32 %s5952_s28, %s5953_s2 }
0x27ff   : > { %s5955_s29 = smax.f32 %s9688_s25, %s5954_s27 }
0x2800   : > { %s5956_s1 = sadd.f32 1e-05, %s5955_s29 }
0x2801   : > { %s789_s2 = scalar_lea.vmem %s11974_s6, %s11973_s0 }
0x2802   : > { %v5957_v54 = vstv %s5956_s1 }
0x2803   : > { %9326 = vrsqrt.f32 %v5957_v54 }
0x280d   : > { %v9327_v57 = vpop.eup %9326 }
0x280e   : > { %9172 = vpush %v9327_v57 }
0x283f   : > { %s9173_s3 = spop %9172 }
0x2840   : > { %v5960_v19 = vstv %s9173_s3 }
0x2841   : > { %v5961_v33 = vmul.f32 %v5960_v19, %v11871_v4 }
0x2843   : > { %v5963_v58 = vmul.f32 %v5962_v43, %v5961_v33  ;;  %v5971_v62 = vrot.slane %v5961_v33, %v10743_v50 }
0x2845   : > { %v5965_v61 = vrot.slane %v5963_v58, 7  ;;  %v5972_v42 = vmul.f32 %v5971_v62, %v11875_v12  ;;  %v5973_v29 = vmul.f32 %v5971_v62, %v11877_v15 }
0x2847   : > { %v5967_v60 = vsub.f32 %v11871_v4, %v5965_v61 }
0x2849   : > { %v5977_v40 = vrot.slane %v5967_v60, %v10747_v55 }
0x284b   : > { %v5978_v2 = vadd.f32 %v5977_v40, %v5972_v42  ;;  %v5979_v38 = vadd.f32 %v5977_v40, %v5973_v29 }
0x284d   : > { %v5983_v30 = vrot.slane %v5978_v2, 7  ;;  %v5984_v41 = vrot.slane %v5979_v38, 7  ;;  %5990 = vst [vmem:[#allocation2 + $0x8] sm:$0xff] %v5978_v2  ;;  %v5993_v32 = vrot.slane %v5978_v2, 1  ;;  %v5994_v3 = vrot.slane %v5979_v38, 1  ;;  %6123 = vmatprep.mubr.f32.mxu1 %v5978_v2 }
0x284f   : > { %v5985_v37 = vsel %vm813_vm2, %v5983_v30, %v5984_v41  ;;  %v5995_v50 = vsel %vm824_vm5, %v5993_v32, %v5994_v3  ;;  %5999 = vst [vmem:[#allocation2 + $0x48] sm:$0x7f] %v5994_v3  ;;  %5988 = vst [vmem:[#allocation2] sm:$0xfe] %v5983_v30 }
0x2850   : > { %5998 = vst [vmem:[#allocation2 + $0x10] sm:$0xff] %v5995_v50  ;;  %7944 = vmatprep.mubr.f32.mxu0 %v5995_v50 }
0x2856   : > { %v6000_v4 = vld [vmem:[#allocation2] sm:$0xff]  ;;  %v6005_v12 = vld [vmem:[#allocation2 + $0x48] sm:$0xff] }
0x2857   : > { %6124 = vmatmul.mubr.f32.vlgmr.msra.gmra.mrb[50].mxu1 %v6000_v4  ;;  %7945 = vmatmul.mubr.f32.vlgmr.msra.gmra.mrb[54].mxu0 %v6005_v12 }
0x2858   : > { %6128 = vmatprep.mubr.f32.mxu1 %v5979_v38 }
0x285b   : > { %6129 = vmatmul.mubr.f32.gmra.mrb[52].mxu1 %v5985_v37 }
0x292a   : > { %v7468_v55 = vpop.f32.mrb[50].mxu1  ;;  %v7946_v15 = vpop.f32.mrb[54].mxu0 }
0x292b   : > { %v7469_v5 = vpop.f32.mrb[51].mxu1  ;;  %v6200_v56 = vpop.f32.mrb[55].mxu0 }
0x292c   : > { %v7470_v7 = vadd.f32 %v7469_v5, %v7468_v55 }
0x292e   : > { %v6126_v0 = vadd.f32 %v7470_v7, %v6460_v1  ;;  %v7471_v45 = vpop.f32.mrb[52].mxu1 }
0x292f   : > { %v7472_v8 = vpop.f32.mrb[53].mxu1 }
0x2930   : > { %v6201_v63 = vadd.f32 %v6200_v56, %v6126_v0  ;;  %v7473_v13 = vadd.f32 %v7472_v8, %v7471_v45 }
0x2932   : > { %9328 = vtanh.f32 %v6201_v63  ;;  %v6131_v16 = vadd.f32 %v7473_v13, %v6460_v1 }
0x2934   : > { %v6206_v10 = vadd.f32 %v7946_v15, %v6131_v16 }
0x2936   : > { %9330 = vtanh.f32 %v6206_v10 }
0x293c   : > { %v9329_v17 = vpop.eup %9328 }
0x293d   : > { %v6211_v22 = vadd.f32 1.0, %v9329_v17 }
0x293f   : > { %v6213_v23 = vmul.f32 0.5, %v6211_v22 }
0x2940   : > { %v9331_v36 = vpop.eup %9330 }
0x2941   : > { %6215 = vst [vmem:[%s789_s2] sm:$0xff] %v6213_v23  ;;  %v6212_v24 = vadd.f32 1.0, %v9331_v36 }
0x2943   : > { %v6214_v25 = vmul.f32 0.5, %v6212_v24 }
0x2945   : > { %6216 = vst [vmem:[%s789_s2 + $0x8] sm:$0xff] %v6214_v25 }
0x2946 PF: > { %s11975_s28 = sld [smem:[#allocation26_spill]] }
0x294c   : > { %s36_s1 = sadd.s32 1, %s11975_s28  }
0x294d   : > { %p33_p2 = scmp.ge.s32.totalorder %s36_s1, 4  }
0x294f   :  { %35 = sbr.rel (!%p33_p2) target bundleno = 17 (0x11), region = 181 }
0x2956   :  { %6238 = vsyncpa [#allocation4], 1 }
0x2957   :  { %6240 = vsyncpa [#allocation4 + $0x1], 1 }
0x2958   :  { %6241 = vsyncpa [#allocation6], 1 }
0x2959   :  { %6242 = vsyncpa [#allocation9], 1 }
0x295a   :  { %6243 = vsyncpa [#allocation12], 1 }
0x295b   :  { %6244 = vsyncpa [#allocation15], 1 }
0x295c   :  { %6245 = vsyncpa [#allocation18], 1 }

</bundles_post_ra>
